<compile_context>
chip_gen: v7x
topology: tpu7x:2x2x1
jax: 0.10.0
libtpu: 0.0.40
codegen_flags: <defaults>
</compile_context>

<pallas_src>
import functools

import numpy as np
import jax
import jax.numpy as jnp
from jax.experimental import pallas as pl
from jax.experimental.pallas import tpu as pltpu


# ----------------------------------------------------------------------------
# Per-generation VMEM budget (feedback: don't hardcode 32 MiB; cap at ~48 MiB).
# ----------------------------------------------------------------------------
def _vmem_limit_bytes():
    default = 32 * 1024 * 1024
    try:
        info = pltpu.get_tpu_info()
        cap = getattr(info, "vmem_capacity_bytes", None)
        if cap is None:
            return default
        return int(min(48 * 1024 * 1024, max(int(cap) // 2, 16 * 1024 * 1024)))
    except Exception:
        return default


# ----------------------------------------------------------------------------
# Deterministic parameter construction (same synthesized structure as before)
# ----------------------------------------------------------------------------
def _init_conv(key, kh, kw, cin, cout, scale=0.1):
    kw_, kb_ = jax.random.split(key)
    w = scale * jax.random.normal(kw_, (kh, kw, cin, cout), dtype=jnp.float32)
    b = scale * jax.random.normal(kb_, (cout,), dtype=jnp.float32)
    return {"w": w, "b": b}


def make_params(key, in_ch, class_nums, num_anchors):
    keys = iter(jax.random.split(key, 64))
    bb_channels = [16, 32, 64]
    params = {"backbone": [], "ct_head": {}, "yolo_head": []}

    c_prev = in_ch
    for c in bb_channels:
        params["backbone"].append(_init_conv(next(keys), 3, 3, c_prev, c))
        c_prev = c

    deep_c = bb_channels[-1]
    for name, out_c in (("hm", class_nums), ("wh", 2), ("reg", 2)):
        params["ct_head"][name] = {
            "c1": _init_conv(next(keys), 3, 3, deep_c, 64),
            "c2": _init_conv(next(keys), 1, 1, 64, out_c),
        }

    yolo_out = num_anchors * (5 + class_nums)
    for c in bb_channels[::-1]:  # yolov3 head consumes bko[::-1]
        params["yolo_head"].append({
            "c1": _init_conv(next(keys), 3, 3, c, 64),
            "c2": _init_conv(next(keys), 1, 1, 64, yolo_out),
        })
    return params


# ----------------------------------------------------------------------------
# One-time packing: conv -> (row selector R, tap Toeplitz M, tiled bias)
# Activation layout everywhere: (H, W*C) with element (h, w*C + c) = x[h, w, c].
# ----------------------------------------------------------------------------
def _conv3x3_mats(w, b, H, W, stride):
    kh, kw, cin, cout = w.shape
    ho = (H + 2 - kh) // stride + 1
    wo = (W + 2 - kw) // stride + 1
    R = np.zeros((3, ho, H), np.float32)
    for di in range(3):
        for oy in range(ho):
            iy = stride * oy + di - 1
            if 0 <= iy < H:
                R[di, oy, iy] = 1.0
    M = np.zeros((3, W * cin, wo * cout), np.float32)
    for di in range(3):
        for dj in range(3):
            for ox in range(wo):
                ix = stride * ox + dj - 1
                if 0 <= ix < W:
                    M[di, ix * cin:(ix + 1) * cin,
                      ox * cout:(ox + 1) * cout] += w[di, dj]
    brow = np.tile(b, wo)[None, :]
    return (jnp.asarray(R, jnp.bfloat16),
            jnp.asarray(M, jnp.bfloat16),
            jnp.asarray(brow, jnp.float32), ho, wo)


def _conv1x1_mats(w, b, wo):
    chid, cout = w.shape[2], w.shape[3]
    W2 = np.zeros((wo * chid, wo * cout), np.float32)
    for ox in range(wo):
        W2[ox * chid:(ox + 1) * chid, ox * cout:(ox + 1) * cout] = w[0, 0]
    b2 = np.tile(b, wo)[None, :]
    return jnp.asarray(W2, jnp.bfloat16), jnp.asarray(b2, jnp.float32)


def pack_model(params, in_hw, class_nums, num_anchors):
    H, W = in_hw
    weights = []
    bb_meta = []
    feat_hw_c = []
    h_, w_ = H, W
    for layer in params["backbone"]:
        wnp = np.asarray(layer["w"], np.float32)
        bnp = np.asarray(layer["b"], np.float32)
        R, M, brow, ho, wo = _conv3x3_mats(wnp, bnp, h_, w_, stride=2)
        weights += [R, M, brow]
        bb_meta.append(dict(H=h_, W=w_, Cin=wnp.shape[2],
                            ho=ho, wo=wo, Cout=wnp.shape[3]))
        h_, w_ = ho, wo
        feat_hw_c.append((ho, wo, wnp.shape[3]))

    n_bb = len(bb_meta)
    head_meta = []

    # (a) merged CenterNet branches (hm|wh|reg) on the deepest feature (exact fusion:
    #     hidden channels concatenated, 1x1 conv block-diagonal).
    fh, fw, fc = feat_hw_c[-1]
    w1 = np.concatenate([np.asarray(params["ct_head"][n]["c1"]["w"], np.float32)
                         for n in ("hm", "wh", "reg")], axis=3)
    b1 = np.concatenate([np.asarray(params["ct_head"][n]["c1"]["b"], np.float32)
                         for n in ("hm", "wh", "reg")], axis=0)
    outs = [class_nums, 2, 2]
    chid_each = int(params["ct_head"]["hm"]["c1"]["w"].shape[3])
    w2 = np.zeros((1, 1, w1.shape[3], sum(outs)), np.float32)
    b2 = np.zeros((sum(outs),), np.float32)
    ro = co = 0
    for n, oc in zip(("hm", "wh", "reg"), outs):
        w2[0, 0, ro:ro + chid_each, co:co + oc] = np.asarray(
            params["ct_head"][n]["c2"]["w"], np.float32)[0, 0]
        b2[co:co + oc] = np.asarray(params["ct_head"][n]["c2"]["b"], np.float32)
        ro += chid_each
        co += oc
    R1, M1, b1row, ho, wo = _conv3x3_mats(w1, b1, fh, fw, stride=1)
    W2m, b2row = _conv1x1_mats(w2, b2, wo)
    weights += [R1, M1, b1row, W2m, b2row]
    head_meta.append(dict(name="ct", feat=n_bb - 1, H=fh, W=fw,
                          Cin=fc, Chid=int(w1.shape[3]), Cout=int(sum(outs))))

    # (b) YOLO branches: scale s consumes feats[::-1][s]
    for s, br in enumerate(params["yolo_head"]):
        fi = n_bb - 1 - s
        fh, fw, fc = feat_hw_c[fi]
        w1 = np.asarray(br["c1"]["w"], np.float32)
        b1 = np.asarray(br["c1"]["b"], np.float32)
        w2 = np.asarray(br["c2"]["w"], np.float32)
        b2 = np.asarray(br["c2"]["b"], np.float32)
        R1, M1, b1row, ho, wo = _conv3x3_mats(w1, b1, fh, fw, stride=1)
        W2m, b2row = _conv1x1_mats(w2, b2, wo)
        weights += [R1, M1, b1row, W2m, b2row]
        head_meta.append(dict(name=f"yolo{s}", feat=fi, H=fh, W=fw,
                              Cin=fc, Chid=int(w1.shape[3]), Cout=int(w2.shape[3])))

    static = dict(n_bb=n_bb, bb=bb_meta, heads=head_meta,
                  class_nums=class_nums, num_anchors=num_anchors, in_hw=(H, W))
    return weights, static


# ----------------------------------------------------------------------------
# Fused whole-network kernel (one batch element per grid step)
# ----------------------------------------------------------------------------
def _make_kernel(static):
    n_bb = static["n_bb"]
    heads = static["heads"]
    n_hd = len(heads)

    def _conv3x3(h_bf16, R_ref, M_ref, b_ref, relu):
        acc = None
        for di in range(3):
            r = R_ref[di]                                     # (ho, Hin) 0/1 bf16
            sel = jnp.dot(r, h_bf16, preferred_element_type=jnp.float32)
            sel = sel.astype(jnp.bfloat16)                    # exact: pure row pick
            p = jnp.dot(sel, M_ref[di], preferred_element_type=jnp.float32)
            acc = p if acc is None else acc + p
        acc = acc + b_ref[...]
        if relu:
            acc = jnp.maximum(acc, 0.0)
        return acc

    def kernel(*refs):
        i = 0
        x_ref = refs[i]; i += 1
        bb_refs = []
        for _ in range(n_bb):
            bb_refs.append(refs[i:i + 3]); i += 3
        hd_refs = []
        for _ in range(n_hd):
            hd_refs.append(refs[i:i + 5]); i += 5
        out_refs = refs[i:i + n_hd]

        # ---- backbone: 3 x [conv3x3 stride-2 + ReLU], all VMEM-resident ----
        h = x_ref[0].astype(jnp.bfloat16)                     # (H, W*Cin)
        feats = []
        for li in range(n_bb):
            R_ref, M_ref, b_ref = bb_refs[li]
            h = _conv3x3(h, R_ref, M_ref, b_ref, relu=True).astype(jnp.bfloat16)
            feats.append(h)

        # ---- heads: fused (conv3x3 + ReLU) -> conv1x1; hidden never leaves VMEM
        for hi in range(n_hd):
            R_ref, M_ref, b1_ref, W2_ref, b2_ref = hd_refs[hi]
            f = feats[heads[hi]["feat"]]
            hid = _conv3x3(f, R_ref, M_ref, b1_ref, relu=True).astype(jnp.bfloat16)
            out = jnp.dot(hid, W2_ref[...], preferred_element_type=jnp.float32)
            out_refs[hi][0] = out + b2_ref[...]

    return kernel


def _zero_index_map(b, nd):
    return (0,) * nd


def _batch_index_map(b):
    return (b, 0, 0)


def _cost_estimate(static, batch, weights, out_shapes, x_shape):
    flops = 0
    for m in static["bb"]:
        K = m["W"] * m["Cin"]
        N = m["wo"] * m["Cout"]
        flops += 2 * 3 * (m["ho"] * m["H"] * K + m["ho"] * K * N)
    for hm_ in static["heads"]:
        K = hm_["W"] * hm_["Cin"]
        N1 = hm_["W"] * hm_["Chid"]
        N2 = hm_["W"] * hm_["Cout"]
        flops += 2 * 3 * (hm_["H"] * hm_["H"] * K + hm_["H"] * K * N1)
        flops += 2 * hm_["H"] * N1 * N2
    flops *= batch
    bytes_acc = int(np.prod(x_shape)) * 4
    for a in weights:
        bytes_acc += int(np.prod(a.shape)) * a.dtype.itemsize
    for s in out_shapes:
        bytes_acc += int(np.prod(s.shape)) * 4
    return pl.CostEstimate(flops=int(flops), transcendentals=0,
                           bytes_accessed=int(bytes_acc))


# ----------------------------------------------------------------------------
# Forward pass (matches CombinationModel.forward structure)
# ----------------------------------------------------------------------------
def combination_model_forward(weights, x_nchw, *, static):
    n_bb = static["n_bb"]
    heads = static["heads"]
    class_nums = static["class_nums"]
    num_anchors = static["num_anchors"]
    H, W = static["in_hw"]
    batch = x_nchw.shape[0]
    cin = x_nchw.shape[1]

    # TODO(synk): NCHW->NHWC transpose + flatten remain (tiny) XLA glue ops.
    x = jnp.transpose(x_nchw, (0, 2, 3, 1)).reshape(batch, H, W * cin)

    in_specs = [pl.BlockSpec((1, H, W * cin), _batch_index_map)]
    for arr in weights:
        in_specs.append(pl.BlockSpec(
            arr.shape, functools.partial(_zero_index_map, nd=arr.ndim)))

    out_shapes, out_specs = [], []
    for hm_ in heads:
        hh, ww, cc = hm_["H"], hm_["W"], hm_["Cout"]
        out_shapes.append(jax.ShapeDtypeStruct((batch, hh, ww * cc), jnp.float32))
        out_specs.append(pl.BlockSpec((1, hh, ww * cc), _batch_index_map))

    outs = pl.pallas_call(
        _make_kernel(static),
        out_shape=tuple(out_shapes),
        grid=(batch,),
        in_specs=in_specs,
        out_specs=tuple(out_specs),
        compiler_params=pltpu.CompilerParams(
            dimension_semantics=("parallel",),
            vmem_limit_bytes=_vmem_limit_bytes()),
        cost_estimate=_cost_estimate(static, batch, weights, out_shapes, x.shape),
    )(x, *weights)

    results = {}
    for o, hm_ in zip(outs, heads):
        hh, ww, cc = hm_["H"], hm_["W"], hm_["Cout"]
        results[hm_["name"]] = o.reshape(batch, hh, ww, cc)

    # CenterNet outputs back to NCHW (merged slab -> hm/wh/reg column split)
    ct4 = results["ct"]
    ct_out = {
        "hm": jnp.transpose(ct4[..., :class_nums], (0, 3, 1, 2)),
        "wh": jnp.transpose(ct4[..., class_nums:class_nums + 2], (0, 3, 1, 2)),
        "reg": jnp.transpose(ct4[..., class_nums + 2:class_nums + 4], (0, 3, 1, 2)),
    }
    # YOLO outputs: (B, na, H, W, 5+nc) raw logits per scale
    yolo_out = []
    for s in range(n_bb):
        r = results[f"yolo{s}"]
        b_, hh, ww, nc_ = r.shape
        r = r.reshape(b_, hh, ww, num_anchors, nc_ // num_anchors)
        yolo_out.append(jnp.transpose(r, (0, 3, 1, 2, 4)))
    return ct_out, tuple(yolo_out)


# ----------------------------------------------------------------------------
# Pure-XLA float32 reference (correctness check for the fused kernel)
# ----------------------------------------------------------------------------
def _conv_ref(x, w, b, stride, pad, relu):
    y = jax.lax.conv_general_dilated(
        x, w, window_strides=(stride, stride),
        padding=((pad, pad), (pad, pad)),
        dimension_numbers=("NHWC", "HWIO", "NHWC"))
    y = y + b
    return jnp.maximum(y, 0.0) if relu else y


def reference_forward(params, inp_nchw, num_anchors, class_nums):
    x = jnp.transpose(inp_nchw, (0, 2, 3, 1))
    feats, h = [], x
    for layer in params["backbone"]:
        h = _conv_ref(h, layer["w"], layer["b"], 2, 1, True)
        feats.append(h)
    ct = {}
    for name, br in params["ct_head"].items():
        t = _conv_ref(feats[-1], br["c1"]["w"], br["c1"]["b"], 1, 1, True)
        t = _conv_ref(t, br["c2"]["w"], br["c2"]["b"], 1, 0, False)
        ct[name] = jnp.transpose(t, (0, 3, 1, 2))
    yolo = []
    for br, f in zip(params["yolo_head"], feats[::-1]):
        t = _conv_ref(f, br["c1"]["w"], br["c1"]["b"], 1, 1, True)
        t = _conv_ref(t, br["c2"]["w"], br["c2"]["b"], 1, 0, False)
        n, ho, wo, _ = t.shape
        t = t.reshape(n, ho, wo, num_anchors, 5 + class_nums)
        yolo.append(jnp.transpose(t, (0, 3, 1, 2, 4)))
    return ct, tuple(yolo)


# ----------------------------------------------------------------------------
if __name__ == "__main__":
    CLASS_NUMS = 4
    NUM_ANCHORS = 3
    B, C, H, W = 2, 3, 32, 32

    key = jax.random.PRNGKey(0)
    k_inp, k_par = jax.random.split(key)
    inp = jax.random.normal(k_inp, (B, C, H, W), dtype=jnp.float32)
    params = make_params(k_par, C, CLASS_NUMS, NUM_ANCHORS)

    weights, static = pack_model(params, (H, W), CLASS_NUMS, NUM_ANCHORS)

    fwd = jax.jit(functools.partial(combination_model_forward, static=static))
    ct_out, yolo_out = fwd(weights, inp)
    jax.block_until_ready((ct_out, yolo_out))

    # shape checks
    assert ct_out["hm"].shape == (B, CLASS_NUMS, 4, 4)
    assert ct_out["wh"].shape == (B, 2, 4, 4)
    assert ct_out["reg"].shape == (B, 2, 4, 4)
    assert yolo_out[0].shape == (B, NUM_ANCHORS, 4, 4, 5 + CLASS_NUMS)
    assert yolo_out[1].shape == (B, NUM_ANCHORS, 8, 8, 5 + CLASS_NUMS)
    assert yolo_out[2].shape == (B, NUM_ANCHORS, 16, 16, 5 + CLASS_NUMS)

    # numeric check vs f32 XLA reference (bf16 matmul operands -> loose, norm-based tol)
    ct_ref, yolo_ref = reference_forward(params, inp, NUM_ANCHORS, CLASS_NUMS)

    def _relerr(a, b):
        return float(jnp.linalg.norm(a - b) / (jnp.linalg.norm(b) + 1e-6))

    for name in ("hm", "wh", "reg"):
        assert _relerr(ct_out[name], ct_ref[name]) < 0.15, name
    for s, (a, b) in enumerate(zip(yolo_out, yolo_ref)):
        assert _relerr(a, b) < 0.15, f"yolo{s}"

    print("KERNEL_OK")
</pallas_src>

<mosaic_0001>
module attributes {stable_mosaic.version = 11 : i64} {
  func.func @kernel(%arg0: i32, %arg1: memref<1x32x96xf32, #tpu.memory_space<vmem>>, %arg2: memref<3x16x32xbf16, #tpu.memory_space<vmem>>, %arg3: memref<3x96x256xbf16, #tpu.memory_space<vmem>>, %arg4: memref<1x256xf32, #tpu.memory_space<vmem>>, %arg5: memref<3x8x16xbf16, #tpu.memory_space<vmem>>, %arg6: memref<3x256x256xbf16, #tpu.memory_space<vmem>>, %arg7: memref<1x256xf32, #tpu.memory_space<vmem>>, %arg8: memref<3x4x8xbf16, #tpu.memory_space<vmem>>, %arg9: memref<3x256x256xbf16, #tpu.memory_space<vmem>>, %arg10: memref<1x256xf32, #tpu.memory_space<vmem>>, %arg11: memref<3x4x4xbf16, #tpu.memory_space<vmem>>, %arg12: memref<3x256x768xbf16, #tpu.memory_space<vmem>>, %arg13: memref<1x768xf32, #tpu.memory_space<vmem>>, %arg14: memref<768x32xbf16, #tpu.memory_space<vmem>>, %arg15: memref<1x32xf32, #tpu.memory_space<vmem>>, %arg16: memref<3x4x4xbf16, #tpu.memory_space<vmem>>, %arg17: memref<3x256x256xbf16, #tpu.memory_space<vmem>>, %arg18: memref<1x256xf32, #tpu.memory_space<vmem>>, %arg19: memref<256x108xbf16, #tpu.memory_space<vmem>>, %arg20: memref<1x108xf32, #tpu.memory_space<vmem>>, %arg21: memref<3x8x8xbf16, #tpu.memory_space<vmem>>, %arg22: memref<3x256x512xbf16, #tpu.memory_space<vmem>>, %arg23: memref<1x512xf32, #tpu.memory_space<vmem>>, %arg24: memref<512x216xbf16, #tpu.memory_space<vmem>>, %arg25: memref<1x216xf32, #tpu.memory_space<vmem>>, %arg26: memref<3x16x16xbf16, #tpu.memory_space<vmem>>, %arg27: memref<3x256x1024xbf16, #tpu.memory_space<vmem>>, %arg28: memref<1x1024xf32, #tpu.memory_space<vmem>>, %arg29: memref<1024x432xbf16, #tpu.memory_space<vmem>>, %arg30: memref<1x432xf32, #tpu.memory_space<vmem>>, %arg31: memref<1x4x32xf32, #tpu.memory_space<vmem>>, %arg32: memref<1x4x108xf32, #tpu.memory_space<vmem>>, %arg33: memref<1x8x216xf32, #tpu.memory_space<vmem>>, %arg34: memref<1x16x432xf32, #tpu.memory_space<vmem>>) attributes {dimension_semantics = [#tpu.dimension_semantics<parallel>], iteration_bounds = array<i64: 2>, scalar_prefetch = 0 : i64, scratch_operands = 0 : i64, tpu.core_type = #tpu.core_type<tc>, window_params = [{transform_indices = @transform_0, window_bounds = array<i64: 1, 32, 96>}, {pipeline_mode = #tpu.pipeline_mode<synchronous>, transform_indices = @transform_1, window_bounds = array<i64: 3, 16, 32>}, {pipeline_mode = #tpu.pipeline_mode<synchronous>, transform_indices = @transform_2, window_bounds = array<i64: 3, 96, 256>}, {pipeline_mode = #tpu.pipeline_mode<synchronous>, transform_indices = @transform_3, window_bounds = array<i64: 1, 256>}, {pipeline_mode = #tpu.pipeline_mode<synchronous>, transform_indices = @transform_4, window_bounds = array<i64: 3, 8, 16>}, {pipeline_mode = #tpu.pipeline_mode<synchronous>, transform_indices = @transform_5, window_bounds = array<i64: 3, 256, 256>}, {pipeline_mode = #tpu.pipeline_mode<synchronous>, transform_indices = @transform_6, window_bounds = array<i64: 1, 256>}, {pipeline_mode = #tpu.pipeline_mode<synchronous>, transform_indices = @transform_7, window_bounds = array<i64: 3, 4, 8>}, {pipeline_mode = #tpu.pipeline_mode<synchronous>, transform_indices = @transform_8, window_bounds = array<i64: 3, 256, 256>}, {pipeline_mode = #tpu.pipeline_mode<synchronous>, transform_indices = @transform_9, window_bounds = array<i64: 1, 256>}, {pipeline_mode = #tpu.pipeline_mode<synchronous>, transform_indices = @transform_10, window_bounds = array<i64: 3, 4, 4>}, {pipeline_mode = #tpu.pipeline_mode<synchronous>, transform_indices = @transform_11, window_bounds = array<i64: 3, 256, 768>}, {pipeline_mode = #tpu.pipeline_mode<synchronous>, transform_indices = @transform_12, window_bounds = array<i64: 1, 768>}, {pipeline_mode = #tpu.pipeline_mode<synchronous>, transform_indices = @transform_13, window_bounds = array<i64: 768, 32>}, {pipeline_mode = #tpu.pipeline_mode<synchronous>, transform_indices = @transform_14, window_bounds = array<i64: 1, 32>}, {pipeline_mode = #tpu.pipeline_mode<synchronous>, transform_indices = @transform_15, window_bounds = array<i64: 3, 4, 4>}, {pipeline_mode = #tpu.pipeline_mode<synchronous>, transform_indices = @transform_16, window_bounds = array<i64: 3, 256, 256>}, {pipeline_mode = #tpu.pipeline_mode<synchronous>, transform_indices = @transform_17, window_bounds = array<i64: 1, 256>}, {pipeline_mode = #tpu.pipeline_mode<synchronous>, transform_indices = @transform_18, window_bounds = array<i64: 256, 108>}, {pipeline_mode = #tpu.pipeline_mode<synchronous>, transform_indices = @transform_19, window_bounds = array<i64: 1, 108>}, {pipeline_mode = #tpu.pipeline_mode<synchronous>, transform_indices = @transform_20, window_bounds = array<i64: 3, 8, 8>}, {pipeline_mode = #tpu.pipeline_mode<synchronous>, transform_indices = @transform_21, window_bounds = array<i64: 3, 256, 512>}, {pipeline_mode = #tpu.pipeline_mode<synchronous>, transform_indices = @transform_22, window_bounds = array<i64: 1, 512>}, {pipeline_mode = #tpu.pipeline_mode<synchronous>, transform_indices = @transform_23, window_bounds = array<i64: 512, 216>}, {pipeline_mode = #tpu.pipeline_mode<synchronous>, transform_indices = @transform_24, window_bounds = array<i64: 1, 216>}, {pipeline_mode = #tpu.pipeline_mode<synchronous>, transform_indices = @transform_25, window_bounds = array<i64: 3, 16, 16>}, {pipeline_mode = #tpu.pipeline_mode<synchronous>, transform_indices = @transform_26, window_bounds = array<i64: 3, 256, 1024>}, {pipeline_mode = #tpu.pipeline_mode<synchronous>, transform_indices = @transform_27, window_bounds = array<i64: 1, 1024>}, {pipeline_mode = #tpu.pipeline_mode<synchronous>, transform_indices = @transform_28, window_bounds = array<i64: 1024, 432>}, {pipeline_mode = #tpu.pipeline_mode<synchronous>, transform_indices = @transform_29, window_bounds = array<i64: 1, 432>}, {transform_indices = @transform_30, window_bounds = array<i64: 1, 4, 32>}, {transform_indices = @transform_31, window_bounds = array<i64: 1, 4, 108>}, {transform_indices = @transform_32, window_bounds = array<i64: 1, 8, 216>}, {transform_indices = @transform_33, window_bounds = array<i64: 1, 16, 432>}]} {
    %c0 = arith.constant 0 : index
    %c0_0 = arith.constant 0 : index
    %c0_1 = arith.constant 0 : index
    %0 = vector.load %arg1[%c0, %c0_0, %c0_1] : memref<1x32x96xf32, #tpu.memory_space<vmem>>, vector<1x32x96xf32>
    %1 = vector.shape_cast %0 : vector<1x32x96xf32> to vector<32x96xf32>
    %2 = arith.truncf %1 : vector<32x96xf32> to vector<32x96xbf16>
    %c0_2 = arith.constant 0 : index
    %c0_3 = arith.constant 0 : index
    %c0_4 = arith.constant 0 : index
    %3 = vector.load %arg2[%c0_2, %c0_3, %c0_4] : memref<3x16x32xbf16, #tpu.memory_space<vmem>>, vector<1x16x32xbf16>
    %4 = vector.shape_cast %3 : vector<1x16x32xbf16> to vector<16x32xbf16>
    %cst = arith.constant dense<0.000000e+00> : vector<16x96xf32>
    %5 = tpu.matmul %4, %2, %cst {dimension_numbers = #tpu.dot_dimension_numbers<[1], [0], [0], [1], [0, 0, 1, 1], [], []>} : vector<16x32xbf16>, vector<32x96xbf16>, vector<16x96xf32> -> vector<16x96xf32>
    %6 = arith.truncf %5 : vector<16x96xf32> to vector<16x96xbf16>
    %c0_5 = arith.constant 0 : index
    %c0_6 = arith.constant 0 : index
    %c0_7 = arith.constant 0 : index
    %7 = vector.load %arg3[%c0_5, %c0_6, %c0_7] : memref<3x96x256xbf16, #tpu.memory_space<vmem>>, vector<1x96x256xbf16>
    %8 = vector.shape_cast %7 : vector<1x96x256xbf16> to vector<96x256xbf16>
    %cst_8 = arith.constant dense<0.000000e+00> : vector<16x256xf32>
    %9 = tpu.matmul %6, %8, %cst_8 {dimension_numbers = #tpu.dot_dimension_numbers<[1], [0], [0], [1], [0, 0, 1, 1], [], []>} : vector<16x96xbf16>, vector<96x256xbf16>, vector<16x256xf32> -> vector<16x256xf32>
    %c1 = arith.constant 1 : index
    %c0_9 = arith.constant 0 : index
    %c0_10 = arith.constant 0 : index
    %10 = vector.load %arg2[%c1, %c0_9, %c0_10] : memref<3x16x32xbf16, #tpu.memory_space<vmem>>, vector<1x16x32xbf16>
    %11 = vector.shape_cast %10 : vector<1x16x32xbf16> to vector<16x32xbf16>
    %cst_11 = arith.constant dense<0.000000e+00> : vector<16x96xf32>
    %12 = tpu.matmul %11, %2, %cst_11 {dimension_numbers = #tpu.dot_dimension_numbers<[1], [0], [0], [1], [0, 0, 1, 1], [], []>} : vector<16x32xbf16>, vector<32x96xbf16>, vector<16x96xf32> -> vector<16x96xf32>
    %13 = arith.truncf %12 : vector<16x96xf32> to vector<16x96xbf16>
    %c1_12 = arith.constant 1 : index
    %c0_13 = arith.constant 0 : index
    %c0_14 = arith.constant 0 : index
    %14 = vector.load %arg3[%c1_12, %c0_13, %c0_14] : memref<3x96x256xbf16, #tpu.memory_space<vmem>>, vector<1x96x256xbf16>
    %15 = vector.shape_cast %14 : vector<1x96x256xbf16> to vector<96x256xbf16>
    %cst_15 = arith.constant dense<0.000000e+00> : vector<16x256xf32>
    %16 = tpu.matmul %13, %15, %cst_15 {dimension_numbers = #tpu.dot_dimension_numbers<[1], [0], [0], [1], [0, 0, 1, 1], [], []>} : vector<16x96xbf16>, vector<96x256xbf16>, vector<16x256xf32> -> vector<16x256xf32>
    %17 = arith.addf %9, %16 : vector<16x256xf32>
    %c2 = arith.constant 2 : index
    %c0_16 = arith.constant 0 : index
    %c0_17 = arith.constant 0 : index
    %18 = vector.load %arg2[%c2, %c0_16, %c0_17] : memref<3x16x32xbf16, #tpu.memory_space<vmem>>, vector<1x16x32xbf16>
    %19 = vector.shape_cast %18 : vector<1x16x32xbf16> to vector<16x32xbf16>
    %cst_18 = arith.constant dense<0.000000e+00> : vector<16x96xf32>
    %20 = tpu.matmul %19, %2, %cst_18 {dimension_numbers = #tpu.dot_dimension_numbers<[1], [0], [0], [1], [0, 0, 1, 1], [], []>} : vector<16x32xbf16>, vector<32x96xbf16>, vector<16x96xf32> -> vector<16x96xf32>
    %21 = arith.truncf %20 : vector<16x96xf32> to vector<16x96xbf16>
    %c2_19 = arith.constant 2 : index
    %c0_20 = arith.constant 0 : index
    %c0_21 = arith.constant 0 : index
    %22 = vector.load %arg3[%c2_19, %c0_20, %c0_21] : memref<3x96x256xbf16, #tpu.memory_space<vmem>>, vector<1x96x256xbf16>
    %23 = vector.shape_cast %22 : vector<1x96x256xbf16> to vector<96x256xbf16>
    %cst_22 = arith.constant dense<0.000000e+00> : vector<16x256xf32>
    %24 = tpu.matmul %21, %23, %cst_22 {dimension_numbers = #tpu.dot_dimension_numbers<[1], [0], [0], [1], [0, 0, 1, 1], [], []>} : vector<16x96xbf16>, vector<96x256xbf16>, vector<16x256xf32> -> vector<16x256xf32>
    %25 = arith.addf %17, %24 : vector<16x256xf32>
    %c0_23 = arith.constant 0 : index
    %c0_24 = arith.constant 0 : index
    %26 = vector.load %arg4[%c0_23, %c0_24] : memref<1x256xf32, #tpu.memory_space<vmem>>, vector<1x256xf32>
    %27 = vector.broadcast %26 : vector<1x256xf32> to vector<16x256xf32>
    %28 = arith.addf %25, %27 : vector<16x256xf32>
    %cst_25 = arith.constant 0.000000e+00 : f32
    %29 = vector.broadcast %cst_25 : f32 to vector<16x256xf32>
    %30 = arith.maximumf %28, %29 : vector<16x256xf32>
    %31 = arith.truncf %30 : vector<16x256xf32> to vector<16x256xbf16>
    %c0_26 = arith.constant 0 : index
    %c0_27 = arith.constant 0 : index
    %c0_28 = arith.constant 0 : index
    %32 = vector.load %arg5[%c0_26, %c0_27, %c0_28] : memref<3x8x16xbf16, #tpu.memory_space<vmem>>, vector<1x8x16xbf16>
    %33 = vector.shape_cast %32 : vector<1x8x16xbf16> to vector<8x16xbf16>
    %cst_29 = arith.constant dense<0.000000e+00> : vector<8x256xf32>
    %34 = tpu.matmul %33, %31, %cst_29 {dimension_numbers = #tpu.dot_dimension_numbers<[1], [0], [0], [1], [0, 0, 1, 1], [], []>} : vector<8x16xbf16>, vector<16x256xbf16>, vector<8x256xf32> -> vector<8x256xf32>
    %35 = arith.truncf %34 : vector<8x256xf32> to vector<8x256xbf16>
    %c0_30 = arith.constant 0 : index
    %c0_31 = arith.constant 0 : index
    %c0_32 = arith.constant 0 : index
    %36 = vector.load %arg6[%c0_30, %c0_31, %c0_32] : memref<3x256x256xbf16, #tpu.memory_space<vmem>>, vector<1x256x256xbf16>
    %37 = vector.shape_cast %36 : vector<1x256x256xbf16> to vector<256x256xbf16>
    %cst_33 = arith.constant dense<0.000000e+00> : vector<8x256xf32>
    %38 = tpu.matmul %35, %37, %cst_33 {dimension_numbers = #tpu.dot_dimension_numbers<[1], [0], [0], [1], [0, 0, 1, 1], [], []>} : vector<8x256xbf16>, vector<256x256xbf16>, vector<8x256xf32> -> vector<8x256xf32>
    %c1_34 = arith.constant 1 : index
    %c0_35 = arith.constant 0 : index
    %c0_36 = arith.constant 0 : index
    %39 = vector.load %arg5[%c1_34, %c0_35, %c0_36] : memref<3x8x16xbf16, #tpu.memory_space<vmem>>, vector<1x8x16xbf16>
    %40 = vector.shape_cast %39 : vector<1x8x16xbf16> to vector<8x16xbf16>
    %cst_37 = arith.constant dense<0.000000e+00> : vector<8x256xf32>
    %41 = tpu.matmul %40, %31, %cst_37 {dimension_numbers = #tpu.dot_dimension_numbers<[1], [0], [0], [1], [0, 0, 1, 1], [], []>} : vector<8x16xbf16>, vector<16x256xbf16>, vector<8x256xf32> -> vector<8x256xf32>
    %42 = arith.truncf %41 : vector<8x256xf32> to vector<8x256xbf16>
    %c1_38 = arith.constant 1 : index
    %c0_39 = arith.constant 0 : index
    %c0_40 = arith.constant 0 : index
    %43 = vector.load %arg6[%c1_38, %c0_39, %c0_40] : memref<3x256x256xbf16, #tpu.memory_space<vmem>>, vector<1x256x256xbf16>
    %44 = vector.shape_cast %43 : vector<1x256x256xbf16> to vector<256x256xbf16>
    %cst_41 = arith.constant dense<0.000000e+00> : vector<8x256xf32>
    %45 = tpu.matmul %42, %44, %cst_41 {dimension_numbers = #tpu.dot_dimension_numbers<[1], [0], [0], [1], [0, 0, 1, 1], [], []>} : vector<8x256xbf16>, vector<256x256xbf16>, vector<8x256xf32> -> vector<8x256xf32>
    %46 = arith.addf %38, %45 : vector<8x256xf32>
    %c2_42 = arith.constant 2 : index
    %c0_43 = arith.constant 0 : index
    %c0_44 = arith.constant 0 : index
    %47 = vector.load %arg5[%c2_42, %c0_43, %c0_44] : memref<3x8x16xbf16, #tpu.memory_space<vmem>>, vector<1x8x16xbf16>
    %48 = vector.shape_cast %47 : vector<1x8x16xbf16> to vector<8x16xbf16>
    %cst_45 = arith.constant dense<0.000000e+00> : vector<8x256xf32>
    %49 = tpu.matmul %48, %31, %cst_45 {dimension_numbers = #tpu.dot_dimension_numbers<[1], [0], [0], [1], [0, 0, 1, 1], [], []>} : vector<8x16xbf16>, vector<16x256xbf16>, vector<8x256xf32> -> vector<8x256xf32>
    %50 = arith.truncf %49 : vector<8x256xf32> to vector<8x256xbf16>
    %c2_46 = arith.constant 2 : index
    %c0_47 = arith.constant 0 : index
    %c0_48 = arith.constant 0 : index
    %51 = vector.load %arg6[%c2_46, %c0_47, %c0_48] : memref<3x256x256xbf16, #tpu.memory_space<vmem>>, vector<1x256x256xbf16>
    %52 = vector.shape_cast %51 : vector<1x256x256xbf16> to vector<256x256xbf16>
    %cst_49 = arith.constant dense<0.000000e+00> : vector<8x256xf32>
    %53 = tpu.matmul %50, %52, %cst_49 {dimension_numbers = #tpu.dot_dimension_numbers<[1], [0], [0], [1], [0, 0, 1, 1], [], []>} : vector<8x256xbf16>, vector<256x256xbf16>, vector<8x256xf32> -> vector<8x256xf32>
    %54 = arith.addf %46, %53 : vector<8x256xf32>
    %c0_50 = arith.constant 0 : index
    %c0_51 = arith.constant 0 : index
    %55 = vector.load %arg7[%c0_50, %c0_51] : memref<1x256xf32, #tpu.memory_space<vmem>>, vector<1x256xf32>
    %56 = vector.broadcast %55 : vector<1x256xf32> to vector<8x256xf32>
    %57 = arith.addf %54, %56 : vector<8x256xf32>
    %cst_52 = arith.constant 0.000000e+00 : f32
    %58 = vector.broadcast %cst_52 : f32 to vector<8x256xf32>
    %59 = arith.maximumf %57, %58 : vector<8x256xf32>
    %60 = arith.truncf %59 : vector<8x256xf32> to vector<8x256xbf16>
    %c0_53 = arith.constant 0 : index
    %c0_54 = arith.constant 0 : index
    %c0_55 = arith.constant 0 : index
    %61 = vector.load %arg8[%c0_53, %c0_54, %c0_55] : memref<3x4x8xbf16, #tpu.memory_space<vmem>>, vector<1x4x8xbf16>
    %62 = vector.shape_cast %61 : vector<1x4x8xbf16> to vector<4x8xbf16>
    %cst_56 = arith.constant dense<0.000000e+00> : vector<4x256xf32>
    %63 = tpu.matmul %62, %60, %cst_56 {dimension_numbers = #tpu.dot_dimension_numbers<[1], [0], [0], [1], [0, 0, 1, 1], [], []>} : vector<4x8xbf16>, vector<8x256xbf16>, vector<4x256xf32> -> vector<4x256xf32>
    %64 = arith.truncf %63 : vector<4x256xf32> to vector<4x256xbf16>
    %c0_57 = arith.constant 0 : index
    %c0_58 = arith.constant 0 : index
    %c0_59 = arith.constant 0 : index
    %65 = vector.load %arg9[%c0_57, %c0_58, %c0_59] : memref<3x256x256xbf16, #tpu.memory_space<vmem>>, vector<1x256x256xbf16>
    %66 = vector.shape_cast %65 : vector<1x256x256xbf16> to vector<256x256xbf16>
    %cst_60 = arith.constant dense<0.000000e+00> : vector<4x256xf32>
    %67 = tpu.matmul %64, %66, %cst_60 {dimension_numbers = #tpu.dot_dimension_numbers<[1], [0], [0], [1], [0, 0, 1, 1], [], []>} : vector<4x256xbf16>, vector<256x256xbf16>, vector<4x256xf32> -> vector<4x256xf32>
    %c1_61 = arith.constant 1 : index
    %c0_62 = arith.constant 0 : index
    %c0_63 = arith.constant 0 : index
    %68 = vector.load %arg8[%c1_61, %c0_62, %c0_63] : memref<3x4x8xbf16, #tpu.memory_space<vmem>>, vector<1x4x8xbf16>
    %69 = vector.shape_cast %68 : vector<1x4x8xbf16> to vector<4x8xbf16>
    %cst_64 = arith.constant dense<0.000000e+00> : vector<4x256xf32>
    %70 = tpu.matmul %69, %60, %cst_64 {dimension_numbers = #tpu.dot_dimension_numbers<[1], [0], [0], [1], [0, 0, 1, 1], [], []>} : vector<4x8xbf16>, vector<8x256xbf16>, vector<4x256xf32> -> vector<4x256xf32>
    %71 = arith.truncf %70 : vector<4x256xf32> to vector<4x256xbf16>
    %c1_65 = arith.constant 1 : index
    %c0_66 = arith.constant 0 : index
    %c0_67 = arith.constant 0 : index
    %72 = vector.load %arg9[%c1_65, %c0_66, %c0_67] : memref<3x256x256xbf16, #tpu.memory_space<vmem>>, vector<1x256x256xbf16>
    %73 = vector.shape_cast %72 : vector<1x256x256xbf16> to vector<256x256xbf16>
    %cst_68 = arith.constant dense<0.000000e+00> : vector<4x256xf32>
    %74 = tpu.matmul %71, %73, %cst_68 {dimension_numbers = #tpu.dot_dimension_numbers<[1], [0], [0], [1], [0, 0, 1, 1], [], []>} : vector<4x256xbf16>, vector<256x256xbf16>, vector<4x256xf32> -> vector<4x256xf32>
    %75 = arith.addf %67, %74 : vector<4x256xf32>
    %c2_69 = arith.constant 2 : index
    %c0_70 = arith.constant 0 : index
    %c0_71 = arith.constant 0 : index
    %76 = vector.load %arg8[%c2_69, %c0_70, %c0_71] : memref<3x4x8xbf16, #tpu.memory_space<vmem>>, vector<1x4x8xbf16>
    %77 = vector.shape_cast %76 : vector<1x4x8xbf16> to vector<4x8xbf16>
    %cst_72 = arith.constant dense<0.000000e+00> : vector<4x256xf32>
    %78 = tpu.matmul %77, %60, %cst_72 {dimension_numbers = #tpu.dot_dimension_numbers<[1], [0], [0], [1], [0, 0, 1, 1], [], []>} : vector<4x8xbf16>, vector<8x256xbf16>, vector<4x256xf32> -> vector<4x256xf32>
    %79 = arith.truncf %78 : vector<4x256xf32> to vector<4x256xbf16>
    %c2_73 = arith.constant 2 : index
    %c0_74 = arith.constant 0 : index
    %c0_75 = arith.constant 0 : index
    %80 = vector.load %arg9[%c2_73, %c0_74, %c0_75] : memref<3x256x256xbf16, #tpu.memory_space<vmem>>, vector<1x256x256xbf16>
    %81 = vector.shape_cast %80 : vector<1x256x256xbf16> to vector<256x256xbf16>
    %cst_76 = arith.constant dense<0.000000e+00> : vector<4x256xf32>
    %82 = tpu.matmul %79, %81, %cst_76 {dimension_numbers = #tpu.dot_dimension_numbers<[1], [0], [0], [1], [0, 0, 1, 1], [], []>} : vector<4x256xbf16>, vector<256x256xbf16>, vector<4x256xf32> -> vector<4x256xf32>
    %83 = arith.addf %75, %82 : vector<4x256xf32>
    %c0_77 = arith.constant 0 : index
    %c0_78 = arith.constant 0 : index
    %84 = vector.load %arg10[%c0_77, %c0_78] : memref<1x256xf32, #tpu.memory_space<vmem>>, vector<1x256xf32>
    %85 = vector.broadcast %84 : vector<1x256xf32> to vector<4x256xf32>
    %86 = arith.addf %83, %85 : vector<4x256xf32>
    %cst_79 = arith.constant 0.000000e+00 : f32
    %87 = vector.broadcast %cst_79 : f32 to vector<4x256xf32>
    %88 = arith.maximumf %86, %87 : vector<4x256xf32>
    %89 = arith.truncf %88 : vector<4x256xf32> to vector<4x256xbf16>
    %c0_80 = arith.constant 0 : index
    %c0_81 = arith.constant 0 : index
    %c0_82 = arith.constant 0 : index
    %90 = vector.load %arg11[%c0_80, %c0_81, %c0_82] : memref<3x4x4xbf16, #tpu.memory_space<vmem>>, vector<1x4x4xbf16>
    %91 = vector.shape_cast %90 : vector<1x4x4xbf16> to vector<4x4xbf16>
    %cst_83 = arith.constant dense<0.000000e+00> : vector<4x256xf32>
    %92 = tpu.matmul %91, %89, %cst_83 {dimension_numbers = #tpu.dot_dimension_numbers<[1], [0], [0], [1], [0, 0, 1, 1], [], []>} : vector<4x4xbf16>, vector<4x256xbf16>, vector<4x256xf32> -> vector<4x256xf32>
    %93 = arith.truncf %92 : vector<4x256xf32> to vector<4x256xbf16>
    %c0_84 = arith.constant 0 : index
    %c0_85 = arith.constant 0 : index
    %c0_86 = arith.constant 0 : index
    %94 = vector.load %arg12[%c0_84, %c0_85, %c0_86] : memref<3x256x768xbf16, #tpu.memory_space<vmem>>, vector<1x256x768xbf16>
    %95 = vector.shape_cast %94 : vector<1x256x768xbf16> to vector<256x768xbf16>
    %cst_87 = arith.constant dense<0.000000e+00> : vector<4x768xf32>
    %96 = tpu.matmul %93, %95, %cst_87 {dimension_numbers = #tpu.dot_dimension_numbers<[1], [0], [0], [1], [0, 0, 1, 1], [], []>} : vector<4x256xbf16>, vector<256x768xbf16>, vector<4x768xf32> -> vector<4x768xf32>
    %c1_88 = arith.constant 1 : index
    %c0_89 = arith.constant 0 : index
    %c0_90 = arith.constant 0 : index
    %97 = vector.load %arg11[%c1_88, %c0_89, %c0_90] : memref<3x4x4xbf16, #tpu.memory_space<vmem>>, vector<1x4x4xbf16>
    %98 = vector.shape_cast %97 : vector<1x4x4xbf16> to vector<4x4xbf16>
    %cst_91 = arith.constant dense<0.000000e+00> : vector<4x256xf32>
    %99 = tpu.matmul %98, %89, %cst_91 {dimension_numbers = #tpu.dot_dimension_numbers<[1], [0], [0], [1], [0, 0, 1, 1], [], []>} : vector<4x4xbf16>, vector<4x256xbf16>, vector<4x256xf32> -> vector<4x256xf32>
    %100 = arith.truncf %99 : vector<4x256xf32> to vector<4x256xbf16>
    %c1_92 = arith.constant 1 : index
    %c0_93 = arith.constant 0 : index
    %c0_94 = arith.constant 0 : index
    %101 = vector.load %arg12[%c1_92, %c0_93, %c0_94] : memref<3x256x768xbf16, #tpu.memory_space<vmem>>, vector<1x256x768xbf16>
    %102 = vector.shape_cast %101 : vector<1x256x768xbf16> to vector<256x768xbf16>
    %cst_95 = arith.constant dense<0.000000e+00> : vector<4x768xf32>
    %103 = tpu.matmul %100, %102, %cst_95 {dimension_numbers = #tpu.dot_dimension_numbers<[1], [0], [0], [1], [0, 0, 1, 1], [], []>} : vector<4x256xbf16>, vector<256x768xbf16>, vector<4x768xf32> -> vector<4x768xf32>
    %104 = arith.addf %96, %103 : vector<4x768xf32>
    %c2_96 = arith.constant 2 : index
    %c0_97 = arith.constant 0 : index
    %c0_98 = arith.constant 0 : index
    %105 = vector.load %arg11[%c2_96, %c0_97, %c0_98] : memref<3x4x4xbf16, #tpu.memory_space<vmem>>, vector<1x4x4xbf16>
    %106 = vector.shape_cast %105 : vector<1x4x4xbf16> to vector<4x4xbf16>
    %cst_99 = arith.constant dense<0.000000e+00> : vector<4x256xf32>
    %107 = tpu.matmul %106, %89, %cst_99 {dimension_numbers = #tpu.dot_dimension_numbers<[1], [0], [0], [1], [0, 0, 1, 1], [], []>} : vector<4x4xbf16>, vector<4x256xbf16>, vector<4x256xf32> -> vector<4x256xf32>
    %108 = arith.truncf %107 : vector<4x256xf32> to vector<4x256xbf16>
    %c2_100 = arith.constant 2 : index
    %c0_101 = arith.constant 0 : index
    %c0_102 = arith.constant 0 : index
    %109 = vector.load %arg12[%c2_100, %c0_101, %c0_102] : memref<3x256x768xbf16, #tpu.memory_space<vmem>>, vector<1x256x768xbf16>
    %110 = vector.shape_cast %109 : vector<1x256x768xbf16> to vector<256x768xbf16>
    %cst_103 = arith.constant dense<0.000000e+00> : vector<4x768xf32>
    %111 = tpu.matmul %108, %110, %cst_103 {dimension_numbers = #tpu.dot_dimension_numbers<[1], [0], [0], [1], [0, 0, 1, 1], [], []>} : vector<4x256xbf16>, vector<256x768xbf16>, vector<4x768xf32> -> vector<4x768xf32>
    %112 = arith.addf %104, %111 : vector<4x768xf32>
    %c0_104 = arith.constant 0 : index
    %c0_105 = arith.constant 0 : index
    %113 = vector.load %arg13[%c0_104, %c0_105] : memref<1x768xf32, #tpu.memory_space<vmem>>, vector<1x768xf32>
    %114 = vector.broadcast %113 : vector<1x768xf32> to vector<4x768xf32>
    %115 = arith.addf %112, %114 : vector<4x768xf32>
    %cst_106 = arith.constant 0.000000e+00 : f32
    %116 = vector.broadcast %cst_106 : f32 to vector<4x768xf32>
    %117 = arith.maximumf %115, %116 : vector<4x768xf32>
    %118 = arith.truncf %117 : vector<4x768xf32> to vector<4x768xbf16>
    %c0_107 = arith.constant 0 : index
    %c0_108 = arith.constant 0 : index
    %119 = vector.load %arg14[%c0_107, %c0_108] : memref<768x32xbf16, #tpu.memory_space<vmem>>, vector<768x32xbf16>
    %cst_109 = arith.constant dense<0.000000e+00> : vector<4x32xf32>
    %120 = tpu.matmul %118, %119, %cst_109 {dimension_numbers = #tpu.dot_dimension_numbers<[1], [0], [0], [1], [0, 0, 1, 1], [], []>} : vector<4x768xbf16>, vector<768x32xbf16>, vector<4x32xf32> -> vector<4x32xf32>
    %c0_110 = arith.constant 0 : index
    %c0_111 = arith.constant 0 : index
    %121 = vector.load %arg15[%c0_110, %c0_111] : memref<1x32xf32, #tpu.memory_space<vmem>>, vector<1x32xf32>
    %122 = vector.broadcast %121 : vector<1x32xf32> to vector<4x32xf32>
    %123 = arith.addf %120, %122 : vector<4x32xf32>
    %c0_112 = arith.constant 0 : index
    %c0_113 = arith.constant 0 : index
    %c0_114 = arith.constant 0 : index
    %124 = vector.load %arg31[%c0_112, %c0_113, %c0_114] : memref<1x4x32xf32, #tpu.memory_space<vmem>>, vector<1x4x32xf32>
    %125 = vector.shape_cast %124 : vector<1x4x32xf32> to vector<4x32xf32>
    %126 = vector.shape_cast %123 : vector<4x32xf32> to vector<1x4x32xf32>
    tpu.vector_store %arg31[%c0_112, %c0_113, %c0_114], %126 {strides = array<i32>} : memref<1x4x32xf32, #tpu.memory_space<vmem>>, vector<1x4x32xf32>,
    %c0_115 = arith.constant 0 : index
    %c0_116 = arith.constant 0 : index
    %c0_117 = arith.constant 0 : index
    %127 = vector.load %arg16[%c0_115, %c0_116, %c0_117] : memref<3x4x4xbf16, #tpu.memory_space<vmem>>, vector<1x4x4xbf16>
    %128 = vector.shape_cast %127 : vector<1x4x4xbf16> to vector<4x4xbf16>
    %cst_118 = arith.constant dense<0.000000e+00> : vector<4x256xf32>
    %129 = tpu.matmul %128, %89, %cst_118 {dimension_numbers = #tpu.dot_dimension_numbers<[1], [0], [0], [1], [0, 0, 1, 1], [], []>} : vector<4x4xbf16>, vector<4x256xbf16>, vector<4x256xf32> -> vector<4x256xf32>
    %130 = arith.truncf %129 : vector<4x256xf32> to vector<4x256xbf16>
    %c0_119 = arith.constant 0 : index
    %c0_120 = arith.constant 0 : index
    %c0_121 = arith.constant 0 : index
    %131 = vector.load %arg17[%c0_119, %c0_120, %c0_121] : memref<3x256x256xbf16, #tpu.memory_space<vmem>>, vector<1x256x256xbf16>
    %132 = vector.shape_cast %131 : vector<1x256x256xbf16> to vector<256x256xbf16>
    %cst_122 = arith.constant dense<0.000000e+00> : vector<4x256xf32>
    %133 = tpu.matmul %130, %132, %cst_122 {dimension_numbers = #tpu.dot_dimension_numbers<[1], [0], [0], [1], [0, 0, 1, 1], [], []>} : vector<4x256xbf16>, vector<256x256xbf16>, vector<4x256xf32> -> vector<4x256xf32>
    %c1_123 = arith.constant 1 : index
    %c0_124 = arith.constant 0 : index
    %c0_125 = arith.constant 0 : index
    %134 = vector.load %arg16[%c1_123, %c0_124, %c0_125] : memref<3x4x4xbf16, #tpu.memory_space<vmem>>, vector<1x4x4xbf16>
    %135 = vector.shape_cast %134 : vector<1x4x4xbf16> to vector<4x4xbf16>
    %cst_126 = arith.constant dense<0.000000e+00> : vector<4x256xf32>
    %136 = tpu.matmul %135, %89, %cst_126 {dimension_numbers = #tpu.dot_dimension_numbers<[1], [0], [0], [1], [0, 0, 1, 1], [], []>} : vector<4x4xbf16>, vector<4x256xbf16>, vector<4x256xf32> -> vector<4x256xf32>
    %137 = arith.truncf %136 : vector<4x256xf32> to vector<4x256xbf16>
    %c1_127 = arith.constant 1 : index
    %c0_128 = arith.constant 0 : index
    %c0_129 = arith.constant 0 : index
    %138 = vector.load %arg17[%c1_127, %c0_128, %c0_129] : memref<3x256x256xbf16, #tpu.memory_space<vmem>>, vector<1x256x256xbf16>
    %139 = vector.shape_cast %138 : vector<1x256x256xbf16> to vector<256x256xbf16>
    %cst_130 = arith.constant dense<0.000000e+00> : vector<4x256xf32>
    %140 = tpu.matmul %137, %139, %cst_130 {dimension_numbers = #tpu.dot_dimension_numbers<[1], [0], [0], [1], [0, 0, 1, 1], [], []>} : vector<4x256xbf16>, vector<256x256xbf16>, vector<4x256xf32> -> vector<4x256xf32>
    %141 = arith.addf %133, %140 : vector<4x256xf32>
    %c2_131 = arith.constant 2 : index
    %c0_132 = arith.constant 0 : index
    %c0_133 = arith.constant 0 : index
    %142 = vector.load %arg16[%c2_131, %c0_132, %c0_133] : memref<3x4x4xbf16, #tpu.memory_space<vmem>>, vector<1x4x4xbf16>
    %143 = vector.shape_cast %142 : vector<1x4x4xbf16> to vector<4x4xbf16>
    %cst_134 = arith.constant dense<0.000000e+00> : vector<4x256xf32>
    %144 = tpu.matmul %143, %89, %cst_134 {dimension_numbers = #tpu.dot_dimension_numbers<[1], [0], [0], [1], [0, 0, 1, 1], [], []>} : vector<4x4xbf16>, vector<4x256xbf16>, vector<4x256xf32> -> vector<4x256xf32>
    %145 = arith.truncf %144 : vector<4x256xf32> to vector<4x256xbf16>
    %c2_135 = arith.constant 2 : index
    %c0_136 = arith.constant 0 : index
    %c0_137 = arith.constant 0 : index
    %146 = vector.load %arg17[%c2_135, %c0_136, %c0_137] : memref<3x256x256xbf16, #tpu.memory_space<vmem>>, vector<1x256x256xbf16>
    %147 = vector.shape_cast %146 : vector<1x256x256xbf16> to vector<256x256xbf16>
    %cst_138 = arith.constant dense<0.000000e+00> : vector<4x256xf32>
    %148 = tpu.matmul %145, %147, %cst_138 {dimension_numbers = #tpu.dot_dimension_numbers<[1], [0], [0], [1], [0, 0, 1, 1], [], []>} : vector<4x256xbf16>, vector<256x256xbf16>, vector<4x256xf32> -> vector<4x256xf32>
    %149 = arith.addf %141, %148 : vector<4x256xf32>
    %c0_139 = arith.constant 0 : index
    %c0_140 = arith.constant 0 : index
    %150 = vector.load %arg18[%c0_139, %c0_140] : memref<1x256xf32, #tpu.memory_space<vmem>>, vector<1x256xf32>
    %151 = vector.broadcast %150 : vector<1x256xf32> to vector<4x256xf32>
    %152 = arith.addf %149, %151 : vector<4x256xf32>
    %cst_141 = arith.constant 0.000000e+00 : f32
    %153 = vector.broadcast %cst_141 : f32 to vector<4x256xf32>
    %154 = arith.maximumf %152, %153 : vector<4x256xf32>
    %155 = arith.truncf %154 : vector<4x256xf32> to vector<4x256xbf16>
    %c0_142 = arith.constant 0 : index
    %c0_143 = arith.constant 0 : index
    %156 = vector.load %arg19[%c0_142, %c0_143] : memref<256x108xbf16, #tpu.memory_space<vmem>>, vector<256x108xbf16>
    %cst_144 = arith.constant dense<0.000000e+00> : vector<4x108xf32>
    %157 = tpu.matmul %155, %156, %cst_144 {dimension_numbers = #tpu.dot_dimension_numbers<[1], [0], [0], [1], [0, 0, 1, 1], [], []>} : vector<4x256xbf16>, vector<256x108xbf16>, vector<4x108xf32> -> vector<4x108xf32>
    %c0_145 = arith.constant 0 : index
    %c0_146 = arith.constant 0 : index
    %158 = vector.load %arg20[%c0_145, %c0_146] : memref<1x108xf32, #tpu.memory_space<vmem>>, vector<1x108xf32>
    %159 = vector.broadcast %158 : vector<1x108xf32> to vector<4x108xf32>
    %160 = arith.addf %157, %159 : vector<4x108xf32>
    %c0_147 = arith.constant 0 : index
    %c0_148 = arith.constant 0 : index
    %c0_149 = arith.constant 0 : index
    %161 = vector.load %arg32[%c0_147, %c0_148, %c0_149] : memref<1x4x108xf32, #tpu.memory_space<vmem>>, vector<1x4x108xf32>
    %162 = vector.shape_cast %161 : vector<1x4x108xf32> to vector<4x108xf32>
    %163 = vector.shape_cast %160 : vector<4x108xf32> to vector<1x4x108xf32>
    tpu.vector_store %arg32[%c0_147, %c0_148, %c0_149], %163 {strides = array<i32>} : memref<1x4x108xf32, #tpu.memory_space<vmem>>, vector<1x4x108xf32>,
    %c0_150 = arith.constant 0 : index
    %c0_151 = arith.constant 0 : index
    %c0_152 = arith.constant 0 : index
    %164 = vector.load %arg21[%c0_150, %c0_151, %c0_152] : memref<3x8x8xbf16, #tpu.memory_space<vmem>>, vector<1x8x8xbf16>
    %165 = vector.shape_cast %164 : vector<1x8x8xbf16> to vector<8x8xbf16>
    %cst_153 = arith.constant dense<0.000000e+00> : vector<8x256xf32>
    %166 = tpu.matmul %165, %60, %cst_153 {dimension_numbers = #tpu.dot_dimension_numbers<[1], [0], [0], [1], [0, 0, 1, 1], [], []>} : vector<8x8xbf16>, vector<8x256xbf16>, vector<8x256xf32> -> vector<8x256xf32>
    %167 = arith.truncf %166 : vector<8x256xf32> to vector<8x256xbf16>
    %c0_154 = arith.constant 0 : index
    %c0_155 = arith.constant 0 : index
    %c0_156 = arith.constant 0 : index
    %168 = vector.load %arg22[%c0_154, %c0_155, %c0_156] : memref<3x256x512xbf16, #tpu.memory_space<vmem>>, vector<1x256x512xbf16>
    %169 = vector.shape_cast %168 : vector<1x256x512xbf16> to vector<256x512xbf16>
    %cst_157 = arith.constant dense<0.000000e+00> : vector<8x512xf32>
    %170 = tpu.matmul %167, %169, %cst_157 {dimension_numbers = #tpu.dot_dimension_numbers<[1], [0], [0], [1], [0, 0, 1, 1], [], []>} : vector<8x256xbf16>, vector<256x512xbf16>, vector<8x512xf32> -> vector<8x512xf32>
    %c1_158 = arith.constant 1 : index
    %c0_159 = arith.constant 0 : index
    %c0_160 = arith.constant 0 : index
    %171 = vector.load %arg21[%c1_158, %c0_159, %c0_160] : memref<3x8x8xbf16, #tpu.memory_space<vmem>>, vector<1x8x8xbf16>
    %172 = vector.shape_cast %171 : vector<1x8x8xbf16> to vector<8x8xbf16>
    %cst_161 = arith.constant dense<0.000000e+00> : vector<8x256xf32>
    %173 = tpu.matmul %172, %60, %cst_161 {dimension_numbers = #tpu.dot_dimension_numbers<[1], [0], [0], [1], [0, 0, 1, 1], [], []>} : vector<8x8xbf16>, vector<8x256xbf16>, vector<8x256xf32> -> vector<8x256xf32>
    %174 = arith.truncf %173 : vector<8x256xf32> to vector<8x256xbf16>
    %c1_162 = arith.constant 1 : index
    %c0_163 = arith.constant 0 : index
    %c0_164 = arith.constant 0 : index
    %175 = vector.load %arg22[%c1_162, %c0_163, %c0_164] : memref<3x256x512xbf16, #tpu.memory_space<vmem>>, vector<1x256x512xbf16>
    %176 = vector.shape_cast %175 : vector<1x256x512xbf16> to vector<256x512xbf16>
    %cst_165 = arith.constant dense<0.000000e+00> : vector<8x512xf32>
    %177 = tpu.matmul %174, %176, %cst_165 {dimension_numbers = #tpu.dot_dimension_numbers<[1], [0], [0], [1], [0, 0, 1, 1], [], []>} : vector<8x256xbf16>, vector<256x512xbf16>, vector<8x512xf32> -> vector<8x512xf32>
    %178 = arith.addf %170, %177 : vector<8x512xf32>
    %c2_166 = arith.constant 2 : index
    %c0_167 = arith.constant 0 : index
    %c0_168 = arith.constant 0 : index
    %179 = vector.load %arg21[%c2_166, %c0_167, %c0_168] : memref<3x8x8xbf16, #tpu.memory_space<vmem>>, vector<1x8x8xbf16>
    %180 = vector.shape_cast %179 : vector<1x8x8xbf16> to vector<8x8xbf16>
    %cst_169 = arith.constant dense<0.000000e+00> : vector<8x256xf32>
    %181 = tpu.matmul %180, %60, %cst_169 {dimension_numbers = #tpu.dot_dimension_numbers<[1], [0], [0], [1], [0, 0, 1, 1], [], []>} : vector<8x8xbf16>, vector<8x256xbf16>, vector<8x256xf32> -> vector<8x256xf32>
    %182 = arith.truncf %181 : vector<8x256xf32> to vector<8x256xbf16>
    %c2_170 = arith.constant 2 : index
    %c0_171 = arith.constant 0 : index
    %c0_172 = arith.constant 0 : index
    %183 = vector.load %arg22[%c2_170, %c0_171, %c0_172] : memref<3x256x512xbf16, #tpu.memory_space<vmem>>, vector<1x256x512xbf16>
    %184 = vector.shape_cast %183 : vector<1x256x512xbf16> to vector<256x512xbf16>
    %cst_173 = arith.constant dense<0.000000e+00> : vector<8x512xf32>
    %185 = tpu.matmul %182, %184, %cst_173 {dimension_numbers = #tpu.dot_dimension_numbers<[1], [0], [0], [1], [0, 0, 1, 1], [], []>} : vector<8x256xbf16>, vector<256x512xbf16>, vector<8x512xf32> -> vector<8x512xf32>
    %186 = arith.addf %178, %185 : vector<8x512xf32>
    %c0_174 = arith.constant 0 : index
    %c0_175 = arith.constant 0 : index
    %187 = vector.load %arg23[%c0_174, %c0_175] : memref<1x512xf32, #tpu.memory_space<vmem>>, vector<1x512xf32>
    %188 = vector.broadcast %187 : vector<1x512xf32> to vector<8x512xf32>
    %189 = arith.addf %186, %188 : vector<8x512xf32>
    %cst_176 = arith.constant 0.000000e+00 : f32
    %190 = vector.broadcast %cst_176 : f32 to vector<8x512xf32>
    %191 = arith.maximumf %189, %190 : vector<8x512xf32>
    %192 = arith.truncf %191 : vector<8x512xf32> to vector<8x512xbf16>
    %c0_177 = arith.constant 0 : index
    %c0_178 = arith.constant 0 : index
    %193 = vector.load %arg24[%c0_177, %c0_178] : memref<512x216xbf16, #tpu.memory_space<vmem>>, vector<512x216xbf16>
    %cst_179 = arith.constant dense<0.000000e+00> : vector<8x216xf32>
    %194 = tpu.matmul %192, %193, %cst_179 {dimension_numbers = #tpu.dot_dimension_numbers<[1], [0], [0], [1], [0, 0, 1, 1], [], []>} : vector<8x512xbf16>, vector<512x216xbf16>, vector<8x216xf32> -> vector<8x216xf32>
    %c0_180 = arith.constant 0 : index
    %c0_181 = arith.constant 0 : index
    %195 = vector.load %arg25[%c0_180, %c0_181] : memref<1x216xf32, #tpu.memory_space<vmem>>, vector<1x216xf32>
    %196 = vector.broadcast %195 : vector<1x216xf32> to vector<8x216xf32>
    %197 = arith.addf %194, %196 : vector<8x216xf32>
    %c0_182 = arith.constant 0 : index
    %c0_183 = arith.constant 0 : index
    %c0_184 = arith.constant 0 : index
    %198 = vector.load %arg33[%c0_182, %c0_183, %c0_184] : memref<1x8x216xf32, #tpu.memory_space<vmem>>, vector<1x8x216xf32>
    %199 = vector.shape_cast %198 : vector<1x8x216xf32> to vector<8x216xf32>
    %200 = vector.shape_cast %197 : vector<8x216xf32> to vector<1x8x216xf32>
    tpu.vector_store %arg33[%c0_182, %c0_183, %c0_184], %200 {strides = array<i32>} : memref<1x8x216xf32, #tpu.memory_space<vmem>>, vector<1x8x216xf32>,
    %c0_185 = arith.constant 0 : index
    %c0_186 = arith.constant 0 : index
    %c0_187 = arith.constant 0 : index
    %201 = vector.load %arg26[%c0_185, %c0_186, %c0_187] : memref<3x16x16xbf16, #tpu.memory_space<vmem>>, vector<1x16x16xbf16>
    %202 = vector.shape_cast %201 : vector<1x16x16xbf16> to vector<16x16xbf16>
    %cst_188 = arith.constant dense<0.000000e+00> : vector<16x256xf32>
    %203 = tpu.matmul %202, %31, %cst_188 {dimension_numbers = #tpu.dot_dimension_numbers<[1], [0], [0], [1], [0, 0, 1, 1], [], []>} : vector<16x16xbf16>, vector<16x256xbf16>, vector<16x256xf32> -> vector<16x256xf32>
    %204 = arith.truncf %203 : vector<16x256xf32> to vector<16x256xbf16>
    %c0_189 = arith.constant 0 : index
    %c0_190 = arith.constant 0 : index
    %c0_191 = arith.constant 0 : index
    %205 = vector.load %arg27[%c0_189, %c0_190, %c0_191] : memref<3x256x1024xbf16, #tpu.memory_space<vmem>>, vector<1x256x1024xbf16>
    %206 = vector.shape_cast %205 : vector<1x256x1024xbf16> to vector<256x1024xbf16>
    %cst_192 = arith.constant dense<0.000000e+00> : vector<16x1024xf32>
    %207 = tpu.matmul %204, %206, %cst_192 {dimension_numbers = #tpu.dot_dimension_numbers<[1], [0], [0], [1], [0, 0, 1, 1], [], []>} : vector<16x256xbf16>, vector<256x1024xbf16>, vector<16x1024xf32> -> vector<16x1024xf32>
    %c1_193 = arith.constant 1 : index
    %c0_194 = arith.constant 0 : index
    %c0_195 = arith.constant 0 : index
    %208 = vector.load %arg26[%c1_193, %c0_194, %c0_195] : memref<3x16x16xbf16, #tpu.memory_space<vmem>>, vector<1x16x16xbf16>
    %209 = vector.shape_cast %208 : vector<1x16x16xbf16> to vector<16x16xbf16>
    %cst_196 = arith.constant dense<0.000000e+00> : vector<16x256xf32>
    %210 = tpu.matmul %209, %31, %cst_196 {dimension_numbers = #tpu.dot_dimension_numbers<[1], [0], [0], [1], [0, 0, 1, 1], [], []>} : vector<16x16xbf16>, vector<16x256xbf16>, vector<16x256xf32> -> vector<16x256xf32>
    %211 = arith.truncf %210 : vector<16x256xf32> to vector<16x256xbf16>
    %c1_197 = arith.constant 1 : index
    %c0_198 = arith.constant 0 : index
    %c0_199 = arith.constant 0 : index
    %212 = vector.load %arg27[%c1_197, %c0_198, %c0_199] : memref<3x256x1024xbf16, #tpu.memory_space<vmem>>, vector<1x256x1024xbf16>
    %213 = vector.shape_cast %212 : vector<1x256x1024xbf16> to vector<256x1024xbf16>
    %cst_200 = arith.constant dense<0.000000e+00> : vector<16x1024xf32>
    %214 = tpu.matmul %211, %213, %cst_200 {dimension_numbers = #tpu.dot_dimension_numbers<[1], [0], [0], [1], [0, 0, 1, 1], [], []>} : vector<16x256xbf16>, vector<256x1024xbf16>, vector<16x1024xf32> -> vector<16x1024xf32>
    %215 = arith.addf %207, %214 : vector<16x1024xf32>
    %c2_201 = arith.constant 2 : index
    %c0_202 = arith.constant 0 : index
    %c0_203 = arith.constant 0 : index
    %216 = vector.load %arg26[%c2_201, %c0_202, %c0_203] : memref<3x16x16xbf16, #tpu.memory_space<vmem>>, vector<1x16x16xbf16>
    %217 = vector.shape_cast %216 : vector<1x16x16xbf16> to vector<16x16xbf16>
    %cst_204 = arith.constant dense<0.000000e+00> : vector<16x256xf32>
    %218 = tpu.matmul %217, %31, %cst_204 {dimension_numbers = #tpu.dot_dimension_numbers<[1], [0], [0], [1], [0, 0, 1, 1], [], []>} : vector<16x16xbf16>, vector<16x256xbf16>, vector<16x256xf32> -> vector<16x256xf32>
    %219 = arith.truncf %218 : vector<16x256xf32> to vector<16x256xbf16>
    %c2_205 = arith.constant 2 : index
    %c0_206 = arith.constant 0 : index
    %c0_207 = arith.constant 0 : index
    %220 = vector.load %arg27[%c2_205, %c0_206, %c0_207] : memref<3x256x1024xbf16, #tpu.memory_space<vmem>>, vector<1x256x1024xbf16>
    %221 = vector.shape_cast %220 : vector<1x256x1024xbf16> to vector<256x1024xbf16>
    %cst_208 = arith.constant dense<0.000000e+00> : vector<16x1024xf32>
    %222 = tpu.matmul %219, %221, %cst_208 {dimension_numbers = #tpu.dot_dimension_numbers<[1], [0], [0], [1], [0, 0, 1, 1], [], []>} : vector<16x256xbf16>, vector<256x1024xbf16>, vector<16x1024xf32> -> vector<16x1024xf32>
    %223 = arith.addf %215, %222 : vector<16x1024xf32>
    %c0_209 = arith.constant 0 : index
    %c0_210 = arith.constant 0 : index
    %224 = vector.load %arg28[%c0_209, %c0_210] : memref<1x1024xf32, #tpu.memory_space<vmem>>, vector<1x1024xf32>
    %225 = vector.broadcast %224 : vector<1x1024xf32> to vector<16x1024xf32>
    %226 = arith.addf %223, %225 : vector<16x1024xf32>
    %cst_211 = arith.constant 0.000000e+00 : f32
    %227 = vector.broadcast %cst_211 : f32 to vector<16x1024xf32>
    %228 = arith.maximumf %226, %227 : vector<16x1024xf32>
    %229 = arith.truncf %228 : vector<16x1024xf32> to vector<16x1024xbf16>
    %c0_212 = arith.constant 0 : index
    %c0_213 = arith.constant 0 : index
    %230 = vector.load %arg29[%c0_212, %c0_213] : memref<1024x432xbf16, #tpu.memory_space<vmem>>, vector<1024x432xbf16>
    %cst_214 = arith.constant dense<0.000000e+00> : vector<16x432xf32>
    %231 = tpu.matmul %229, %230, %cst_214 {dimension_numbers = #tpu.dot_dimension_numbers<[1], [0], [0], [1], [0, 0, 1, 1], [], []>} : vector<16x1024xbf16>, vector<1024x432xbf16>, vector<16x432xf32> -> vector<16x432xf32>
    %c0_215 = arith.constant 0 : index
    %c0_216 = arith.constant 0 : index
    %232 = vector.load %arg30[%c0_215, %c0_216] : memref<1x432xf32, #tpu.memory_space<vmem>>, vector<1x432xf32>
    %233 = vector.broadcast %232 : vector<1x432xf32> to vector<16x432xf32>
    %234 = arith.addf %231, %233 : vector<16x432xf32>
    %c0_217 = arith.constant 0 : index
    %c0_218 = arith.constant 0 : index
    %c0_219 = arith.constant 0 : index
    %235 = vector.load %arg34[%c0_217, %c0_218, %c0_219] : memref<1x16x432xf32, #tpu.memory_space<vmem>>, vector<1x16x432xf32>
    %236 = vector.shape_cast %235 : vector<1x16x432xf32> to vector<16x432xf32>
    %237 = vector.shape_cast %234 : vector<16x432xf32> to vector<1x16x432xf32>
    tpu.vector_store %arg34[%c0_217, %c0_218, %c0_219], %237 {strides = array<i32>} : memref<1x16x432xf32, #tpu.memory_space<vmem>>, vector<1x16x432xf32>,
    return
  }
  func.func @transform_0(%arg0: i32) -> (i32, i32, i32) {
    %c0_i32 = arith.constant 0 : i32
    %c0_i32_0 = arith.constant 0 : i32
    %c0_i32_1 = arith.constant 0 : i32
    return %arg0, %c0_i32, %c0_i32_0 : i32, i32, i32
  }
  func.func @transform_1(%arg0: i32) -> (i32, i32, i32) {
    %c0_i32 = arith.constant 0 : i32
    %c0_i32_0 = arith.constant 0 : i32
    %c0_i32_1 = arith.constant 0 : i32
    %c0_i32_2 = arith.constant 0 : i32
    return %c0_i32, %c0_i32_0, %c0_i32_1 : i32, i32, i32
  }
  func.func @transform_2(%arg0: i32) -> (i32, i32, i32) {
    %c0_i32 = arith.constant 0 : i32
    %c0_i32_0 = arith.constant 0 : i32
    %c0_i32_1 = arith.constant 0 : i32
    %c0_i32_2 = arith.constant 0 : i32
    return %c0_i32, %c0_i32_0, %c0_i32_1 : i32, i32, i32
  }
  func.func @transform_3(%arg0: i32) -> (i32, i32) {
    %c0_i32 = arith.constant 0 : i32
    %c0_i32_0 = arith.constant 0 : i32
    %c0_i32_1 = arith.constant 0 : i32
    return %c0_i32, %c0_i32_0 : i32, i32
  }
  func.func @transform_4(%arg0: i32) -> (i32, i32, i32) {
    %c0_i32 = arith.constant 0 : i32
    %c0_i32_0 = arith.constant 0 : i32
    %c0_i32_1 = arith.constant 0 : i32
    %c0_i32_2 = arith.constant 0 : i32
    return %c0_i32, %c0_i32_0, %c0_i32_1 : i32, i32, i32
  }
  func.func @transform_5(%arg0: i32) -> (i32, i32, i32) {
    %c0_i32 = arith.constant 0 : i32
    %c0_i32_0 = arith.constant 0 : i32
    %c0_i32_1 = arith.constant 0 : i32
    %c0_i32_2 = arith.constant 0 : i32
    return %c0_i32, %c0_i32_0, %c0_i32_1 : i32, i32, i32
  }
  func.func @transform_6(%arg0: i32) -> (i32, i32) {
    %c0_i32 = arith.constant 0 : i32
    %c0_i32_0 = arith.constant 0 : i32
    %c0_i32_1 = arith.constant 0 : i32
    return %c0_i32, %c0_i32_0 : i32, i32
  }
  func.func @transform_7(%arg0: i32) -> (i32, i32, i32) {
    %c0_i32 = arith.constant 0 : i32
    %c0_i32_0 = arith.constant 0 : i32
    %c0_i32_1 = arith.constant 0 : i32
    %c0_i32_2 = arith.constant 0 : i32
    return %c0_i32, %c0_i32_0, %c0_i32_1 : i32, i32, i32
  }
  func.func @transform_8(%arg0: i32) -> (i32, i32, i32) {
    %c0_i32 = arith.constant 0 : i32
    %c0_i32_0 = arith.constant 0 : i32
    %c0_i32_1 = arith.constant 0 : i32
    %c0_i32_2 = arith.constant 0 : i32
    return %c0_i32, %c0_i32_0, %c0_i32_1 : i32, i32, i32
  }
  func.func @transform_9(%arg0: i32) -> (i32, i32) {
    %c0_i32 = arith.constant 0 : i32
    %c0_i32_0 = arith.constant 0 : i32
    %c0_i32_1 = arith.constant 0 : i32
    return %c0_i32, %c0_i32_0 : i32, i32
  }
  func.func @transform_10(%arg0: i32) -> (i32, i32, i32) {
    %c0_i32 = arith.constant 0 : i32
    %c0_i32_0 = arith.constant 0 : i32
    %c0_i32_1 = arith.constant 0 : i32
    %c0_i32_2 = arith.constant 0 : i32
    return %c0_i32, %c0_i32_0, %c0_i32_1 : i32, i32, i32
  }
  func.func @transform_11(%arg0: i32) -> (i32, i32, i32) {
    %c0_i32 = arith.constant 0 : i32
    %c0_i32_0 = arith.constant 0 : i32
    %c0_i32_1 = arith.constant 0 : i32
    %c0_i32_2 = arith.constant 0 : i32
    return %c0_i32, %c0_i32_0, %c0_i32_1 : i32, i32, i32
  }
  func.func @transform_12(%arg0: i32) -> (i32, i32) {
    %c0_i32 = arith.constant 0 : i32
    %c0_i32_0 = arith.constant 0 : i32
    %c0_i32_1 = arith.constant 0 : i32
    return %c0_i32, %c0_i32_0 : i32, i32
  }
  func.func @transform_13(%arg0: i32) -> (i32, i32) {
    %c0_i32 = arith.constant 0 : i32
    %c0_i32_0 = arith.constant 0 : i32
    %c0_i32_1 = arith.constant 0 : i32
    return %c0_i32, %c0_i32_0 : i32, i32
  }
  func.func @transform_14(%arg0: i32) -> (i32, i32) {
    %c0_i32 = arith.constant 0 : i32
    %c0_i32_0 = arith.constant 0 : i32
    %c0_i32_1 = arith.constant 0 : i32
    return %c0_i32, %c0_i32_0 : i32, i32
  }
  func.func @transform_15(%arg0: i32) -> (i32, i32, i32) {
    %c0_i32 = arith.constant 0 : i32
    %c0_i32_0 = arith.constant 0 : i32
    %c0_i32_1 = arith.constant 0 : i32
    %c0_i32_2 = arith.constant 0 : i32
    return %c0_i32, %c0_i32_0, %c0_i32_1 : i32, i32, i32
  }
  func.func @transform_16(%arg0: i32) -> (i32, i32, i32) {
    %c0_i32 = arith.constant 0 : i32
    %c0_i32_0 = arith.constant 0 : i32
    %c0_i32_1 = arith.constant 0 : i32
    %c0_i32_2 = arith.constant 0 : i32
    return %c0_i32, %c0_i32_0, %c0_i32_1 : i32, i32, i32
  }
  func.func @transform_17(%arg0: i32) -> (i32, i32) {
    %c0_i32 = arith.constant 0 : i32
    %c0_i32_0 = arith.constant 0 : i32
    %c0_i32_1 = arith.constant 0 : i32
    return %c0_i32, %c0_i32_0 : i32, i32
  }
  func.func @transform_18(%arg0: i32) -> (i32, i32) {
    %c0_i32 = arith.constant 0 : i32
    %c0_i32_0 = arith.constant 0 : i32
    %c0_i32_1 = arith.constant 0 : i32
    return %c0_i32, %c0_i32_0 : i32, i32
  }
  func.func @transform_19(%arg0: i32) -> (i32, i32) {
    %c0_i32 = arith.constant 0 : i32
    %c0_i32_0 = arith.constant 0 : i32
    %c0_i32_1 = arith.constant 0 : i32
    return %c0_i32, %c0_i32_0 : i32, i32
  }
  func.func @transform_20(%arg0: i32) -> (i32, i32, i32) {
    %c0_i32 = arith.constant 0 : i32
    %c0_i32_0 = arith.constant 0 : i32
    %c0_i32_1 = arith.constant 0 : i32
    %c0_i32_2 = arith.constant 0 : i32
    return %c0_i32, %c0_i32_0, %c0_i32_1 : i32, i32, i32
  }
  func.func @transform_21(%arg0: i32) -> (i32, i32, i32) {
    %c0_i32 = arith.constant 0 : i32
    %c0_i32_0 = arith.constant 0 : i32
    %c0_i32_1 = arith.constant 0 : i32
    %c0_i32_2 = arith.constant 0 : i32
    return %c0_i32, %c0_i32_0, %c0_i32_1 : i32, i32, i32
  }
  func.func @transform_22(%arg0: i32) -> (i32, i32) {
    %c0_i32 = arith.constant 0 : i32
    %c0_i32_0 = arith.constant 0 : i32
    %c0_i32_1 = arith.constant 0 : i32
    return %c0_i32, %c0_i32_0 : i32, i32
  }
  func.func @transform_23(%arg0: i32) -> (i32, i32) {
    %c0_i32 = arith.constant 0 : i32
    %c0_i32_0 = arith.constant 0 : i32
    %c0_i32_1 = arith.constant 0 : i32
    return %c0_i32, %c0_i32_0 : i32, i32
  }
  func.func @transform_24(%arg0: i32) -> (i32, i32) {
    %c0_i32 = arith.constant 0 : i32
    %c0_i32_0 = arith.constant 0 : i32
    %c0_i32_1 = arith.constant 0 : i32
    return %c0_i32, %c0_i32_0 : i32, i32
  }
  func.func @transform_25(%arg0: i32) -> (i32, i32, i32) {
    %c0_i32 = arith.constant 0 : i32
    %c0_i32_0 = arith.constant 0 : i32
    %c0_i32_1 = arith.constant 0 : i32
    %c0_i32_2 = arith.constant 0 : i32
    return %c0_i32, %c0_i32_0, %c0_i32_1 : i32, i32, i32
  }
  func.func @transform_26(%arg0: i32) -> (i32, i32, i32) {
    %c0_i32 = arith.constant 0 : i32
    %c0_i32_0 = arith.constant 0 : i32
    %c0_i32_1 = arith.constant 0 : i32
    %c0_i32_2 = arith.constant 0 : i32
    return %c0_i32, %c0_i32_0, %c0_i32_1 : i32, i32, i32
  }
  func.func @transform_27(%arg0: i32) -> (i32, i32) {
    %c0_i32 = arith.constant 0 : i32
    %c0_i32_0 = arith.constant 0 : i32
    %c0_i32_1 = arith.constant 0 : i32
    return %c0_i32, %c0_i32_0 : i32, i32
  }
  func.func @transform_28(%arg0: i32) -> (i32, i32) {
    %c0_i32 = arith.constant 0 : i32
    %c0_i32_0 = arith.constant 0 : i32
    %c0_i32_1 = arith.constant 0 : i32
    return %c0_i32, %c0_i32_0 : i32, i32
  }
  func.func @transform_29(%arg0: i32) -> (i32, i32) {
    %c0_i32 = arith.constant 0 : i32
    %c0_i32_0 = arith.constant 0 : i32
    %c0_i32_1 = arith.constant 0 : i32
    return %c0_i32, %c0_i32_0 : i32, i32
  }
  func.func @transform_30(%arg0: i32) -> (i32, i32, i32) {
    %c0_i32 = arith.constant 0 : i32
    %c0_i32_0 = arith.constant 0 : i32
    %c0_i32_1 = arith.constant 0 : i32
    return %arg0, %c0_i32, %c0_i32_0 : i32, i32, i32
  }
  func.func @transform_31(%arg0: i32) -> (i32, i32, i32) {
    %c0_i32 = arith.constant 0 : i32
    %c0_i32_0 = arith.constant 0 : i32
    %c0_i32_1 = arith.constant 0 : i32
    return %arg0, %c0_i32, %c0_i32_0 : i32, i32, i32
  }
  func.func @transform_32(%arg0: i32) -> (i32, i32, i32) {
    %c0_i32 = arith.constant 0 : i32
    %c0_i32_0 = arith.constant 0 : i32
    %c0_i32_1 = arith.constant 0 : i32
    return %arg0, %c0_i32, %c0_i32_0 : i32, i32, i32
  }
  func.func @transform_33(%arg0: i32) -> (i32, i32, i32) {
    %c0_i32 = arith.constant 0 : i32
    %c0_i32_0 = arith.constant 0 : i32
    %c0_i32_1 = arith.constant 0 : i32
    return %arg0, %c0_i32, %c0_i32_0 : i32, i32, i32
  }
}

</mosaic_0001>

<bundles_post_ra>
// kernel: combination_model_forward.1
= control target key start
LH: loop header
LB: loop body
LE: loop exit
PB: predicated region body
PF: predicated region fallthrough
CT: control target
= control target key end

     0   :  { %s19783_s6 = smov 1   ;;  %s19784_s10 = smov 2   ;;  %s21869_s0 = inlined_call_operand.smem [shape: u32[34], index: -1, kind: input, shape index: {}] }
   0x1   :  { %s19853_s5 = sld [smem:[%s21869_s0]]   ;;  %s19785_s14 = smov 3  }
   0x2   :  { %s19858_s9 = sld [smem:[%s21869_s0 + %s19783_s6]]   ;;  %s19786_s18 = smov 4  }
   0x3   :  { %s19863_s13 = sld [smem:[%s21869_s0 + %s19784_s10]]   ;;  %s19787_s22 = smov 5  }
   0x4   :  { %s19868_s17 = sld [smem:[%s21869_s0 + %s19785_s14]]   ;;  %s19788_s26 = smov 6  }
   0x5   :  { %s19873_s21 = sld [smem:[%s21869_s0 + %s19786_s18]]   ;;  %s19789_s30 = smov 7  }
   0x6   :  { %s19878_s25 = sld [smem:[%s21869_s0 + %s19787_s22]]   ;;  %s19790_s4 = smov 8  }
   0x7   :  { %21899 = sst [smem:[#allocation40_spill]] %s19853_s5  ;;  %s19791_s10 = smov 9  }
   0x8   :  { %21900 = sst [smem:[#allocation41_spill]] %s19858_s9  ;;  %s19792_s15 = smov 10  }
   0x9   :  { %21901 = sst [smem:[#allocation42_spill]] %s19863_s13  ;;  %s19793_s20 = smov 11  }
   0xa   :  { %s19883_s29 = sld [smem:[%s21869_s0 + %s19788_s26]]   ;;  %s19794_s26 = smov 12  }
   0xb   :  { %s19888_s3 = sld [smem:[%s21869_s0 + %s19789_s30]]   ;;  %s19795_s1 = smov 13  }
   0xc   :  { %21902 = sst [smem:[#allocation43_spill]] %s19878_s25  ;;  %s19796_s7 = smov 14  }
   0xd   :  { %s19893_s8 = sld [smem:[%s21869_s0 + %s19790_s4]]   ;;  %s19798_s22 = smov 16  }
   0xe   :  { %s19898_s14 = sld [smem:[%s21869_s0 + %s19791_s10]]   ;;  %s19799_s28 = smov 17  }
   0xf   :  { %s19903_s19 = sld [smem:[%s21869_s0 + %s19792_s15]]   ;;  %s19797_s15 = smov 15  }
  0x10   :  { %s19908_s24 = sld [smem:[%s21869_s0 + %s19793_s20]]  }
  0x11   :  { %21903 = sst [smem:[#allocation44_spill]] %s19888_s3 }
  0x12   :  { %s19913_s30 = sld [smem:[%s21869_s0 + %s19794_s26]]  }
  0x13   :  { %21904 = sst [smem:[#allocation45_spill]] %s19893_s8 }
  0x14   :  { %s19918_s6 = sld [smem:[%s21869_s0 + %s19795_s1]]  }
  0x15   :  { %s19923_s12 = sld [smem:[%s21869_s0 + %s19796_s7]]   ;;  %s19800_s7 = smov 18  }
  0x16   :  { %21905 = sst [smem:[#allocation46_spill]] %s19908_s24 }
  0x17   :  { %s19928_s20 = sld [smem:[%s21869_s0 + %s19797_s15]]   ;;  %s19801_s15 = smov 19  }
  0x18   :  { %s19933_s27 = sld [smem:[%s21869_s0 + %s19798_s22]]   ;;  %s19802_s22 = smov 20  }
  0x19   :  { %s19938_s4 = sld [smem:[%s21869_s0 + %s19799_s28]]   ;;  %s19803_s28 = smov 21  }
  0x1a   :  { %21906 = sst [smem:[#allocation47_spill]] %s19918_s6 }
  0x1b   :  { %s19943_s6 = sld [smem:[%s21869_s0 + %s19800_s7]]   ;;  %s19804_s7 = smov 22  }
  0x1c   :  { %s19948_s24 = sld [smem:[%s21869_s0 + %s19801_s15]]   ;;  %s19805_s15 = smov 23  }
  0x1d   :  { %s19953_s25 = sld [smem:[%s21869_s0 + %s19802_s22]]   ;;  %s19806_s22 = smov 24  }
  0x1e   :  { %21907 = sst [smem:[#allocation48_spill]] %s19933_s27 }
  0x1f   :  { %21908 = sst [smem:[#allocation49_spill]] %s19938_s4 }
  0x20   :  { %s19958_s4 = sld [smem:[%s21869_s0 + %s19803_s28]]   ;;  %s19807_s28 = smov 25  }
  0x21   :  { %21909 = sst [smem:[#allocation50_spill]] %s19943_s6 }
  0x22   :  { %s19963_s6 = sld [smem:[%s21869_s0 + %s19804_s7]]   ;;  %s19808_s7 = smov 26  }
  0x23   :  { %21910 = sst [smem:[#allocation51_spill]] %s19953_s25 }
  0x24   :  { %s19968_s5 = sld [smem:[%s21869_s0 + %s19805_s15]]   ;;  %s19809_s15 = smov 27  }
  0x25   :  { %s19973_s25 = sld [smem:[%s21869_s0 + %s19806_s22]]   ;;  %s19810_s22 = smov 28  }
  0x26   :  { %21911 = sst [smem:[#allocation52_spill]] %s19958_s4 }
  0x27   :  { %s19978_s27 = sld [smem:[%s21869_s0 + %s19807_s28]]   ;;  %s19811_s28 = smov 29  }
  0x28   :  { %21912 = sst [smem:[#allocation53_spill]] %s19963_s6 }
  0x29   :  { %s19983_s6 = sld [smem:[%s21869_s0 + %s19808_s7]]   ;;  %s19812_s7 = smov 30  }
  0x2a   :  { %21913 = sst [smem:[#allocation54_spill]] %s19968_s5 }
  0x2b   :  { %21914 = sst [smem:[#allocation55_spill]] %s19973_s25 }
  0x2c   :  { %s19988_s5 = sld [smem:[%s21869_s0 + %s19809_s15]]   ;;  %s19813_s15 = smov 31  }
  0x2d   :  { %21915 = sst [smem:[#allocation56_spill]] %s19978_s27 }
  0x2e   :  { %s19993_s25 = sld [smem:[%s21869_s0 + %s19810_s22]]   ;;  %s19814_s22 = smov 32  }
  0x2f   :  { %21916 = sst [smem:[#allocation57_spill]] %s19983_s6 }
  0x30   :  { %s19998_s27 = sld [smem:[%s21869_s0 + %s19811_s28]]   ;;  %s19815_s28 = smov 33  }
  0x31   :  { %s20003_s6 = sld [smem:[%s21869_s0 + %s19812_s7]]  }
  0x32   :  { %21917 = sst [smem:[#allocation58_spill]] %s19988_s5 }
  0x33   :  { %s20008_s5 = sld [smem:[%s21869_s0 + %s19813_s15]]  }
  0x34   :  { %21918 = sst [smem:[#allocation59_spill]] %s19993_s25 }
  0x35   :  { %s20013_s25 = sld [smem:[%s21869_s0 + %s19814_s22]]  }
  0x36   :  { %21919 = sst [smem:[#allocation60_spill]] %s19998_s27 }
  0x37   :  { %s20018_s27 = sld [smem:[%s21869_s0 + %s19815_s28]]  }
  0x38   :  { %73 = vsyncpa [#allocation3], 0 }
  0x39   :  { %74 = vsyncpa [#allocation5], 0 }
  0x3a   :  { %75 = vsyncpa [#allocation8], 0 }
  0x3b   :  { %76 = vsyncpa [#allocation11], 0 }
  0x3c   :  { %77 = vsyncpa [#allocation14], 0 }
  0x3d   :  { %78 = vsyncpa [#allocation17], 0 }
  0x3e   :  { %79 = vsyncpa [#allocation20], 0 }
  0x3f   :  { %80 = vsyncpa [#allocation23], 0 }
  0x40   :  { %81 = vsyncpa [#allocation26], 0 }
  0x41   :  { %82 = vsyncpa [#allocation29], 0  ;;  %s20020_s7 = smov 0  }
  0x42 LB: > { %s21920_s9 = sld [smem:[#allocation41_spill]]  ;;  %s21921_s8 = sld [smem:[#allocation45_spill]]  ;;  %s19781_s7 = sphi %s20020_s7, %s88_s7  }
  0x43   : > { %s21922_s4 = sld [smem:[#allocation52_spill]]  ;;  %s21924_s13 = sld [smem:[#allocation42_spill]] }
  0x44   : > { %s21923_s3 = sld [smem:[#allocation44_spill]]  ;;  %s19816_s0 = smov [#allocation4]  }
  0x45   : > { %s857_s10 = sshll.u32 %s19816_s0, 4  ;;  %s20026_s11 = sadd.s32 4294967295, %s19781_s7   ;;  %s20031_s10 = int_to_ptr.vmem [resolvable:$true] %s857_s10 }
  0x46   : > { %p14859_p0 = scmp.ge.s32.totalorder %s19781_s7, 1  ;;  %p832_p1 = scmp.lt.s32.totalorder %s19781_s7, 3 }
  0x47   : > { %p21882_p2 = scmp.eq.s32.totalorder %s20026_s11, 0  ;;  %s19817_s18 = smov [#allocation7]  }
  0x48   : > { %p20033_p3 = pnand %p14859_p0, %p832_p1  ;;  %s881_s22 = sshll.u32 %s19817_s18, 4  ;;  %s20045_s22 = int_to_ptr.vmem [resolvable:$true] %s881_s22 }
  0x49   : > { %s19818_s23 = smov [#allocation10]   ;;  %s19231_s28 = scalar_lea.hbm %s21924_s13, 4608 }
  0x4a   : > { %s21925_s15 = scalar_select %p20033_p3, 1, 0 }
  0x4b   : > { %p17314_p4 = pneg %p20033_p3  ;;  %s908_s26 = sshll.u32 %s19818_s23, 4  ;;  %s20047_s26 = int_to_ptr.vmem [resolvable:$true] %s908_s26 }
  0x4c   : > { %p19232_p6 = scmp.ne.s32.totalorder %s21924_s13, %s19231_s28  ;;  %p19238_p10 = scmp.lt.u32.totalorder %s19231_s28, %s21924_s13 }
  0x4d   : > { %p20041_p5 = pnand %p21882_p2, %p17314_p4 }
  0x4f   : > { %p20053_p7 = pneg %p20041_p5 }
  0x51   : > { %p19234_p8 = pnand %p20053_p7, %p19232_p6 }
  0x53   : > { %p19235_p9 = pneg %p19234_p8 }
  0x55   : > { %p19240_p11 = pnand %p19238_p10, %p19235_p9 }
  0x57   : > { %19243 = shalt.err (!%p19240_p11)
}
  0x58   : > { %s19244_s2 = scalar_lea.vmem %s20031_s10, 4608  ;;  %p19252_p1 = scmp.lt.s32.totalorder %s20031_s10, %s20031_s10 }
  0x59   : > { %p19245_p12 = scmp.ne.s32.totalorder %s20031_s10, %s19244_s2  ;;  %p19253_p4 = scmp.lt.s32.totalorder %s19244_s2, %s19244_s2 }
  0x5b   : > { %p19247_p13 = pnand %p19245_p12, %p20053_p7  ;;  %p19254_p2 = por %p19253_p4, %p19252_p1 }
  0x5d   : > { %p19248_p0 = pneg %p19247_p13 }
  0x5f   : > { %p19255_p3 = pnand %p19254_p2, %p19248_p0 }
  0x61   : > { %19258 = shalt.err (!%p19255_p3)
}
  0x62   : > { %s21884_s0 = smov 128   ;;  %s21886_s18 = smov 8  }
  0x63   : > { %17320 = dma.hbm_to_vmem [thread:$0]  (!%p20041_p5), %s21924_s13, 4608, %s20031_s10, [#allocation5], %s21884_s0, %s21884_s0, %s21886_s18  }
  0x64   : > { %s19259_s23 = scalar_lea.hbm %s19873_s21, 192 }
  0x65   : > { %p19260_p6 = scmp.ne.s32.totalorder %s19873_s21, %s19259_s23  ;;  %p19266_p3 = scmp.lt.u32.totalorder %s19259_s23, %s19873_s21 }
  0x67   : > { %p19262_p8 = pnand %p19260_p6, %p20053_p7 }
  0x69   : > { %p19263_p2 = pneg %p19262_p8 }
  0x6b   : > { %p19268_p9 = pnand %p19266_p3, %p19263_p2 }
  0x6d   : > { %19271 = shalt.err (!%p19268_p9)
}
  0x6e   : > { %s19272_s28 = scalar_lea.vmem %s20045_s22, 192  ;;  %p19280_p13 = scmp.lt.s32.totalorder %s20045_s22, %s20045_s22 }
  0x6f   : > { %p19273_p10 = scmp.ne.s32.totalorder %s20045_s22, %s19272_s28  ;;  %p19281_p0 = scmp.lt.s32.totalorder %s19272_s28, %s19272_s28 }
  0x71   : > { %p19275_p11 = pnand %p19273_p10, %p20053_p7  ;;  %p19282_p1 = por %p19281_p0, %p19280_p13 }
  0x73   : > { %p19276_p12 = pneg %p19275_p11 }
  0x75   : > { %p19283_p4 = pnand %p19282_p1, %p19276_p12 }
  0x77   : > { %19286 = shalt.err (!%p19283_p4)
}
  0x78   : > { %s21888_s10 = smov 64   ;;  %s21890_s2 = smov 4  }
  0x79   : > { %17326 = dma.hbm_to_vmem [thread:$0]  (!%p20041_p5), %s19873_s21, 192, %s20045_s22, [#allocation8], %s21888_s10, %s21888_s10, %s21890_s2  }
  0x7a   : > { %s19287_s23 = scalar_lea.hbm %s21923_s3, 96 }
  0x7b   : > { %p19288_p6 = scmp.ne.s32.totalorder %s21923_s3, %s19287_s23  ;;  %p19294_p3 = scmp.lt.u32.totalorder %s19287_s23, %s21923_s3 }
  0x7d   : > { %p19290_p8 = pnand %p19288_p6, %p20053_p7 }
  0x7f   : > { %p19291_p2 = pneg %p19290_p8 }
  0x81   : > { %p19296_p9 = pnand %p19294_p3, %p19291_p2 }
  0x83   : > { %19299 = shalt.err (!%p19296_p9)
}
  0x84   : > { %s19300_s28 = scalar_lea.vmem %s20047_s26, 96  ;;  %p19308_p13 = scmp.lt.s32.totalorder %s20047_s26, %s20047_s26 }
  0x85   : > { %p19301_p10 = scmp.ne.s32.totalorder %s20047_s26, %s19300_s28  ;;  %p19309_p0 = scmp.lt.s32.totalorder %s19300_s28, %s19300_s28 }
  0x87   : > { %p19303_p11 = pnand %p19301_p10, %p20053_p7  ;;  %p19310_p1 = por %p19309_p0, %p19308_p13 }
  0x89   : > { %p19304_p12 = pneg %p19303_p11 }
  0x8b   : > { %p19311_p4 = pnand %p19310_p1, %p19304_p12 }
  0x8d   : > { %19314 = shalt.err (!%p19311_p4)
}
  0x8e   : > { %s21893_s22 = smov 32   ;;  %s21894_s23 = smov 2  }
  0x8f   : > { %17332 = dma.hbm_to_vmem [thread:$0]  (!%p20041_p5), %s21923_s3, 96, %s20047_s26, [#allocation11], %s21893_s22, %s21893_s22, %s21894_s23  }
  0x90   : > { %s19825_s0 = smov [#allocation13]   ;;  %s19826_s28 = smov [#allocation16]  }
  0x91   : > { %s935_s18 = sshll.u32 %s19825_s0, 4  ;;  %s962_s10 = sshll.u32 %s19826_s28, 4  ;;  %s936_s18 = int_to_ptr.vmem [resolvable:$true] %s935_s18  ;;  %s20109_s10 = int_to_ptr.vmem [resolvable:$true] %s962_s10 }
  0x92   : > { %s19315_s2 = scalar_lea.hbm %s19898_s14, 32 }
  0x93   : > { %p19316_p6 = scmp.ne.s32.totalorder %s19898_s14, %s19315_s2  ;;  %p19322_p3 = scmp.lt.u32.totalorder %s19315_s2, %s19898_s14 }
  0x95   : > { %p19318_p8 = pnand %p19316_p6, %p20053_p7 }
  0x97   : > { %p19319_p2 = pneg %p19318_p8 }
  0x99   : > { %p19324_p9 = pnand %p19322_p3, %p19319_p2 }
  0x9b   : > { %19327 = shalt.err (!%p19324_p9)
}
  0x9c   : > { %s19328_s13 = scalar_lea.vmem %s936_s18, 32  ;;  %p19336_p13 = scmp.lt.s32.totalorder %s936_s18, %s936_s18 }
  0x9d   : > { %p19329_p10 = scmp.ne.s32.totalorder %s936_s18, %s19328_s13  ;;  %p19337_p0 = scmp.lt.s32.totalorder %s19328_s13, %s19328_s13 }
  0x9f   : > { %p19331_p11 = pnand %p19329_p10, %p20053_p7  ;;  %p19338_p1 = por %p19337_p0, %p19336_p13 }
  0xa1   : > { %p19332_p12 = pneg %p19331_p11 }
  0xa3   : > { %p19339_p4 = pnand %p19338_p1, %p19332_p12 }
  0xa5   : > { %19342 = shalt.err (!%p19339_p4)
}
  0xa6   : > { %17338 = dma.hbm_to_vmem [thread:$0]  (!%p20041_p5), %s19898_s14, 32, %s936_s18, [#allocation14]  }
  0xa7   : > { %s19343_s26 = scalar_lea.hbm %s19913_s30, 96 }
  0xa8   : > { %p19344_p6 = scmp.ne.s32.totalorder %s19913_s30, %s19343_s26  ;;  %p19350_p3 = scmp.lt.u32.totalorder %s19343_s26, %s19913_s30 }
  0xaa   : > { %p19346_p8 = pnand %p19344_p6, %p20053_p7 }
  0xac   : > { %p19347_p2 = pneg %p19346_p8 }
  0xae   : > { %p19352_p9 = pnand %p19350_p3, %p19347_p2 }
  0xb0   : > { %19355 = shalt.err (!%p19352_p9)
}
  0xb1   : > { %s19356_s13 = scalar_lea.vmem %s20109_s10, 96  ;;  %p19364_p13 = scmp.lt.s32.totalorder %s20109_s10, %s20109_s10 }
  0xb2   : > { %p19357_p10 = scmp.ne.s32.totalorder %s20109_s10, %s19356_s13  ;;  %p19365_p0 = scmp.lt.s32.totalorder %s19356_s13, %s19356_s13 }
  0xb4   : > { %p19359_p11 = pnand %p19357_p10, %p20053_p7  ;;  %p19366_p1 = por %p19365_p0, %p19364_p13 }
  0xb6   : > { %p19360_p12 = pneg %p19359_p11 }
  0xb8   : > { %p19367_p4 = pnand %p19366_p1, %p19360_p12 }
  0xba   : > { %19370 = shalt.err (!%p19367_p4)
}
  0xbb   : > { %17344 = dma.hbm_to_vmem [thread:$0]  (!%p20041_p5), %s19913_s30, 96, %s20109_s10, [#allocation17]  }
  0xbc   : > { %s19827_s0 = smov [#allocation19]   ;;  %s19828_s2 = smov [#allocation22]  }
  0xbd   : > { %s986_s18 = sshll.u32 %s19827_s0, 4  ;;  %s1019_s28 = sshll.u32 %s19828_s2, 4  ;;  %s987_s18 = int_to_ptr.vmem [resolvable:$true] %s986_s18  ;;  %s20136_s28 = int_to_ptr.vmem [resolvable:$true] %s1019_s28 }
  0xbe   : > { %s19371_s26 = scalar_lea.hbm %s19928_s20, 96 }
  0xbf   : > { %p19372_p6 = scmp.ne.s32.totalorder %s19928_s20, %s19371_s26  ;;  %p19378_p3 = scmp.lt.u32.totalorder %s19371_s26, %s19928_s20 }
  0xc1   : > { %p19374_p8 = pnand %p19372_p6, %p20053_p7 }
  0xc3   : > { %p19375_p2 = pneg %p19374_p8 }
  0xc5   : > { %p19380_p9 = pnand %p19378_p3, %p19375_p2 }
  0xc7   : > { %19383 = shalt.err (!%p19380_p9)
}
  0xc8   : > { %s19384_s13 = scalar_lea.vmem %s987_s18, 96  ;;  %p19392_p13 = scmp.lt.s32.totalorder %s987_s18, %s987_s18 }
  0xc9   : > { %p19385_p10 = scmp.ne.s32.totalorder %s987_s18, %s19384_s13  ;;  %p19393_p0 = scmp.lt.s32.totalorder %s19384_s13, %s19384_s13 }
  0xcb   : > { %p19387_p11 = pnand %p19385_p10, %p20053_p7  ;;  %p19394_p1 = por %p19393_p0, %p19392_p13 }
  0xcd   : > { %p19388_p12 = pneg %p19387_p11 }
  0xcf   : > { %p19395_p4 = pnand %p19394_p1, %p19388_p12 }
  0xd1   : > { %19398 = shalt.err (!%p19395_p4)
}
  0xd2   : > { %17350 = dma.hbm_to_vmem [thread:$0]  (!%p20041_p5), %s19928_s20, 96, %s987_s18, [#allocation20], %s21893_s22, %s21893_s22, %s21894_s23  }
  0xd3   : > { %s19399_s10 = scalar_lea.hbm %s19948_s24, 16 }
  0xd4   : > { %p19400_p6 = scmp.ne.s32.totalorder %s19948_s24, %s19399_s10  ;;  %p19406_p3 = scmp.lt.u32.totalorder %s19399_s10, %s19948_s24 }
  0xd6   : > { %p19402_p8 = pnand %p19400_p6, %p20053_p7 }
  0xd8   : > { %p19403_p2 = pneg %p19402_p8 }
  0xda   : > { %p19408_p9 = pnand %p19406_p3, %p19403_p2 }
  0xdc   : > { %19411 = shalt.err (!%p19408_p9)
}
  0xdd   : > { %s19412_s0 = scalar_lea.vmem %s20136_s28, 16  ;;  %s19419_s2 = scalar_lea.vmem %s20136_s28, 32 }
  0xde   : > { %p19413_p10 = scmp.ne.s32.totalorder %s20136_s28, %s19412_s0  ;;  %p19420_p13 = scmp.lt.s32.totalorder %s20136_s28, %s20136_s28 }
  0xdf   : > { %p19421_p0 = scmp.lt.s32.totalorder %s19419_s2, %s19412_s0 }
  0xe0   : > { %p19415_p11 = pnand %p19413_p10, %p20053_p7 }
  0xe1   : > { %p19422_p1 = por %p19421_p0, %p19420_p13 }
  0xe2   : > { %p19416_p12 = pneg %p19415_p11 }
  0xe4   : > { %p19423_p4 = pnand %p19422_p1, %p19416_p12 }
  0xe6   : > { %19426 = shalt.err (!%p19423_p4)
}
  0xe7   : > { %17356 = dma.hbm_to_vmem [thread:$0]  (!%p20041_p5), %s19948_s24, 16, %s20136_s28, [#allocation23]  }
  0xe8   : > { %s19829_s18 = smov [#allocation25]   ;;  %s19427_s13 = scalar_lea.hbm %s21922_s4, 24576 }
  0xe9   : > { %s1042_s26 = sshll.u32 %s19829_s18, 4  ;;  %p19428_p6 = scmp.ne.s32.totalorder %s21922_s4, %s19427_s13  ;;  %s1043_s26 = int_to_ptr.vmem [resolvable:$true] %s1042_s26 }
  0xea   : > { %p19434_p3 = scmp.lt.u32.totalorder %s19427_s13, %s21922_s4 }
  0xeb   : > { %p19430_p8 = pnand %p19428_p6, %p20053_p7 }
  0xed   : > { %p19431_p2 = pneg %p19430_p8 }
  0xef   : > { %p19436_p9 = pnand %p19434_p3, %p19431_p2 }
  0xf1   : > { %19439 = shalt.err (!%p19436_p9)
}
  0xf2   : > { %s19440_s10 = scalar_lea.vmem %s1043_s26, 24576  ;;  %p19448_p13 = scmp.lt.s32.totalorder %s1043_s26, %s1043_s26 }
  0xf3   : > { %p19441_p10 = scmp.ne.s32.totalorder %s1043_s26, %s19440_s10  ;;  %p19449_p0 = scmp.lt.s32.totalorder %s19440_s10, %s19440_s10 }
  0xf5   : > { %p19443_p11 = pnand %p19441_p10, %p20053_p7  ;;  %p19450_p1 = por %p19449_p0, %p19448_p13 }
  0xf7   : > { %p19444_p12 = pneg %p19443_p11 }
  0xf9   : > { %p19451_p4 = pnand %p19450_p1, %p19444_p12 }
  0xfb   : > { %19454 = shalt.err (!%p19451_p4)
}
  0xfc   : > { %s19830_s28 = smov 256   ;;  %s19831_s0 = smov 16  }
  0xfd   : > { %17362 = dma.hbm_to_vmem [thread:$0]  (!%p20041_p5), %s21922_s4, 24576, %s1043_s26, [#allocation26], %s19830_s28, %s19830_s28, %s19831_s0  }
  0xfe   : > { %s19832_s2 = smov [#allocation2]   ;;  %s19833_s13 = smov [#allocation6]  }
  0xff   : > { %s844_s18 = sshll.u32 %s19832_s2, 4  ;;  %s871_s22 = sshll.u32 %s19833_s13, 4  ;;  %s845_s18 = int_to_ptr.vmem [resolvable:$true] %s844_s18  ;;  %s872_s22 = int_to_ptr.vmem [resolvable:$true] %s871_s22 }
 0x100   : > { %s19455_s23 = scalar_lea.hbm %s21920_s9, 384 }
 0x101   : > { %p19456_p6 = scmp.ne.s32.totalorder %s21920_s9, %s19455_s23  ;;  %p19462_p3 = scmp.lt.u32.totalorder %s19455_s23, %s21920_s9 }
 0x103   : > { %p19458_p8 = pnand %p19456_p6, %p20053_p7 }
 0x105   : > { %p19459_p2 = pneg %p19458_p8 }
 0x107   : > { %p19464_p9 = pnand %p19462_p3, %p19459_p2 }
 0x109   : > { %19467 = shalt.err (!%p19464_p9)
}
 0x10a   : > { %s19468_s10 = scalar_lea.vmem %s845_s18, 384  ;;  %p19476_p13 = scmp.lt.s32.totalorder %s845_s18, %s845_s18 }
 0x10b   : > { %p19469_p10 = scmp.ne.s32.totalorder %s845_s18, %s19468_s10  ;;  %p19477_p0 = scmp.lt.s32.totalorder %s19468_s10, %s19468_s10 }
 0x10d   : > { %p19471_p11 = pnand %p19469_p10, %p20053_p7  ;;  %p19478_p1 = por %p19477_p0, %p19476_p13 }
 0x10f   : > { %p19472_p12 = pneg %p19471_p11 }
 0x111   : > { %p19479_p4 = pnand %p19478_p1, %p19472_p12 }
 0x113   : > { %19482 = shalt.err (!%p19479_p4)
}
 0x114   : > { %s21928_s26 = smov 4   ;;  %s21929_s28 = smov 64  }
 0x115   : > { %17317 = dma.hbm_to_vmem [thread:$0]  (!%p20041_p5), %s21920_s9, 384, %s845_s18, [#allocation3], %s21929_s28, %s21929_s28, %s21928_s26  }
 0x116   : > { %s19483_s23 = scalar_lea.hbm %s19868_s17, 32 }
 0x117   : > { %p19484_p6 = scmp.ne.s32.totalorder %s19868_s17, %s19483_s23  ;;  %p19490_p3 = scmp.lt.u32.totalorder %s19483_s23, %s19868_s17 }
 0x119   : > { %p19486_p8 = pnand %p19484_p6, %p20053_p7 }
 0x11b   : > { %p19487_p2 = pneg %p19486_p8 }
 0x11d   : > { %p19492_p9 = pnand %p19490_p3, %p19487_p2 }
 0x11f   : > { %19495 = shalt.err (!%p19492_p9)
}
 0x120   : > { %s19496_s0 = scalar_lea.vmem %s872_s22, 32  ;;  %p19504_p13 = scmp.lt.s32.totalorder %s872_s22, %s872_s22 }
 0x121   : > { %p19497_p10 = scmp.ne.s32.totalorder %s872_s22, %s19496_s0  ;;  %p19505_p0 = scmp.lt.s32.totalorder %s19496_s0, %s19496_s0 }
 0x123   : > { %p19499_p11 = pnand %p19497_p10, %p20053_p7  ;;  %p19506_p1 = por %p19505_p0, %p19504_p13 }
 0x125   : > { %p19500_p12 = pneg %p19499_p11 }
 0x127   : > { %p19507_p4 = pnand %p19506_p1, %p19500_p12 }
 0x129   : > { %19510 = shalt.err (!%p19507_p4)
}
 0x12a   : > { %17323 = dma.hbm_to_vmem [thread:$0]  (!%p20041_p5), %s19868_s17, 32, %s872_s22, [#allocation5]  }
 0x12b   : > { %s19834_s2 = smov [#allocation9]   ;;  %s19835_s13 = smov [#allocation12]  }
 0x12c   : > { %s898_s18 = sshll.u32 %s19834_s2, 4  ;;  %s921_s10 = sshll.u32 %s19835_s13, 4  ;;  %s899_s18 = int_to_ptr.vmem [resolvable:$true] %s898_s18  ;;  %s922_s10 = int_to_ptr.vmem [resolvable:$true] %s921_s10 }
 0x12d   : > { %s19511_s23 = scalar_lea.hbm %s19883_s29, 32 }
 0x12e   : > { %p19512_p6 = scmp.ne.s32.totalorder %s19883_s29, %s19511_s23  ;;  %p19518_p3 = scmp.lt.u32.totalorder %s19511_s23, %s19883_s29 }
 0x130   : > { %p19514_p8 = pnand %p19512_p6, %p20053_p7 }
 0x132   : > { %p19515_p2 = pneg %p19514_p8 }
 0x134   : > { %p19520_p9 = pnand %p19518_p3, %p19515_p2 }
 0x136   : > { %19523 = shalt.err (!%p19520_p9)
}
 0x137   : > { %s19524_s0 = scalar_lea.vmem %s899_s18, 32  ;;  %p19532_p13 = scmp.lt.s32.totalorder %s899_s18, %s899_s18 }
 0x138   : > { %p19525_p10 = scmp.ne.s32.totalorder %s899_s18, %s19524_s0  ;;  %p19533_p0 = scmp.lt.s32.totalorder %s19524_s0, %s19524_s0 }
 0x13a   : > { %p19527_p11 = pnand %p19525_p10, %p20053_p7  ;;  %p19534_p1 = por %p19533_p0, %p19532_p13 }
 0x13c   : > { %p19528_p12 = pneg %p19527_p11 }
 0x13e   : > { %p19535_p4 = pnand %p19534_p1, %p19528_p12 }
 0x140   : > { %19538 = shalt.err (!%p19535_p4)
}
 0x141   : > { %17329 = dma.hbm_to_vmem [thread:$0]  (!%p20041_p5), %s19883_s29, 32, %s899_s18, [#allocation8]  }
 0x142   : > { %s19539_s22 = scalar_lea.hbm %s21921_s8, 12288 }
 0x143   : > { %p19540_p6 = scmp.ne.s32.totalorder %s21921_s8, %s19539_s22  ;;  %p19546_p3 = scmp.lt.u32.totalorder %s19539_s22, %s21921_s8 }
 0x145   : > { %p19542_p8 = pnand %p19540_p6, %p20053_p7 }
 0x147   : > { %p19543_p2 = pneg %p19542_p8 }
 0x149   : > { %p19548_p9 = pnand %p19546_p3, %p19543_p2 }
 0x14b   : > { %19551 = shalt.err (!%p19548_p9)
}
 0x14c   : > { %s19552_s2 = scalar_lea.vmem %s922_s10, 12288  ;;  %p19560_p13 = scmp.lt.s32.totalorder %s922_s10, %s922_s10 }
 0x14d   : > { %p19553_p10 = scmp.ne.s32.totalorder %s922_s10, %s19552_s2  ;;  %p19561_p0 = scmp.lt.s32.totalorder %s19552_s2, %s19552_s2 }
 0x14f   : > { %p19555_p11 = pnand %p19553_p10, %p20053_p7  ;;  %p19562_p1 = por %p19561_p0, %p19560_p13 }
 0x151   : > { %p19556_p12 = pneg %p19555_p11 }
 0x153   : > { %p19563_p4 = pnand %p19562_p1, %p19556_p12 }
 0x155   : > { %19566 = shalt.err (!%p19563_p4)
}
 0x156   : > { %s21930_s18 = smov 8   ;;  %s21931_s13 = smov 128  }
 0x157   : > { %17335 = dma.hbm_to_vmem [thread:$0]  (!%p20041_p5), %s21921_s8, 12288, %s922_s10, [#allocation11], %s21931_s13, %s21931_s13, %s21930_s18  }
 0x158   : > { %s19836_s23 = smov [#allocation15]   ;;  %s19837_s22 = smov [#allocation18]  }
 0x159   : > { %s945_s0 = sshll.u32 %s19836_s23, 4  ;;  %s976_s3 = sshll.u32 %s19837_s22, 4  ;;  %s946_s0 = int_to_ptr.vmem [resolvable:$true] %s945_s0  ;;  %s977_s3 = int_to_ptr.vmem [resolvable:$true] %s976_s3 }
 0x15a   : > { %s19567_s2 = scalar_lea.hbm %s19903_s19, 96 }
 0x15b   : > { %p19568_p6 = scmp.ne.s32.totalorder %s19903_s19, %s19567_s2  ;;  %p19574_p3 = scmp.lt.u32.totalorder %s19567_s2, %s19903_s19 }
 0x15d   : > { %p19570_p8 = pnand %p19568_p6, %p20053_p7 }
 0x15f   : > { %p19571_p2 = pneg %p19570_p8 }
 0x161   : > { %p19576_p9 = pnand %p19574_p3, %p19571_p2 }
 0x163   : > { %19579 = shalt.err (!%p19576_p9)
}
 0x164   : > { %s19580_s4 = scalar_lea.vmem %s946_s0, 96  ;;  %p19588_p13 = scmp.lt.s32.totalorder %s946_s0, %s946_s0 }
 0x165   : > { %p19581_p10 = scmp.ne.s32.totalorder %s946_s0, %s19580_s4  ;;  %p19589_p0 = scmp.lt.s32.totalorder %s19580_s4, %s19580_s4 }
 0x167   : > { %p19583_p11 = pnand %p19581_p10, %p20053_p7  ;;  %p19590_p1 = por %p19589_p0, %p19588_p13 }
 0x169   : > { %p19584_p12 = pneg %p19583_p11 }
 0x16b   : > { %p19591_p4 = pnand %p19590_p1, %p19584_p12 }
 0x16d   : > { %19594 = shalt.err (!%p19591_p4)
}
 0x16e   : > { %s21932_s10 = smov 2   ;;  %s21933_s23 = smov 32  }
 0x16f   : > { %17341 = dma.hbm_to_vmem [thread:$0]  (!%p20041_p5), %s19903_s19, 96, %s946_s0, [#allocation14], %s21933_s23, %s21933_s23, %s21932_s10  }
 0x170   : > { %s19595_s22 = scalar_lea.hbm %s19923_s12, 16 }
 0x171   : > { %p19596_p6 = scmp.ne.s32.totalorder %s19923_s12, %s19595_s22  ;;  %p19602_p3 = scmp.lt.u32.totalorder %s19595_s22, %s19923_s12 }
 0x173   : > { %p19598_p8 = pnand %p19596_p6, %p20053_p7 }
 0x175   : > { %p19599_p2 = pneg %p19598_p8 }
 0x177   : > { %p19604_p9 = pnand %p19602_p3, %p19599_p2 }
 0x179   : > { %19607 = shalt.err (!%p19604_p9)
}
 0x17a   : > { %s19608_s4 = scalar_lea.vmem %s977_s3, 16  ;;  %s19615_s2 = scalar_lea.vmem %s977_s3, 32 }
 0x17b   : > { %p19609_p10 = scmp.ne.s32.totalorder %s977_s3, %s19608_s4  ;;  %p19616_p13 = scmp.lt.s32.totalorder %s977_s3, %s977_s3 }
 0x17c   : > { %p19617_p0 = scmp.lt.s32.totalorder %s19615_s2, %s19608_s4 }
 0x17d   : > { %p19611_p11 = pnand %p19609_p10, %p20053_p7 }
 0x17e   : > { %p19618_p1 = por %p19617_p0, %p19616_p13 }
 0x17f   : > { %p19612_p12 = pneg %p19611_p11 }
 0x181   : > { %p19619_p4 = pnand %p19618_p1, %p19612_p12 }
 0x183   : > { %19622 = shalt.err (!%p19619_p4)
}
 0x184   : > { %s21934_s0 = sld [smem:[#allocation48_spill]]  ;;  %s19838_s10 = smov [#allocation21]  }
 0x185   : > { %17347 = dma.hbm_to_vmem [thread:$0]  (!%p20041_p5), %s19923_s12, 16, %s977_s3, [#allocation17]  }
 0x186   : > { %s999_s23 = sshll.u32 %s19838_s10, 4  ;;  %s19839_s22 = smov [#allocation24]   ;;  %s1000_s23 = int_to_ptr.vmem [resolvable:$true] %s999_s23 }
 0x187   : > { %s1029_s8 = sshll.u32 %s19839_s22, 4  ;;  %s1030_s8 = int_to_ptr.vmem [resolvable:$true] %s1029_s8 }
 0x18a   : > { %s19623_s9 = scalar_lea.hbm %s21934_s0, 12288 }
 0x18b   : > { %p19624_p6 = scmp.ne.s32.totalorder %s21934_s0, %s19623_s9  ;;  %p19630_p3 = scmp.lt.u32.totalorder %s19623_s9, %s21934_s0 }
 0x18d   : > { %p19626_p8 = pnand %p19624_p6, %p20053_p7 }
 0x18f   : > { %p19627_p2 = pneg %p19626_p8 }
 0x191   : > { %p19632_p9 = pnand %p19630_p3, %p19627_p2 }
 0x193   : > { %19635 = shalt.err (!%p19632_p9)
}
 0x194   : > { %s19636_s4 = scalar_lea.vmem %s1000_s23, 12288  ;;  %p19644_p13 = scmp.lt.s32.totalorder %s1000_s23, %s1000_s23 }
 0x195   : > { %p19637_p10 = scmp.ne.s32.totalorder %s1000_s23, %s19636_s4  ;;  %p19645_p0 = scmp.lt.s32.totalorder %s19636_s4, %s19636_s4 }
 0x197   : > { %p19639_p11 = pnand %p19637_p10, %p20053_p7  ;;  %p19646_p1 = por %p19645_p0, %p19644_p13 }
 0x199   : > { %p19640_p12 = pneg %p19639_p11 }
 0x19b   : > { %p19647_p4 = pnand %p19646_p1, %p19640_p12 }
 0x19d   : > { %19650 = shalt.err (!%p19647_p4)
}
 0x19e   : > { %s21935_s9 = sld [smem:[#allocation51_spill]] }
 0x19f   : > { %17353 = dma.hbm_to_vmem [thread:$0]  (!%p20041_p5), %s21934_s0, 12288, %s1000_s23, [#allocation20], %s21931_s13, %s21931_s13, %s21930_s18  }
 0x1a4   : > { %s19651_s3 = scalar_lea.hbm %s21935_s9, 192 }
 0x1a5   : > { %p19652_p6 = scmp.ne.s32.totalorder %s21935_s9, %s19651_s3  ;;  %p19658_p3 = scmp.lt.u32.totalorder %s19651_s3, %s21935_s9 }
 0x1a7   : > { %p19654_p8 = pnand %p19652_p6, %p20053_p7 }
 0x1a9   : > { %p19655_p2 = pneg %p19654_p8 }
 0x1ab   : > { %p19660_p9 = pnand %p19658_p3, %p19655_p2 }
 0x1ad   : > { %19663 = shalt.err (!%p19660_p9)
}
 0x1ae   : > { %s19664_s2 = scalar_lea.vmem %s1030_s8, 192  ;;  %p19672_p13 = scmp.lt.s32.totalorder %s1030_s8, %s1030_s8 }
 0x1af   : > { %p19665_p10 = scmp.ne.s32.totalorder %s1030_s8, %s19664_s2  ;;  %p19673_p0 = scmp.lt.s32.totalorder %s19664_s2, %s19664_s2 }
 0x1b1   : > { %p19667_p11 = pnand %p19665_p10, %p20053_p7  ;;  %p19674_p1 = por %p19673_p0, %p19672_p13 }
 0x1b3   : > { %p19668_p12 = pneg %p19667_p11 }
 0x1b5   : > { %p19675_p4 = pnand %p19674_p1, %p19668_p12 }
 0x1b7   : > { %19678 = shalt.err (!%p19675_p4)
}
 0x1b8   : > { %s21936_s18 = sld [smem:[#allocation53_spill]]  ;;  %s19840_s13 = smov [#allocation27]  }
 0x1b9   : > { %17359 = dma.hbm_to_vmem [thread:$0]  (!%p20041_p5), %s21935_s9, 192, %s1030_s8, [#allocation23], %s21929_s28, %s21929_s28, %s21928_s26  }
 0x1ba   : > { %s1056_s10 = sshll.u32 %s19840_s13, 4  ;;  %s19841_s23 = smov [#allocation28]   ;;  %s1057_s10 = int_to_ptr.vmem [resolvable:$true] %s1056_s10 }
 0x1bb   : > { %s1070_s22 = sshll.u32 %s19841_s23, 4  ;;  %s1071_s22 = int_to_ptr.vmem [resolvable:$true] %s1070_s22 }
 0x1be   : > { %s19679_s4 = scalar_lea.hbm %s21936_s18, 64 }
 0x1bf   : > { %p19680_p6 = scmp.ne.s32.totalorder %s21936_s18, %s19679_s4  ;;  %p19686_p3 = scmp.lt.u32.totalorder %s19679_s4, %s21936_s18 }
 0x1c1   : > { %p19682_p8 = pnand %p19680_p6, %p20053_p7 }
 0x1c3   : > { %p19683_p2 = pneg %p19682_p8 }
 0x1c5   : > { %p19688_p9 = pnand %p19686_p3, %p19683_p2 }
 0x1c7   : > { %19691 = shalt.err (!%p19688_p9)
}
 0x1c8   : > { %s19692_s3 = scalar_lea.vmem %s1057_s10, 64  ;;  %p19700_p13 = scmp.lt.s32.totalorder %s1057_s10, %s1057_s10 }
 0x1c9   : > { %p19693_p10 = scmp.ne.s32.totalorder %s1057_s10, %s19692_s3  ;;  %p19701_p0 = scmp.lt.s32.totalorder %s19692_s3, %s19692_s3 }
 0x1cb   : > { %p19695_p11 = pnand %p19693_p10, %p20053_p7  ;;  %p19702_p1 = por %p19701_p0, %p19700_p13 }
 0x1cd   : > { %p19696_p12 = pneg %p19695_p11 }
 0x1cf   : > { %p19703_p4 = pnand %p19702_p1, %p19696_p12 }
 0x1d1   : > { %19706 = shalt.err (!%p19703_p4)
}
 0x1d2   : > { %s21937_s8 = sld [smem:[#allocation55_spill]] }
 0x1d3   : > { %17365 = dma.hbm_to_vmem [thread:$0]  (!%p20041_p5), %s21936_s18, 64, %s1057_s10, [#allocation26]  }
 0x1d8   : > { %s19707_s26 = scalar_lea.hbm %s21937_s8, 32 }
 0x1d9   : > { %p19708_p6 = scmp.ne.s32.totalorder %s21937_s8, %s19707_s26  ;;  %p19714_p3 = scmp.lt.u32.totalorder %s19707_s26, %s21937_s8 }
 0x1db   : > { %p19710_p8 = pnand %p19708_p6, %p20053_p7 }
 0x1dd   : > { %p19711_p2 = pneg %p19710_p8 }
 0x1df   : > { %p19716_p9 = pnand %p19714_p3, %p19711_p2 }
 0x1e1   : > { %19719 = shalt.err (!%p19716_p9)
}
 0x1e2   : > { %s19720_s28 = scalar_lea.vmem %s1071_s22, 32  ;;  %p19728_p13 = scmp.lt.s32.totalorder %s1071_s22, %s1071_s22 }
 0x1e3   : > { %p19721_p10 = scmp.ne.s32.totalorder %s1071_s22, %s19720_s28  ;;  %p19729_p0 = scmp.lt.s32.totalorder %s19720_s28, %s19720_s28 }
 0x1e5   : > { %p19723_p11 = pnand %p19721_p10, %p20053_p7  ;;  %p19730_p1 = por %p19729_p0, %p19728_p13 }
 0x1e7   : > { %p19724_p12 = pneg %p19723_p11 }
 0x1e9   : > { %p19731_p4 = pnand %p19730_p1, %p19724_p12 }
 0x1eb   : > { %19734 = shalt.err (!%p19731_p4)
}
 0x1ec   : > { %17368 = dma.hbm_to_vmem [thread:$0]  (!%p20041_p5), %s21937_s8, 32, %s1071_s22, [#allocation29]  }
 0x1ed   : > { %p21938_p6 = scmp.ne.s32.totalorder %s21925_s15, 0 }
 0x1ee   : > { %p21939_p8 = scmp.eq.s32.totalorder (!%p21938_p6), %s20026_s11, 0 }
 0x1ef   : > { %1106 = sbr.rel (%p21938_p6) target bundleno = 5876 (0x16f4), region = 140 }
 0x1f6   : > { %19740 = dma.done.wait (%p21939_p8), [#allocation3], 384   ;;  %p21940_p2 = pmov %p21939_p8 }
 0x1f8   : > { %19742 = vsyncadd (%p21940_p2), [#allocation3], 4294966912  ;;  %p21941_p7 = pmov %p21940_p2 }
 0x1f9   : > { %p21942_p3 = pmov %p21940_p2 }
 0x1fa   : > { %19744 = dma.done.wait (%p21941_p7), [#allocation5], 4640  }
 0x1fb   : > { %19746 = vsyncadd (%p21942_p3), [#allocation5], 4294962656  ;;  %p21943_p9 = pmov %p21940_p2 }
 0x1fc   : > { %p21944_p5 = pmov %p21940_p2 }
 0x1fd   : > { %19748 = dma.done.wait (%p21943_p9), [#allocation8], 224  }
 0x1fe   : > { %19750 = vsyncadd (%p21944_p5), [#allocation8], 4294967072  ;;  %p21945_p10 = pmov %p21940_p2 }
 0x1ff   : > { %p21946_p11 = pmov %p21940_p2 }
 0x200   : > { %19752 = dma.done.wait (%p21945_p10), [#allocation11], 12384  }
 0x201   : > { %19754 = vsyncadd (%p21946_p11), [#allocation11], 4294954912  ;;  %p21947_p12 = pmov %p21940_p2 }
 0x202   : > { %p21948_p13 = pmov %p21940_p2 }
 0x203   : > { %19756 = dma.done.wait (%p21947_p12), [#allocation14], 128  }
 0x204   : > { %19758 = vsyncadd (%p21948_p13), [#allocation14], 4294967168  ;;  %p21949_p0 = pmov %p21940_p2 }
 0x206   : > { %19760 = dma.done.wait (%p21949_p0), [#allocation17], 112   ;;  %p21950_p1 = pmov %p21949_p0 }
 0x207   : > { %p21951_p4 = pmov %p21949_p0 }
 0x208   : > { %19762 = vsyncadd (%p21950_p1), [#allocation17], 4294967184 }
 0x209   : > { %19764 = dma.done.wait (%p21951_p4), [#allocation20], 12384   ;;  %p21952_p6 = pmov %p21949_p0 }
 0x20a   : > { %p21953_p8 = pmov %p21949_p0 }
 0x20b   : > { %19766 = vsyncadd (%p21952_p6), [#allocation20], 4294954912 }
 0x20c   : > { %19768 = dma.done.wait (%p21953_p8), [#allocation23], 208   ;;  %p21954_p2 = pmov %p21949_p0 }
 0x20d   : > { %p21955_p7 = pmov %p21949_p0 }
 0x20e   : > { %19770 = vsyncadd (%p21954_p2), [#allocation23], 4294967088 }
 0x20f   : > { %19772 = dma.done.wait (%p21955_p7), [#allocation26], 24640   ;;  %p21956_p3 = pmov %p21949_p0 }
 0x210   : > { %p21957_p9 = pmov %p21949_p0 }
 0x211   : > { %19774 = vsyncadd (%p21956_p3), [#allocation26], 4294942656 }
 0x212   : > { %19776 = dma.done.wait (%p21957_p9), [#allocation29], 32   ;;  %p21958_p5 = pmov %p21949_p0 }
 0x213   : > { %s21959_s15 = sld [smem:[#allocation40_spill]]  ;;  %p1271_p10 = scmp.lt.s32.totalorder %s20026_s11, 1  ;;  %v19842_v0 = vmov 0.0   ;;  %vm19843_vm0 = vmmov 0   ;;  %v17478_v7 = vld [vmem:[#allocation4 + $0x64] ss:$8 sps:$4 sm:$0xff]  }
 0x214   : > { %19778 = vsyncadd (%p21958_p5), [#allocation29], 4294967264  ;;  %17140 = vmatprep.subr.bf16.mxu1 %v19842_v0  ;;  %17144 = vmatprep.mubr.msk.bf16.mxu1 %vm19843_vm0, %v19842_v0  ;;  %v17480_v8 = vld [vmem:[#allocation4 + $0x60] ss:$8 sps:$4 sm:$0xff]   ;;  %v17481_v10 = vld [vmem:[#allocation4 + $0x74] ss:$8 sps:$4 sm:$0xff]  }
 0x215   : > { %s21972_s11 = smov (!%p1271_p10, %s20026_s11), 1  ;;  %v17475_v9 = vld [vmem:[#allocation2] sm:$0xff]   ;;  %vm1308_vm1 = vcmask 261120   ;;  %1496 = vmatprep.subr.bf16.mxu0 %v17478_v7  ;;  %v17483_v11 = vld [vmem:[#allocation4 + $0x70] ss:$8 sps:$4 sm:$0xff]   ;;  %v19844_v23 = vmov 0  }
 0x216   : > { %s17040_s16 = sshll.u32 %s21972_s11, 5  ;;  %1497 = vmatpush1.bf16.msra.mxu0 %v17480_v8  ;;  %v17484_v12 = vld [vmem:[#allocation4 + $0x84] ss:$8 sps:$4 sm:$0xff]   ;;  %v17486_v13 = vld [vmem:[#allocation4 + $0x80] ss:$8 sps:$4 sm:$0xff]   ;;  %v17476_v14 = vld [vmem:[#allocation2 + $0x8] sm:$0xff]   ;;  %1528 = vmatprep.mubr.bf16.mxu0 %v19844_v23 }
 0x217   : > { %1498 = vmatprep.subr.bf16.mxu0 %v17481_v10  ;;  %v17477_v15 = vld [vmem:[#allocation2 + $0x10] sm:$0xff]   ;;  %v17490_v18 = vld [vmem:[#allocation4 + $0xa4] ss:$8 sps:$4 sm:$0xff]   ;;  %v17492_v19 = vld [vmem:[#allocation4 + $0xa0] ss:$8 sps:$4 sm:$0xff]   ;;  %vm1492_vm2 = vcmask 785408  }
 0x218   : > { %v17487_v16 = vld [vmem:[#allocation4 + $0x94] ss:$8 sps:$4 sm:$0xff]   ;;  %v17489_v17 = vld [vmem:[#allocation4 + $0x90] ss:$8 sps:$4 sm:$0xff]   ;;  %v17498_v22 = vld [vmem:[#allocation4 + $0x4] ss:$8 sps:$4 sm:$0xff]  }
 0x219   : > { %s1275_s1 = scalar_lea.vmem %s21959_s15, %s17040_s16  ;;  %v17493_v20 = vld [vmem:[#allocation4 + $0xb4] ss:$8 sps:$4 sm:$0xff]   ;;  %v17495_v21 = vld [vmem:[#allocation4 + $0xb0] ss:$8 sps:$4 sm:$0xff]   ;;  %v17496_v30 = vld [vmem:[#allocation4] ss:$8 sps:$4 sm:$0xff]  }
 0x21a   : > { %v1295_v1 = vld [vmem:[%s1275_s1] sm:$0xff]  ;;  %v1296_v2 = vld [vmem:[%s1275_s1 + $0x8] sm:$0xff]  ;;  %v1297_v3 = vld [vmem:[%s1275_s1 + $0x10] sm:$0xff]  ;;  %1499 = vmatpush1.bf16.msra.mxu0 %v17483_v11  ;;  %s21960_s2 = sld [smem:[#allocation43_spill]]  ;;  %vm1844_vm3 = vcmask 130048   ;;  %vm2713_vm4 = vcmask 1043456  }
 0x21b   : > { %v1299_v4 = vpack.c.bf16 %v1296_v2, %v1295_v1  ;;  %v1298_v5 = vld [vmem:[%s1275_s1 + $0x18] sm:$0xff]  ;;  %1500 = vmatprep.subr.bf16.mxu0 %v17484_v12  ;;  %v17501_v32 = vld [vmem:[#allocation4 + $0x14] ss:$8 sps:$4 sm:$0xff]   ;;  %v17499_v36 = vld [vmem:[#allocation4 + $0x10] ss:$8 sps:$4 sm:$0xff]   ;;  %vm2709_vm5 = vcmask 64512  }
 0x21c   : > { %v1300_v6 = vpack.c.bf16 %v1298_v5, %v1297_v3  ;;  %v17504_v37 = vld [vmem:[#allocation4 + $0x24] ss:$8 sps:$4 sm:$0xff]   ;;  %v17502_v38 = vld [vmem:[#allocation4 + $0x20] ss:$8 sps:$4 sm:$0xff]   ;;  %v17507_v40 = vld [vmem:[#allocation4 + $0x34] ss:$8 sps:$4 sm:$0xff]  }
 0x21d   : > { %17141 = vmatpush3.bf16.msra.mxu1 %v1299_v4  ;;  %v17505_v45 = vld [vmem:[#allocation4 + $0x30] ss:$8 sps:$4 sm:$0xff]   ;;  %v17510_v46 = vld [vmem:[#allocation4 + $0x44] ss:$8 sps:$4 sm:$0xff]   ;;  %v17508_v47 = vld [vmem:[#allocation4 + $0x40] ss:$8 sps:$4 sm:$0xff]  }
 0x21e   : > { %17142 = vmatprep.subr.bf16.mxu1 %v19842_v0  ;;  %1501 = vmatpush1.bf16.msra.mxu0 %v17486_v13  ;;  %v17513_v48 = vld [vmem:[#allocation4 + $0x54] ss:$8 sps:$4 sm:$0xff]   ;;  %v17511_v49 = vld [vmem:[#allocation4 + $0x50] ss:$8 sps:$4 sm:$0xff]   ;;  %v17516_v50 = vld [vmem:[#allocation4 + $0xc4] ss:$8 sps:$4 sm:$0xff]  }
 0x21f   : > { %1502 = vmatprep.subr.bf16.mxu0 %v17487_v16  ;;  %v17514_v51 = vld [vmem:[#allocation4 + $0xc0] ss:$8 sps:$4 sm:$0xff]   ;;  %v17519_v52 = vld [vmem:[#allocation4 + $0xd4] ss:$8 sps:$4 sm:$0xff]   ;;  %v17517_v53 = vld [vmem:[#allocation4 + $0xd0] ss:$8 sps:$4 sm:$0xff]  }
 0x220   : > { %v17522_v54 = vld [vmem:[#allocation4 + $0xe4] ss:$8 sps:$4 sm:$0xff]   ;;  %v17520_v55 = vld [vmem:[#allocation4 + $0xe0] ss:$8 sps:$4 sm:$0xff]   ;;  %v17525_v56 = vld [vmem:[#allocation4 + $0xf4] ss:$8 sps:$4 sm:$0xff]  }
 0x221   : > { %17143 = vmatpush3.bf16.msra.mxu1 %v1300_v6  ;;  %v17523_v57 = vld [vmem:[#allocation4 + $0xf0] ss:$8 sps:$4 sm:$0xff]   ;;  %v17528_v58 = vld [vmem:[#allocation4 + $0x104] ss:$8 sps:$4 sm:$0xff]   ;;  %v17526_v59 = vld [vmem:[#allocation4 + $0x100] ss:$8 sps:$4 sm:$0xff]  }
 0x222   : > { %17148 = vmatprep.subr.bf16.mxu1 %v19842_v0  ;;  %1503 = vmatpush1.bf16.msra.mxu0 %v17489_v17  ;;  %v17531_v60 = vld [vmem:[#allocation4 + $0x114] ss:$8 sps:$4 sm:$0xff]   ;;  %v17529_v61 = vld [vmem:[#allocation4 + $0x110] ss:$8 sps:$4 sm:$0xff]   ;;  %s21961_s13 = sld [smem:[#allocation46_spill]]  ;;  %vm3585_vm6 = vcmask 1041408  }
 0x223   : > { %1504 = vmatprep.subr.bf16.mxu0 %v17490_v18  ;;  %v17532_v62 = vld [vmem:[%s21960_s2 + $0x100] ss:$8 sps:$4 sm:$0xff]   ;;  %v17534_v63 = vld [vmem:[%s21960_s2 + $0x104] ss:$8 sps:$4 sm:$0xff]   ;;  %v17535_v1 = vld [vmem:[%s21960_s2 + $0x110] ss:$8 sps:$4 sm:$0xff]  }
 0x224   : > { %17145 = vmatmul.mubr.msk.bf16.vlgmr.msra.gmra.mrb[0].mxu1 %vm1308_vm1, %v17475_v9  ;;  %v17540_v2 = vld [vmem:[%s21960_s2 + $0x124] ss:$8 sps:$4 sm:$0xff]   ;;  %v17538_v3 = vld [vmem:[%s21960_s2 + $0x120] ss:$8 sps:$4 sm:$0xff]   ;;  %v17541_v5 = vld [vmem:[%s21960_s2 + $0x130] ss:$8 sps:$4 sm:$0xff]  }
 0x225   : > { %17149 = vmatpush3.bf16.msra.mxu1 %v1299_v4  ;;  %17152 = vmatprep.mubr.msk.bf16.mxu1 %vm19843_vm0, %v19842_v0  ;;  %v17544_v7 = vld [vmem:[%s21960_s2 + $0x140] ss:$8 sps:$4 sm:$0xff]   ;;  %v17549_v8 = vld [vmem:[%s21960_s2 + $0x154] ss:$8 sps:$4 sm:$0xff]   ;;  %v17547_v9 = vld [vmem:[%s21960_s2 + $0x150] ss:$8 sps:$4 sm:$0xff]  }
 0x226   : > { %17150 = vmatprep.subr.bf16.mxu1 %v19842_v0  ;;  %1505 = vmatpush1.bf16.msra.mxu0 %v17492_v19  ;;  %v17552_v10 = vld [vmem:[%s21960_s2 + $0x164] ss:$8 sps:$4 sm:$0xff]   ;;  %v17550_v11 = vld [vmem:[%s21960_s2 + $0x160] ss:$8 sps:$4 sm:$0xff]   ;;  %v17555_v12 = vld [vmem:[%s21960_s2 + $0x174] ss:$8 sps:$4 sm:$0xff]  }
 0x227   : > { %1506 = vmatprep.subr.bf16.mxu0 %v17493_v20  ;;  %v17553_v13 = vld [vmem:[%s21960_s2 + $0x170] ss:$8 sps:$4 sm:$0xff]   ;;  %v17561_v16 = vld [vmem:[%s21960_s2 + $0x194] ss:$8 sps:$4 sm:$0xff]   ;;  %v17564_v18 = vld [vmem:[%s21960_s2 + $0x1a4] ss:$8 sps:$4 sm:$0xff]  }
 0x228   : > { %v17559_v17 = vld [vmem:[%s21960_s2 + $0x190] ss:$8 sps:$4 sm:$0xff]   ;;  %v17562_v19 = vld [vmem:[%s21960_s2 + $0x1a0] ss:$8 sps:$4 sm:$0xff]   ;;  %v17567_v20 = vld [vmem:[%s21960_s2 + $0x1b4] ss:$8 sps:$4 sm:$0xff]  }
 0x229   : > { %17151 = vmatpush3.bf16.msra.mxu1 %v1300_v6  ;;  %vm3581_vm7 = vcmask 31744   ;;  %s21962_s10 = sld [smem:[#allocation47_spill]]  ;;  %s21963_s23 = sld [smem:[#allocation50_spill]]  ;;  %vm6397_vm8 = vcmask 257024   ;;  %vm7438_vm9 = vcmask 879616   ;;  %vm9500_vm10 = vcmask 719872  }
 0x22a   : > { %17156 = vmatprep.subr.bf16.mxu1 %v19842_v0  ;;  %1507 = vmatpush1.bf16.msra.mxu0 %v17495_v21  ;;  %v17565_v21 = vld [vmem:[%s21960_s2 + $0x1b0] ss:$8 sps:$4 sm:$0xff]   ;;  %s14900_s22 = sshll.u32 %s21972_s11, 2  ;;  %s21964_s3 = sld [smem:[#allocation49_spill]]  ;;  %vm14494_vm11 = vcmask 392192  }
 0x22b   : > { %1602 = vmatprep.subr.bf16.mxu0 %v17498_v22  ;;  %v17570_v22 = vld [vmem:[%s21960_s2 + $0x1c4] ss:$8 sps:$4 sm:$0xff]   ;;  %s1279_s4 = scalar_lea.vmem %s20003_s6, %s14900_s22  ;;  %s1283_s26 = scalar_lea.vmem %s20008_s5, %s14900_s22 }
 0x22c   : > { %17153 = vmatmul.mubr.msk.bf16.vlgmr.msra.gmra.mrb[4].mxu1 %vm1308_vm1, %v17476_v14  ;;  %v17558_v14 = vld [vmem:[%s21960_s2 + $0x184] ss:$8 sps:$4 sm:$0xff]   ;;  %s21965_s28 = sld [smem:[#allocation54_spill]]  ;;  %s21966_s15 = sld [smem:[#allocation57_spill]] }
 0x22d   : > { %17157 = vmatpush3.bf16.msra.mxu1 %v1299_v4  ;;  %17160 = vmatprep.mubr.msk.bf16.mxu1 %vm19843_vm0, %v19842_v0  ;;  %v17543_v4 = vld [vmem:[%s21960_s2 + $0x134] ss:$8 sps:$4 sm:$0xff]   ;;  %s21967_s16 = sld [smem:[#allocation56_spill]]  ;;  %s17041_s1 = sshll.u32 %s21972_s11, 4 }
 0x22e   : > { %17158 = vmatprep.subr.bf16.mxu1 %v19842_v0  ;;  %v17537_v0 = vld [vmem:[%s21960_s2 + $0x114] ss:$8 sps:$4 sm:$0xff]   ;;  %s1288_s22 = scalar_lea.vmem %s20013_s25, %s17041_s1  ;;  %s17042_s1 = sshll.u32 %s21972_s11, 6 }
 0x231   : > { %17159 = vmatpush3.bf16.msra.mxu1 %v1300_v6  ;;  %v17546_v6 = vld [vmem:[%s21960_s2 + $0x144] ss:$8 sps:$4 sm:$0xff]  }
 0x234   : > { %17161 = vmatmul.mubr.msk.bf16.vlgmr.msra.gmra.mrb[8].mxu1 %vm1308_vm1, %v17477_v15  ;;  %v17556_v15 = vld [vmem:[%s21960_s2 + $0x180] ss:$8 sps:$4 sm:$0xff]  }
 0x235   : > { %1880 = vmatprep.mubr.bf16.mxu1 %v19844_v23 }
 0x2f7   : > { %v1346_v24 = vpop.f32.mrb[0].mxu1 }
 0x2f8   : > { %v17146_v25 = vpop.f32.mrb[1].mxu1 }
 0x2f9   : > { %v1349_v26 = vpop.f32.mrb[2].mxu1  ;;  %v1823_v25 = vlaneseq }
 0x2fa   : > { %v1353_v27 = vpack.c.bf16 %v1349_v26, %v1346_v24  ;;  %v17147_v28 = vpop.f32.mrb[3].mxu1  ;;  %v17568_v24 = vld [vmem:[%s21960_s2 + $0x1c0] ss:$8 sps:$4 sm:$0xff]  }
 0x2fb   : > { %v20379_v26 = vshrl.u32 %v1823_v25, 7  ;;  %v1821_v28 = vld [vmem:[#allocation6] sm:$0x3]  ;;  %v17609_v25 = vld [vmem:[%s21960_s2 + $0x94] ss:$8 sps:$4 sm:$0xff]  }
 0x2ff   : > { %v1411_v29 = vpop.f32.mrb[4].mxu1 }
 0x300   : > { %v17154_v31 = vpop.f32.mrb[5].mxu1 }
 0x301   : > { %v1414_v33 = vpop.f32.mrb[6].mxu1 }
 0x302   : > { %v1418_v34 = vpack.c.bf16 %v1414_v33, %v1411_v29  ;;  %v17155_v35 = vpop.f32.mrb[7].mxu1  ;;  %v20385_v29 = vsub.s32 1, %v20379_v26 }
 0x304   : > { %14922 = vmatmul.mubr.msk.bf16.vlgmr.msra.gmra.mrb[0].mxu0 %vm1492_vm2, %v1418_v34  ;;  %v1830_v31 = vrot.slane %v1821_v28, %v20385_v29 }
 0x305   : > { %1603 = vmatpush1.bf16.msra.mxu0 %v17496_v30  ;;  %1634 = vmatprep.mubr.bf16.mxu0 %v19844_v23 }
 0x306   : > { %1604 = vmatprep.subr.bf16.mxu0 %v17501_v32 }
 0x307   : > { %v1690_v39 = vpop.f32.mrb[8].mxu1 }
 0x308   : > { %v17162_v41 = vpop.f32.mrb[9].mxu1 }
 0x309   : > { %1605 = vmatpush1.bf16.msra.mxu0 %v17499_v36  ;;  %v1693_v42 = vpop.f32.mrb[10].mxu1 }
 0x30a   : > { %1606 = vmatprep.subr.bf16.mxu0 %v17504_v37  ;;  %v1697_v43 = vpack.c.bf16 %v1693_v42, %v1690_v39  ;;  %v17163_v44 = vpop.f32.mrb[11].mxu1 }
 0x30d   : > { %1607 = vmatpush1.bf16.msra.mxu0 %v17502_v38 }
 0x30e   : > { %1608 = vmatprep.subr.bf16.mxu0 %v17507_v40 }
 0x311   : > { %1609 = vmatpush1.bf16.msra.mxu0 %v17505_v45 }
 0x312   : > { %1610 = vmatprep.subr.bf16.mxu0 %v17510_v46  ;;  %v1843_v46 = vld [vmem:[#allocation7] sm:$0xf] }
 0x315   : > { %1611 = vmatpush1.bf16.msra.mxu0 %v17508_v47  ;;  %v1924_v47 = vld [vmem:[#allocation7 + $0x4] sm:$0xf] }
 0x316   : > { %1612 = vmatprep.subr.bf16.mxu0 %v17513_v48  ;;  %v2407_v48 = vld [vmem:[#allocation7 + $0x8] sm:$0xf] }
 0x319   : > { %1613 = vmatpush1.bf16.msra.mxu0 %v17511_v49  ;;  %v17573_v49 = vld [vmem:[%s21960_s2 + $0x1d4] ss:$8 sps:$4 sm:$0xff]  }
 0x31a   : > { %1774 = vmatprep.subr.bf16.mxu0 %v17516_v50  ;;  %v17571_v50 = vld [vmem:[%s21960_s2 + $0x1d0] ss:$8 sps:$4 sm:$0xff]  }
 0x31c   : > { %14935 = vmatmul.mubr.msk.bf16.vlgmr.msra.gmra.mrb[0].mxu0 %vm1492_vm2, %v1353_v27  ;;  %v20382_v27 = vsub.s32 0, %v20379_v26 }
 0x31d   : > { %1775 = vmatpush1.bf16.msra.mxu0 %v17514_v51  ;;  %1806 = vmatprep.mubr.bf16.mxu0 %v19844_v23  ;;  %v17574_v51 = vld [vmem:[%s21960_s2 + $0x1e0] ss:$8 sps:$4 sm:$0xff]  }
 0x31e   : > { %1776 = vmatprep.subr.bf16.mxu0 %v17519_v52  ;;  %v1826_v30 = vrot.slane %v1821_v28, %v20382_v27  ;;  %v17576_v52 = vld [vmem:[%s21960_s2 + $0x1e4] ss:$8 sps:$4 sm:$0xff]   ;;  %v17607_v28 = vld [vmem:[%s21960_s2 + $0x90] ss:$8 sps:$4 sm:$0xff]  }
 0x321   : > { %1777 = vmatpush1.bf16.msra.mxu0 %v17517_v53  ;;  %v17579_v53 = vld [vmem:[%s21960_s2 + $0x1f4] ss:$8 sps:$4 sm:$0xff]  }
 0x322   : > { %1778 = vmatprep.subr.bf16.mxu0 %v17522_v54  ;;  %v17577_v54 = vld [vmem:[%s21960_s2 + $0x1f0] ss:$8 sps:$4 sm:$0xff]  }
 0x325   : > { %1779 = vmatpush1.bf16.msra.mxu0 %v17520_v55  ;;  %v17582_v55 = vld [vmem:[%s21960_s2 + $0x4] ss:$8 sps:$4 sm:$0xff]  }
 0x326   : > { %1780 = vmatprep.subr.bf16.mxu0 %v17525_v56 }
 0x329   : > { %1781 = vmatpush1.bf16.msra.mxu0 %v17523_v57 }
 0x32a   : > { %1782 = vmatprep.subr.bf16.mxu0 %v17528_v58 }
 0x32d   : > { %1783 = vmatpush1.bf16.msra.mxu0 %v17526_v59 }
 0x32e   : > { %1784 = vmatprep.subr.bf16.mxu0 %v17531_v60 }
 0x331   : > { %1785 = vmatpush1.bf16.msra.mxu0 %v17529_v61 }
 0x332   : > { %2164 = vmatprep.subr.bf16.mxu0 %v17534_v63 }
 0x334   : > { %14950 = vmatmul.mubr.msk.bf16.vlgmr.msra.gmra.mrb[0].mxu0 %vm1492_vm2, %v1697_v43 }
 0x335   : > { %2165 = vmatpush1.bf16.msra.mxu0 %v17532_v62 }
 0x336   : > { %2166 = vmatprep.subr.bf16.mxu0 %v17537_v0  ;;  %v17580_v0 = vld [vmem:[%s21960_s2] ss:$8 sps:$4 sm:$0xff]  }
 0x339   : > { %2167 = vmatpush1.bf16.msra.mxu0 %v17535_v1 }
 0x33a   : > { %2168 = vmatprep.subr.bf16.mxu0 %v17540_v2 }
 0x33d   : > { %2169 = vmatpush1.bf16.msra.mxu0 %v17538_v3  ;;  %v17585_v3 = vld [vmem:[%s21960_s2 + $0x14] ss:$8 sps:$4 sm:$0xff]  }
 0x33e   : > { %2170 = vmatprep.subr.bf16.mxu0 %v17543_v4 }
 0x341   : > { %2171 = vmatpush1.bf16.msra.mxu0 %v17541_v5  ;;  %v17583_v5 = vld [vmem:[%s21960_s2 + $0x10] ss:$8 sps:$4 sm:$0xff]  }
 0x342   : > { %2172 = vmatprep.subr.bf16.mxu0 %v17546_v6  ;;  %v17588_v6 = vld [vmem:[%s21960_s2 + $0x24] ss:$8 sps:$4 sm:$0xff]  }
 0x345   : > { %2173 = vmatpush1.bf16.msra.mxu0 %v17544_v7 }
 0x346   : > { %2174 = vmatprep.subr.bf16.mxu0 %v17549_v8 }
 0x349   : > { %2175 = vmatpush1.bf16.msra.mxu0 %v17547_v9  ;;  %v17586_v9 = vld [vmem:[%s21960_s2 + $0x20] ss:$8 sps:$4 sm:$0xff]  }
 0x34a   : > { %2176 = vmatprep.subr.bf16.mxu0 %v17552_v10 }
 0x34d   : > { %2177 = vmatpush1.bf16.msra.mxu0 %v17550_v11  ;;  %v17591_v11 = vld [vmem:[%s21960_s2 + $0x34] ss:$8 sps:$4 sm:$0xff]  }
 0x34e   : > { %2178 = vmatprep.subr.bf16.mxu0 %v17555_v12 }
 0x351   : > { %2179 = vmatpush1.bf16.msra.mxu0 %v17553_v13  ;;  %v17589_v13 = vld [vmem:[%s21960_s2 + $0x30] ss:$8 sps:$4 sm:$0xff]  }
 0x352   : > { %2180 = vmatprep.subr.bf16.mxu0 %v17558_v14  ;;  %v17594_v14 = vld [vmem:[%s21960_s2 + $0x44] ss:$8 sps:$4 sm:$0xff]  }
 0x355   : > { %2181 = vmatpush1.bf16.msra.mxu0 %v17556_v15  ;;  %v17592_v15 = vld [vmem:[%s21960_s2 + $0x40] ss:$8 sps:$4 sm:$0xff]  }
 0x356   : > { %2182 = vmatprep.subr.bf16.mxu0 %v17561_v16  ;;  %v17597_v16 = vld [vmem:[%s21960_s2 + $0x54] ss:$8 sps:$4 sm:$0xff]  }
 0x359   : > { %2183 = vmatpush1.bf16.msra.mxu0 %v17559_v17  ;;  %v17595_v17 = vld [vmem:[%s21960_s2 + $0x50] ss:$8 sps:$4 sm:$0xff]  }
 0x35a   : > { %2184 = vmatprep.subr.bf16.mxu0 %v17564_v18  ;;  %v17600_v18 = vld [vmem:[%s21960_s2 + $0x64] ss:$8 sps:$4 sm:$0xff]  }
 0x35d   : > { %2185 = vmatpush1.bf16.msra.mxu0 %v17562_v19  ;;  %v17598_v19 = vld [vmem:[%s21960_s2 + $0x60] ss:$8 sps:$4 sm:$0xff]  }
 0x35e   : > { %2186 = vmatprep.subr.bf16.mxu0 %v17567_v20  ;;  %v17603_v20 = vld [vmem:[%s21960_s2 + $0x74] ss:$8 sps:$4 sm:$0xff]  }
 0x361   : > { %2187 = vmatpush1.bf16.msra.mxu0 %v17565_v21  ;;  %v17601_v21 = vld [vmem:[%s21960_s2 + $0x70] ss:$8 sps:$4 sm:$0xff]  }
 0x362   : > { %2188 = vmatprep.subr.bf16.mxu0 %v17570_v22  ;;  %v17606_v22 = vld [vmem:[%s21960_s2 + $0x84] ss:$8 sps:$4 sm:$0xff]  }
 0x365   : > { %2189 = vmatpush1.bf16.msra.mxu0 %v17568_v24  ;;  %v17604_v24 = vld [vmem:[%s21960_s2 + $0x80] ss:$8 sps:$4 sm:$0xff]  }
 0x366   : > { %2190 = vmatprep.subr.bf16.mxu0 %v17573_v49  ;;  %v17631_v49 = vld [vmem:[%s21960_s2 + $0x210] ss:$8 sps:$4 sm:$0xff]  }
 0x369   : > { %2191 = vmatpush1.bf16.msra.mxu0 %v17571_v50  ;;  %v17636_v50 = vld [vmem:[%s21960_s2 + $0x224] ss:$8 sps:$4 sm:$0xff]  }
 0x36a   : > { %2192 = vmatprep.subr.bf16.mxu0 %v17576_v52  ;;  %v17639_v52 = vld [vmem:[%s21960_s2 + $0x234] ss:$8 sps:$4 sm:$0xff]  }
 0x36d   : > { %2193 = vmatpush1.bf16.msra.mxu0 %v17574_v51  ;;  %v17634_v51 = vld [vmem:[%s21960_s2 + $0x220] ss:$8 sps:$4 sm:$0xff]  }
 0x36e   : > { %2194 = vmatprep.subr.bf16.mxu0 %v17579_v53  ;;  %v17637_v53 = vld [vmem:[%s21960_s2 + $0x230] ss:$8 sps:$4 sm:$0xff]  }
 0x371   : > { %2195 = vmatpush1.bf16.msra.mxu0 %v17577_v54  ;;  %v17642_v54 = vld [vmem:[%s21960_s2 + $0x244] ss:$8 sps:$4 sm:$0xff]  }
 0x372   : > { %2365 = vmatprep.subr.bf16.mxu0 %v17582_v55  ;;  %v17640_v55 = vld [vmem:[%s21960_s2 + $0x240] ss:$8 sps:$4 sm:$0xff]  }
 0x407   : > { %v1808_v32 = vpop.f32.mrb[0].mxu0 }
 0x408   : > { %v1833_v33 = vadd.f32 %v1826_v30, %v1808_v32  ;;  %v1810_v34 = vpop.f32.mrb[1].mxu0  ;;  %v17615_v32 = vld [vmem:[%s21960_s2 + $0xb4] ss:$8 sps:$4 sm:$0xff]  }
 0x409   : > { %v1834_v35 = vadd.f32 %v1830_v31, %v1810_v34  ;;  %v1812_v36 = vpop.f32.mrb[2].mxu0  ;;  %v17618_v34 = vld [vmem:[%s21960_s2 + $0xc4] ss:$8 sps:$4 sm:$0xff]  }
 0x40a   : > { %v1835_v37 = vadd.f32 %v1826_v30, %v1812_v36  ;;  %v1814_v38 = vpop.f32.mrb[3].mxu0  ;;  %v1837_v40 = vmax.f32 %v1833_v33, 0.0  ;;  %v17612_v30 = vld [vmem:[%s21960_s2 + $0xa4] ss:$8 sps:$4 sm:$0xff]   ;;  %v17613_v33 = vld [vmem:[%s21960_s2 + $0xb0] ss:$8 sps:$4 sm:$0xff]  }
 0x40b   : > { %v1836_v39 = vadd.f32 %v1830_v31, %v1814_v38  ;;  %v1838_v42 = vmax.f32 %v1834_v35, 0.0  ;;  %v17610_v31 = vld [vmem:[%s21960_s2 + $0xa0] ss:$8 sps:$4 sm:$0xff]   ;;  %v17621_v36 = vld [vmem:[%s21960_s2 + $0xd4] ss:$8 sps:$4 sm:$0xff]  }
 0x40c   : > { %v1839_v41 = vmax.f32 %v1835_v37, 0.0  ;;  %v17616_v35 = vld [vmem:[%s21960_s2 + $0xc0] ss:$8 sps:$4 sm:$0xff]   ;;  %v17619_v37 = vld [vmem:[%s21960_s2 + $0xd0] ss:$8 sps:$4 sm:$0xff]  }
 0x40d   : > { %v1840_v43 = vmax.f32 %v1836_v39, 0.0  ;;  %v17624_v38 = vld [vmem:[%s21960_s2 + $0xe4] ss:$8 sps:$4 sm:$0xff]   ;;  %v17622_v39 = vld [vmem:[%s21960_s2 + $0xe0] ss:$8 sps:$4 sm:$0xff]  }
 0x40e   : > { %v20389_v44 = vpack.c.bf16 %v1839_v41, %v1837_v40  ;;  %v17627_v40 = vld [vmem:[%s21960_s2 + $0xf4] ss:$8 sps:$4 sm:$0xff]   ;;  %v17625_v41 = vld [vmem:[%s21960_s2 + $0xf0] ss:$8 sps:$4 sm:$0xff]  }
 0x40f   : > { %v20391_v45 = vpack.c.bf16 %v1840_v43, %v1838_v42  ;;  %v17630_v42 = vld [vmem:[%s21960_s2 + $0x204] ss:$8 sps:$4 sm:$0xff]   ;;  %v17628_v43 = vld [vmem:[%s21960_s2 + $0x200] ss:$8 sps:$4 sm:$0xff]  }
 0x411   : > { %1848 = vmatprep.subr.bf16.mxu1 %v20391_v45 }
 0x412   : > { %1849 = vmatpush1.bf16.msra.mxu1 %v20389_v44 }
 0x413   : > { %1928 = vmatprep.subr.bf16.mxu1 %v20391_v45 }
 0x415   : > { %14951 = vmatmul.mubr.msk.bf16.vlgmr.msra.gmra.mrb[12].mxu1 %vm1844_vm3, %v1843_v46 }
 0x416   : > { %1929 = vmatpush1.bf16.msra.mxu1 %v20389_v44  ;;  %1960 = vmatprep.mubr.bf16.mxu1 %v19844_v23 }
 0x417   : > { %2411 = vmatprep.subr.bf16.mxu1 %v20391_v45 }
 0x41d   : > { %14952 = vmatmul.mubr.msk.bf16.vlgmr.msra.gmra.mrb[16].mxu1 %vm1844_vm3, %v1924_v47 }
 0x41e   : > { %2412 = vmatpush1.bf16.msra.mxu1 %v20389_v44  ;;  %2443 = vmatprep.mubr.bf16.mxu1 %v19844_v23 }
 0x425   : > { %15049 = vmatmul.mubr.msk.bf16.vlgmr.msra.gmra.mrb[20].mxu1 %vm1844_vm3, %v2407_v48  ;;  %v17633_v48 = vld [vmem:[%s21960_s2 + $0x214] ss:$8 sps:$4 sm:$0xff]  }
 0x4e8   : > { %v20411_v56 = vpop.f32.mrb[12].mxu1 }
 0x4e9   : > { %v1884_v57 = vpop.f32.mrb[13].mxu1  ;;  %v1889_v47 = vpack.c.bf16 %v20411_v56, %v20411_v56  ;;  %v17645_v56 = vld [vmem:[%s21960_s2 + $0x254] ss:$8 sps:$4 sm:$0xff]  }
 0x4ea   : > { %v1886_v58 = vpop.f32.mrb[14].mxu1  ;;  %v1890_v4 = vpack.c.bf16 %v1884_v57, %v1884_v57  ;;  %v17643_v57 = vld [vmem:[%s21960_s2 + $0x250] ss:$8 sps:$4 sm:$0xff]  }
 0x4eb   : > { %v1887_v59 = vpop.f32.mrb[15].mxu1  ;;  %v17648_v58 = vld [vmem:[%s21960_s2 + $0x264] ss:$8 sps:$4 sm:$0xff]  }
 0x4ec   : > { %v17646_v59 = vld [vmem:[%s21960_s2 + $0x260] ss:$8 sps:$4 sm:$0xff]  }
 0x4f0   : > { %v1962_v60 = vpop.f32.mrb[16].mxu1 }
 0x4f1   : > { %v1964_v61 = vpop.f32.mrb[17].mxu1  ;;  %v1969_v1 = vpack.c.bf16 %v1962_v60, %v1962_v60  ;;  %v17651_v60 = vld [vmem:[%s21960_s2 + $0x274] ss:$8 sps:$4 sm:$0xff]  }
 0x4f2   : > { %v1970_v62 = vpack.c.bf16 %v1964_v61, %v1964_v61  ;;  %v1966_v63 = vpop.f32.mrb[18].mxu1  ;;  %v17649_v61 = vld [vmem:[%s21960_s2 + $0x270] ss:$8 sps:$4 sm:$0xff]  }
 0x4f3   : > { %v1967_v2 = vpop.f32.mrb[19].mxu1  ;;  %v17652_v63 = vld [vmem:[%s21960_s2 + $0x280] ss:$8 sps:$4 sm:$0xff]  }
 0x4f4   : > { %2196 = vmatprep.mubr.bf16.mxu0 %v1970_v62  ;;  %v17654_v62 = vld [vmem:[%s21960_s2 + $0x284] ss:$8 sps:$4 sm:$0xff]  }
 0x4f5   : > { %2197 = vmatmul.mubr.bf16.vlgmr.msra.gmra.mrb[4].mxu0 %v1969_v1  ;;  %v17655_v1 = vld [vmem:[%s21960_s2 + $0x290] ss:$8 sps:$4 sm:$0xff]   ;;  %v17660_v2 = vld [vmem:[%s21960_s2 + $0x2a4] ss:$8 sps:$4 sm:$0xff]  }
 0x4f6   : > { %2366 = vmatpush1.bf16.msra.mxu0 %v17580_v0  ;;  %2397 = vmatprep.mubr.bf16.mxu0 %v1890_v4  ;;  %v17657_v0 = vld [vmem:[%s21960_s2 + $0x294] ss:$8 sps:$4 sm:$0xff]  }
 0x4f7   : > { %2367 = vmatprep.subr.bf16.mxu0 %v17585_v3  ;;  %v17658_v3 = vld [vmem:[%s21960_s2 + $0x2a0] ss:$8 sps:$4 sm:$0xff]   ;;  %v17663_v4 = vld [vmem:[%s21960_s2 + $0x2b4] ss:$8 sps:$4 sm:$0xff]  }
 0x4f8   : > { %v20417_v7 = vpop.f32.mrb[20].mxu1 }
 0x4f9   : > { %v20419_v8 = vpop.f32.mrb[21].mxu1 }
 0x4fa   : > { %2368 = vmatpush1.bf16.msra.mxu0 %v17583_v5  ;;  %v2449_v10 = vpop.f32.mrb[22].mxu1  ;;  %v2453_v46 = vpack.c.bf16 %v20419_v8, %v20419_v8  ;;  %v17661_v5 = vld [vmem:[%s21960_s2 + $0x2b0] ss:$8 sps:$4 sm:$0xff]   ;;  %v17664_v8 = vld [vmem:[%s21960_s2 + $0x2c0] ss:$8 sps:$4 sm:$0xff]  }
 0x4fb   : > { %2369 = vmatprep.subr.bf16.mxu0 %v17588_v6  ;;  %v2450_v12 = vpop.f32.mrb[23].mxu1  ;;  %v17666_v6 = vld [vmem:[%s21960_s2 + $0x2c4] ss:$8 sps:$4 sm:$0xff]   ;;  %v17667_v10 = vld [vmem:[%s21960_s2 + $0x2d0] ss:$8 sps:$4 sm:$0xff]  }
 0x4fc   : > { %v17670_v12 = vld [vmem:[%s21960_s2 + $0x2e0] ss:$8 sps:$4 sm:$0xff]  }
 0x4fe   : > { %2370 = vmatpush1.bf16.msra.mxu0 %v17586_v9  ;;  %v17669_v9 = vld [vmem:[%s21960_s2 + $0x2d4] ss:$8 sps:$4 sm:$0xff]  }
 0x4ff   : > { %2371 = vmatprep.subr.bf16.mxu0 %v17591_v11  ;;  %v17672_v11 = vld [vmem:[%s21960_s2 + $0x2e4] ss:$8 sps:$4 sm:$0xff]  }
 0x502   : > { %2372 = vmatpush1.bf16.msra.mxu0 %v17589_v13  ;;  %v17675_v13 = vld [vmem:[%s21960_s2 + $0x2f4] ss:$8 sps:$4 sm:$0xff]  }
 0x503   : > { %2373 = vmatprep.subr.bf16.mxu0 %v17594_v14  ;;  %v17673_v14 = vld [vmem:[%s21960_s2 + $0x2f0] ss:$8 sps:$4 sm:$0xff]  }
 0x506   : > { %2374 = vmatpush1.bf16.msra.mxu0 %v17592_v15  ;;  %v2452_v15 = vpack.c.bf16 %v20417_v7, %v20417_v7  ;;  %v17732_v7 = vld [vmem:[#allocation12 + $0x24] ss:$8 sps:$4 sm:$0xff]  }
 0x507   : > { %2375 = vmatprep.subr.bf16.mxu0 %v17597_v16 }
 0x50a   : > { %2376 = vmatpush1.bf16.msra.mxu0 %v17595_v17 }
 0x50b   : > { %2377 = vmatprep.subr.bf16.mxu0 %v17600_v18 }
 0x50e   : > { %2378 = vmatpush1.bf16.msra.mxu0 %v17598_v19 }
 0x50f   : > { %2379 = vmatprep.subr.bf16.mxu0 %v17603_v20 }
 0x512   : > { %2380 = vmatpush1.bf16.msra.mxu0 %v17601_v21 }
 0x513   : > { %2381 = vmatprep.subr.bf16.mxu0 %v17606_v22 }
 0x516   : > { %2382 = vmatpush1.bf16.msra.mxu0 %v17604_v24 }
 0x517   : > { %2383 = vmatprep.subr.bf16.mxu0 %v17609_v25 }
 0x51a   : > { %2384 = vmatpush1.bf16.msra.mxu0 %v17607_v28 }
 0x51b   : > { %2385 = vmatprep.subr.bf16.mxu0 %v17612_v30  ;;  %v17724_v30 = vld [vmem:[#allocation12] ss:$8 sps:$4 sm:$0xff]  }
 0x51e   : > { %2386 = vmatpush1.bf16.msra.mxu0 %v17610_v31  ;;  %v17726_v31 = vld [vmem:[#allocation12 + $0x4] ss:$8 sps:$4 sm:$0xff]  }
 0x51f   : > { %2387 = vmatprep.subr.bf16.mxu0 %v17615_v32  ;;  %v17729_v32 = vld [vmem:[#allocation12 + $0x14] ss:$8 sps:$4 sm:$0xff]   ;;  %3237 = vmatprep.subr.bf16.mxu1 %v17726_v31  ;;  %v17691_v31 = vld [vmem:[#allocation12 + $0x150] ss:$8 sps:$4 sm:$0xff]  }
 0x520   : > { %3238 = vmatpush1.bf16.msra.mxu1 %v17724_v30  ;;  %v17693_v30 = vld [vmem:[#allocation12 + $0x154] ss:$8 sps:$4 sm:$0xff]  }
 0x521   : > { %3239 = vmatprep.subr.bf16.mxu1 %v17729_v32  ;;  %v17696_v32 = vld [vmem:[#allocation12 + $0x164] ss:$8 sps:$4 sm:$0xff]  }
 0x522   : > { %2388 = vmatpush1.bf16.msra.mxu0 %v17613_v33  ;;  %v17727_v33 = vld [vmem:[#allocation12 + $0x10] ss:$8 sps:$4 sm:$0xff]  }
 0x523   : > { %2389 = vmatprep.subr.bf16.mxu0 %v17618_v34  ;;  %v17730_v34 = vld [vmem:[#allocation12 + $0x20] ss:$8 sps:$4 sm:$0xff]  }
 0x524   : > { %3240 = vmatpush1.bf16.msra.mxu1 %v17727_v33  ;;  %v17694_v33 = vld [vmem:[#allocation12 + $0x160] ss:$8 sps:$4 sm:$0xff]  }
 0x525   : > { %3241 = vmatprep.subr.bf16.mxu1 %v17732_v7  ;;  %v17699_v7 = vld [vmem:[#allocation12 + $0x174] ss:$8 sps:$4 sm:$0xff]  }
 0x526   : > { %2390 = vmatpush1.bf16.msra.mxu0 %v17616_v35  ;;  %v17735_v35 = vld [vmem:[#allocation12 + $0x34] ss:$8 sps:$4 sm:$0xff]  }
 0x527   : > { %2391 = vmatprep.subr.bf16.mxu0 %v17621_v36  ;;  %v17733_v36 = vld [vmem:[#allocation12 + $0x30] ss:$8 sps:$4 sm:$0xff]  }
 0x528   : > { %3242 = vmatpush1.bf16.msra.mxu1 %v17730_v34  ;;  %v17697_v34 = vld [vmem:[#allocation12 + $0x170] ss:$8 sps:$4 sm:$0xff]  }
 0x529   : > { %3243 = vmatprep.subr.bf16.mxu1 %v17735_v35  ;;  %v17702_v35 = vld [vmem:[#allocation12 + $0x184] ss:$8 sps:$4 sm:$0xff]  }
 0x52a   : > { %2392 = vmatpush1.bf16.msra.mxu0 %v17619_v37  ;;  %v17738_v37 = vld [vmem:[#allocation12 + $0x44] ss:$8 sps:$4 sm:$0xff]  }
 0x52b   : > { %2393 = vmatprep.subr.bf16.mxu0 %v17624_v38  ;;  %v17736_v38 = vld [vmem:[#allocation12 + $0x40] ss:$8 sps:$4 sm:$0xff]  }
 0x52c   : > { %3244 = vmatpush1.bf16.msra.mxu1 %v17733_v36  ;;  %v17700_v36 = vld [vmem:[#allocation12 + $0x180] ss:$8 sps:$4 sm:$0xff]  }
 0x52d   : > { %3245 = vmatprep.subr.bf16.mxu1 %v17738_v37  ;;  %v17705_v37 = vld [vmem:[#allocation12 + $0x194] ss:$8 sps:$4 sm:$0xff]  }
 0x52e   : > { %2394 = vmatpush1.bf16.msra.mxu0 %v17622_v39  ;;  %v17741_v39 = vld [vmem:[#allocation12 + $0x54] ss:$8 sps:$4 sm:$0xff]  }
 0x52f   : > { %2395 = vmatprep.subr.bf16.mxu0 %v17627_v40  ;;  %v17739_v40 = vld [vmem:[#allocation12 + $0x50] ss:$8 sps:$4 sm:$0xff]  }
 0x530   : > { %3246 = vmatpush1.bf16.msra.mxu1 %v17736_v38  ;;  %v17703_v38 = vld [vmem:[#allocation12 + $0x190] ss:$8 sps:$4 sm:$0xff]  }
 0x531   : > { %3247 = vmatprep.subr.bf16.mxu1 %v17741_v39  ;;  %v17708_v39 = vld [vmem:[#allocation12 + $0x1a4] ss:$8 sps:$4 sm:$0xff]  }
 0x532   : > { %2396 = vmatpush1.bf16.msra.mxu0 %v17625_v41  ;;  %v17744_v41 = vld [vmem:[#allocation12 + $0x64] ss:$8 sps:$4 sm:$0xff]  }
 0x533   : > { %2647 = vmatprep.subr.bf16.mxu0 %v17630_v42  ;;  %v17742_v42 = vld [vmem:[#allocation12 + $0x60] ss:$8 sps:$4 sm:$0xff]  }
 0x534   : > { %3248 = vmatpush1.bf16.msra.mxu1 %v17739_v40  ;;  %v17706_v40 = vld [vmem:[#allocation12 + $0x1a0] ss:$8 sps:$4 sm:$0xff]  }
 0x535   : > { %2398 = vmatmul.mubr.bf16.vlgmr.msra.gmra.mrb[8].mxu0 %v1889_v47  ;;  %3249 = vmatprep.subr.bf16.mxu1 %v17744_v41  ;;  %v17750_v47 = vld [vmem:[#allocation12 + $0x84] ss:$8 sps:$4 sm:$0xff]   ;;  %v17711_v41 = vld [vmem:[#allocation12 + $0x1b4] ss:$8 sps:$4 sm:$0xff]  }
 0x536   : > { %2648 = vmatpush1.bf16.msra.mxu0 %v17628_v43  ;;  %2679 = vmatprep.mubr.bf16.mxu0 %v2453_v46  ;;  %v17747_v43 = vld [vmem:[#allocation12 + $0x74] ss:$8 sps:$4 sm:$0xff]   ;;  %v17745_v46 = vld [vmem:[#allocation12 + $0x70] ss:$8 sps:$4 sm:$0xff]  }
 0x537   : > { %2649 = vmatprep.subr.bf16.mxu0 %v17633_v48  ;;  %v17748_v48 = vld [vmem:[#allocation12 + $0x80] ss:$8 sps:$4 sm:$0xff]  }
 0x538   : > { %3250 = vmatpush1.bf16.msra.mxu1 %v17742_v42  ;;  %v17709_v42 = vld [vmem:[#allocation12 + $0x1b0] ss:$8 sps:$4 sm:$0xff]  }
 0x539   : > { %3251 = vmatprep.subr.bf16.mxu1 %v17747_v43  ;;  %v17714_v43 = vld [vmem:[#allocation12 + $0x1c4] ss:$8 sps:$4 sm:$0xff]  }
 0x53a   : > { %2650 = vmatpush1.bf16.msra.mxu0 %v17631_v49  ;;  %v17753_v49 = vld [vmem:[#allocation12 + $0x94] ss:$8 sps:$4 sm:$0xff]  }
 0x53b   : > { %2651 = vmatprep.subr.bf16.mxu0 %v17636_v50  ;;  %v17751_v50 = vld [vmem:[#allocation12 + $0x90] ss:$8 sps:$4 sm:$0xff]  }
 0x53c   : > { %3252 = vmatpush1.bf16.msra.mxu1 %v17745_v46  ;;  %v17712_v46 = vld [vmem:[#allocation12 + $0x1c0] ss:$8 sps:$4 sm:$0xff]  }
 0x53d   : > { %3253 = vmatprep.subr.bf16.mxu1 %v17750_v47  ;;  %v17717_v47 = vld [vmem:[#allocation12 + $0x1d4] ss:$8 sps:$4 sm:$0xff]  }
 0x53e   : > { %2652 = vmatpush1.bf16.msra.mxu0 %v17634_v51  ;;  %v17756_v51 = vld [vmem:[#allocation12 + $0xa4] ss:$8 sps:$4 sm:$0xff]  }
 0x53f   : > { %2653 = vmatprep.subr.bf16.mxu0 %v17639_v52  ;;  %v17754_v52 = vld [vmem:[#allocation12 + $0xa0] ss:$8 sps:$4 sm:$0xff]  }
 0x540   : > { %3254 = vmatpush1.bf16.msra.mxu1 %v17748_v48  ;;  %v17715_v48 = vld [vmem:[#allocation12 + $0x1d0] ss:$8 sps:$4 sm:$0xff]  }
 0x541   : > { %3255 = vmatprep.subr.bf16.mxu1 %v17753_v49  ;;  %v17720_v49 = vld [vmem:[#allocation12 + $0x1e4] ss:$8 sps:$4 sm:$0xff]  }
 0x542   : > { %2654 = vmatpush1.bf16.msra.mxu0 %v17637_v53  ;;  %v2690_v53 = vld [vmem:[#allocation9] sm:$0x3] }
 0x543   : > { %2655 = vmatprep.subr.bf16.mxu0 %v17642_v54  ;;  %v17759_v54 = vld [vmem:[#allocation12 + $0xb4] ss:$8 sps:$4 sm:$0xff]  }
 0x544   : > { %3256 = vmatpush1.bf16.msra.mxu1 %v17751_v50  ;;  %v17718_v50 = vld [vmem:[#allocation12 + $0x1e0] ss:$8 sps:$4 sm:$0xff]  }
 0x545   : > { %3257 = vmatprep.subr.bf16.mxu1 %v17756_v51  ;;  %v17723_v51 = vld [vmem:[#allocation12 + $0x1f4] ss:$8 sps:$4 sm:$0xff]  }
 0x546   : > { %2656 = vmatpush1.bf16.msra.mxu0 %v17640_v55  ;;  %v2695_v55 = vrot.slane %v2690_v53, %v20382_v27 }
 0x547   : > { %2657 = vmatprep.subr.bf16.mxu0 %v17645_v56  ;;  %v17757_v56 = vld [vmem:[#allocation12 + $0xb0] ss:$8 sps:$4 sm:$0xff]  }
 0x548   : > { %3258 = vmatpush1.bf16.msra.mxu1 %v17754_v52  ;;  %v17721_v52 = vld [vmem:[#allocation12 + $0x1f0] ss:$8 sps:$4 sm:$0xff]  }
 0x549   : > { %3259 = vmatprep.subr.bf16.mxu1 %v17759_v54  ;;  %v17769_v54 = vld [vmem:[#allocation12 + $0xf0] ss:$8 sps:$4 sm:$0xff]  }
 0x54a   : > { %2658 = vmatpush1.bf16.msra.mxu0 %v17643_v57 }
 0x54b   : > { %2659 = vmatprep.subr.bf16.mxu0 %v17648_v58  ;;  %v2699_v58 = vrot.slane %v2690_v53, %v20385_v29  ;;  %v17771_v53 = vld [vmem:[#allocation12 + $0xf4] ss:$8 sps:$4 sm:$0xff]  }
 0x54c   : > { %3260 = vmatpush1.bf16.msra.mxu1 %v17757_v56 }
 0x54e   : > { %2660 = vmatpush1.bf16.msra.mxu0 %v17646_v59  ;;  %v17762_v59 = vld [vmem:[#allocation12 + $0xc4] ss:$8 sps:$4 sm:$0xff]  }
 0x54f   : > { %2661 = vmatprep.subr.bf16.mxu0 %v17651_v60  ;;  %3261 = vmatprep.subr.bf16.mxu1 %v17762_v59 }
 0x552   : > { %2662 = vmatpush1.bf16.msra.mxu0 %v17649_v61 }
 0x553   : > { %2663 = vmatprep.subr.bf16.mxu0 %v17654_v62 }
 0x556   : > { %2664 = vmatpush1.bf16.msra.mxu0 %v17652_v63 }
 0x557   : > { %2665 = vmatprep.subr.bf16.mxu0 %v17657_v0 }
 0x55a   : > { %2666 = vmatpush1.bf16.msra.mxu0 %v17655_v1 }
 0x55b   : > { %2667 = vmatprep.subr.bf16.mxu0 %v17660_v2  ;;  %v17760_v2 = vld [vmem:[#allocation12 + $0xc0] ss:$8 sps:$4 sm:$0xff]  }
 0x55c   : > { %3262 = vmatpush1.bf16.msra.mxu1 %v17760_v2 }
 0x55e   : > { %2668 = vmatpush1.bf16.msra.mxu0 %v17658_v3 }
 0x55f   : > { %2669 = vmatprep.subr.bf16.mxu0 %v17663_v4  ;;  %v17765_v4 = vld [vmem:[#allocation12 + $0xd4] ss:$8 sps:$4 sm:$0xff]  }
 0x560   : > { %3263 = vmatprep.subr.bf16.mxu1 %v17765_v4  ;;  %v3279_v4 = vld [vmem:[#allocation10 + $0x4] sm:$0x3] }
 0x562   : > { %2670 = vmatpush1.bf16.msra.mxu0 %v17661_v5 }
 0x563   : > { %2671 = vmatprep.subr.bf16.mxu0 %v17666_v6 }
 0x566   : > { %2672 = vmatpush1.bf16.msra.mxu0 %v17664_v8 }
 0x567   : > { %2673 = vmatprep.subr.bf16.mxu0 %v17669_v9  ;;  %v17763_v9 = vld [vmem:[#allocation12 + $0xd0] ss:$8 sps:$4 sm:$0xff]  }
 0x568   : > { %3264 = vmatpush1.bf16.msra.mxu1 %v17763_v9  ;;  %v17780_v9 = vld [vmem:[#allocation12 + $0x224] ss:$8 sps:$4 sm:$0xff]  }
 0x56a   : > { %2674 = vmatpush1.bf16.msra.mxu0 %v17667_v10 }
 0x56b   : > { %2675 = vmatprep.subr.bf16.mxu0 %v17672_v11  ;;  %v17768_v11 = vld [vmem:[#allocation12 + $0xe4] ss:$8 sps:$4 sm:$0xff]  }
 0x56c   : > { %3265 = vmatprep.subr.bf16.mxu1 %v17768_v11  ;;  %v17778_v11 = vld [vmem:[#allocation12 + $0x220] ss:$8 sps:$4 sm:$0xff]  }
 0x56e   : > { %2676 = vmatpush1.bf16.msra.mxu0 %v17670_v12 }
 0x56f   : > { %2677 = vmatprep.subr.bf16.mxu0 %v17675_v13  ;;  %v2708_v13 = vld [vmem:[#allocation10] sm:$0x3] }
 0x572   : > { %2678 = vmatpush1.bf16.msra.mxu0 %v17673_v14  ;;  %v17678_v14 = vld [vmem:[#allocation12 + $0x104] ss:$8 sps:$4 sm:$0xff]  }
 0x575   : > { %2680 = vmatmul.mubr.bf16.vlgmr.msra.gmra.mrb[12].mxu0 %v2452_v15  ;;  %v17766_v15 = vld [vmem:[#allocation12 + $0xe0] ss:$8 sps:$4 sm:$0xff]  }
 0x576   : > { %2752 = vmatprep.mubr.bf16.mxu0 %v19844_v23  ;;  %3266 = vmatpush1.bf16.msra.mxu1 %v17766_v15  ;;  %v17786_v15 = vld [vmem:[#allocation12 + $0x244] ss:$8 sps:$4 sm:$0xff]  }
 0x577   : > { %3267 = vmatprep.subr.bf16.mxu1 %v17771_v53 }
 0x57a   : > { %3268 = vmatpush1.bf16.msra.mxu1 %v17769_v54 }
 0x5c8   : > { %v2198_v16 = vpop.f32.mrb[4].mxu0 }
 0x5c9   : > { %v2200_v17 = vpop.f32.mrb[5].mxu0 }
 0x5ca   : > { %v2202_v18 = vpop.f32.mrb[6].mxu0 }
 0x5cb   : > { %v2203_v19 = vpop.f32.mrb[7].mxu0  ;;  %v17681_v18 = vld [vmem:[#allocation12 + $0x114] ss:$8 sps:$4 sm:$0xff]  }
 0x5cc   : > { %v17679_v19 = vld [vmem:[#allocation12 + $0x110] ss:$8 sps:$4 sm:$0xff]  }
 0x608   : > { %v2399_v20 = vpop.f32.mrb[8].mxu0 }
 0x609   : > { %v2400_v21 = vadd.f32 %v2399_v20, %v2198_v16  ;;  %v2401_v22 = vpop.f32.mrb[9].mxu0  ;;  %v17676_v16 = vld [vmem:[#allocation12 + $0x100] ss:$8 sps:$4 sm:$0xff]   ;;  %v17684_v20 = vld [vmem:[#allocation12 + $0x124] ss:$8 sps:$4 sm:$0xff]  }
 0x60a   : > { %v2402_v24 = vadd.f32 %v2401_v22, %v2200_v17  ;;  %v2403_v25 = vpop.f32.mrb[10].mxu0  ;;  %v2796_v17 = vld [vmem:[#allocation10 + $0x2] sm:$0x3] }
 0x60b   : > { %v2404_v28 = vpop.f32.mrb[11].mxu0  ;;  %v17687_v22 = vld [vmem:[#allocation12 + $0x134] ss:$8 sps:$4 sm:$0xff]   ;;  %v17690_v25 = vld [vmem:[#allocation12 + $0x144] ss:$8 sps:$4 sm:$0xff]  }
 0x60c   : > { %v17688_v28 = vld [vmem:[#allocation12 + $0x140] ss:$8 sps:$4 sm:$0xff]  }
 0x648   : > { %v2681_v57 = vpop.f32.mrb[12].mxu0 }
 0x649   : > { %v2688_v60 = vadd.f32 %v2681_v57, %v2400_v21  ;;  %v2683_v61 = vpop.f32.mrb[13].mxu0  ;;  %v17682_v21 = vld [vmem:[#allocation12 + $0x120] ss:$8 sps:$4 sm:$0xff]  }
 0x64a   : > { %v2689_v62 = vadd.f32 %v2683_v61, %v2402_v24  ;;  %v2685_v63 = vpop.f32.mrb[14].mxu0  ;;  %v17685_v24 = vld [vmem:[#allocation12 + $0x130] ss:$8 sps:$4 sm:$0xff]  }
 0x64b   : > { %v2702_v0 = vadd.f32 %v2695_v55, %v2688_v60  ;;  %v2686_v1 = vpop.f32.mrb[15].mxu0 }
 0x64c   : > { %v2703_v3 = vadd.f32 %v2699_v58, %v2689_v62 }
 0x64d   : > { %v2704_v5 = vmax.f32 %v2702_v0, 0.0 }
 0x64e   : > { %v2705_v6 = vmax.f32 %v2703_v3, 0.0  ;;  %v17774_v3 = vld [vmem:[#allocation12 + $0x204] ss:$8 sps:$4 sm:$0xff]  }
 0x64f   : > { %v2706_v8 = vpack.c.bf16 %v2704_v5, %v2704_v5  ;;  %v17772_v5 = vld [vmem:[#allocation12 + $0x200] ss:$8 sps:$4 sm:$0xff]  }
 0x650   : > { %v20489_v10 = vpack.c.bf16 %v2705_v6, %v2705_v6  ;;  %v17777_v6 = vld [vmem:[#allocation12 + $0x214] ss:$8 sps:$4 sm:$0xff]  }
 0x651   : > { %v20492_v12 = vsel %vm2713_vm4, %v2706_v8, 0  ;;  %v17775_v8 = vld [vmem:[#allocation12 + $0x210] ss:$8 sps:$4 sm:$0xff]  }
 0x652   : > { %15114 = vmatprep.subr.msk.bf16.mxu0 %vm2713_vm4, %v20489_v10 }
 0x653   : > { %2721 = vmatpush1.bf16.msra.mxu0 %v20492_v12 }
 0x654   : > { %15116 = vmatprep.subr.msk.bf16.mxu0 %vm2713_vm4, %v20489_v10 }
 0x656   : > { %15115 = vmatmul.mubr.msk.bf16.vlgmr.msra.gmra.mrb[16].mxu0 %vm2709_vm5, %v2708_v13  ;;  %v17783_v13 = vld [vmem:[#allocation12 + $0x234] ss:$8 sps:$4 sm:$0xff]  }
 0x657   : > { %2801 = vmatpush1.bf16.msra.mxu0 %v20492_v12  ;;  %2832 = vmatprep.mubr.bf16.mxu0 %v19844_v23 }
 0x658   : > { %3036 = vmatprep.subr.bf16.mxu0 %v17678_v14  ;;  %v17781_v14 = vld [vmem:[#allocation12 + $0x230] ss:$8 sps:$4 sm:$0xff]  }
 0x65e   : > { %15117 = vmatmul.mubr.msk.bf16.vlgmr.msra.gmra.mrb[20].mxu0 %vm2709_vm5, %v2796_v17  ;;  %v17789_v17 = vld [vmem:[#allocation12 + $0x254] ss:$8 sps:$4 sm:$0xff]  }
 0x65f   : > { %3037 = vmatpush1.bf16.msra.mxu0 %v17676_v16  ;;  %v17784_v16 = vld [vmem:[#allocation12 + $0x240] ss:$8 sps:$4 sm:$0xff]  }
 0x660   : > { %3038 = vmatprep.subr.bf16.mxu0 %v17681_v18  ;;  %v17787_v18 = vld [vmem:[#allocation12 + $0x250] ss:$8 sps:$4 sm:$0xff]  }
 0x663   : > { %3039 = vmatpush1.bf16.msra.mxu0 %v17679_v19  ;;  %v17792_v19 = vld [vmem:[#allocation12 + $0x264] ss:$8 sps:$4 sm:$0xff]  }
 0x664   : > { %3040 = vmatprep.subr.bf16.mxu0 %v17684_v20  ;;  %v17790_v20 = vld [vmem:[#allocation12 + $0x260] ss:$8 sps:$4 sm:$0xff]  }
 0x667   : > { %3041 = vmatpush1.bf16.msra.mxu0 %v17682_v21  ;;  %v17795_v21 = vld [vmem:[#allocation12 + $0x274] ss:$8 sps:$4 sm:$0xff]  }
 0x668   : > { %3042 = vmatprep.subr.bf16.mxu0 %v17687_v22  ;;  %v17793_v22 = vld [vmem:[#allocation12 + $0x270] ss:$8 sps:$4 sm:$0xff]  }
 0x66b   : > { %3043 = vmatpush1.bf16.msra.mxu0 %v17685_v24  ;;  %v17798_v24 = vld [vmem:[#allocation12 + $0x284] ss:$8 sps:$4 sm:$0xff]  }
 0x66c   : > { %3044 = vmatprep.subr.bf16.mxu0 %v17690_v25  ;;  %v17796_v25 = vld [vmem:[#allocation12 + $0x280] ss:$8 sps:$4 sm:$0xff]  }
 0x66f   : > { %3045 = vmatpush1.bf16.msra.mxu0 %v17688_v28  ;;  %v17801_v28 = vld [vmem:[#allocation12 + $0x294] ss:$8 sps:$4 sm:$0xff]  }
 0x670   : > { %3046 = vmatprep.subr.bf16.mxu0 %v17693_v30  ;;  %v17799_v30 = vld [vmem:[#allocation12 + $0x290] ss:$8 sps:$4 sm:$0xff]  }
 0x673   : > { %3047 = vmatpush1.bf16.msra.mxu0 %v17691_v31  ;;  %v17804_v31 = vld [vmem:[#allocation12 + $0x2a4] ss:$8 sps:$4 sm:$0xff]  }
 0x674   : > { %3048 = vmatprep.subr.bf16.mxu0 %v17696_v32  ;;  %v17802_v32 = vld [vmem:[#allocation12 + $0x2a0] ss:$8 sps:$4 sm:$0xff]  }
 0x677   : > { %3049 = vmatpush1.bf16.msra.mxu0 %v17694_v33  ;;  %v17807_v33 = vld [vmem:[#allocation12 + $0x2b4] ss:$8 sps:$4 sm:$0xff]  }
 0x678   : > { %3050 = vmatprep.subr.bf16.mxu0 %v17699_v7  ;;  %v17805_v7 = vld [vmem:[#allocation12 + $0x2b0] ss:$8 sps:$4 sm:$0xff]  }
 0x67b   : > { %3051 = vmatpush1.bf16.msra.mxu0 %v17697_v34  ;;  %v17808_v34 = vld [vmem:[#allocation12 + $0x2c0] ss:$8 sps:$4 sm:$0xff]  }
 0x67c   : > { %3052 = vmatprep.subr.bf16.mxu0 %v17702_v35  ;;  %v17810_v35 = vld [vmem:[#allocation12 + $0x2c4] ss:$8 sps:$4 sm:$0xff]  }
 0x67f   : > { %3053 = vmatpush1.bf16.msra.mxu0 %v17700_v36  ;;  %v17813_v36 = vld [vmem:[#allocation12 + $0x2d4] ss:$8 sps:$4 sm:$0xff]  }
 0x680   : > { %3054 = vmatprep.subr.bf16.mxu0 %v17705_v37  ;;  %v17811_v37 = vld [vmem:[#allocation12 + $0x2d0] ss:$8 sps:$4 sm:$0xff]  }
 0x683   : > { %3055 = vmatpush1.bf16.msra.mxu0 %v17703_v38  ;;  %v17814_v38 = vld [vmem:[#allocation12 + $0x2e0] ss:$8 sps:$4 sm:$0xff]  }
 0x684   : > { %3056 = vmatprep.subr.bf16.mxu0 %v17708_v39  ;;  %v17816_v39 = vld [vmem:[#allocation12 + $0x2e4] ss:$8 sps:$4 sm:$0xff]  }
 0x687   : > { %3057 = vmatpush1.bf16.msra.mxu0 %v17706_v40  ;;  %v17819_v40 = vld [vmem:[#allocation12 + $0x2f4] ss:$8 sps:$4 sm:$0xff]  }
 0x688   : > { %3058 = vmatprep.subr.bf16.mxu0 %v17711_v41  ;;  %v17817_v41 = vld [vmem:[#allocation12 + $0x2f0] ss:$8 sps:$4 sm:$0xff]  }
 0x68b   : > { %3059 = vmatpush1.bf16.msra.mxu0 %v17709_v42 }
 0x68c   : > { %3060 = vmatprep.subr.bf16.mxu0 %v17714_v43 }
 0x68f   : > { %3061 = vmatpush1.bf16.msra.mxu0 %v17712_v46 }
 0x690   : > { %3062 = vmatprep.subr.bf16.mxu0 %v17717_v47 }
 0x693   : > { %3063 = vmatpush1.bf16.msra.mxu0 %v17715_v48 }
 0x694   : > { %3064 = vmatprep.subr.bf16.mxu0 %v17720_v49 }
 0x697   : > { %3065 = vmatpush1.bf16.msra.mxu0 %v17718_v50 }
 0x698   : > { %3066 = vmatprep.subr.bf16.mxu0 %v17723_v51 }
 0x69b   : > { %3067 = vmatpush1.bf16.msra.mxu0 %v17721_v52 }
 0x69c   : > { %15182 = vmatprep.subr.msk.bf16.mxu0 %vm2713_vm4, %v20489_v10 }
 0x729   : > { %v2754_v55 = vpop.f32.mrb[16].mxu0 }
 0x72a   : > { %v2756_v56 = vpop.f32.mrb[17].mxu0  ;;  %v2761_v59 = vpack.c.bf16 %v2754_v55, %v2754_v55 }
 0x72b   : > { %v2762_v57 = vpack.c.bf16 %v2756_v56, %v2756_v56  ;;  %v2758_v58 = vpop.f32.mrb[18].mxu0 }
 0x72c   : > { %v2759_v60 = vpop.f32.mrb[19].mxu0 }
 0x72d   : > { %3269 = vmatprep.mubr.bf16.mxu1 %v2762_v57  ;;  %v17823_v60 = vld [vmem:[%s21961_s13 + $0x308] ss:$24 sps:$4 sm:$0xff]  }
 0x72e   : > { %3270 = vmatmul.mubr.bf16.vlgmr.msra.gmra.mrb[24].mxu1 %v2761_v59 }
 0x72f   : > { %3624 = vmatprep.mubr.bf16.mxu1 %v19844_v23 }
 0x731   : > { %v2834_v61 = vpop.f32.mrb[20].mxu0 }
 0x732   : > { %v2836_v62 = vpop.f32.mrb[21].mxu0  ;;  %v2841_v1 = vpack.c.bf16 %v2834_v61, %v2834_v61  ;;  %v17825_v61 = vld [vmem:[%s21961_s13 + $0x30c] ss:$24 sps:$4 sm:$0xff]  }
 0x733   : > { %v2842_v63 = vpack.c.bf16 %v2836_v62, %v2836_v62  ;;  %v2838_v0 = vpop.f32.mrb[22].mxu0  ;;  %v17831_v62 = vld [vmem:[%s21961_s13 + $0x33c] ss:$24 sps:$4 sm:$0xff]  }
 0x734   : > { %v2839_v2 = vpop.f32.mrb[23].mxu0  ;;  %v17837_v0 = vld [vmem:[%s21961_s13 + $0x36c] ss:$24 sps:$4 sm:$0xff]  }
 0x735   : > { %3068 = vmatprep.mubr.bf16.mxu0 %v2842_v63  ;;  %v17829_v63 = vld [vmem:[%s21961_s13 + $0x338] ss:$24 sps:$4 sm:$0xff]   ;;  %v17843_v2 = vld [vmem:[%s21961_s13 + $0x39c] ss:$24 sps:$4 sm:$0xff]  }
 0x736   : > { %3069 = vmatmul.mubr.bf16.vlgmr.msra.gmra.mrb[24].mxu0 %v2841_v1  ;;  %v17835_v1 = vld [vmem:[%s21961_s13 + $0x368] ss:$24 sps:$4 sm:$0xff]  }
 0x737   : > { %3284 = vmatpush1.bf16.msra.mxu0 %v20492_v12  ;;  %3315 = vmatprep.mubr.bf16.mxu0 %v19844_v23 }
 0x738   : > { %3519 = vmatprep.subr.bf16.mxu0 %v17774_v3  ;;  %v17841_v3 = vld [vmem:[%s21961_s13 + $0x398] ss:$24 sps:$4 sm:$0xff]  }
 0x73e   : > { %15183 = vmatmul.mubr.msk.bf16.vlgmr.msra.gmra.mrb[28].mxu0 %vm2709_vm5, %v3279_v4  ;;  %v17849_v4 = vld [vmem:[%s21961_s13 + $0x3cc] ss:$24 sps:$4 sm:$0xff]  }
 0x73f   : > { %3520 = vmatpush1.bf16.msra.mxu0 %v17772_v5  ;;  %v17847_v5 = vld [vmem:[%s21961_s13 + $0x3c8] ss:$24 sps:$4 sm:$0xff]  }
 0x740   : > { %3521 = vmatprep.subr.bf16.mxu0 %v17777_v6  ;;  %v17855_v6 = vld [vmem:[%s21961_s13 + $0x3fc] ss:$24 sps:$4 sm:$0xff]  }
 0x743   : > { %3522 = vmatpush1.bf16.msra.mxu0 %v17775_v8  ;;  %v17853_v8 = vld [vmem:[%s21961_s13 + $0x3f8] ss:$24 sps:$4 sm:$0xff]  }
 0x744   : > { %3523 = vmatprep.subr.bf16.mxu0 %v17780_v9  ;;  %v17861_v9 = vld [vmem:[%s21961_s13 + $0x42c] ss:$24 sps:$4 sm:$0xff]  }
 0x747   : > { %3524 = vmatpush1.bf16.msra.mxu0 %v17778_v11  ;;  %v17859_v11 = vld [vmem:[%s21961_s13 + $0x428] ss:$24 sps:$4 sm:$0xff]  }
 0x748   : > { %3525 = vmatprep.subr.bf16.mxu0 %v17783_v13  ;;  %v17867_v13 = vld [vmem:[%s21961_s13 + $0x45c] ss:$24 sps:$4 sm:$0xff]  }
 0x74b   : > { %3526 = vmatpush1.bf16.msra.mxu0 %v17781_v14  ;;  %v17865_v14 = vld [vmem:[%s21961_s13 + $0x458] ss:$24 sps:$4 sm:$0xff]  }
 0x74c   : > { %3527 = vmatprep.subr.bf16.mxu0 %v17786_v15  ;;  %v17873_v15 = vld [vmem:[%s21961_s13 + $0x48c] ss:$24 sps:$4 sm:$0xff]  }
 0x74f   : > { %3528 = vmatpush1.bf16.msra.mxu0 %v17784_v16  ;;  %v17871_v16 = vld [vmem:[%s21961_s13 + $0x488] ss:$24 sps:$4 sm:$0xff]  }
 0x750   : > { %3529 = vmatprep.subr.bf16.mxu0 %v17789_v17  ;;  %v17879_v17 = vld [vmem:[%s21961_s13 + $0x4bc] ss:$24 sps:$4 sm:$0xff]  }
 0x753   : > { %3530 = vmatpush1.bf16.msra.mxu0 %v17787_v18  ;;  %v17877_v18 = vld [vmem:[%s21961_s13 + $0x4b8] ss:$24 sps:$4 sm:$0xff]  }
 0x754   : > { %3531 = vmatprep.subr.bf16.mxu0 %v17792_v19  ;;  %v17885_v19 = vld [vmem:[%s21961_s13 + $0x4ec] ss:$24 sps:$4 sm:$0xff]  }
 0x757   : > { %3532 = vmatpush1.bf16.msra.mxu0 %v17790_v20  ;;  %v17883_v20 = vld [vmem:[%s21961_s13 + $0x4e8] ss:$24 sps:$4 sm:$0xff]  }
 0x758   : > { %3533 = vmatprep.subr.bf16.mxu0 %v17795_v21  ;;  %v17891_v21 = vld [vmem:[%s21961_s13 + $0x51c] ss:$24 sps:$4 sm:$0xff]  }
 0x75b   : > { %3534 = vmatpush1.bf16.msra.mxu0 %v17793_v22  ;;  %v17889_v22 = vld [vmem:[%s21961_s13 + $0x518] ss:$24 sps:$4 sm:$0xff]  }
 0x75c   : > { %3535 = vmatprep.subr.bf16.mxu0 %v17798_v24  ;;  %v17897_v24 = vld [vmem:[%s21961_s13 + $0x54c] ss:$24 sps:$4 sm:$0xff]  }
 0x75f   : > { %3536 = vmatpush1.bf16.msra.mxu0 %v17796_v25  ;;  %v17895_v25 = vld [vmem:[%s21961_s13 + $0x548] ss:$24 sps:$4 sm:$0xff]  }
 0x760   : > { %3537 = vmatprep.subr.bf16.mxu0 %v17801_v28  ;;  %v17903_v28 = vld [vmem:[%s21961_s13 + $0x57c] ss:$24 sps:$4 sm:$0xff]  }
 0x763   : > { %3538 = vmatpush1.bf16.msra.mxu0 %v17799_v30  ;;  %v17901_v30 = vld [vmem:[%s21961_s13 + $0x578] ss:$24 sps:$4 sm:$0xff]  }
 0x764   : > { %3539 = vmatprep.subr.bf16.mxu0 %v17804_v31  ;;  %v3562_v31 = vld [vmem:[#allocation13] sm:$0x3] }
 0x767   : > { %3540 = vmatpush1.bf16.msra.mxu0 %v17802_v32  ;;  %v3567_v32 = vrot.slane %v3562_v31, %v20382_v27 }
 0x768   : > { %3541 = vmatprep.subr.bf16.mxu0 %v17807_v33 }
 0x76b   : > { %3542 = vmatpush1.bf16.msra.mxu0 %v17805_v7  ;;  %v3571_v7 = vrot.slane %v3562_v31, %v20385_v29 }
 0x76c   : > { %3543 = vmatprep.subr.bf16.mxu0 %v17810_v35 }
 0x76f   : > { %3544 = vmatpush1.bf16.msra.mxu0 %v17808_v34 }
 0x770   : > { %3545 = vmatprep.subr.bf16.mxu0 %v17813_v36 }
 0x773   : > { %3546 = vmatpush1.bf16.msra.mxu0 %v17811_v37 }
 0x774   : > { %3547 = vmatprep.subr.bf16.mxu0 %v17816_v39 }
 0x777   : > { %3548 = vmatpush1.bf16.msra.mxu0 %v17814_v38 }
 0x778   : > { %3549 = vmatprep.subr.bf16.mxu0 %v17819_v40 }
 0x77b   : > { %3550 = vmatpush1.bf16.msra.mxu0 %v17817_v41 }
 0x77c   : > { %4397 = vmatprep.subr.bf16.mxu0 %v17825_v61  ;;  %v17850_v61 = vld [vmem:[%s21961_s13 + $0x3f0] ss:$24 sps:$4 sm:$0xff]  }
 0x801   : > { %v3271_v42 = vpop.f32.mrb[24].mxu1 }
 0x802   : > { %v3273_v43 = vpop.f32.mrb[25].mxu1 }
 0x803   : > { %v3275_v46 = vpop.f32.mrb[26].mxu1 }
 0x804   : > { %v3276_v47 = vpop.f32.mrb[27].mxu1 }
 0x809   : > { %v3070_v48 = vpop.f32.mrb[24].mxu0 }
 0x80a   : > { %v20509_v49 = vadd.f32 %v3271_v42, %v3070_v48  ;;  %v3072_v50 = vpop.f32.mrb[25].mxu0  ;;  %v3580_v48 = vld [vmem:[#allocation15] sm:$0x3] }
 0x80b   : > { %v20511_v51 = vadd.f32 %v3273_v43, %v3072_v50  ;;  %v3074_v52 = vpop.f32.mrb[26].mxu0  ;;  %v3732_v50 = vld [vmem:[#allocation15 + $0x2] sm:$0x3] }
 0x80c   : > { %v3075_v53 = vpop.f32.mrb[27].mxu0  ;;  %v17828_v52 = vld [vmem:[%s21961_s13 + $0x334] ss:$24 sps:$4 sm:$0xff]  }
 0x80d   : > { %v17826_v53 = vld [vmem:[%s21961_s13 + $0x330] ss:$24 sps:$4 sm:$0xff]  }
 0x811   : > { %v3317_v54 = vpop.f32.mrb[28].mxu0 }
 0x812   : > { %v3319_v55 = vpop.f32.mrb[29].mxu0  ;;  %v3324_v58 = vpack.c.bf16 %v3317_v54, %v3317_v54  ;;  %v17834_v54 = vld [vmem:[%s21961_s13 + $0x364] ss:$24 sps:$4 sm:$0xff]  }
 0x813   : > { %v3325_v56 = vpack.c.bf16 %v3319_v55, %v3319_v55  ;;  %v3321_v57 = vpop.f32.mrb[30].mxu0  ;;  %v17832_v55 = vld [vmem:[%s21961_s13 + $0x360] ss:$24 sps:$4 sm:$0xff]  }
 0x814   : > { %v3322_v59 = vpop.f32.mrb[31].mxu0  ;;  %v17838_v57 = vld [vmem:[%s21961_s13 + $0x390] ss:$24 sps:$4 sm:$0xff]  }
 0x815   : > { %3551 = vmatprep.mubr.bf16.mxu0 %v3325_v56  ;;  %v17840_v56 = vld [vmem:[%s21961_s13 + $0x394] ss:$24 sps:$4 sm:$0xff]   ;;  %v17844_v59 = vld [vmem:[%s21961_s13 + $0x3c0] ss:$24 sps:$4 sm:$0xff]  }
 0x816   : > { %3552 = vmatmul.mubr.bf16.vlgmr.msra.gmra.mrb[32].mxu0 %v3324_v58  ;;  %v17846_v58 = vld [vmem:[%s21961_s13 + $0x3c4] ss:$24 sps:$4 sm:$0xff]  }
 0x817   : > { %4398 = vmatpush1.bf16.msra.mxu0 %v17823_v60  ;;  %v17852_v60 = vld [vmem:[%s21961_s13 + $0x3f4] ss:$24 sps:$4 sm:$0xff]  }
 0x818   : > { %4399 = vmatprep.subr.bf16.mxu0 %v17831_v62  ;;  %v17858_v62 = vld [vmem:[%s21961_s13 + $0x424] ss:$24 sps:$4 sm:$0xff]  }
 0x81b   : > { %4400 = vmatpush1.bf16.msra.mxu0 %v17829_v63  ;;  %v17856_v63 = vld [vmem:[%s21961_s13 + $0x420] ss:$24 sps:$4 sm:$0xff]  }
 0x81c   : > { %4401 = vmatprep.subr.bf16.mxu0 %v17837_v0  ;;  %v17864_v0 = vld [vmem:[%s21961_s13 + $0x454] ss:$24 sps:$4 sm:$0xff]  }
 0x81f   : > { %4402 = vmatpush1.bf16.msra.mxu0 %v17835_v1  ;;  %v17862_v1 = vld [vmem:[%s21961_s13 + $0x450] ss:$24 sps:$4 sm:$0xff]  }
 0x820   : > { %4403 = vmatprep.subr.bf16.mxu0 %v17843_v2  ;;  %v17870_v2 = vld [vmem:[%s21961_s13 + $0x484] ss:$24 sps:$4 sm:$0xff]  }
 0x823   : > { %4404 = vmatpush1.bf16.msra.mxu0 %v17841_v3  ;;  %v17868_v3 = vld [vmem:[%s21961_s13 + $0x480] ss:$24 sps:$4 sm:$0xff]  }
 0x824   : > { %4405 = vmatprep.subr.bf16.mxu0 %v17849_v4  ;;  %v17876_v4 = vld [vmem:[%s21961_s13 + $0x4b4] ss:$24 sps:$4 sm:$0xff]  }
 0x827   : > { %4406 = vmatpush1.bf16.msra.mxu0 %v17847_v5  ;;  %v17874_v5 = vld [vmem:[%s21961_s13 + $0x4b0] ss:$24 sps:$4 sm:$0xff]  }
 0x828   : > { %4407 = vmatprep.subr.bf16.mxu0 %v17855_v6  ;;  %v17882_v6 = vld [vmem:[%s21961_s13 + $0x4e4] ss:$24 sps:$4 sm:$0xff]  }
 0x82b   : > { %4408 = vmatpush1.bf16.msra.mxu0 %v17853_v8  ;;  %v17880_v8 = vld [vmem:[%s21961_s13 + $0x4e0] ss:$24 sps:$4 sm:$0xff]  }
 0x82c   : > { %4409 = vmatprep.subr.bf16.mxu0 %v17861_v9  ;;  %v17888_v9 = vld [vmem:[%s21961_s13 + $0x514] ss:$24 sps:$4 sm:$0xff]  }
 0x82f   : > { %4410 = vmatpush1.bf16.msra.mxu0 %v17859_v11  ;;  %v17886_v11 = vld [vmem:[%s21961_s13 + $0x510] ss:$24 sps:$4 sm:$0xff]  }
 0x830   : > { %4411 = vmatprep.subr.bf16.mxu0 %v17867_v13  ;;  %v17894_v13 = vld [vmem:[%s21961_s13 + $0x544] ss:$24 sps:$4 sm:$0xff]  }
 0x833   : > { %4412 = vmatpush1.bf16.msra.mxu0 %v17865_v14  ;;  %v17892_v14 = vld [vmem:[%s21961_s13 + $0x540] ss:$24 sps:$4 sm:$0xff]  }
 0x834   : > { %4413 = vmatprep.subr.bf16.mxu0 %v17873_v15  ;;  %v17900_v15 = vld [vmem:[%s21961_s13 + $0x574] ss:$24 sps:$4 sm:$0xff]  }
 0x837   : > { %4414 = vmatpush1.bf16.msra.mxu0 %v17871_v16  ;;  %v17898_v16 = vld [vmem:[%s21961_s13 + $0x570] ss:$24 sps:$4 sm:$0xff]  }
 0x838   : > { %4415 = vmatprep.subr.bf16.mxu0 %v17879_v17  ;;  %v17904_v17 = vld [vmem:[%s21961_s13 + $0x5a0] ss:$24 sps:$4 sm:$0xff]  }
 0x83b   : > { %4416 = vmatpush1.bf16.msra.mxu0 %v17877_v18  ;;  %v17906_v18 = vld [vmem:[%s21961_s13 + $0x5a4] ss:$24 sps:$4 sm:$0xff]  }
 0x83c   : > { %4417 = vmatprep.subr.bf16.mxu0 %v17885_v19  ;;  %v17907_v19 = vld [vmem:[%s21961_s13 + $0x5a8] ss:$24 sps:$4 sm:$0xff]  }
 0x83f   : > { %4418 = vmatpush1.bf16.msra.mxu0 %v17883_v20  ;;  %v17909_v20 = vld [vmem:[%s21961_s13 + $0x5ac] ss:$24 sps:$4 sm:$0xff]  }
 0x840   : > { %4419 = vmatprep.subr.bf16.mxu0 %v17891_v21  ;;  %v17912_v21 = vld [vmem:[%s21961_s13 + $0x5d4] ss:$24 sps:$4 sm:$0xff]  }
 0x843   : > { %4420 = vmatpush1.bf16.msra.mxu0 %v17889_v22  ;;  %v17915_v22 = vld [vmem:[%s21961_s13 + $0x5dc] ss:$24 sps:$4 sm:$0xff]  }
 0x844   : > { %4421 = vmatprep.subr.bf16.mxu0 %v17897_v24  ;;  %v17910_v24 = vld [vmem:[%s21961_s13 + $0x5d0] ss:$24 sps:$4 sm:$0xff]  }
 0x847   : > { %4422 = vmatpush1.bf16.msra.mxu0 %v17895_v25  ;;  %v17913_v25 = vld [vmem:[%s21961_s13 + $0x5d8] ss:$24 sps:$4 sm:$0xff]  }
 0x848   : > { %4423 = vmatprep.subr.bf16.mxu0 %v17903_v28  ;;  %v17918_v28 = vld [vmem:[%s21961_s13 + $0x314] ss:$24 sps:$4 sm:$0xff]  }
 0x84b   : > { %4424 = vmatpush1.bf16.msra.mxu0 %v17901_v30  ;;  %v17921_v30 = vld [vmem:[%s21961_s13 + $0x4] ss:$24 sps:$4 sm:$0xff]  }
 0x84c   : > { %4425 = vmatprep.subr.bf16.mxu0 %v17909_v20  ;;  %v17970_v20 = vld [vmem:[%s21961_s13 + $0x4c0] ss:$24 sps:$4 sm:$0xff]  }
 0x84f   : > { %4426 = vmatpush1.bf16.msra.mxu0 %v17907_v19  ;;  %v17975_v19 = vld [vmem:[%s21961_s13 + $0x1b4] ss:$24 sps:$4 sm:$0xff]  }
 0x850   : > { %4427 = vmatprep.subr.bf16.mxu0 %v17915_v22  ;;  %v17978_v22 = vld [vmem:[%s21961_s13 + $0x4f4] ss:$24 sps:$4 sm:$0xff]  }
 0x853   : > { %4428 = vmatpush1.bf16.msra.mxu0 %v17913_v25  ;;  %v17976_v25 = vld [vmem:[%s21961_s13 + $0x4f0] ss:$24 sps:$4 sm:$0xff]  }
 0x854   : > { %4959 = vmatprep.subr.bf16.mxu0 %v17921_v30  ;;  %v17984_v30 = vld [vmem:[%s21961_s13 + $0x524] ss:$24 sps:$4 sm:$0xff]  }
 0x8e9   : > { %v3553_v33 = vpop.f32.mrb[32].mxu0 }
 0x8ea   : > { %v3560_v34 = vadd.f32 %v3553_v33, %v20509_v49  ;;  %v3555_v35 = vpop.f32.mrb[33].mxu0  ;;  %v17822_v49 = vld [vmem:[%s21961_s13 + $0x304] ss:$24 sps:$4 sm:$0xff]  }
 0x8eb   : > { %v3561_v36 = vadd.f32 %v3555_v35, %v20511_v51  ;;  %v3557_v37 = vpop.f32.mrb[34].mxu0  ;;  %v17820_v51 = vld [vmem:[%s21961_s13 + $0x300] ss:$24 sps:$4 sm:$0xff]  }
 0x8ec   : > { %v3574_v38 = vadd.f32 %v3567_v32, %v3560_v34  ;;  %v3558_v39 = vpop.f32.mrb[35].mxu0 }
 0x8ed   : > { %v3575_v40 = vadd.f32 %v3571_v7, %v3561_v36  ;;  %v17919_v39 = vld [vmem:[%s21961_s13] ss:$24 sps:$4 sm:$0xff]  }
 0x8ee   : > { %v3576_v41 = vmax.f32 %v3574_v38, 0.0  ;;  %v17916_v38 = vld [vmem:[%s21961_s13 + $0x310] ss:$24 sps:$4 sm:$0xff]  }
 0x8ef   : > { %v3577_v42 = vmax.f32 %v3575_v40, 0.0 }
 0x8f0   : > { %v3578_v43 = vpack.c.bf16 %v3576_v41, %v3576_v41 }
 0x8f1   : > { %v20545_v46 = vpack.c.bf16 %v3577_v42, %v3577_v42  ;;  %v17924_v42 = vld [vmem:[%s21961_s13 + $0x344] ss:$24 sps:$4 sm:$0xff]  }
 0x8f2   : > { %v20548_v47 = vsel %vm3585_vm6, %v3578_v43, 0  ;;  %v17927_v43 = vld [vmem:[%s21961_s13 + $0x34] ss:$24 sps:$4 sm:$0xff]  }
 0x8f3   : > { %15216 = vmatprep.subr.msk.bf16.mxu1 %vm3585_vm6, %v20545_v46 }
 0x8f4   : > { %3593 = vmatpush1.bf16.msra.mxu1 %v20548_v47 }
 0x8f5   : > { %15218 = vmatprep.subr.msk.bf16.mxu1 %vm3585_vm6, %v20545_v46 }
 0x8f7   : > { %15217 = vmatmul.mubr.msk.bf16.vlgmr.msra.gmra.mrb[28].mxu1 %vm3581_vm7, %v3580_v48 }
 0x8f8   : > { %3737 = vmatpush1.bf16.msra.mxu1 %v20548_v47  ;;  %3768 = vmatprep.mubr.bf16.mxu1 %v19844_v23 }
 0x8f9   : > { %4356 = vmatprep.subr.bf16.mxu1 %v17822_v49  ;;  %v17922_v49 = vld [vmem:[%s21961_s13 + $0x340] ss:$24 sps:$4 sm:$0xff]  }
 0x8ff   : > { %15219 = vmatmul.mubr.msk.bf16.vlgmr.msra.gmra.mrb[32].mxu1 %vm3581_vm7, %v3732_v50  ;;  %v17925_v50 = vld [vmem:[%s21961_s13 + $0x30] ss:$24 sps:$4 sm:$0xff]  }
 0x900   : > { %4357 = vmatpush1.bf16.msra.mxu1 %v17820_v51  ;;  %v17930_v51 = vld [vmem:[%s21961_s13 + $0x374] ss:$24 sps:$4 sm:$0xff]  }
 0x901   : > { %4358 = vmatprep.subr.bf16.mxu1 %v17828_v52  ;;  %v17933_v52 = vld [vmem:[%s21961_s13 + $0x64] ss:$24 sps:$4 sm:$0xff]  }
 0x904   : > { %4359 = vmatpush1.bf16.msra.mxu1 %v17826_v53  ;;  %v17928_v53 = vld [vmem:[%s21961_s13 + $0x370] ss:$24 sps:$4 sm:$0xff]  }
 0x905   : > { %4360 = vmatprep.subr.bf16.mxu1 %v17834_v54  ;;  %v17931_v54 = vld [vmem:[%s21961_s13 + $0x60] ss:$24 sps:$4 sm:$0xff]  }
 0x908   : > { %4361 = vmatpush1.bf16.msra.mxu1 %v17832_v55  ;;  %v17936_v55 = vld [vmem:[%s21961_s13 + $0x3a4] ss:$24 sps:$4 sm:$0xff]  }
 0x909   : > { %4362 = vmatprep.subr.bf16.mxu1 %v17840_v56  ;;  %v17939_v56 = vld [vmem:[%s21961_s13 + $0x94] ss:$24 sps:$4 sm:$0xff]  }
 0x90c   : > { %4363 = vmatpush1.bf16.msra.mxu1 %v17838_v57  ;;  %v17934_v57 = vld [vmem:[%s21961_s13 + $0x3a0] ss:$24 sps:$4 sm:$0xff]  }
 0x90d   : > { %4364 = vmatprep.subr.bf16.mxu1 %v17846_v58  ;;  %v17937_v58 = vld [vmem:[%s21961_s13 + $0x90] ss:$24 sps:$4 sm:$0xff]  }
 0x910   : > { %4365 = vmatpush1.bf16.msra.mxu1 %v17844_v59  ;;  %v17942_v59 = vld [vmem:[%s21961_s13 + $0x3d4] ss:$24 sps:$4 sm:$0xff]  }
 0x911   : > { %4366 = vmatprep.subr.bf16.mxu1 %v17852_v60  ;;  %v17945_v60 = vld [vmem:[%s21961_s13 + $0xc4] ss:$24 sps:$4 sm:$0xff]  }
 0x914   : > { %4367 = vmatpush1.bf16.msra.mxu1 %v17850_v61  ;;  %v17940_v61 = vld [vmem:[%s21961_s13 + $0x3d0] ss:$24 sps:$4 sm:$0xff]  }
 0x915   : > { %4368 = vmatprep.subr.bf16.mxu1 %v17858_v62  ;;  %v17943_v62 = vld [vmem:[%s21961_s13 + $0xc0] ss:$24 sps:$4 sm:$0xff]  }
 0x918   : > { %4369 = vmatpush1.bf16.msra.mxu1 %v17856_v63  ;;  %v17948_v63 = vld [vmem:[%s21961_s13 + $0x404] ss:$24 sps:$4 sm:$0xff]  }
 0x919   : > { %4370 = vmatprep.subr.bf16.mxu1 %v17864_v0  ;;  %v17951_v0 = vld [vmem:[%s21961_s13 + $0xf4] ss:$24 sps:$4 sm:$0xff]  }
 0x91c   : > { %4371 = vmatpush1.bf16.msra.mxu1 %v17862_v1  ;;  %v17946_v1 = vld [vmem:[%s21961_s13 + $0x400] ss:$24 sps:$4 sm:$0xff]  }
 0x91d   : > { %4372 = vmatprep.subr.bf16.mxu1 %v17870_v2  ;;  %v17949_v2 = vld [vmem:[%s21961_s13 + $0xf0] ss:$24 sps:$4 sm:$0xff]  }
 0x920   : > { %4373 = vmatpush1.bf16.msra.mxu1 %v17868_v3  ;;  %v17954_v3 = vld [vmem:[%s21961_s13 + $0x434] ss:$24 sps:$4 sm:$0xff]  }
 0x921   : > { %4374 = vmatprep.subr.bf16.mxu1 %v17876_v4  ;;  %v17957_v4 = vld [vmem:[%s21961_s13 + $0x124] ss:$24 sps:$4 sm:$0xff]  }
 0x924   : > { %4375 = vmatpush1.bf16.msra.mxu1 %v17874_v5  ;;  %v17952_v5 = vld [vmem:[%s21961_s13 + $0x430] ss:$24 sps:$4 sm:$0xff]  }
 0x925   : > { %4376 = vmatprep.subr.bf16.mxu1 %v17882_v6  ;;  %v17955_v6 = vld [vmem:[%s21961_s13 + $0x120] ss:$24 sps:$4 sm:$0xff]  }
 0x928   : > { %4377 = vmatpush1.bf16.msra.mxu1 %v17880_v8  ;;  %v17960_v8 = vld [vmem:[%s21961_s13 + $0x464] ss:$24 sps:$4 sm:$0xff]  }
 0x929   : > { %4378 = vmatprep.subr.bf16.mxu1 %v17888_v9  ;;  %v17963_v9 = vld [vmem:[%s21961_s13 + $0x154] ss:$24 sps:$4 sm:$0xff]  }
 0x92c   : > { %4379 = vmatpush1.bf16.msra.mxu1 %v17886_v11  ;;  %v17958_v11 = vld [vmem:[%s21961_s13 + $0x460] ss:$24 sps:$4 sm:$0xff]  }
 0x92d   : > { %4380 = vmatprep.subr.bf16.mxu1 %v17894_v13  ;;  %v17961_v13 = vld [vmem:[%s21961_s13 + $0x150] ss:$24 sps:$4 sm:$0xff]  }
 0x930   : > { %4381 = vmatpush1.bf16.msra.mxu1 %v17892_v14  ;;  %v17966_v14 = vld [vmem:[%s21961_s13 + $0x494] ss:$24 sps:$4 sm:$0xff]  }
 0x931   : > { %4382 = vmatprep.subr.bf16.mxu1 %v17900_v15  ;;  %v17969_v15 = vld [vmem:[%s21961_s13 + $0x184] ss:$24 sps:$4 sm:$0xff]  }
 0x934   : > { %4383 = vmatpush1.bf16.msra.mxu1 %v17898_v16  ;;  %v17964_v16 = vld [vmem:[%s21961_s13 + $0x490] ss:$24 sps:$4 sm:$0xff]  }
 0x935   : > { %4384 = vmatprep.subr.bf16.mxu1 %v17906_v18  ;;  %v17972_v18 = vld [vmem:[%s21961_s13 + $0x4c4] ss:$24 sps:$4 sm:$0xff]  }
 0x938   : > { %4385 = vmatpush1.bf16.msra.mxu1 %v17904_v17  ;;  %v17967_v17 = vld [vmem:[%s21961_s13 + $0x180] ss:$24 sps:$4 sm:$0xff]  }
 0x939   : > { %4386 = vmatprep.subr.bf16.mxu1 %v17912_v21  ;;  %v17973_v21 = vld [vmem:[%s21961_s13 + $0x1b0] ss:$24 sps:$4 sm:$0xff]  }
 0x93c   : > { %4387 = vmatpush1.bf16.msra.mxu1 %v17910_v24  ;;  %v17981_v24 = vld [vmem:[%s21961_s13 + $0x1e4] ss:$24 sps:$4 sm:$0xff]  }
 0x93d   : > { %4438 = vmatprep.subr.bf16.mxu1 %v17918_v28  ;;  %v17979_v28 = vld [vmem:[%s21961_s13 + $0x1e0] ss:$24 sps:$4 sm:$0xff]  }
 0x9ca   : > { %v20597_v31 = vpop.f32.mrb[28].mxu1 }
 0x9cb   : > { %v3628_v32 = vpop.f32.mrb[29].mxu1 }
 0x9cc   : > { %v3630_v33 = vpop.f32.mrb[30].mxu1  ;;  %v20605_v48 = vpack.c.bf16 %v3628_v32, %v3628_v32  ;;  %v17987_v32 = vld [vmem:[%s21961_s13 + $0x214] ss:$24 sps:$4 sm:$0xff]  }
 0x9cd   : > { %v3631_v7 = vpop.f32.mrb[31].mxu1  ;;  %v17982_v33 = vld [vmem:[%s21961_s13 + $0x520] ss:$24 sps:$4 sm:$0xff]  }
 0x9ce   : > { %v17985_v7 = vld [vmem:[%s21961_s13 + $0x210] ss:$24 sps:$4 sm:$0xff]  }
 0x9d2   : > { %v3770_v34 = vpop.f32.mrb[32].mxu1 }
 0x9d3   : > { %v3772_v35 = vpop.f32.mrb[33].mxu1  ;;  %v20601_v40 = vpack.c.bf16 %v3770_v34, %v3770_v34  ;;  %v17990_v34 = vld [vmem:[%s21961_s13 + $0x554] ss:$24 sps:$4 sm:$0xff]  }
 0x9d4   : > { %v3778_v36 = vpack.c.bf16 %v3772_v35, %v3772_v35  ;;  %v3774_v37 = vpop.f32.mrb[34].mxu1  ;;  %v17993_v35 = vld [vmem:[%s21961_s13 + $0x244] ss:$24 sps:$4 sm:$0xff]  }
 0x9d5   : > { %v3775_v41 = vpop.f32.mrb[35].mxu1  ;;  %v17991_v37 = vld [vmem:[%s21961_s13 + $0x240] ss:$24 sps:$4 sm:$0xff]  }
 0x9d6   : > { %4388 = vmatprep.mubr.bf16.mxu1 %v3778_v36  ;;  %4429 = vmatprep.mubr.bf16.mxu0 %v3778_v36  ;;  %v17994_v41 = vld [vmem:[%s21961_s13 + $0x580] ss:$24 sps:$4 sm:$0xff]  }
 0x9d7   : > { %4389 = vmatmul.mubr.bf16.vlgmr.msra.gmra.mrb[36].mxu1 %v20601_v40  ;;  %4430 = vmatmul.mubr.bf16.vlgmr.msra.gmra.mrb[36].mxu0 %v20601_v40 }
 0x9d8   : > { %4439 = vmatpush1.bf16.msra.mxu1 %v17916_v38  ;;  %4960 = vmatpush1.bf16.msra.mxu0 %v17919_v39  ;;  %v17996_v38 = vld [vmem:[%s21961_s13 + $0x584] ss:$24 sps:$4 sm:$0xff]   ;;  %v17999_v39 = vld [vmem:[%s21961_s13 + $0x274] ss:$24 sps:$4 sm:$0xff]  }
 0x9d9   : > { %4991 = vmatprep.mubr.bf16.mxu0 %v20605_v48  ;;  %4470 = vmatprep.mubr.bf16.mxu1 %v3778_v36  ;;  %v17988_v36 = vld [vmem:[%s21961_s13 + $0x550] ss:$24 sps:$4 sm:$0xff]  }
 0x9da   : > { %4440 = vmatprep.subr.bf16.mxu1 %v17924_v42  ;;  %4961 = vmatprep.subr.bf16.mxu0 %v17927_v43  ;;  %v17997_v42 = vld [vmem:[%s21961_s13 + $0x270] ss:$24 sps:$4 sm:$0xff]   ;;  %v18002_v43 = vld [vmem:[%s21961_s13 + $0x5b4] ss:$24 sps:$4 sm:$0xff]  }
 0x9dc   : > { %4441 = vmatpush1.bf16.msra.mxu1 %v17922_v49  ;;  %4962 = vmatpush1.bf16.msra.mxu0 %v17925_v50  ;;  %v18005_v49 = vld [vmem:[%s21961_s13 + $0x2a4] ss:$24 sps:$4 sm:$0xff]   ;;  %v18000_v50 = vld [vmem:[%s21961_s13 + $0x5b0] ss:$24 sps:$4 sm:$0xff]  }
 0x9dd   : > { %4442 = vmatprep.subr.bf16.mxu1 %v17930_v51  ;;  %4963 = vmatprep.subr.bf16.mxu0 %v17933_v52  ;;  %v18003_v51 = vld [vmem:[%s21961_s13 + $0x2a0] ss:$24 sps:$4 sm:$0xff]   ;;  %v18008_v52 = vld [vmem:[%s21961_s13 + $0x5e4] ss:$24 sps:$4 sm:$0xff]  }
 0x9e0   : > { %4443 = vmatpush1.bf16.msra.mxu1 %v17928_v53  ;;  %4964 = vmatpush1.bf16.msra.mxu0 %v17931_v54  ;;  %v18011_v53 = vld [vmem:[%s21961_s13 + $0x2d4] ss:$24 sps:$4 sm:$0xff]   ;;  %v18006_v54 = vld [vmem:[%s21961_s13 + $0x5e0] ss:$24 sps:$4 sm:$0xff]  }
 0x9e1   : > { %4444 = vmatprep.subr.bf16.mxu1 %v17936_v55  ;;  %4965 = vmatprep.subr.bf16.mxu0 %v17939_v56  ;;  %v18009_v55 = vld [vmem:[%s21961_s13 + $0x2d0] ss:$24 sps:$4 sm:$0xff]   ;;  %v18014_v56 = vld [vmem:[%s21961_s13 + $0xc] ss:$24 sps:$4 sm:$0xff]  }
 0x9e4   : > { %4445 = vmatpush1.bf16.msra.mxu1 %v17934_v57  ;;  %4966 = vmatpush1.bf16.msra.mxu0 %v17937_v58  ;;  %v18017_v57 = vld [vmem:[%s21961_s13 + $0x14] ss:$24 sps:$4 sm:$0xff]   ;;  %v18012_v58 = vld [vmem:[%s21961_s13 + $0x8] ss:$24 sps:$4 sm:$0xff]  }
 0x9e5   : > { %4446 = vmatprep.subr.bf16.mxu1 %v17942_v59  ;;  %4967 = vmatprep.subr.bf16.mxu0 %v17945_v60  ;;  %v20673_v59 = vpack.c.bf16 %v20597_v31, %v20597_v31  ;;  %v18015_v60 = vld [vmem:[%s21961_s13 + $0x10] ss:$24 sps:$4 sm:$0xff]   ;;  %v18021_v31 = vld [vmem:[%s21961_s13 + $0x40] ss:$24 sps:$4 sm:$0xff]  }
 0x9e8   : > { %4447 = vmatpush1.bf16.msra.mxu1 %v17940_v61  ;;  %4968 = vmatpush1.bf16.msra.mxu0 %v17943_v62  ;;  %v18020_v61 = vld [vmem:[%s21961_s13 + $0x3c] ss:$24 sps:$4 sm:$0xff]  }
 0x9e9   : > { %4448 = vmatprep.subr.bf16.mxu1 %v17948_v63  ;;  %4969 = vmatprep.subr.bf16.mxu0 %v17951_v0  ;;  %v18023_v62 = vld [vmem:[%s21961_s13 + $0x44] ss:$24 sps:$4 sm:$0xff]   ;;  %v18018_v63 = vld [vmem:[%s21961_s13 + $0x38] ss:$24 sps:$4 sm:$0xff]  }
 0x9ea   : > { %v18026_v0 = vld [vmem:[%s21961_s13 + $0x6c] ss:$24 sps:$4 sm:$0xff]  }
 0x9ec   : > { %4449 = vmatpush1.bf16.msra.mxu1 %v17946_v1  ;;  %4970 = vmatpush1.bf16.msra.mxu0 %v17949_v2  ;;  %v18024_v1 = vld [vmem:[%s21961_s13 + $0x68] ss:$24 sps:$4 sm:$0xff]  }
 0x9ed   : > { %4450 = vmatprep.subr.bf16.mxu1 %v17954_v3  ;;  %4971 = vmatprep.subr.bf16.mxu0 %v17957_v4  ;;  %v18027_v2 = vld [vmem:[%s21961_s13 + $0x70] ss:$24 sps:$4 sm:$0xff]   ;;  %v18032_v3 = vld [vmem:[%s21961_s13 + $0x9c] ss:$24 sps:$4 sm:$0xff]  }
 0x9ee   : > { %v18035_v4 = vld [vmem:[%s21961_s13 + $0xa4] ss:$24 sps:$4 sm:$0xff]  }
 0x9f0   : > { %4451 = vmatpush1.bf16.msra.mxu1 %v17952_v5  ;;  %4972 = vmatpush1.bf16.msra.mxu0 %v17955_v6  ;;  %v18033_v5 = vld [vmem:[%s21961_s13 + $0xa0] ss:$24 sps:$4 sm:$0xff]   ;;  %v18038_v6 = vld [vmem:[%s21961_s13 + $0xcc] ss:$24 sps:$4 sm:$0xff]  }
 0x9f1   : > { %4452 = vmatprep.subr.bf16.mxu1 %v17960_v8  ;;  %4973 = vmatprep.subr.bf16.mxu0 %v17963_v9  ;;  %v18041_v8 = vld [vmem:[%s21961_s13 + $0xd4] ss:$24 sps:$4 sm:$0xff]   ;;  %v18036_v9 = vld [vmem:[%s21961_s13 + $0xc8] ss:$24 sps:$4 sm:$0xff]  }
 0x9f4   : > { %4453 = vmatpush1.bf16.msra.mxu1 %v17958_v11  ;;  %4974 = vmatpush1.bf16.msra.mxu0 %v17961_v13  ;;  %v18039_v11 = vld [vmem:[%s21961_s13 + $0xd0] ss:$24 sps:$4 sm:$0xff]   ;;  %v18044_v13 = vld [vmem:[%s21961_s13 + $0xfc] ss:$24 sps:$4 sm:$0xff]  }
 0x9f5   : > { %4454 = vmatprep.subr.bf16.mxu1 %v17966_v14  ;;  %4975 = vmatprep.subr.bf16.mxu0 %v17969_v15  ;;  %v18047_v14 = vld [vmem:[%s21961_s13 + $0x104] ss:$24 sps:$4 sm:$0xff]   ;;  %v18042_v15 = vld [vmem:[%s21961_s13 + $0xf8] ss:$24 sps:$4 sm:$0xff]  }
 0x9f8   : > { %4455 = vmatpush1.bf16.msra.mxu1 %v17964_v16  ;;  %4976 = vmatpush1.bf16.msra.mxu0 %v17967_v17  ;;  %v18045_v16 = vld [vmem:[%s21961_s13 + $0x100] ss:$24 sps:$4 sm:$0xff]   ;;  %v18050_v17 = vld [vmem:[%s21961_s13 + $0x12c] ss:$24 sps:$4 sm:$0xff]  }
 0x9f9   : > { %4456 = vmatprep.subr.bf16.mxu1 %v17972_v18  ;;  %4977 = vmatprep.subr.bf16.mxu0 %v17975_v19  ;;  %v18053_v18 = vld [vmem:[%s21961_s13 + $0x134] ss:$24 sps:$4 sm:$0xff]   ;;  %v18048_v19 = vld [vmem:[%s21961_s13 + $0x128] ss:$24 sps:$4 sm:$0xff]  }
 0x9fc   : > { %4457 = vmatpush1.bf16.msra.mxu1 %v17970_v20  ;;  %4978 = vmatpush1.bf16.msra.mxu0 %v17973_v21  ;;  %v18051_v20 = vld [vmem:[%s21961_s13 + $0x130] ss:$24 sps:$4 sm:$0xff]   ;;  %v18056_v21 = vld [vmem:[%s21961_s13 + $0x15c] ss:$24 sps:$4 sm:$0xff]  }
 0x9fd   : > { %4458 = vmatprep.subr.bf16.mxu1 %v17978_v22  ;;  %4979 = vmatprep.subr.bf16.mxu0 %v17981_v24  ;;  %v18059_v22 = vld [vmem:[%s21961_s13 + $0x164] ss:$24 sps:$4 sm:$0xff]   ;;  %v18054_v24 = vld [vmem:[%s21961_s13 + $0x158] ss:$24 sps:$4 sm:$0xff]  }
 0xa00   : > { %4459 = vmatpush1.bf16.msra.mxu1 %v17976_v25  ;;  %4980 = vmatpush1.bf16.msra.mxu0 %v17979_v28  ;;  %v18057_v25 = vld [vmem:[%s21961_s13 + $0x160] ss:$24 sps:$4 sm:$0xff]   ;;  %v18062_v28 = vld [vmem:[%s21961_s13 + $0x18c] ss:$24 sps:$4 sm:$0xff]  }
 0xa01   : > { %4460 = vmatprep.subr.bf16.mxu1 %v17984_v30  ;;  %4981 = vmatprep.subr.bf16.mxu0 %v17987_v32  ;;  %v18065_v30 = vld [vmem:[%s21961_s13 + $0x194] ss:$24 sps:$4 sm:$0xff]   ;;  %v18060_v32 = vld [vmem:[%s21961_s13 + $0x188] ss:$24 sps:$4 sm:$0xff]  }
 0xa04   : > { %4461 = vmatpush1.bf16.msra.mxu1 %v17982_v33  ;;  %4982 = vmatpush1.bf16.msra.mxu0 %v17985_v7  ;;  %v18063_v33 = vld [vmem:[%s21961_s13 + $0x190] ss:$24 sps:$4 sm:$0xff]   ;;  %v18068_v7 = vld [vmem:[%s21961_s13 + $0x1bc] ss:$24 sps:$4 sm:$0xff]  }
 0xa05   : > { %4462 = vmatprep.subr.bf16.mxu1 %v17990_v34  ;;  %4983 = vmatprep.subr.bf16.mxu0 %v17993_v35  ;;  %v18071_v34 = vld [vmem:[%s21961_s13 + $0x1c4] ss:$24 sps:$4 sm:$0xff]   ;;  %v18066_v35 = vld [vmem:[%s21961_s13 + $0x1b8] ss:$24 sps:$4 sm:$0xff]  }
 0xa08   : > { %4463 = vmatpush1.bf16.msra.mxu1 %v17988_v36  ;;  %4984 = vmatpush1.bf16.msra.mxu0 %v17991_v37  ;;  %v18069_v36 = vld [vmem:[%s21961_s13 + $0x1c0] ss:$24 sps:$4 sm:$0xff]   ;;  %v18074_v37 = vld [vmem:[%s21961_s13 + $0x1ec] ss:$24 sps:$4 sm:$0xff]  }
 0xa09   : > { %4464 = vmatprep.subr.bf16.mxu1 %v17996_v38  ;;  %4985 = vmatprep.subr.bf16.mxu0 %v17999_v39  ;;  %v18077_v38 = vld [vmem:[%s21961_s13 + $0x1f4] ss:$24 sps:$4 sm:$0xff]   ;;  %v18072_v39 = vld [vmem:[%s21961_s13 + $0x1e8] ss:$24 sps:$4 sm:$0xff]  }
 0xa0c   : > { %4465 = vmatpush1.bf16.msra.mxu1 %v17994_v41  ;;  %4986 = vmatpush1.bf16.msra.mxu0 %v17997_v42  ;;  %v18075_v41 = vld [vmem:[%s21961_s13 + $0x1f0] ss:$24 sps:$4 sm:$0xff]   ;;  %v18080_v42 = vld [vmem:[%s21961_s13 + $0x21c] ss:$24 sps:$4 sm:$0xff]  }
 0xa0d   : > { %4466 = vmatprep.subr.bf16.mxu1 %v18002_v43  ;;  %4987 = vmatprep.subr.bf16.mxu0 %v18005_v49  ;;  %v18083_v43 = vld [vmem:[%s21961_s13 + $0x224] ss:$24 sps:$4 sm:$0xff]   ;;  %v18078_v49 = vld [vmem:[%s21961_s13 + $0x218] ss:$24 sps:$4 sm:$0xff]  }
 0xa10   : > { %4467 = vmatpush1.bf16.msra.mxu1 %v18000_v50  ;;  %4988 = vmatpush1.bf16.msra.mxu0 %v18003_v51  ;;  %v18081_v50 = vld [vmem:[%s21961_s13 + $0x220] ss:$24 sps:$4 sm:$0xff]   ;;  %v18086_v51 = vld [vmem:[%s21961_s13 + $0x24c] ss:$24 sps:$4 sm:$0xff]  }
 0xa11   : > { %4468 = vmatprep.subr.bf16.mxu1 %v18008_v52  ;;  %4989 = vmatprep.subr.bf16.mxu0 %v18011_v53  ;;  %v18089_v52 = vld [vmem:[%s21961_s13 + $0x254] ss:$24 sps:$4 sm:$0xff]   ;;  %v18084_v53 = vld [vmem:[%s21961_s13 + $0x248] ss:$24 sps:$4 sm:$0xff]  }
 0xa14   : > { %4469 = vmatpush1.bf16.msra.mxu1 %v18006_v54  ;;  %4990 = vmatpush1.bf16.msra.mxu0 %v18009_v55  ;;  %v18087_v54 = vld [vmem:[%s21961_s13 + $0x250] ss:$24 sps:$4 sm:$0xff]   ;;  %v18092_v55 = vld [vmem:[%s21961_s13 + $0x27c] ss:$24 sps:$4 sm:$0xff]  }
 0xa15   : > { %5000 = vmatprep.subr.bf16.mxu1 %v18014_v56  ;;  %5041 = vmatprep.subr.bf16.mxu0 %v18017_v57  ;;  %v18095_v56 = vld [vmem:[%s21961_s13 + $0x284] ss:$24 sps:$4 sm:$0xff]   ;;  %v18090_v57 = vld [vmem:[%s21961_s13 + $0x278] ss:$24 sps:$4 sm:$0xff]  }
 0xa17   : > { %4471 = vmatmul.mubr.bf16.vlgmr.msra.gmra.mrb[40].mxu1 %v20601_v40  ;;  %4992 = vmatmul.mubr.bf16.vlgmr.msra.gmra.mrb[40].mxu0 %v20673_v59  ;;  %v18029_v40 = vld [vmem:[%s21961_s13 + $0x74] ss:$24 sps:$4 sm:$0xff]  }
 0xa18   : > { %5001 = vmatpush1.bf16.msra.mxu1 %v18012_v58  ;;  %5032 = vmatprep.mubr.bf16.mxu1 %v20605_v48  ;;  %v18093_v58 = vld [vmem:[%s21961_s13 + $0x280] ss:$24 sps:$4 sm:$0xff]  }
 0xa19   : > { %5042 = vmatpush1.bf16.msra.mxu0 %v18015_v60  ;;  %5073 = vmatprep.mubr.bf16.mxu0 %v20605_v48  ;;  %v18030_v48 = vld [vmem:[%s21961_s13 + $0x98] ss:$24 sps:$4 sm:$0xff]   ;;  %v18098_v60 = vld [vmem:[%s21961_s13 + $0x2ac] ss:$24 sps:$4 sm:$0xff]  }
 0xa1a   : > { %5002 = vmatprep.subr.bf16.mxu1 %v18020_v61  ;;  %5043 = vmatprep.subr.bf16.mxu0 %v18023_v62  ;;  %v18101_v61 = vld [vmem:[%s21961_s13 + $0x2b4] ss:$24 sps:$4 sm:$0xff]   ;;  %v18096_v62 = vld [vmem:[%s21961_s13 + $0x2a8] ss:$24 sps:$4 sm:$0xff]  }
 0xa1c   : > { %5003 = vmatpush1.bf16.msra.mxu1 %v18018_v63  ;;  %v18099_v63 = vld [vmem:[%s21961_s13 + $0x2b0] ss:$24 sps:$4 sm:$0xff]  }
 0xa1d   : > { %5044 = vmatpush1.bf16.msra.mxu0 %v18021_v31  ;;  %5004 = vmatprep.subr.bf16.mxu1 %v18026_v0  ;;  %v18104_v31 = vld [vmem:[%s21961_s13 + $0x2dc] ss:$24 sps:$4 sm:$0xff]  }
 0xa1e   : > { %5045 = vmatprep.subr.bf16.mxu0 %v18029_v40  ;;  %v18107_v0 = vld [vmem:[%s21961_s13 + $0x2e4] ss:$24 sps:$4 sm:$0xff]   ;;  %v18102_v40 = vld [vmem:[%s21961_s13 + $0x2d8] ss:$24 sps:$4 sm:$0xff]  }
 0xa20   : > { %5005 = vmatpush1.bf16.msra.mxu1 %v18024_v1  ;;  %v18105_v1 = vld [vmem:[%s21961_s13 + $0x2e0] ss:$24 sps:$4 sm:$0xff]  }
 0xa21   : > { %5046 = vmatpush1.bf16.msra.mxu0 %v18027_v2  ;;  %5006 = vmatprep.subr.bf16.mxu1 %v18032_v3  ;;  %v5083_v2 = vld [vmem:[#allocation15 + $0x4] sm:$0x3]  ;;  %v18108_v3 = vld [vmem:[%s21961_s13 + $0x600] ss:$24 sps:$4 sm:$0xff]  }
 0xa22   : > { %5047 = vmatprep.subr.bf16.mxu0 %v18035_v4  ;;  %v18110_v4 = vld [vmem:[%s21961_s13 + $0x604] ss:$24 sps:$4 sm:$0xff]  }
 0xa24   : > { %5007 = vmatpush1.bf16.msra.mxu1 %v18030_v48  ;;  %v18111_v48 = vld [vmem:[%s21961_s13 + $0x608] ss:$24 sps:$4 sm:$0xff]  }
 0xa25   : > { %5048 = vmatpush1.bf16.msra.mxu0 %v18033_v5  ;;  %5008 = vmatprep.subr.bf16.mxu1 %v18038_v6  ;;  %v18113_v5 = vld [vmem:[%s21961_s13 + $0x60c] ss:$24 sps:$4 sm:$0xff]  }
 0xa26   : > { %5049 = vmatprep.subr.bf16.mxu0 %v18041_v8  ;;  %v18116_v6 = vld [vmem:[%s21961_s13 + $0x634] ss:$24 sps:$4 sm:$0xff]   ;;  %v18114_v8 = vld [vmem:[%s21961_s13 + $0x630] ss:$24 sps:$4 sm:$0xff]  }
 0xa28   : > { %5009 = vmatpush1.bf16.msra.mxu1 %v18036_v9  ;;  %v18117_v9 = vld [vmem:[%s21961_s13 + $0x638] ss:$24 sps:$4 sm:$0xff]  }
 0xa29   : > { %5050 = vmatpush1.bf16.msra.mxu0 %v18039_v11  ;;  %5010 = vmatprep.subr.bf16.mxu1 %v18044_v13  ;;  %v18122_v11 = vld [vmem:[%s21961_s13 + $0x664] ss:$24 sps:$4 sm:$0xff]  }
 0xa2a   : > { %5051 = vmatprep.subr.bf16.mxu0 %v18047_v14  ;;  %v18125_v13 = vld [vmem:[%s21961_s13 + $0x66c] ss:$24 sps:$4 sm:$0xff]   ;;  %v18120_v14 = vld [vmem:[%s21961_s13 + $0x660] ss:$24 sps:$4 sm:$0xff]  }
 0xa2c   : > { %5011 = vmatpush1.bf16.msra.mxu1 %v18042_v15  ;;  %v18123_v15 = vld [vmem:[%s21961_s13 + $0x668] ss:$24 sps:$4 sm:$0xff]  }
 0xa2d   : > { %5052 = vmatpush1.bf16.msra.mxu0 %v18045_v16  ;;  %5012 = vmatprep.subr.bf16.mxu1 %v18050_v17  ;;  %v18128_v16 = vld [vmem:[%s21961_s13 + $0x694] ss:$24 sps:$4 sm:$0xff]  }
 0xa2e   : > { %5053 = vmatprep.subr.bf16.mxu0 %v18053_v18  ;;  %v18131_v17 = vld [vmem:[%s21961_s13 + $0x69c] ss:$24 sps:$4 sm:$0xff]   ;;  %v18126_v18 = vld [vmem:[%s21961_s13 + $0x690] ss:$24 sps:$4 sm:$0xff]  }
 0xa30   : > { %5013 = vmatpush1.bf16.msra.mxu1 %v18048_v19  ;;  %v18129_v19 = vld [vmem:[%s21961_s13 + $0x698] ss:$24 sps:$4 sm:$0xff]  }
 0xa31   : > { %5054 = vmatpush1.bf16.msra.mxu0 %v18051_v20  ;;  %5014 = vmatprep.subr.bf16.mxu1 %v18056_v21  ;;  %v18134_v20 = vld [vmem:[%s21961_s13 + $0x6c4] ss:$24 sps:$4 sm:$0xff]  }
 0xa32   : > { %5055 = vmatprep.subr.bf16.mxu0 %v18059_v22  ;;  %v18137_v21 = vld [vmem:[%s21961_s13 + $0x6cc] ss:$24 sps:$4 sm:$0xff]   ;;  %v18132_v22 = vld [vmem:[%s21961_s13 + $0x6c0] ss:$24 sps:$4 sm:$0xff]  }
 0xa34   : > { %5015 = vmatpush1.bf16.msra.mxu1 %v18054_v24  ;;  %v18135_v24 = vld [vmem:[%s21961_s13 + $0x6c8] ss:$24 sps:$4 sm:$0xff]  }
 0xa35   : > { %5056 = vmatpush1.bf16.msra.mxu0 %v18057_v25  ;;  %5016 = vmatprep.subr.bf16.mxu1 %v18062_v28  ;;  %v18140_v25 = vld [vmem:[%s21961_s13 + $0x6f4] ss:$24 sps:$4 sm:$0xff]  }
 0xa36   : > { %5057 = vmatprep.subr.bf16.mxu0 %v18065_v30  ;;  %v18143_v28 = vld [vmem:[%s21961_s13 + $0x6fc] ss:$24 sps:$4 sm:$0xff]   ;;  %v18138_v30 = vld [vmem:[%s21961_s13 + $0x6f0] ss:$24 sps:$4 sm:$0xff]  }
 0xa38   : > { %5017 = vmatpush1.bf16.msra.mxu1 %v18060_v32  ;;  %v18141_v32 = vld [vmem:[%s21961_s13 + $0x6f8] ss:$24 sps:$4 sm:$0xff]  }
 0xa39   : > { %5058 = vmatpush1.bf16.msra.mxu0 %v18063_v33  ;;  %5018 = vmatprep.subr.bf16.mxu1 %v18068_v7  ;;  %v18146_v33 = vld [vmem:[%s21961_s13 + $0x724] ss:$24 sps:$4 sm:$0xff]  }
 0xa3a   : > { %5059 = vmatprep.subr.bf16.mxu0 %v18071_v34  ;;  %v18149_v7 = vld [vmem:[%s21961_s13 + $0x72c] ss:$24 sps:$4 sm:$0xff]   ;;  %v18144_v34 = vld [vmem:[%s21961_s13 + $0x720] ss:$24 sps:$4 sm:$0xff]  }
 0xa3c   : > { %5019 = vmatpush1.bf16.msra.mxu1 %v18066_v35  ;;  %v18147_v35 = vld [vmem:[%s21961_s13 + $0x728] ss:$24 sps:$4 sm:$0xff]  }
 0xa3d   : > { %5060 = vmatpush1.bf16.msra.mxu0 %v18069_v36  ;;  %5020 = vmatprep.subr.bf16.mxu1 %v18074_v37  ;;  %v18152_v36 = vld [vmem:[%s21961_s13 + $0x754] ss:$24 sps:$4 sm:$0xff]  }
 0xa3e   : > { %5061 = vmatprep.subr.bf16.mxu0 %v18077_v38  ;;  %v18155_v37 = vld [vmem:[%s21961_s13 + $0x75c] ss:$24 sps:$4 sm:$0xff]   ;;  %v18150_v38 = vld [vmem:[%s21961_s13 + $0x750] ss:$24 sps:$4 sm:$0xff]  }
 0xa40   : > { %5021 = vmatpush1.bf16.msra.mxu1 %v18072_v39  ;;  %v18153_v39 = vld [vmem:[%s21961_s13 + $0x758] ss:$24 sps:$4 sm:$0xff]  }
 0xa41   : > { %5062 = vmatpush1.bf16.msra.mxu0 %v18075_v41  ;;  %5022 = vmatprep.subr.bf16.mxu1 %v18080_v42  ;;  %v18158_v41 = vld [vmem:[%s21961_s13 + $0x784] ss:$24 sps:$4 sm:$0xff]  }
 0xa42   : > { %5063 = vmatprep.subr.bf16.mxu0 %v18083_v43  ;;  %v18161_v42 = vld [vmem:[%s21961_s13 + $0x78c] ss:$24 sps:$4 sm:$0xff]   ;;  %v18156_v43 = vld [vmem:[%s21961_s13 + $0x780] ss:$24 sps:$4 sm:$0xff]  }
 0xa44   : > { %5023 = vmatpush1.bf16.msra.mxu1 %v18078_v49  ;;  %v18159_v49 = vld [vmem:[%s21961_s13 + $0x788] ss:$24 sps:$4 sm:$0xff]  }
 0xa45   : > { %5064 = vmatpush1.bf16.msra.mxu0 %v18081_v50  ;;  %5024 = vmatprep.subr.bf16.mxu1 %v18086_v51  ;;  %v18164_v50 = vld [vmem:[%s21961_s13 + $0x7b4] ss:$24 sps:$4 sm:$0xff]  }
 0xa46   : > { %5065 = vmatprep.subr.bf16.mxu0 %v18089_v52  ;;  %v18167_v51 = vld [vmem:[%s21961_s13 + $0x7bc] ss:$24 sps:$4 sm:$0xff]   ;;  %v18162_v52 = vld [vmem:[%s21961_s13 + $0x7b0] ss:$24 sps:$4 sm:$0xff]  }
 0xa48   : > { %5025 = vmatpush1.bf16.msra.mxu1 %v18084_v53  ;;  %v18165_v53 = vld [vmem:[%s21961_s13 + $0x7b8] ss:$24 sps:$4 sm:$0xff]  }
 0xa49   : > { %5066 = vmatpush1.bf16.msra.mxu0 %v18087_v54  ;;  %5026 = vmatprep.subr.bf16.mxu1 %v18092_v55  ;;  %v18170_v54 = vld [vmem:[%s21961_s13 + $0x7e4] ss:$24 sps:$4 sm:$0xff]  }
 0xa4a   : > { %5067 = vmatprep.subr.bf16.mxu0 %v18095_v56  ;;  %v18173_v55 = vld [vmem:[%s21961_s13 + $0x7ec] ss:$24 sps:$4 sm:$0xff]   ;;  %v18168_v56 = vld [vmem:[%s21961_s13 + $0x7e0] ss:$24 sps:$4 sm:$0xff]  }
 0xa4c   : > { %5027 = vmatpush1.bf16.msra.mxu1 %v18090_v57  ;;  %v18171_v57 = vld [vmem:[%s21961_s13 + $0x7e8] ss:$24 sps:$4 sm:$0xff]  }
 0xa4d   : > { %5068 = vmatpush1.bf16.msra.mxu0 %v18093_v58  ;;  %5028 = vmatprep.subr.bf16.mxu1 %v18098_v60  ;;  %v18176_v58 = vld [vmem:[%s21961_s13 + $0x814] ss:$24 sps:$4 sm:$0xff]  }
 0xa4e   : > { %5069 = vmatprep.subr.bf16.mxu0 %v18101_v61  ;;  %v18179_v60 = vld [vmem:[%s21961_s13 + $0x81c] ss:$24 sps:$4 sm:$0xff]   ;;  %v18174_v61 = vld [vmem:[%s21961_s13 + $0x810] ss:$24 sps:$4 sm:$0xff]  }
 0xa50   : > { %5029 = vmatpush1.bf16.msra.mxu1 %v18096_v62  ;;  %v18177_v62 = vld [vmem:[%s21961_s13 + $0x818] ss:$24 sps:$4 sm:$0xff]  }
 0xa51   : > { %5070 = vmatpush1.bf16.msra.mxu0 %v18099_v63  ;;  %5030 = vmatprep.subr.bf16.mxu1 %v18104_v31  ;;  %v18182_v63 = vld [vmem:[%s21961_s13 + $0x844] ss:$24 sps:$4 sm:$0xff]  }
 0xa52   : > { %5071 = vmatprep.subr.bf16.mxu0 %v18107_v0  ;;  %v18185_v31 = vld [vmem:[%s21961_s13 + $0x84c] ss:$24 sps:$4 sm:$0xff]   ;;  %v18180_v0 = vld [vmem:[%s21961_s13 + $0x840] ss:$24 sps:$4 sm:$0xff]  }
 0xa54   : > { %5031 = vmatpush1.bf16.msra.mxu1 %v18102_v40  ;;  %v18183_v40 = vld [vmem:[%s21961_s13 + $0x848] ss:$24 sps:$4 sm:$0xff]  }
 0xa55   : > { %5072 = vmatpush1.bf16.msra.mxu0 %v18105_v1  ;;  %15508 = vmatprep.subr.msk.bf16.mxu1 %vm3585_vm6, %v20545_v46  ;;  %v18188_v1 = vld [vmem:[%s21961_s13 + $0x874] ss:$24 sps:$4 sm:$0xff]  }
 0xa56   : > { %5748 = vmatprep.subr.bf16.mxu0 %v18113_v5 }
 0xa57   : > { %5033 = vmatmul.mubr.bf16.vlgmr.msra.gmra.mrb[44].mxu1 %v20673_v59 }
 0xa58   : > { %5074 = vmatmul.mubr.bf16.vlgmr.msra.gmra.mrb[44].mxu0 %v20673_v59  ;;  %5088 = vmatpush1.bf16.msra.mxu1 %v20548_v47  ;;  %v18119_v59 = vld [vmem:[%s21961_s13 + $0x63c] ss:$24 sps:$4 sm:$0xff]  }
 0xa59   : > { %5119 = vmatprep.mubr.bf16.mxu1 %v19844_v23  ;;  %5707 = vmatprep.subr.bf16.mxu1 %v18110_v4  ;;  %v18186_v4 = vld [vmem:[%s21961_s13 + $0x870] ss:$24 sps:$4 sm:$0xff]  }
 0xa5a   : > { %5749 = vmatpush1.bf16.msra.mxu0 %v18111_v48  ;;  %v18191_v48 = vld [vmem:[%s21961_s13 + $0x87c] ss:$24 sps:$4 sm:$0xff]  }
 0xa5b   : > { %5750 = vmatprep.subr.bf16.mxu0 %v18119_v59  ;;  %v18189_v59 = vld [vmem:[%s21961_s13 + $0x878] ss:$24 sps:$4 sm:$0xff]  }
 0xa5e   : > { %5751 = vmatpush1.bf16.msra.mxu0 %v18117_v9 }
 0xa5f   : > { %15509 = vmatmul.mubr.msk.bf16.vlgmr.msra.gmra.mrb[48].mxu1 %vm3581_vm7, %v5083_v2  ;;  %5752 = vmatprep.subr.bf16.mxu0 %v18125_v13 }
 0xa60   : > { %5708 = vmatpush1.bf16.msra.mxu1 %v18108_v3 }
 0xa61   : > { %5709 = vmatprep.subr.bf16.mxu1 %v18116_v6 }
 0xa62   : > { %5753 = vmatpush1.bf16.msra.mxu0 %v18123_v15  ;;  %v18192_v15 = vld [vmem:[%s21961_s13 + $0x8a0] ss:$24 sps:$4 sm:$0xff]  }
 0xa63   : > { %5754 = vmatprep.subr.bf16.mxu0 %v18131_v17  ;;  %v18197_v17 = vld [vmem:[%s21961_s13 + $0x8ac] ss:$24 sps:$4 sm:$0xff]  }
 0xa64   : > { %5710 = vmatpush1.bf16.msra.mxu1 %v18114_v8 }
 0xa65   : > { %5711 = vmatprep.subr.bf16.mxu1 %v18122_v11 }
 0xa66   : > { %5755 = vmatpush1.bf16.msra.mxu0 %v18129_v19  ;;  %v18198_v19 = vld [vmem:[%s21961_s13 + $0x8d0] ss:$24 sps:$4 sm:$0xff]  }
 0xa67   : > { %5756 = vmatprep.subr.bf16.mxu0 %v18137_v21  ;;  %v18201_v21 = vld [vmem:[%s21961_s13 + $0x8d8] ss:$24 sps:$4 sm:$0xff]  }
 0xa68   : > { %5712 = vmatpush1.bf16.msra.mxu1 %v18120_v14  ;;  %v18194_v14 = vld [vmem:[%s21961_s13 + $0x8a4] ss:$24 sps:$4 sm:$0xff]  }
 0xa69   : > { %5713 = vmatprep.subr.bf16.mxu1 %v18128_v16  ;;  %v18195_v16 = vld [vmem:[%s21961_s13 + $0x8a8] ss:$24 sps:$4 sm:$0xff]  }
 0xa6a   : > { %5757 = vmatpush1.bf16.msra.mxu0 %v18135_v24 }
 0xa6b   : > { %5758 = vmatprep.subr.bf16.mxu0 %v18143_v28 }
 0xa6c   : > { %5714 = vmatpush1.bf16.msra.mxu1 %v18126_v18  ;;  %v18200_v18 = vld [vmem:[%s21961_s13 + $0x8d4] ss:$24 sps:$4 sm:$0xff]  }
 0xa6d   : > { %5715 = vmatprep.subr.bf16.mxu1 %v18134_v20  ;;  %v18203_v20 = vld [vmem:[%s21961_s13 + $0x8dc] ss:$24 sps:$4 sm:$0xff]  }
 0xa6e   : > { %5759 = vmatpush1.bf16.msra.mxu0 %v18141_v32 }
 0xa6f   : > { %5760 = vmatprep.subr.bf16.mxu0 %v18149_v7 }
 0xa70   : > { %5716 = vmatpush1.bf16.msra.mxu1 %v18132_v22  ;;  %v18206_v22 = vld [vmem:[%s21961_s13 + $0x614] ss:$24 sps:$4 sm:$0xff]  }
 0xa71   : > { %5717 = vmatprep.subr.bf16.mxu1 %v18140_v25 }
 0xa72   : > { %5761 = vmatpush1.bf16.msra.mxu0 %v18147_v35 }
 0xa73   : > { %5762 = vmatprep.subr.bf16.mxu0 %v18155_v37  ;;  %v18268_v37 = vld [vmem:[%s21962_s10 + $0x40] sm:$0xff]  }
 0xa74   : > { %5718 = vmatpush1.bf16.msra.mxu1 %v18138_v30 }
 0xa75   : > { %5719 = vmatprep.subr.bf16.mxu1 %v18146_v33 }
 0xa76   : > { %5763 = vmatpush1.bf16.msra.mxu0 %v18153_v39 }
 0xa77   : > { %5764 = vmatprep.subr.bf16.mxu0 %v18161_v42 }
 0xa78   : > { %5720 = vmatpush1.bf16.msra.mxu1 %v18144_v34 }
 0xa79   : > { %5721 = vmatprep.subr.bf16.mxu1 %v18152_v36 }
 0xa7a   : > { %5765 = vmatpush1.bf16.msra.mxu0 %v18159_v49 }
 0xa7b   : > { %5766 = vmatprep.subr.bf16.mxu0 %v18167_v51 }
 0xa7c   : > { %5722 = vmatpush1.bf16.msra.mxu1 %v18150_v38 }
 0xa7d   : > { %5723 = vmatprep.subr.bf16.mxu1 %v18158_v41 }
 0xa7e   : > { %5767 = vmatpush1.bf16.msra.mxu0 %v18165_v53 }
 0xa7f   : > { %5768 = vmatprep.subr.bf16.mxu0 %v18173_v55 }
 0xa80   : > { %5724 = vmatpush1.bf16.msra.mxu1 %v18156_v43 }
 0xa81   : > { %5725 = vmatprep.subr.bf16.mxu1 %v18164_v50 }
 0xa82   : > { %5769 = vmatpush1.bf16.msra.mxu0 %v18171_v57 }
 0xa83   : > { %5770 = vmatprep.subr.bf16.mxu0 %v18179_v60 }
 0xa84   : > { %5726 = vmatpush1.bf16.msra.mxu1 %v18162_v52 }
 0xa85   : > { %5727 = vmatprep.subr.bf16.mxu1 %v18170_v54 }
 0xa86   : > { %5771 = vmatpush1.bf16.msra.mxu0 %v18177_v62 }
 0xa87   : > { %5772 = vmatprep.subr.bf16.mxu0 %v18185_v31  ;;  %v18209_v31 = vld [vmem:[%s21961_s13 + $0x644] ss:$24 sps:$4 sm:$0xff]  }
 0xa88   : > { %5728 = vmatpush1.bf16.msra.mxu1 %v18168_v56 }
 0xa89   : > { %5729 = vmatprep.subr.bf16.mxu1 %v18176_v58 }
 0xa8a   : > { %5773 = vmatpush1.bf16.msra.mxu0 %v18183_v40  ;;  %v18270_v40 = vld [vmem:[%s21962_s10 + $0x48] sm:$0xff]  }
 0xa8b   : > { %5774 = vmatprep.subr.bf16.mxu0 %v18191_v48  ;;  %v18210_v48 = vld [vmem:[%s21961_s13 + $0x670] ss:$24 sps:$4 sm:$0xff]  }
 0xa8c   : > { %5730 = vmatpush1.bf16.msra.mxu1 %v18174_v61  ;;  %v18204_v61 = vld [vmem:[%s21961_s13 + $0x610] ss:$24 sps:$4 sm:$0xff]  }
 0xa8d   : > { %5731 = vmatprep.subr.bf16.mxu1 %v18182_v63 }
 0xa8e   : > { %5775 = vmatpush1.bf16.msra.mxu0 %v18189_v59  ;;  %v18274_v59 = vld [vmem:[%s21962_s10 + $0x58] sm:$0xff]  }
 0xa8f   : > { %5776 = vmatprep.subr.bf16.mxu0 %v18197_v17  ;;  %v18278_v17 = vld [vmem:[%s21962_s10 + $0x68] sm:$0xff]  }
 0xa90   : > { %5732 = vmatpush1.bf16.msra.mxu1 %v18180_v0  ;;  %v18269_v0 = vld [vmem:[%s21962_s10] sm:$0xff]  }
 0xa91   : > { %5733 = vmatprep.subr.bf16.mxu1 %v18188_v1  ;;  %v18207_v1 = vld [vmem:[%s21961_s13 + $0x640] ss:$24 sps:$4 sm:$0xff]  }
 0xa92   : > { %5777 = vmatpush1.bf16.msra.mxu0 %v18195_v16  ;;  %v18277_v16 = vld [vmem:[%s21962_s10 + $0x20] sm:$0xff]  }
 0xa93   : > { %5778 = vmatprep.subr.bf16.mxu0 %v18203_v20  ;;  %v18279_v20 = vld [vmem:[%s21962_s10 + $0x28] sm:$0xff]  }
 0xa94   : > { %5734 = vmatpush1.bf16.msra.mxu1 %v18186_v4  ;;  %v18272_v4 = vld [vmem:[%s21962_s10 + $0x50] sm:$0xff]  }
 0xa95   : > { %5735 = vmatprep.subr.bf16.mxu1 %v18194_v14  ;;  %v18216_v14 = vld [vmem:[%s21961_s13 + $0x6d0] ss:$24 sps:$4 sm:$0xff]  }
 0xa96   : > { %5779 = vmatpush1.bf16.msra.mxu0 %v18201_v21  ;;  %v18222_v21 = vld [vmem:[%s21961_s13 + $0x730] ss:$24 sps:$4 sm:$0xff]  }
 0xa97   : > { %17052 = vmatprep.subr.bf16.mxu0 %v18268_v37  ;;  %v18237_v37 = vld [vmem:[%s21961_s13 + $0x820] ss:$24 sps:$4 sm:$0xff]  }
 0xa98   : > { %5736 = vmatpush1.bf16.msra.mxu1 %v18192_v15  ;;  %v18221_v15 = vld [vmem:[%s21961_s13 + $0x704] ss:$24 sps:$4 sm:$0xff]  }
 0xa99   : > { %5737 = vmatprep.subr.bf16.mxu1 %v18200_v18  ;;  %v18219_v18 = vld [vmem:[%s21961_s13 + $0x700] ss:$24 sps:$4 sm:$0xff]  }
 0xa9c   : > { %5738 = vmatpush1.bf16.msra.mxu1 %v18198_v19  ;;  %v18224_v19 = vld [vmem:[%s21961_s13 + $0x734] ss:$24 sps:$4 sm:$0xff]  }
 0xa9d   : > { %5789 = vmatprep.subr.bf16.mxu1 %v18206_v22  ;;  %v18227_v22 = vld [vmem:[%s21961_s13 + $0x764] ss:$24 sps:$4 sm:$0xff]  }
 0xaaa   : > { %v4390_v2 = vpop.f32.mrb[36].mxu1  ;;  %v4431_v3 = vpop.f32.mrb[36].mxu0 }
 0xaab   : > { %v4392_v5 = vpop.f32.mrb[37].mxu1  ;;  %v4433_v6 = vpop.f32.mrb[37].mxu0 }
 0xaac   : > { %v4394_v8 = vpop.f32.mrb[38].mxu1  ;;  %v4435_v9 = vpop.f32.mrb[38].mxu0 }
 0xaad   : > { %v4395_v11 = vpop.f32.mrb[39].mxu1  ;;  %v4436_v13 = vpop.f32.mrb[39].mxu0  ;;  %v18213_v8 = vld [vmem:[%s21961_s13 + $0x6a0] ss:$24 sps:$4 sm:$0xff]   ;;  %v18218_v9 = vld [vmem:[%s21961_s13 + $0x6d4] ss:$24 sps:$4 sm:$0xff]  }
 0xaae   : > { %v18275_v11 = vld [vmem:[%s21962_s10 + $0x18] sm:$0xff]   ;;  %v18276_v13 = vld [vmem:[%s21962_s10 + $0x60] sm:$0xff]  }
 0xaea   : > { %v4472_v24 = vpop.f32.mrb[40].mxu1  ;;  %v4993_v25 = vpop.f32.mrb[40].mxu0 }
 0xaeb   : > { %v20812_v28 = vadd.f32 %v4993_v25, %v4390_v2  ;;  %v4474_v30 = vpop.f32.mrb[41].mxu1  ;;  %v4995_v32 = vpop.f32.mrb[41].mxu0  ;;  %v18212_v2 = vld [vmem:[%s21961_s13 + $0x674] ss:$24 sps:$4 sm:$0xff]  }
 0xaec   : > { %v20814_v33 = vadd.f32 %v4995_v32, %v4392_v5  ;;  %v4476_v7 = vpop.f32.mrb[42].mxu1  ;;  %v4997_v34 = vpop.f32.mrb[42].mxu0  ;;  %v18215_v5 = vld [vmem:[%s21961_s13 + $0x6a4] ss:$24 sps:$4 sm:$0xff]   ;;  %v18230_v25 = vld [vmem:[%s21961_s13 + $0x794] ss:$24 sps:$4 sm:$0xff]  }
 0xaed   : > { %v4477_v35 = vpop.f32.mrb[43].mxu1  ;;  %v4998_v36 = vpop.f32.mrb[43].mxu0  ;;  %v18233_v32 = vld [vmem:[%s21961_s13 + $0x7c4] ss:$24 sps:$4 sm:$0xff]   ;;  %v18231_v7 = vld [vmem:[%s21961_s13 + $0x7c0] ss:$24 sps:$4 sm:$0xff]  }
 0xaee   : > { %v18236_v34 = vld [vmem:[%s21961_s13 + $0x7f4] ss:$24 sps:$4 sm:$0xff]   ;;  %v18234_v35 = vld [vmem:[%s21961_s13 + $0x7f0] ss:$24 sps:$4 sm:$0xff]   ;;  %v18239_v36 = vld [vmem:[%s21961_s13 + $0x824] ss:$24 sps:$4 sm:$0xff]  }
 0xb2a   : > { %v5034_v38 = vpop.f32.mrb[44].mxu1 }
 0xb2b   : > { %v20817_v39 = vadd.f32 %v5034_v38, %v4431_v3  ;;  %v5075_v41 = vpop.f32.mrb[44].mxu0  ;;  %v5036_v42 = vpop.f32.mrb[45].mxu1  ;;  %v18271_v3 = vld [vmem:[%s21962_s10 + $0x8] sm:$0xff]  }
 0xb2c   : > { %v20819_v43 = vadd.f32 %v5075_v41, %v4472_v24  ;;  %v20821_v49 = vadd.f32 %v5036_v42, %v4433_v6  ;;  %v5077_v50 = vpop.f32.mrb[45].mxu0  ;;  %v5038_v51 = vpop.f32.mrb[46].mxu1  ;;  %v18273_v6 = vld [vmem:[%s21962_s10 + $0x10] sm:$0xff]   ;;  %v18225_v24 = vld [vmem:[%s21961_s13 + $0x760] ss:$24 sps:$4 sm:$0xff]  }
 0xb2d   : > { %v20823_v52 = vadd.f32 %v5077_v50, %v4474_v30  ;;  %v5079_v53 = vpop.f32.mrb[46].mxu0  ;;  %v5039_v54 = vpop.f32.mrb[47].mxu1  ;;  %v18228_v30 = vld [vmem:[%s21961_s13 + $0x790] ss:$24 sps:$4 sm:$0xff]   ;;  %v18242_v38 = vld [vmem:[%s21961_s13 + $0x854] ss:$24 sps:$4 sm:$0xff]  }
 0xb2e   : > { %v5080_v55 = vpop.f32.mrb[47].mxu0  ;;  %v18240_v41 = vld [vmem:[%s21961_s13 + $0x850] ss:$24 sps:$4 sm:$0xff]   ;;  %v18245_v42 = vld [vmem:[%s21961_s13 + $0x884] ss:$24 sps:$4 sm:$0xff]  }
 0xb2f   : > { %v18243_v50 = vld [vmem:[%s21961_s13 + $0x880] ss:$24 sps:$4 sm:$0xff]   ;;  %v18248_v51 = vld [vmem:[%s21961_s13 + $0x8b4] ss:$24 sps:$4 sm:$0xff]   ;;  %v18246_v53 = vld [vmem:[%s21961_s13 + $0x8b0] ss:$24 sps:$4 sm:$0xff]  }
 0xb30   : > { %v18251_v54 = vld [vmem:[%s21961_s13 + $0x8e4] ss:$24 sps:$4 sm:$0xff]   ;;  %v18249_v55 = vld [vmem:[%s21961_s13 + $0x8e0] ss:$24 sps:$4 sm:$0xff]  }
 0xb32   : > { %v5121_v56 = vpop.f32.mrb[48].mxu1 }
 0xb33   : > { %v5123_v57 = vpop.f32.mrb[49].mxu1  ;;  %v20826_v62 = vpack.c.bf16 %v5121_v56, %v5121_v56  ;;  %v18252_v56 = vld [vmem:[%s21962_s10 + $0xc0] sm:$0xff]  }
 0xb34   : > { %v5129_v58 = vpack.c.bf16 %v5123_v57, %v5123_v57  ;;  %v5125_v60 = vpop.f32.mrb[50].mxu1  ;;  %v18253_v57 = vld [vmem:[%s21962_s10 + $0x80] sm:$0xff]  }
 0xb35   : > { %v5126_v63 = vpop.f32.mrb[51].mxu1  ;;  %v18255_v60 = vld [vmem:[%s21962_s10 + $0x88] sm:$0xff]  }
 0xb36   : > { %5739 = vmatprep.mubr.bf16.mxu1 %v5129_v58  ;;  %5780 = vmatprep.mubr.bf16.mxu0 %v5129_v58  ;;  %v18257_v63 = vld [vmem:[%s21962_s10 + $0x90] sm:$0xff]  }
 0xb37   : > { %5740 = vmatmul.mubr.bf16.vlgmr.msra.gmra.mrb[52].mxu1 %v20826_v62  ;;  %5781 = vmatmul.mubr.bf16.vlgmr.msra.gmra.mrb[48].mxu0 %v20826_v62 }
 0xb38   : > { %5790 = vmatpush1.bf16.msra.mxu1 %v18204_v61  ;;  %5821 = vmatprep.mubr.bf16.mxu1 %v5129_v58  ;;  %v18254_v58 = vld [vmem:[%s21962_s10 + $0xc8] sm:$0xff]   ;;  %v18256_v61 = vld [vmem:[%s21962_s10 + $0xd0] sm:$0xff]  }
 0xb39   : > { %5791 = vmatprep.subr.bf16.mxu1 %v18209_v31  ;;  %17053 = vmatpush3.bf16.msra.mxu0 %v18269_v0  ;;  %v18258_v31 = vld [vmem:[%s21962_s10 + $0xd8] sm:$0xff]  }
 0xb3a   : > { %17054 = vmatprep.subr.bf16.mxu0 %v18270_v40  ;;  %v18259_v0 = vld [vmem:[%s21962_s10 + $0x98] sm:$0xff]   ;;  %v18260_v40 = vld [vmem:[%s21962_s10 + $0xe0] sm:$0xff]  }
 0xb3c   : > { %5792 = vmatpush1.bf16.msra.mxu1 %v18207_v1  ;;  %v18262_v1 = vld [vmem:[%s21962_s10 + $0xe8] sm:$0xff]  }
 0xb3d   : > { %5793 = vmatprep.subr.bf16.mxu1 %v18212_v2  ;;  %17055 = vmatpush3.bf16.msra.mxu0 %v18271_v3  ;;  %v18263_v2 = vld [vmem:[%s21962_s10 + $0xa8] sm:$0xff]   ;;  %v18264_v3 = vld [vmem:[%s21962_s10 + $0xf0] sm:$0xff]  }
 0xb3e   : > { %17056 = vmatprep.subr.bf16.mxu0 %v18272_v4  ;;  %v18280_v4 = vld [vmem:[%s21962_s10 + $0x70] sm:$0xff]  }
 0xb40   : > { %5794 = vmatpush1.bf16.msra.mxu1 %v18210_v48  ;;  %v18265_v48 = vld [vmem:[%s21962_s10 + $0xb0] sm:$0xff]  }
 0xb41   : > { %5795 = vmatprep.subr.bf16.mxu1 %v18215_v5  ;;  %17057 = vmatpush3.bf16.msra.mxu0 %v18273_v6  ;;  %v18281_v5 = vld [vmem:[%s21962_s10 + $0x30] sm:$0xff]   ;;  %v18266_v6 = vld [vmem:[%s21962_s10 + $0xf8] sm:$0xff]  }
 0xb42   : > { %17058 = vmatprep.subr.bf16.mxu0 %v18274_v59  ;;  %v18282_v59 = vld [vmem:[%s21962_s10 + $0x78] sm:$0xff]  }
 0xb44   : > { %5796 = vmatpush1.bf16.msra.mxu1 %v18213_v8  ;;  %v18267_v8 = vld [vmem:[%s21962_s10 + $0xb8] sm:$0xff]  }
 0xb45   : > { %5797 = vmatprep.subr.bf16.mxu1 %v18218_v9  ;;  %17059 = vmatpush3.bf16.msra.mxu0 %v18275_v11  ;;  %v18283_v9 = vld [vmem:[%s21962_s10 + $0x38] sm:$0xff]   ;;  %v18284_v11 = vld [vmem:[%s21962_s10 + $0x140] sm:$0xff]  }
 0xb46   : > { %17060 = vmatprep.subr.bf16.mxu0 %v18276_v13  ;;  %v20896_v13 = vsub.s32 2, %v20379_v26 }
 0xb48   : > { %5798 = vmatpush1.bf16.msra.mxu1 %v18216_v14  ;;  %v20898_v14 = vld [vmem:[#allocation16] sm:$0x3f] }
 0xb49   : > { %5799 = vmatprep.subr.bf16.mxu1 %v18221_v15  ;;  %17061 = vmatpush3.bf16.msra.mxu0 %v18277_v16  ;;  %v20901_v15 = vsub.s32 3, %v20379_v26  ;;  %v5841_v16 = vrot.slane %v20898_v14, %v20382_v27 }
 0xb4a   : > { %17062 = vmatprep.subr.bf16.mxu0 %v18278_v17  ;;  %v5849_v17 = vrot.slane %v20898_v14, %v20896_v13 }
 0xb4c   : > { %5800 = vmatpush1.bf16.msra.mxu1 %v18219_v18 }
 0xb4d   : > { %5801 = vmatprep.subr.bf16.mxu1 %v18224_v19  ;;  %17063 = vmatpush3.bf16.msra.mxu0 %v18279_v20  ;;  %v5845_v20 = vrot.slane %v20898_v14, %v20385_v29 }
 0xb4e   : > { %17064 = vmatprep.subr.bf16.mxu0 %v18280_v4  ;;  %v18301_v4 = vld [vmem:[#allocation21 + $0x124] ss:$8 sps:$4 sm:$0xff]  }
 0xb50   : > { %5802 = vmatpush1.bf16.msra.mxu1 %v18222_v21  ;;  %v5853_v21 = vrot.slane %v20898_v14, %v20901_v15 }
 0xb51   : > { %5803 = vmatprep.subr.bf16.mxu1 %v18227_v22  ;;  %17065 = vmatpush3.bf16.msra.mxu0 %v18281_v5  ;;  %v18302_v5 = vld [vmem:[%s21962_s10 + $0x120] sm:$0xff]  }
 0xb52   : > { %17066 = vmatprep.subr.bf16.mxu0 %v18282_v59  ;;  %v18306_v59 = vld [vmem:[#allocation21 + $0x134] ss:$8 sps:$4 sm:$0xff]  }
 0xb54   : > { %5804 = vmatpush1.bf16.msra.mxu1 %v18225_v24 }
 0xb55   : > { %5805 = vmatprep.subr.bf16.mxu1 %v18230_v25  ;;  %17067 = vmatpush3.bf16.msra.mxu0 %v18283_v9  ;;  %v18307_v9 = vld [vmem:[%s21962_s10 + $0x128] sm:$0xff]  }
 0xb56   : > { %17096 = vmatprep.subr.bf16.mxu0 %v18284_v11  ;;  %v18308_v11 = vld [vmem:[%s21962_s10 + $0x170] sm:$0xff]  }
 0xb58   : > { %5806 = vmatpush1.bf16.msra.mxu1 %v18228_v30 }
 0xb59   : > { %5807 = vmatprep.subr.bf16.mxu1 %v18233_v32 }
 0xb5c   : > { %5808 = vmatpush1.bf16.msra.mxu1 %v18231_v7 }
 0xb5d   : > { %5809 = vmatprep.subr.bf16.mxu1 %v18236_v34 }
 0xb60   : > { %5810 = vmatpush1.bf16.msra.mxu1 %v18234_v35 }
 0xb61   : > { %5811 = vmatprep.subr.bf16.mxu1 %v18239_v36 }
 0xb64   : > { %5812 = vmatpush1.bf16.msra.mxu1 %v18237_v37 }
 0xb65   : > { %5813 = vmatprep.subr.bf16.mxu1 %v18242_v38 }
 0xb68   : > { %5814 = vmatpush1.bf16.msra.mxu1 %v18240_v41 }
 0xb69   : > { %5815 = vmatprep.subr.bf16.mxu1 %v18245_v42 }
 0xb6c   : > { %5816 = vmatpush1.bf16.msra.mxu1 %v18243_v50 }
 0xb6d   : > { %5817 = vmatprep.subr.bf16.mxu1 %v18248_v51 }
 0xb70   : > { %5818 = vmatpush1.bf16.msra.mxu1 %v18246_v53 }
 0xb71   : > { %5819 = vmatprep.subr.bf16.mxu1 %v18251_v54 }
 0xb74   : > { %5820 = vmatpush1.bf16.msra.mxu1 %v18249_v55  ;;  %v18285_v55 = vld [vmem:[%s21962_s10 + $0x100] sm:$0xff]  }
 0xb75   : > { %17074 = vmatprep.subr.bf16.mxu1 %v18252_v56 }
 0xb77   : > { %5822 = vmatmul.mubr.bf16.vlgmr.msra.gmra.mrb[56].mxu1 %v20826_v62  ;;  %v18261_v62 = vld [vmem:[%s21962_s10 + $0xa0] sm:$0xff]  }
 0xb78   : > { %17075 = vmatpush3.bf16.msra.mxu1 %v18253_v57  ;;  %v18286_v57 = vld [vmem:[%s21962_s10 + $0x148] sm:$0xff]  }
 0xb79   : > { %17076 = vmatprep.subr.bf16.mxu1 %v18254_v58  ;;  %v18291_v58 = vld [vmem:[#allocation21 + $0x104] ss:$8 sps:$4 sm:$0xff]  }
 0xb7c   : > { %17077 = vmatpush3.bf16.msra.mxu1 %v18255_v60  ;;  %v18287_v60 = vld [vmem:[%s21962_s10 + $0x108] sm:$0xff]  }
 0xb7d   : > { %17078 = vmatprep.subr.bf16.mxu1 %v18256_v61  ;;  %v18288_v61 = vld [vmem:[%s21962_s10 + $0x150] sm:$0xff]  }
 0xb80   : > { %17079 = vmatpush3.bf16.msra.mxu1 %v18257_v63  ;;  %v18289_v63 = vld [vmem:[#allocation21 + $0x100] ss:$8 sps:$4 sm:$0xff]  }
 0xb81   : > { %17080 = vmatprep.subr.bf16.mxu1 %v18258_v31  ;;  %v18292_v31 = vld [vmem:[%s21962_s10 + $0x110] sm:$0xff]  }
 0xb84   : > { %17081 = vmatpush3.bf16.msra.mxu1 %v18259_v0  ;;  %v6399_v0 = vld [vmem:[#allocation19] sm:$0x3] }
 0xb85   : > { %17082 = vmatprep.subr.bf16.mxu1 %v18260_v40  ;;  %v18293_v40 = vld [vmem:[%s21962_s10 + $0x158] sm:$0xff]  }
 0xb88   : > { %17083 = vmatpush3.bf16.msra.mxu1 %v18261_v62  ;;  %v18296_v62 = vld [vmem:[#allocation21 + $0x114] ss:$8 sps:$4 sm:$0xff]  }
 0xb89   : > { %17084 = vmatprep.subr.bf16.mxu1 %v18262_v1  ;;  %v18294_v1 = vld [vmem:[#allocation21 + $0x110] ss:$8 sps:$4 sm:$0xff]  }
 0xb8c   : > { %17085 = vmatpush3.bf16.msra.mxu1 %v18263_v2  ;;  %v18297_v2 = vld [vmem:[%s21962_s10 + $0x118] sm:$0xff]  }
 0xb8d   : > { %17086 = vmatprep.subr.bf16.mxu1 %v18264_v3  ;;  %v18298_v3 = vld [vmem:[%s21962_s10 + $0x160] sm:$0xff]  }
 0xb90   : > { %17087 = vmatpush3.bf16.msra.mxu1 %v18265_v48  ;;  %v18299_v48 = vld [vmem:[#allocation21 + $0x120] ss:$8 sps:$4 sm:$0xff]  }
 0xb91   : > { %17088 = vmatprep.subr.bf16.mxu1 %v18266_v6  ;;  %v18303_v6 = vld [vmem:[%s21962_s10 + $0x168] sm:$0xff]  }
 0xb94   : > { %17089 = vmatpush3.bf16.msra.mxu1 %v18267_v8  ;;  %v18304_v8 = vld [vmem:[#allocation21 + $0x130] ss:$8 sps:$4 sm:$0xff]  }
 0xb95   : > { %15751 = vmatprep.subr.msk.bf16.mxu1 %vm3585_vm6, %v20545_v46 }
 0xc0a   : > { %v5741_v18 = vpop.f32.mrb[52].mxu1  ;;  %v5782_v19 = vpop.f32.mrb[48].mxu0 }
 0xc0b   : > { %v5830_v22 = vadd.f32 %v5741_v18, %v20812_v28  ;;  %v5832_v24 = vadd.f32 %v5782_v19, %v20817_v39  ;;  %v5743_v25 = vpop.f32.mrb[53].mxu1  ;;  %v5784_v30 = vpop.f32.mrb[49].mxu0  ;;  %v18312_v18 = vld [vmem:[%s21962_s10 + $0x130] sm:$0xff]   ;;  %v18313_v19 = vld [vmem:[%s21962_s10 + $0x178] sm:$0xff]  }
 0xc0c   : > { %v5831_v32 = vadd.f32 %v5743_v25, %v20814_v33  ;;  %v5833_v7 = vadd.f32 %v5784_v30, %v20821_v49  ;;  %v5745_v34 = vpop.f32.mrb[54].mxu1  ;;  %v5786_v35 = vpop.f32.mrb[50].mxu0  ;;  %v18318_v25 = vld [vmem:[#allocation21 + $0x160] ss:$8 sps:$4 sm:$0xff]   ;;  %v18323_v30 = vld [vmem:[#allocation21 + $0x174] ss:$8 sps:$4 sm:$0xff]  }
 0xc0d   : > { %v5868_v36 = vadd.f32 %v5841_v16, %v5830_v22  ;;  %v5870_v37 = vadd.f32 %v5849_v17, %v5832_v24  ;;  %v5746_v38 = vpop.f32.mrb[55].mxu1  ;;  %v5787_v41 = vpop.f32.mrb[51].mxu0  ;;  %v18311_v16 = vld [vmem:[#allocation21 + $0x144] ss:$8 sps:$4 sm:$0xff]   ;;  %v18309_v17 = vld [vmem:[#allocation21 + $0x140] ss:$8 sps:$4 sm:$0xff]  }
 0xc0e   : > { %v5869_v42 = vadd.f32 %v5845_v20, %v5831_v32  ;;  %v5871_v50 = vadd.f32 %v5853_v21, %v5833_v7  ;;  %v18316_v20 = vld [vmem:[#allocation21 + $0x154] ss:$8 sps:$4 sm:$0xff]   ;;  %v18314_v21 = vld [vmem:[#allocation21 + $0x150] ss:$8 sps:$4 sm:$0xff]   ;;  %v18320_v24 = vld [vmem:[#allocation21 + $0x164] ss:$8 sps:$4 sm:$0xff]  }
 0xc0f   : > { %v5874_v51 = vmax.f32 %v5868_v36, 0.0  ;;  %v5876_v28 = vmax.f32 %v5870_v37, 0.0  ;;  %v18317_v22 = vld [vmem:[%s21962_s10 + $0x138] sm:$0xff]   ;;  %v18326_v7 = vld [vmem:[#allocation21 + $0x184] ss:$8 sps:$4 sm:$0xff]  }
 0xc10   : > { %v5875_v39 = vmax.f32 %v5869_v42, 0.0  ;;  %v5877_v53 = vmax.f32 %v5871_v50, 0.0  ;;  %v18321_v32 = vld [vmem:[#allocation21 + $0x170] ss:$8 sps:$4 sm:$0xff]   ;;  %v18324_v34 = vld [vmem:[#allocation21 + $0x180] ss:$8 sps:$4 sm:$0xff]  }
 0xc11   : > { %v5880_v56 = vpack.c.bf16 %v5874_v51, %v5874_v51  ;;  %v5882_v49 = vpack.c.bf16 %v5876_v28, %v5876_v28  ;;  %v18329_v35 = vld [vmem:[#allocation21 + $0x194] ss:$8 sps:$4 sm:$0xff]   ;;  %v18327_v36 = vld [vmem:[#allocation21 + $0x190] ss:$8 sps:$4 sm:$0xff]   ;;  %v18332_v37 = vld [vmem:[#allocation21 + $0x1a4] ss:$8 sps:$4 sm:$0xff]  }
 0xc12   : > { %v5881_v54 = vpack.c.bf16 %v5875_v39, %v5875_v39  ;;  %v5883_v33 = vpack.c.bf16 %v5877_v53, %v5877_v53  ;;  %v18330_v38 = vld [vmem:[#allocation21 + $0x1a0] ss:$8 sps:$4 sm:$0xff]   ;;  %v18335_v41 = vld [vmem:[#allocation21 + $0x1b4] ss:$8 sps:$4 sm:$0xff]   ;;  %v5856_v42 = vsub.s32 4, %v20379_v26  ;;  %v5860_v51 = vsub.s32 5, %v20379_v26 }
 0xc13   : > { %v18333_v50 = vld [vmem:[#allocation21 + $0x1b0] ss:$8 sps:$4 sm:$0xff]   ;;  %v18338_v28 = vld [vmem:[#allocation21 + $0x1c4] ss:$8 sps:$4 sm:$0xff]  }
 0xc14   : > { %6309 = vmatprep.mubr.bf16.mxu0 %v5881_v54  ;;  %6349 = vmatprep.mubr.bf16.mxu1 %v5883_v33  ;;  %v5857_v39 = vrot.slane %v20898_v14, %v5856_v42  ;;  %v5861_v54 = vrot.slane %v20898_v14, %v5860_v51  ;;  %v18336_v33 = vld [vmem:[#allocation21 + $0x1c0] ss:$8 sps:$4 sm:$0xff]  }
 0xc15   : > { %6310 = vmatmul.mubr.bf16.vlgmr.msra.gmra.mrb[52].mxu0 %v5880_v56  ;;  %6350 = vmatmul.mubr.bf16.vlgmr.msra.gmra.mrb[60].mxu1 %v5882_v49  ;;  %v18341_v49 = vld [vmem:[#allocation21 + $0x1d4] ss:$8 sps:$4 sm:$0xff]   ;;  %v18342_v14 = vld [vmem:[#allocation21 + $0x1e0] ss:$8 sps:$4 sm:$0xff]  }
 0xc16   : > { %17097 = vmatpush3.bf16.msra.mxu0 %v18285_v55  ;;  %6404 = vmatpush1.bf16.msra.mxu1 %v20548_v47 }
 0xc17   : > { %17098 = vmatprep.subr.bf16.mxu0 %v18286_v57  ;;  %6435 = vmatprep.mubr.bf16.mxu1 %v19844_v23 }
 0xc18   : > { %6719 = vmatprep.subr.bf16.mxu1 %v18291_v58 }
 0xc1a   : > { %17099 = vmatpush3.bf16.msra.mxu0 %v18287_v60 }
 0xc1b   : > { %17100 = vmatprep.subr.bf16.mxu0 %v18288_v61 }
 0xc1d   : > { %15752 = vmatmul.mubr.msk.bf16.vlgmr.msra.gmra.mrb[64].mxu1 %vm3581_vm7, %v6399_v0 }
 0xc1e   : > { %17101 = vmatpush3.bf16.msra.mxu0 %v18292_v31  ;;  %6720 = vmatpush1.bf16.msra.mxu1 %v18289_v63  ;;  %v18339_v31 = vld [vmem:[#allocation21 + $0x1d0] ss:$8 sps:$4 sm:$0xff]  }
 0xc1f   : > { %17102 = vmatprep.subr.bf16.mxu0 %v18293_v40  ;;  %6721 = vmatprep.subr.bf16.mxu1 %v18296_v62  ;;  %v18344_v40 = vld [vmem:[#allocation21 + $0x1e4] ss:$8 sps:$4 sm:$0xff]  }
 0xc22   : > { %17103 = vmatpush3.bf16.msra.mxu0 %v18297_v2  ;;  %6722 = vmatpush1.bf16.msra.mxu1 %v18294_v1 }
 0xc23   : > { %17104 = vmatprep.subr.bf16.mxu0 %v18298_v3  ;;  %6723 = vmatprep.subr.bf16.mxu1 %v18301_v4  ;;  %v6479_v3 = vld [vmem:[#allocation19 + $0x2] sm:$0x3]  ;;  %v18348_v4 = vld [vmem:[#allocation21] ss:$8 sps:$4 sm:$0xff]  }
 0xc26   : > { %17105 = vmatpush3.bf16.msra.mxu0 %v18302_v5  ;;  %6724 = vmatpush1.bf16.msra.mxu1 %v18299_v48  ;;  %v18350_v48 = vld [vmem:[#allocation21 + $0x4] ss:$8 sps:$4 sm:$0xff]   ;;  %v18353_v5 = vld [vmem:[#allocation21 + $0x14] ss:$8 sps:$4 sm:$0xff]  }
 0xc27   : > { %17106 = vmatprep.subr.bf16.mxu0 %v18303_v6  ;;  %6725 = vmatprep.subr.bf16.mxu1 %v18306_v59  ;;  %v18351_v6 = vld [vmem:[#allocation21 + $0x10] ss:$8 sps:$4 sm:$0xff]   ;;  %v18356_v59 = vld [vmem:[#allocation21 + $0x24] ss:$8 sps:$4 sm:$0xff]  }
 0xc2a   : > { %17107 = vmatpush3.bf16.msra.mxu0 %v18307_v9  ;;  %6726 = vmatpush1.bf16.msra.mxu1 %v18304_v8  ;;  %v18354_v8 = vld [vmem:[#allocation21 + $0x20] ss:$8 sps:$4 sm:$0xff]   ;;  %v18359_v9 = vld [vmem:[#allocation21 + $0x34] ss:$8 sps:$4 sm:$0xff]  }
 0xc2b   : > { %17108 = vmatprep.subr.bf16.mxu0 %v18308_v11  ;;  %6727 = vmatprep.subr.bf16.mxu1 %v18311_v16  ;;  %v18357_v11 = vld [vmem:[#allocation21 + $0x30] ss:$8 sps:$4 sm:$0xff]   ;;  %v18362_v16 = vld [vmem:[#allocation21 + $0x44] ss:$8 sps:$4 sm:$0xff]  }
 0xc2e   : > { %17109 = vmatpush3.bf16.msra.mxu0 %v18312_v18  ;;  %6728 = vmatpush1.bf16.msra.mxu1 %v18309_v17  ;;  %v18365_v17 = vld [vmem:[#allocation21 + $0x54] ss:$8 sps:$4 sm:$0xff]   ;;  %v18363_v18 = vld [vmem:[#allocation21 + $0x50] ss:$8 sps:$4 sm:$0xff]  }
 0xc2f   : > { %17110 = vmatprep.subr.bf16.mxu0 %v18313_v19  ;;  %6729 = vmatprep.subr.bf16.mxu1 %v18316_v20  ;;  %v18368_v19 = vld [vmem:[#allocation21 + $0x64] ss:$8 sps:$4 sm:$0xff]   ;;  %v18366_v20 = vld [vmem:[#allocation21 + $0x60] ss:$8 sps:$4 sm:$0xff]  }
 0xc32   : > { %17111 = vmatpush3.bf16.msra.mxu0 %v18317_v22  ;;  %6730 = vmatpush1.bf16.msra.mxu1 %v18314_v21  ;;  %v18371_v21 = vld [vmem:[#allocation21 + $0x74] ss:$8 sps:$4 sm:$0xff]   ;;  %v18369_v22 = vld [vmem:[#allocation21 + $0x70] ss:$8 sps:$4 sm:$0xff]  }
 0xc33   : > { %15753 = vmatprep.subr.msk.bf16.mxu0 %vm3585_vm6, %v20545_v46  ;;  %6731 = vmatprep.subr.bf16.mxu1 %v18320_v24  ;;  %v18374_v24 = vld [vmem:[#allocation21 + $0x84] ss:$8 sps:$4 sm:$0xff]  }
 0xc36   : > { %6732 = vmatpush1.bf16.msra.mxu1 %v18318_v25  ;;  %v18372_v25 = vld [vmem:[#allocation21 + $0x80] ss:$8 sps:$4 sm:$0xff]  }
 0xc37   : > { %6733 = vmatprep.subr.bf16.mxu1 %v18323_v30  ;;  %v18377_v30 = vld [vmem:[#allocation21 + $0x94] ss:$8 sps:$4 sm:$0xff]  }
 0xc3a   : > { %6734 = vmatpush1.bf16.msra.mxu1 %v18321_v32  ;;  %v18375_v32 = vld [vmem:[#allocation21 + $0x90] ss:$8 sps:$4 sm:$0xff]  }
 0xc3b   : > { %6735 = vmatprep.subr.bf16.mxu1 %v18326_v7  ;;  %v18380_v7 = vld [vmem:[#allocation21 + $0xa4] ss:$8 sps:$4 sm:$0xff]  }
 0xc3e   : > { %6736 = vmatpush1.bf16.msra.mxu1 %v18324_v34  ;;  %v18378_v34 = vld [vmem:[#allocation21 + $0xa0] ss:$8 sps:$4 sm:$0xff]  }
 0xc3f   : > { %6737 = vmatprep.subr.bf16.mxu1 %v18329_v35  ;;  %v18383_v35 = vld [vmem:[#allocation21 + $0xb4] ss:$8 sps:$4 sm:$0xff]  }
 0xc42   : > { %6738 = vmatpush1.bf16.msra.mxu1 %v18327_v36  ;;  %v18381_v36 = vld [vmem:[#allocation21 + $0xb0] ss:$8 sps:$4 sm:$0xff]  }
 0xc43   : > { %6739 = vmatprep.subr.bf16.mxu1 %v18332_v37  ;;  %v18386_v37 = vld [vmem:[#allocation21 + $0xc4] ss:$8 sps:$4 sm:$0xff]  }
 0xc46   : > { %6740 = vmatpush1.bf16.msra.mxu1 %v18330_v38  ;;  %v18384_v38 = vld [vmem:[#allocation21 + $0xc0] ss:$8 sps:$4 sm:$0xff]  }
 0xc47   : > { %6741 = vmatprep.subr.bf16.mxu1 %v18335_v41  ;;  %v18389_v41 = vld [vmem:[#allocation21 + $0xd4] ss:$8 sps:$4 sm:$0xff]  }
 0xc4a   : > { %v5823_v53 = vpop.f32.mrb[56].mxu1  ;;  %6742 = vmatpush1.bf16.msra.mxu1 %v18333_v50  ;;  %v18387_v50 = vld [vmem:[#allocation21 + $0xd0] ss:$8 sps:$4 sm:$0xff]  }
 0xc4b   : > { %v5834_v55 = vadd.f32 %v5823_v53, %v20819_v43  ;;  %v5825_v56 = vpop.f32.mrb[57].mxu1  ;;  %6743 = vmatprep.subr.bf16.mxu1 %v18338_v28  ;;  %v18347_v43 = vld [vmem:[#allocation21 + $0x1f4] ss:$8 sps:$4 sm:$0xff]   ;;  %v18392_v28 = vld [vmem:[#allocation21 + $0xe4] ss:$8 sps:$4 sm:$0xff]  }
 0xc4c   : > { %v5835_v57 = vadd.f32 %v5825_v56, %v20823_v52  ;;  %v5827_v58 = vpop.f32.mrb[58].mxu1  ;;  %v18345_v52 = vld [vmem:[#allocation21 + $0x1f0] ss:$8 sps:$4 sm:$0xff]   ;;  %v18395_v53 = vld [vmem:[#allocation21 + $0xf4] ss:$8 sps:$4 sm:$0xff]  }
 0xc4d   : > { %v5872_v60 = vadd.f32 %v5857_v39, %v5834_v55  ;;  %v5828_v61 = vpop.f32.mrb[59].mxu1  ;;  %v18390_v39 = vld [vmem:[#allocation21 + $0xe0] ss:$8 sps:$4 sm:$0xff]  }
 0xc4e   : > { %v5873_v63 = vadd.f32 %v5861_v54, %v5835_v57  ;;  %6744 = vmatpush1.bf16.msra.mxu1 %v18336_v33  ;;  %v18393_v54 = vld [vmem:[#allocation21 + $0xf0] ss:$8 sps:$4 sm:$0xff]   ;;  %v18414_v33 = vld [vmem:[#allocation21 + $0x204] ss:$8 sps:$4 sm:$0xff]  }
 0xc4f   : > { %v5878_v0 = vmax.f32 %v5872_v60, 0.0  ;;  %6745 = vmatprep.subr.bf16.mxu1 %v18341_v49  ;;  %v15702_v49 = vld [vmem:[#allocation18] ss:$0 sm:$0xff] }
 0xc50   : > { %v5879_v62 = vmax.f32 %v5873_v63, 0.0 }
 0xc51   : > { %v5884_v2 = vpack.c.bf16 %v5878_v0, %v5878_v0 }
 0xc52   : > { %v5885_v1 = vpack.c.bf16 %v5879_v62, %v5879_v62  ;;  %6746 = vmatpush1.bf16.msra.mxu1 %v18339_v31 }
 0xc53   : > { %6747 = vmatprep.subr.bf16.mxu1 %v18344_v40 }
 0xc54   : > { %6389 = vmatprep.mubr.bf16.mxu0 %v5885_v1 }
 0xc55   : > { %6390 = vmatmul.mubr.bf16.vlgmr.msra.gmra.mrb[56].mxu0 %v5884_v2 }
 0xc56   : > { %6484 = vmatpush1.bf16.msra.mxu0 %v20548_v47  ;;  %6748 = vmatpush1.bf16.msra.mxu1 %v18342_v14 }
 0xc57   : > { %6749 = vmatprep.subr.bf16.mxu1 %v18347_v43  ;;  %6515 = vmatprep.mubr.bf16.mxu0 %v19844_v23 }
 0xc58   : > { %6920 = vmatprep.subr.bf16.mxu0 %v18350_v48 }
 0xc5a   : > { %6750 = vmatpush1.bf16.msra.mxu1 %v18345_v52 }
 0xc5b   : > { %15819 = vmatprep.subr.msk.bf16.mxu1 %vm3585_vm6, %v20545_v46  ;;  %v18360_v46 = vld [vmem:[#allocation21 + $0x40] ss:$8 sps:$4 sm:$0xff]  }
 0xc5d   : > { %15754 = vmatmul.mubr.msk.bf16.vlgmr.msra.gmra.mrb[60].mxu0 %vm3581_vm7, %v6479_v3 }
 0xc5e   : > { %6921 = vmatpush1.bf16.msra.mxu0 %v18348_v4  ;;  %v18412_v4 = vld [vmem:[#allocation21 + $0x200] ss:$8 sps:$4 sm:$0xff]  }
 0xc5f   : > { %6922 = vmatprep.subr.bf16.mxu0 %v18353_v5  ;;  %v18417_v5 = vld [vmem:[#allocation21 + $0x214] ss:$8 sps:$4 sm:$0xff]  }
 0xc62   : > { %6923 = vmatpush1.bf16.msra.mxu0 %v18351_v6  ;;  %v18415_v6 = vld [vmem:[#allocation21 + $0x210] ss:$8 sps:$4 sm:$0xff]  }
 0xc63   : > { %6924 = vmatprep.subr.bf16.mxu0 %v18356_v59  ;;  %v18420_v59 = vld [vmem:[#allocation21 + $0x224] ss:$8 sps:$4 sm:$0xff]  }
 0xc66   : > { %6925 = vmatpush1.bf16.msra.mxu0 %v18354_v8  ;;  %v18418_v8 = vld [vmem:[#allocation21 + $0x220] ss:$8 sps:$4 sm:$0xff]  }
 0xc67   : > { %6926 = vmatprep.subr.bf16.mxu0 %v18359_v9  ;;  %v18423_v9 = vld [vmem:[#allocation21 + $0x234] ss:$8 sps:$4 sm:$0xff]  }
 0xc6a   : > { %6927 = vmatpush1.bf16.msra.mxu0 %v18357_v11  ;;  %v18421_v11 = vld [vmem:[#allocation21 + $0x230] ss:$8 sps:$4 sm:$0xff]  }
 0xc6b   : > { %6928 = vmatprep.subr.bf16.mxu0 %v18362_v16  ;;  %v18426_v16 = vld [vmem:[#allocation21 + $0x244] ss:$8 sps:$4 sm:$0xff]  }
 0xc6e   : > { %6929 = vmatpush1.bf16.msra.mxu0 %v18360_v46  ;;  %v18424_v46 = vld [vmem:[#allocation21 + $0x240] ss:$8 sps:$4 sm:$0xff]  }
 0xc6f   : > { %6930 = vmatprep.subr.bf16.mxu0 %v18365_v17  ;;  %v18429_v17 = vld [vmem:[#allocation21 + $0x254] ss:$8 sps:$4 sm:$0xff]  }
 0xc72   : > { %6931 = vmatpush1.bf16.msra.mxu0 %v18363_v18  ;;  %v18427_v18 = vld [vmem:[#allocation21 + $0x250] ss:$8 sps:$4 sm:$0xff]  }
 0xc73   : > { %6932 = vmatprep.subr.bf16.mxu0 %v18368_v19  ;;  %v18432_v19 = vld [vmem:[#allocation21 + $0x264] ss:$8 sps:$4 sm:$0xff]  }
 0xc76   : > { %6933 = vmatpush1.bf16.msra.mxu0 %v18366_v20  ;;  %v18430_v20 = vld [vmem:[#allocation21 + $0x260] ss:$8 sps:$4 sm:$0xff]  }
 0xc77   : > { %6934 = vmatprep.subr.bf16.mxu0 %v18371_v21  ;;  %v18435_v21 = vld [vmem:[#allocation21 + $0x274] ss:$8 sps:$4 sm:$0xff]  }
 0xc7a   : > { %6935 = vmatpush1.bf16.msra.mxu0 %v18369_v22  ;;  %v18433_v22 = vld [vmem:[#allocation21 + $0x270] ss:$8 sps:$4 sm:$0xff]  }
 0xc7b   : > { %6936 = vmatprep.subr.bf16.mxu0 %v18374_v24  ;;  %v18438_v24 = vld [vmem:[#allocation21 + $0x284] ss:$8 sps:$4 sm:$0xff]  }
 0xc7e   : > { %6937 = vmatpush1.bf16.msra.mxu0 %v18372_v25  ;;  %v18436_v25 = vld [vmem:[#allocation21 + $0x280] ss:$8 sps:$4 sm:$0xff]  }
 0xc7f   : > { %6938 = vmatprep.subr.bf16.mxu0 %v18377_v30  ;;  %v18441_v30 = vld [vmem:[#allocation21 + $0x294] ss:$8 sps:$4 sm:$0xff]  }
 0xc82   : > { %6939 = vmatpush1.bf16.msra.mxu0 %v18375_v32  ;;  %v18439_v32 = vld [vmem:[#allocation21 + $0x290] ss:$8 sps:$4 sm:$0xff]  }
 0xc83   : > { %6940 = vmatprep.subr.bf16.mxu0 %v18380_v7  ;;  %v18444_v7 = vld [vmem:[#allocation21 + $0x2a4] ss:$8 sps:$4 sm:$0xff]  }
 0xc86   : > { %6941 = vmatpush1.bf16.msra.mxu0 %v18378_v34  ;;  %v18442_v34 = vld [vmem:[#allocation21 + $0x2a0] ss:$8 sps:$4 sm:$0xff]  }
 0xc87   : > { %6942 = vmatprep.subr.bf16.mxu0 %v18383_v35  ;;  %v18447_v35 = vld [vmem:[#allocation21 + $0x2b4] ss:$8 sps:$4 sm:$0xff]  }
 0xc8a   : > { %6943 = vmatpush1.bf16.msra.mxu0 %v18381_v36  ;;  %v18445_v36 = vld [vmem:[#allocation21 + $0x2b0] ss:$8 sps:$4 sm:$0xff]  }
 0xc8b   : > { %6944 = vmatprep.subr.bf16.mxu0 %v18386_v37  ;;  %v18450_v37 = vld [vmem:[#allocation21 + $0x2c4] ss:$8 sps:$4 sm:$0xff]  }
 0xc8e   : > { %6945 = vmatpush1.bf16.msra.mxu0 %v18384_v38  ;;  %v18448_v38 = vld [vmem:[#allocation21 + $0x2c0] ss:$8 sps:$4 sm:$0xff]  }
 0xc8f   : > { %6946 = vmatprep.subr.bf16.mxu0 %v18389_v41 }
 0xc92   : > { %6947 = vmatpush1.bf16.msra.mxu0 %v18387_v50 }
 0xc93   : > { %6948 = vmatprep.subr.bf16.mxu0 %v18392_v28 }
 0xc96   : > { %6949 = vmatpush1.bf16.msra.mxu0 %v18390_v39 }
 0xc97   : > { %6950 = vmatprep.subr.bf16.mxu0 %v18395_v53 }
 0xc9a   : > { %6951 = vmatpush1.bf16.msra.mxu0 %v18393_v54 }
 0xc9b   : > { %7202 = vmatprep.subr.bf16.mxu0 %v18414_v33 }
 0xce8   : > { %v17068_v55 = vpop.f32.mrb[52].mxu0  ;;  %v17090_v56 = vpop.f32.mrb[60].mxu1 }
 0xce9   : > { %v17069_v57 = vpop.f32.mrb[53].mxu0  ;;  %v17091_v58 = vpop.f32.mrb[61].mxu1 }
 0xcea   : > { %v17070_v60 = vadd.f32 %v17069_v57, %v17068_v55  ;;  %v17092_v61 = vadd.f32 %v17091_v58, %v17090_v56  ;;  %v17071_v63 = vpop.f32.mrb[54].mxu0  ;;  %v17093_v31 = vpop.f32.mrb[62].mxu1 }
 0xceb   : > { %v17072_v0 = vpop.f32.mrb[55].mxu0  ;;  %v17094_v40 = vpop.f32.mrb[63].mxu1  ;;  %v18397_v63 = vld [vmem:[%s21963_s23] sm:$0xff]   ;;  %v18398_v31 = vld [vmem:[%s21963_s23 + $0x48] sm:$0xff]  }
 0xcec   : > { %v6312_v62 = vadd.f32 %v17070_v60, %v15702_v49  ;;  %v18396_v60 = vld [vmem:[%s21963_s23 + $0x40] sm:$0xff]   ;;  %v18399_v0 = vld [vmem:[%s21963_s23 + $0x8] sm:$0xff]   ;;  %v18400_v40 = vld [vmem:[%s21963_s23 + $0x50] sm:$0xff]  }
 0xcee   : > { %v20950_v1 = vadd.f32 %v17092_v61, %v6312_v62  ;;  %v6962_v61 = vld [vmem:[#allocation19 + $0x4] sm:$0x3]  ;;  %v18402_v62 = vld [vmem:[%s21963_s23 + $0x58] sm:$0xff]  }
 0xcf0   : > { %v6437_v14 = vpop.f32.mrb[64].mxu1 }
 0xcf1   : > { %v6444_v2 = vpack.c.bf16 %v6437_v14, %v6437_v14  ;;  %v6439_v43 = vpop.f32.mrb[65].mxu1  ;;  %v18404_v14 = vld [vmem:[%s21963_s23 + $0x60] sm:$0xff]  }
 0xcf2   : > { %v6445_v52 = vpack.c.bf16 %v6439_v43, %v6439_v43  ;;  %v6441_v3 = vpop.f32.mrb[66].mxu1  ;;  %v18406_v43 = vld [vmem:[%s21963_s23 + $0x68] sm:$0xff]  }
 0xcf3   : > { %v6442_v48 = vpop.f32.mrb[67].mxu1  ;;  %v18408_v3 = vld [vmem:[%s21963_s23 + $0x70] sm:$0xff]  }
 0xcf4   : > { %6952 = vmatprep.mubr.bf16.mxu0 %v6445_v52  ;;  %v18407_v52 = vld [vmem:[%s21963_s23 + $0x28] sm:$0xff]   ;;  %v18410_v48 = vld [vmem:[%s21963_s23 + $0x78] sm:$0xff]  }
 0xcf5   : > { %6953 = vmatmul.mubr.bf16.vlgmr.msra.gmra.mrb[64].mxu0 %v6444_v2  ;;  %v18405_v2 = vld [vmem:[%s21963_s23 + $0x20] sm:$0xff]  }
 0xcf6   : > { %7203 = vmatpush1.bf16.msra.mxu0 %v18412_v4  ;;  %v18409_v4 = vld [vmem:[%s21963_s23 + $0x30] sm:$0xff]  }
 0xcf7   : > { %7204 = vmatprep.subr.bf16.mxu0 %v18417_v5  ;;  %v18411_v5 = vld [vmem:[%s21963_s23 + $0x38] sm:$0xff]  }
 0xcfa   : > { %7205 = vmatpush1.bf16.msra.mxu0 %v18415_v6  ;;  %v18453_v6 = vld [vmem:[#allocation21 + $0x2d4] ss:$8 sps:$4 sm:$0xff]  }
 0xcfb   : > { %7206 = vmatprep.subr.bf16.mxu0 %v18420_v59  ;;  %v18451_v59 = vld [vmem:[#allocation21 + $0x2d0] ss:$8 sps:$4 sm:$0xff]  }
 0xcfe   : > { %7207 = vmatpush1.bf16.msra.mxu0 %v18418_v8  ;;  %v18454_v8 = vld [vmem:[#allocation21 + $0x2e0] ss:$8 sps:$4 sm:$0xff]  }
 0xcff   : > { %7208 = vmatprep.subr.bf16.mxu0 %v18423_v9  ;;  %v18456_v9 = vld [vmem:[#allocation21 + $0x2e4] ss:$8 sps:$4 sm:$0xff]  }
 0xd02   : > { %7209 = vmatpush1.bf16.msra.mxu0 %v18421_v11  ;;  %v18459_v11 = vld [vmem:[#allocation21 + $0x2f4] ss:$8 sps:$4 sm:$0xff]  }
 0xd03   : > { %7210 = vmatprep.subr.bf16.mxu0 %v18426_v16  ;;  %v18457_v16 = vld [vmem:[#allocation21 + $0x2f0] ss:$8 sps:$4 sm:$0xff]  }
 0xd06   : > { %7211 = vmatpush1.bf16.msra.mxu0 %v18424_v46 }
 0xd07   : > { %7212 = vmatprep.subr.bf16.mxu0 %v18429_v17 }
 0xd0a   : > { %7213 = vmatpush1.bf16.msra.mxu0 %v18427_v18 }
 0xd0b   : > { %7214 = vmatprep.subr.bf16.mxu0 %v18432_v19 }
 0xd0e   : > { %7215 = vmatpush1.bf16.msra.mxu0 %v18430_v20 }
 0xd0f   : > { %7216 = vmatprep.subr.bf16.mxu0 %v18435_v21 }
 0xd12   : > { %7217 = vmatpush1.bf16.msra.mxu0 %v18433_v22 }
 0xd13   : > { %7218 = vmatprep.subr.bf16.mxu0 %v18438_v24 }
 0xd16   : > { %7219 = vmatpush1.bf16.msra.mxu0 %v18436_v25 }
 0xd17   : > { %7220 = vmatprep.subr.bf16.mxu0 %v18441_v30 }
 0xd1a   : > { %7221 = vmatpush1.bf16.msra.mxu0 %v18439_v32 }
 0xd1b   : > { %7222 = vmatprep.subr.bf16.mxu0 %v18444_v7 }
 0xd1e   : > { %7223 = vmatpush1.bf16.msra.mxu0 %v18442_v34 }
 0xd1f   : > { %7224 = vmatprep.subr.bf16.mxu0 %v18447_v35 }
 0xd22   : > { %7225 = vmatpush1.bf16.msra.mxu0 %v18445_v36 }
 0xd23   : > { %7226 = vmatprep.subr.bf16.mxu0 %v18450_v37 }
 0xd26   : > { %7227 = vmatpush1.bf16.msra.mxu0 %v18448_v38  ;;  %v18463_v38 = vld [vmem:[#allocation25 + $0x208] ss:$16 sps:$4 sm:$0xff]  }
 0xd27   : > { %7228 = vmatprep.subr.bf16.mxu0 %v18453_v6 }
 0xd28   : > { %v17112_v41 = vpop.f32.mrb[56].mxu0 }
 0xd29   : > { %v17113_v50 = vpop.f32.mrb[57].mxu0 }
 0xd2a   : > { %v17114_v28 = vadd.f32 %v17113_v50, %v17112_v41  ;;  %v17115_v39 = vpop.f32.mrb[58].mxu0  ;;  %7229 = vmatpush1.bf16.msra.mxu0 %v18451_v59  ;;  %v18465_v41 = vld [vmem:[#allocation25 + $0x20c] ss:$16 sps:$4 sm:$0xff]  }
 0xd2b   : > { %v17116_v53 = vpop.f32.mrb[59].mxu0  ;;  %7230 = vmatprep.subr.bf16.mxu0 %v18456_v9  ;;  %v18471_v50 = vld [vmem:[#allocation25 + $0x22c] ss:$16 sps:$4 sm:$0xff]  }
 0xd2c   : > { %v6392_v54 = vadd.f32 %v17114_v28, %v20950_v1  ;;  %v18403_v1 = vld [vmem:[%s21963_s23 + $0x18] sm:$0xff]  }
 0xd2d   : > { %v18469_v28 = vld [vmem:[#allocation25 + $0x228] ss:$16 sps:$4 sm:$0xff]   ;;  %v18477_v39 = vld [vmem:[#allocation25 + $0x24c] ss:$16 sps:$4 sm:$0xff]  }
 0xd2e   : > { %6398 = vst.msk [vmem:[%s1279_s4] sm:$0xf] %vm6397_vm8, %v6392_v54  ;;  %7231 = vmatpush1.bf16.msra.mxu0 %v18454_v8  ;;  %v18475_v53 = vld [vmem:[#allocation25 + $0x248] ss:$16 sps:$4 sm:$0xff]   ;;  %v18483_v54 = vld [vmem:[#allocation25 + $0x26c] ss:$16 sps:$4 sm:$0xff]  }
 0xd2f   : > { %7232 = vmatprep.subr.bf16.mxu0 %v18459_v11  ;;  %s21968_s4 = sld [smem:[#allocation59_spill]] }
 0xd30   : > { %v6517_v33 = vpop.f32.mrb[60].mxu0 }
 0xd31   : > { %v6519_v55 = vpop.f32.mrb[61].mxu0  ;;  %v6524_v57 = vpack.c.bf16 %v6517_v33, %v6517_v33  ;;  %v18481_v33 = vld [vmem:[#allocation25 + $0x268] ss:$16 sps:$4 sm:$0xff]  }
 0xd32   : > { %v6525_v56 = vpack.c.bf16 %v6519_v55, %v6519_v55  ;;  %v6521_v49 = vpop.f32.mrb[62].mxu0  ;;  %7233 = vmatpush1.bf16.msra.mxu0 %v18457_v16  ;;  %v18489_v55 = vld [vmem:[#allocation25 + $0x28c] ss:$16 sps:$4 sm:$0xff]  }
 0xd33   : > { %v6522_v58 = vpop.f32.mrb[63].mxu0  ;;  %8025 = vmatprep.subr.bf16.mxu0 %v18465_v41  ;;  %v18495_v49 = vld [vmem:[#allocation25 + $0x2ac] ss:$16 sps:$4 sm:$0xff]   ;;  %v18504_v41 = vld [vmem:[#allocation25 + $0x2e4] ss:$16 sps:$4 sm:$0xff]  }
 0xd34   : > { %6751 = vmatprep.mubr.bf16.mxu1 %v6525_v56  ;;  %v18487_v56 = vld [vmem:[#allocation25 + $0x288] ss:$16 sps:$4 sm:$0xff]   ;;  %v18501_v58 = vld [vmem:[#allocation25 + $0x2cc] ss:$16 sps:$4 sm:$0xff]  }
 0xd35   : > { %6752 = vmatmul.mubr.bf16.vlgmr.msra.gmra.mrb[68].mxu1 %v6524_v57  ;;  %v18493_v57 = vld [vmem:[#allocation25 + $0x2a8] ss:$16 sps:$4 sm:$0xff]  }
 0xd36   : > { %6967 = vmatpush1.bf16.msra.mxu1 %v20548_v47  ;;  %6998 = vmatprep.mubr.bf16.mxu1 %v19844_v23  ;;  %v18401_v47 = vld [vmem:[%s21963_s23 + $0x10] sm:$0xff]  }
 0xd37   : > { %17118 = vmatprep.subr.bf16.mxu1 %v18396_v60  ;;  %v18499_v60 = vld [vmem:[#allocation25 + $0x2c8] ss:$16 sps:$4 sm:$0xff]  }
 0xd3d   : > { %15820 = vmatmul.mubr.msk.bf16.vlgmr.msra.gmra.mrb[72].mxu1 %vm3581_vm7, %v6962_v61  ;;  %v18507_v61 = vld [vmem:[#allocation25 + $0x2ec] ss:$16 sps:$4 sm:$0xff]  }
 0xd3e   : > { %17119 = vmatpush3.bf16.msra.mxu1 %v18397_v63  ;;  %v18505_v63 = vld [vmem:[#allocation25 + $0x2e8] ss:$16 sps:$4 sm:$0xff]  }
 0xd3f   : > { %17120 = vmatprep.subr.bf16.mxu1 %v18398_v31  ;;  %v18513_v31 = vld [vmem:[#allocation25 + $0x30c] ss:$16 sps:$4 sm:$0xff]  }
 0xd42   : > { %17121 = vmatpush3.bf16.msra.mxu1 %v18399_v0  ;;  %v18511_v0 = vld [vmem:[#allocation25 + $0x308] ss:$16 sps:$4 sm:$0xff]  }
 0xd43   : > { %17122 = vmatprep.subr.bf16.mxu1 %v18400_v40  ;;  %v18519_v40 = vld [vmem:[#allocation25 + $0x32c] ss:$16 sps:$4 sm:$0xff]  }
 0xd46   : > { %17123 = vmatpush3.bf16.msra.mxu1 %v18401_v47  ;;  %v18517_v47 = vld [vmem:[#allocation25 + $0x328] ss:$16 sps:$4 sm:$0xff]  }
 0xd47   : > { %17124 = vmatprep.subr.bf16.mxu1 %v18402_v62  ;;  %v18525_v62 = vld [vmem:[#allocation25 + $0x34c] ss:$16 sps:$4 sm:$0xff]  }
 0xd4a   : > { %17125 = vmatpush3.bf16.msra.mxu1 %v18403_v1  ;;  %v18523_v1 = vld [vmem:[#allocation25 + $0x348] ss:$16 sps:$4 sm:$0xff]  }
 0xd4b   : > { %17126 = vmatprep.subr.bf16.mxu1 %v18404_v14  ;;  %v7245_v14 = vld [vmem:[%s21964_s3] sm:$0x3]  ;;  %s21969_s3 = sld [smem:[#allocation58_spill]] }
 0xd4e   : > { %17127 = vmatpush3.bf16.msra.mxu1 %v18405_v2  ;;  %v7250_v2 = vrot.slane %v7245_v14, %v20382_v27 }
 0xd4f   : > { %17128 = vmatprep.subr.bf16.mxu1 %v18406_v43 }
 0xd52   : > { %17129 = vmatpush3.bf16.msra.mxu1 %v18407_v52  ;;  %v7254_v52 = vrot.slane %v7245_v14, %v20385_v29  ;;  %v18546_v14 = vld [vmem:[#allocation25 + $0x3c4] ss:$16 sps:$4 sm:$0xff]  }
 0xd53   : > { %17130 = vmatprep.subr.bf16.mxu1 %v18408_v3 }
 0xd56   : > { %17131 = vmatpush3.bf16.msra.mxu1 %v18409_v4 }
 0xd57   : > { %17132 = vmatprep.subr.bf16.mxu1 %v18410_v48 }
 0xd5a   : > { %17133 = vmatpush3.bf16.msra.mxu1 %v18411_v5 }
 0xd5b   : > { %15870 = vmatprep.subr.msk.bf16.mxu1 %vm2713_vm4, %v20489_v10 }
 0xdc8   : > { %v6954_v46 = vpop.f32.mrb[64].mxu0 }
 0xdc9   : > { %v6956_v17 = vpop.f32.mrb[65].mxu0 }
 0xdca   : > { %v6958_v18 = vpop.f32.mrb[66].mxu0 }
 0xdcb   : > { %v6959_v19 = vpop.f32.mrb[67].mxu0  ;;  %v18462_v18 = vld [vmem:[#allocation25 + $0x204] ss:$16 sps:$4 sm:$0xff]  }
 0xdcc   : > { %v7552_v19 = vld [vmem:[#allocation24 + $0x4] sm:$0xf] }
 0xe08   : > { %v6753_v20 = vpop.f32.mrb[68].mxu1 }
 0xe09   : > { %v6755_v21 = vpop.f32.mrb[69].mxu1  ;;  %v6955_v22 = vadd.f32 %v6954_v46, %v6753_v20  ;;  %v18460_v20 = vld [vmem:[#allocation25 + $0x200] ss:$16 sps:$4 sm:$0xff]  }
 0xe0a   : > { %v6757_v24 = vpop.f32.mrb[70].mxu1  ;;  %v6957_v25 = vadd.f32 %v6956_v17, %v6755_v21  ;;  %v7440_v17 = vld [vmem:[#allocation24] sm:$0xf] }
 0xe0b   : > { %v6758_v30 = vpop.f32.mrb[71].mxu1  ;;  %v18468_v21 = vld [vmem:[#allocation25 + $0x224] ss:$16 sps:$4 sm:$0xff]  }
 0xe0c   : > { %v18474_v24 = vld [vmem:[#allocation25 + $0x244] ss:$16 sps:$4 sm:$0xff]  }
 0xe0d   : > { %v18480_v30 = vld [vmem:[#allocation25 + $0x264] ss:$16 sps:$4 sm:$0xff]  }
 0xe10   : > { %v7000_v32 = vpop.f32.mrb[72].mxu1 }
 0xe11   : > { %v7002_v7 = vpop.f32.mrb[73].mxu1  ;;  %v7007_v36 = vpack.c.bf16 %v7000_v32, %v7000_v32  ;;  %v18478_v32 = vld [vmem:[#allocation25 + $0x260] ss:$16 sps:$4 sm:$0xff]  }
 0xe12   : > { %v7008_v34 = vpack.c.bf16 %v7002_v7, %v7002_v7  ;;  %v7004_v35 = vpop.f32.mrb[74].mxu1  ;;  %v18486_v7 = vld [vmem:[#allocation25 + $0x284] ss:$16 sps:$4 sm:$0xff]  }
 0xe13   : > { %v7005_v37 = vpop.f32.mrb[75].mxu1  ;;  %v18492_v35 = vld [vmem:[#allocation25 + $0x2a4] ss:$16 sps:$4 sm:$0xff]  }
 0xe14   : > { %7234 = vmatprep.mubr.bf16.mxu0 %v7008_v34  ;;  %v18484_v34 = vld [vmem:[#allocation25 + $0x280] ss:$16 sps:$4 sm:$0xff]   ;;  %v18498_v37 = vld [vmem:[#allocation25 + $0x2c4] ss:$16 sps:$4 sm:$0xff]  }
 0xe15   : > { %7235 = vmatmul.mubr.bf16.vlgmr.msra.gmra.mrb[68].mxu0 %v7007_v36  ;;  %v18490_v36 = vld [vmem:[#allocation25 + $0x2a0] ss:$16 sps:$4 sm:$0xff]  }
 0xe16   : > { %8026 = vmatpush1.bf16.msra.mxu0 %v18463_v38  ;;  %v18496_v38 = vld [vmem:[#allocation25 + $0x2c0] ss:$16 sps:$4 sm:$0xff]  }
 0xe17   : > { %8027 = vmatprep.subr.bf16.mxu0 %v18471_v50  ;;  %v18502_v50 = vld [vmem:[#allocation25 + $0x2e0] ss:$16 sps:$4 sm:$0xff]  }
 0xe1a   : > { %8028 = vmatpush1.bf16.msra.mxu0 %v18469_v28  ;;  %v18510_v28 = vld [vmem:[#allocation25 + $0x304] ss:$16 sps:$4 sm:$0xff]  }
 0xe1b   : > { %8029 = vmatprep.subr.bf16.mxu0 %v18477_v39  ;;  %v18508_v39 = vld [vmem:[#allocation25 + $0x300] ss:$16 sps:$4 sm:$0xff]  }
 0xe1e   : > { %8030 = vmatpush1.bf16.msra.mxu0 %v18475_v53  ;;  %v18516_v53 = vld [vmem:[#allocation25 + $0x324] ss:$16 sps:$4 sm:$0xff]  }
 0xe1f   : > { %8031 = vmatprep.subr.bf16.mxu0 %v18483_v54  ;;  %v18514_v54 = vld [vmem:[#allocation25 + $0x320] ss:$16 sps:$4 sm:$0xff]  }
 0xe22   : > { %8032 = vmatpush1.bf16.msra.mxu0 %v18481_v33  ;;  %v18522_v33 = vld [vmem:[#allocation25 + $0x344] ss:$16 sps:$4 sm:$0xff]  }
 0xe23   : > { %8033 = vmatprep.subr.bf16.mxu0 %v18489_v55  ;;  %v18520_v55 = vld [vmem:[#allocation25 + $0x340] ss:$16 sps:$4 sm:$0xff]  }
 0xe26   : > { %8034 = vmatpush1.bf16.msra.mxu0 %v18487_v56  ;;  %v18528_v56 = vld [vmem:[#allocation25 + $0x364] ss:$16 sps:$4 sm:$0xff]  }
 0xe27   : > { %8035 = vmatprep.subr.bf16.mxu0 %v18495_v49  ;;  %v18531_v49 = vld [vmem:[#allocation25 + $0x36c] ss:$16 sps:$4 sm:$0xff]  }
 0xe2a   : > { %8036 = vmatpush1.bf16.msra.mxu0 %v18493_v57  ;;  %v18526_v57 = vld [vmem:[#allocation25 + $0x360] ss:$16 sps:$4 sm:$0xff]  }
 0xe2b   : > { %8037 = vmatprep.subr.bf16.mxu0 %v18501_v58  ;;  %v18529_v58 = vld [vmem:[#allocation25 + $0x368] ss:$16 sps:$4 sm:$0xff]  }
 0xe2e   : > { %8038 = vmatpush1.bf16.msra.mxu0 %v18499_v60  ;;  %v18534_v60 = vld [vmem:[#allocation25 + $0x384] ss:$16 sps:$4 sm:$0xff]  }
 0xe2f   : > { %8039 = vmatprep.subr.bf16.mxu0 %v18507_v61  ;;  %v18537_v61 = vld [vmem:[#allocation25 + $0x38c] ss:$16 sps:$4 sm:$0xff]  }
 0xe32   : > { %8040 = vmatpush1.bf16.msra.mxu0 %v18505_v63  ;;  %v18532_v63 = vld [vmem:[#allocation25 + $0x380] ss:$16 sps:$4 sm:$0xff]  }
 0xe33   : > { %8041 = vmatprep.subr.bf16.mxu0 %v18513_v31  ;;  %v18535_v31 = vld [vmem:[#allocation25 + $0x388] ss:$16 sps:$4 sm:$0xff]  }
 0xe36   : > { %8042 = vmatpush1.bf16.msra.mxu0 %v18511_v0  ;;  %v18538_v0 = vld [vmem:[#allocation25 + $0x3a0] ss:$16 sps:$4 sm:$0xff]  }
 0xe37   : > { %8043 = vmatprep.subr.bf16.mxu0 %v18519_v40  ;;  %v18540_v40 = vld [vmem:[#allocation25 + $0x3a4] ss:$16 sps:$4 sm:$0xff]  }
 0xe3a   : > { %8044 = vmatpush1.bf16.msra.mxu0 %v18517_v47  ;;  %v18541_v47 = vld [vmem:[#allocation25 + $0x3a8] ss:$16 sps:$4 sm:$0xff]  }
 0xe3b   : > { %8045 = vmatprep.subr.bf16.mxu0 %v18525_v62  ;;  %v18543_v62 = vld [vmem:[#allocation25 + $0x3ac] ss:$16 sps:$4 sm:$0xff]  }
 0xe3e   : > { %8046 = vmatpush1.bf16.msra.mxu0 %v18523_v1  ;;  %v18544_v1 = vld [vmem:[#allocation25 + $0x3c0] ss:$16 sps:$4 sm:$0xff]  }
 0xe3f   : > { %8047 = vmatprep.subr.bf16.mxu0 %v18531_v49  ;;  %v18577_v49 = vld [vmem:[#allocation25 + $0x68] ss:$16 sps:$4 sm:$0xff]  }
 0xe42   : > { %8048 = vmatpush1.bf16.msra.mxu0 %v18529_v58  ;;  %v18585_v58 = vld [vmem:[#allocation25 + $0x8c] ss:$16 sps:$4 sm:$0xff]  }
 0xe43   : > { %8049 = vmatprep.subr.bf16.mxu0 %v18537_v61  ;;  %v18583_v61 = vld [vmem:[#allocation25 + $0x88] ss:$16 sps:$4 sm:$0xff]  }
 0xe46   : > { %8050 = vmatpush1.bf16.msra.mxu0 %v18535_v31  ;;  %v18591_v31 = vld [vmem:[#allocation25 + $0xac] ss:$16 sps:$4 sm:$0xff]  }
 0xe47   : > { %8051 = vmatprep.subr.bf16.mxu0 %v18543_v62  ;;  %v18597_v62 = vld [vmem:[#allocation25 + $0xcc] ss:$16 sps:$4 sm:$0xff]  }
 0xe4a   : > { %8052 = vmatpush1.bf16.msra.mxu0 %v18541_v47  ;;  %v18594_v47 = vld [vmem:[#allocation25 + $0xc4] ss:$16 sps:$4 sm:$0xff]  }
 0xee8   : > { %v7236_v43 = vpop.f32.mrb[68].mxu0 }
 0xee9   : > { %v7243_v3 = vadd.f32 %v7236_v43, %v6955_v22  ;;  %v7238_v4 = vpop.f32.mrb[69].mxu0  ;;  %v18466_v22 = vld [vmem:[#allocation25 + $0x220] ss:$16 sps:$4 sm:$0xff]   ;;  %v18549_v43 = vld [vmem:[#allocation25 + $0x3cc] ss:$16 sps:$4 sm:$0xff]  }
 0xeea   : > { %v7244_v48 = vadd.f32 %v7238_v4, %v6957_v25  ;;  %v7240_v5 = vpop.f32.mrb[70].mxu0  ;;  %v18472_v25 = vld [vmem:[#allocation25 + $0x240] ss:$16 sps:$4 sm:$0xff]   ;;  %8053 = vmatprep.subr.bf16.mxu0 %v18549_v43  ;;  %v18603_v43 = vld [vmem:[#allocation25 + $0xec] ss:$16 sps:$4 sm:$0xff]  }
 0xeeb   : > { %v7257_v6 = vadd.f32 %v7250_v2, %v7243_v3  ;;  %v7241_v59 = vpop.f32.mrb[71].mxu0  ;;  %v18547_v2 = vld [vmem:[#allocation25 + $0x3c8] ss:$16 sps:$4 sm:$0xff]   ;;  %v18555_v3 = vld [vmem:[#allocation25 + $0x3ec] ss:$16 sps:$4 sm:$0xff]  }
 0xeec   : > { %v7258_v8 = vadd.f32 %v7254_v52, %v7244_v48  ;;  %8054 = vmatpush1.bf16.msra.mxu0 %v18547_v2  ;;  %v18552_v52 = vld [vmem:[#allocation25 + $0x3e4] ss:$16 sps:$4 sm:$0xff]   ;;  %v18550_v4 = vld [vmem:[#allocation25 + $0x3e0] ss:$16 sps:$4 sm:$0xff]   ;;  %v18553_v48 = vld [vmem:[#allocation25 + $0x3e8] ss:$16 sps:$4 sm:$0xff]  }
 0xeed   : > { %v7259_v9 = vmax.f32 %v7257_v6, 0.0  ;;  %8055 = vmatprep.subr.bf16.mxu0 %v18555_v3  ;;  %v18558_v5 = vld [vmem:[#allocation25 + $0x4] ss:$16 sps:$4 sm:$0xff]   ;;  %v18561_v6 = vld [vmem:[#allocation25 + $0xc] ss:$16 sps:$4 sm:$0xff]  }
 0xeee   : > { %v7260_v11 = vmax.f32 %v7258_v8, 0.0  ;;  %v15853_v8 = vld [vmem:[#allocation22] ss:$0 sm:$0xff]  ;;  %v18600_v2 = vld [vmem:[#allocation25 + $0xe4] ss:$16 sps:$4 sm:$0xff]  }
 0xeef   : > { %v7261_v46 = vpack.c.bf16 %v7259_v9, %v7259_v9  ;;  %v18601_v3 = vld [vmem:[#allocation25 + $0xe8] ss:$16 sps:$4 sm:$0xff]  }
 0xef0   : > { %v7262_v16 = vpack.c.bf16 %v7260_v11, %v7260_v11  ;;  %8056 = vmatpush1.bf16.msra.mxu0 %v18553_v48  ;;  %v18609_v48 = vld [vmem:[#allocation25 + $0x10c] ss:$16 sps:$4 sm:$0xff]  }
 0xef1   : > { %8427 = vmatprep.subr.bf16.mxu0 %v18561_v6  ;;  %v18607_v6 = vld [vmem:[#allocation25 + $0x108] ss:$16 sps:$4 sm:$0xff]  }
 0xef2   : > { %7430 = vmatprep.mubr.bf16.mxu1 %v7262_v16 }
 0xef3   : > { %7431 = vmatmul.mubr.bf16.vlgmr.msra.gmra.mrb[76].mxu1 %v7261_v46 }
 0xef4   : > { %7445 = vmatpush1.bf16.msra.mxu1 %v20492_v12  ;;  %7476 = vmatprep.mubr.bf16.mxu1 %v19844_v23 }
 0xef5   : > { %15872 = vmatprep.subr.msk.bf16.mxu1 %vm2713_vm4, %v20489_v10 }
 0xefb   : > { %15871 = vmatmul.mubr.msk.bf16.vlgmr.msra.gmra.mrb[80].mxu1 %vm2709_vm5, %v7440_v17 }
 0xefc   : > { %7557 = vmatpush1.bf16.msra.mxu1 %v20492_v12  ;;  %7588 = vmatprep.mubr.bf16.mxu1 %v19844_v23 }
 0xefd   : > { %7984 = vmatprep.subr.bf16.mxu1 %v18462_v18 }
 0xf03   : > { %15873 = vmatmul.mubr.msk.bf16.vlgmr.msra.gmra.mrb[84].mxu1 %vm2709_vm5, %v7552_v19 }
 0xf04   : > { %7985 = vmatpush1.bf16.msra.mxu1 %v18460_v20 }
 0xf05   : > { %7986 = vmatprep.subr.bf16.mxu1 %v18468_v21 }
 0xf08   : > { %7987 = vmatpush1.bf16.msra.mxu1 %v18466_v22 }
 0xf09   : > { %7988 = vmatprep.subr.bf16.mxu1 %v18474_v24 }
 0xf0c   : > { %7989 = vmatpush1.bf16.msra.mxu1 %v18472_v25 }
 0xf0d   : > { %7990 = vmatprep.subr.bf16.mxu1 %v18480_v30 }
 0xf10   : > { %7991 = vmatpush1.bf16.msra.mxu1 %v18478_v32  ;;  %v18556_v32 = vld [vmem:[#allocation25] ss:$16 sps:$4 sm:$0xff]  }
 0xf11   : > { %7992 = vmatprep.subr.bf16.mxu1 %v18486_v7  ;;  %v18559_v7 = vld [vmem:[#allocation25 + $0x8] ss:$16 sps:$4 sm:$0xff]  }
 0xf14   : > { %7993 = vmatpush1.bf16.msra.mxu1 %v18484_v34 }
 0xf15   : > { %7994 = vmatprep.subr.bf16.mxu1 %v18492_v35 }
 0xf18   : > { %7995 = vmatpush1.bf16.msra.mxu1 %v18490_v36  ;;  %v18564_v36 = vld [vmem:[#allocation25 + $0x24] ss:$16 sps:$4 sm:$0xff]  }
 0xf19   : > { %7996 = vmatprep.subr.bf16.mxu1 %v18498_v37  ;;  %v18567_v37 = vld [vmem:[#allocation25 + $0x2c] ss:$16 sps:$4 sm:$0xff]  }
 0xf1c   : > { %7997 = vmatpush1.bf16.msra.mxu1 %v18496_v38 }
 0xf1d   : > { %7998 = vmatprep.subr.bf16.mxu1 %v18504_v41  ;;  %v18562_v41 = vld [vmem:[#allocation25 + $0x20] ss:$16 sps:$4 sm:$0xff]  }
 0xf20   : > { %7999 = vmatpush1.bf16.msra.mxu1 %v18502_v50  ;;  %v18565_v50 = vld [vmem:[#allocation25 + $0x28] ss:$16 sps:$4 sm:$0xff]  }
 0xf21   : > { %8000 = vmatprep.subr.bf16.mxu1 %v18510_v28  ;;  %v18570_v28 = vld [vmem:[#allocation25 + $0x44] ss:$16 sps:$4 sm:$0xff]  }
 0xf24   : > { %8001 = vmatpush1.bf16.msra.mxu1 %v18508_v39  ;;  %v18573_v39 = vld [vmem:[#allocation25 + $0x4c] ss:$16 sps:$4 sm:$0xff]  }
 0xf25   : > { %8002 = vmatprep.subr.bf16.mxu1 %v18516_v53  ;;  %v18568_v53 = vld [vmem:[#allocation25 + $0x40] ss:$16 sps:$4 sm:$0xff]  }
 0xf28   : > { %8003 = vmatpush1.bf16.msra.mxu1 %v18514_v54  ;;  %v18571_v54 = vld [vmem:[#allocation25 + $0x48] ss:$16 sps:$4 sm:$0xff]  }
 0xf29   : > { %8004 = vmatprep.subr.bf16.mxu1 %v18522_v33  ;;  %v18576_v33 = vld [vmem:[#allocation25 + $0x64] ss:$16 sps:$4 sm:$0xff]  }
 0xf2c   : > { %8005 = vmatpush1.bf16.msra.mxu1 %v18520_v55  ;;  %v18579_v55 = vld [vmem:[#allocation25 + $0x6c] ss:$16 sps:$4 sm:$0xff]  }
 0xf2d   : > { %8006 = vmatprep.subr.bf16.mxu1 %v18528_v56  ;;  %v18574_v56 = vld [vmem:[#allocation25 + $0x60] ss:$16 sps:$4 sm:$0xff]  }
 0xf30   : > { %8007 = vmatpush1.bf16.msra.mxu1 %v18526_v57  ;;  %v18582_v57 = vld [vmem:[#allocation25 + $0x84] ss:$16 sps:$4 sm:$0xff]  }
 0xf31   : > { %8008 = vmatprep.subr.bf16.mxu1 %v18534_v60  ;;  %v18580_v60 = vld [vmem:[#allocation25 + $0x80] ss:$16 sps:$4 sm:$0xff]  }
 0xf34   : > { %8009 = vmatpush1.bf16.msra.mxu1 %v18532_v63  ;;  %v18588_v63 = vld [vmem:[#allocation25 + $0xa4] ss:$16 sps:$4 sm:$0xff]  }
 0xf35   : > { %8010 = vmatprep.subr.bf16.mxu1 %v18540_v40  ;;  %v18589_v40 = vld [vmem:[#allocation25 + $0xa8] ss:$16 sps:$4 sm:$0xff]  }
 0xf38   : > { %8011 = vmatpush1.bf16.msra.mxu1 %v18538_v0  ;;  %v18586_v0 = vld [vmem:[#allocation25 + $0xa0] ss:$16 sps:$4 sm:$0xff]  }
 0xf39   : > { %8012 = vmatprep.subr.bf16.mxu1 %v18546_v14  ;;  %v18595_v14 = vld [vmem:[#allocation25 + $0xc8] ss:$16 sps:$4 sm:$0xff]  }
 0xf3c   : > { %8013 = vmatpush1.bf16.msra.mxu1 %v18544_v1  ;;  %v18592_v1 = vld [vmem:[#allocation25 + $0xc0] ss:$16 sps:$4 sm:$0xff]  }
 0xf3d   : > { %8014 = vmatprep.subr.bf16.mxu1 %v18552_v52  ;;  %v18598_v52 = vld [vmem:[#allocation25 + $0xe0] ss:$16 sps:$4 sm:$0xff]  }
 0xf40   : > { %8015 = vmatpush1.bf16.msra.mxu1 %v18550_v4  ;;  %v18606_v4 = vld [vmem:[#allocation25 + $0x104] ss:$16 sps:$4 sm:$0xff]  }
 0xf41   : > { %8386 = vmatprep.subr.bf16.mxu1 %v18558_v5  ;;  %v18604_v5 = vld [vmem:[#allocation25 + $0x100] ss:$16 sps:$4 sm:$0xff]  }
 0xfc6   : > { %v17134_v59 = vpop.f32.mrb[76].mxu1 }
 0xfc7   : > { %v17135_v9 = vpop.f32.mrb[77].mxu1 }
 0xfc8   : > { %v17136_v11 = vadd.f32 %v17135_v9, %v17134_v59  ;;  %v17137_v16 = vpop.f32.mrb[78].mxu1  ;;  %v18612_v59 = vld [vmem:[#allocation25 + $0x124] ss:$16 sps:$4 sm:$0xff]   ;;  %v18610_v9 = vld [vmem:[#allocation25 + $0x120] ss:$16 sps:$4 sm:$0xff]  }
 0xfc9   : > { %v17138_v46 = vpop.f32.mrb[79].mxu1  ;;  %v18618_v16 = vld [vmem:[#allocation25 + $0x144] ss:$16 sps:$4 sm:$0xff]  }
 0xfca   : > { %v7433_v17 = vadd.f32 %v17136_v11, %v15853_v8  ;;  %v18615_v8 = vld [vmem:[#allocation25 + $0x12c] ss:$16 sps:$4 sm:$0xff]   ;;  %v18613_v11 = vld [vmem:[#allocation25 + $0x128] ss:$16 sps:$4 sm:$0xff]  }
 0xfcb   : > { %v18621_v46 = vld [vmem:[#allocation25 + $0x14c] ss:$16 sps:$4 sm:$0xff]  }
 0xfcc   : > { %7439 = vst.msk [vmem:[%s1283_s26] sm:$0xf] %vm7438_vm9, %v7433_v17  ;;  %v18616_v17 = vld [vmem:[#allocation25 + $0x140] ss:$16 sps:$4 sm:$0xff]   ;;  %s21970_s26 = sld [smem:[#allocation60_spill]] }
 0xfce   : > { %v20992_v18 = vpop.f32.mrb[80].mxu1 }
 0xfcf   : > { %v7480_v19 = vpop.f32.mrb[81].mxu1 }
 0xfd0   : > { %v7482_v20 = vpop.f32.mrb[82].mxu1  ;;  %v7486_v38 = vpack.c.bf16 %v7480_v19, %v7480_v19  ;;  %v18619_v19 = vld [vmem:[#allocation25 + $0x148] ss:$16 sps:$4 sm:$0xff]  }
 0xfd1   : > { %v7483_v21 = vpop.f32.mrb[83].mxu1  ;;  %v18624_v20 = vld [vmem:[#allocation25 + $0x164] ss:$16 sps:$4 sm:$0xff]  }
 0xfd2   : > { %v18627_v21 = vld [vmem:[#allocation25 + $0x16c] ss:$16 sps:$4 sm:$0xff]  }
 0xfd6   : > { %v7590_v22 = vpop.f32.mrb[84].mxu1 }
 0xfd7   : > { %v7592_v24 = vpop.f32.mrb[85].mxu1  ;;  %v7597_v34 = vpack.c.bf16 %v7590_v22, %v7590_v22  ;;  %v18622_v22 = vld [vmem:[#allocation25 + $0x160] ss:$16 sps:$4 sm:$0xff]  }
 0xfd8   : > { %v7598_v25 = vpack.c.bf16 %v7592_v24, %v7592_v24  ;;  %v7594_v30 = vpop.f32.mrb[86].mxu1  ;;  %v18625_v24 = vld [vmem:[#allocation25 + $0x168] ss:$16 sps:$4 sm:$0xff]  }
 0xfd9   : > { %v7595_v35 = vpop.f32.mrb[87].mxu1  ;;  %v18633_v30 = vld [vmem:[#allocation25 + $0x18c] ss:$16 sps:$4 sm:$0xff]  }
 0xfda   : > { %8016 = vmatprep.mubr.bf16.mxu1 %v7598_v25  ;;  %8057 = vmatprep.mubr.bf16.mxu0 %v7598_v25  ;;  %v18630_v25 = vld [vmem:[#allocation25 + $0x184] ss:$16 sps:$4 sm:$0xff]   ;;  %v18639_v35 = vld [vmem:[#allocation25 + $0x1ac] ss:$16 sps:$4 sm:$0xff]  }
 0xfdb   : > { %8017 = vmatmul.mubr.bf16.vlgmr.msra.gmra.mrb[88].mxu1 %v7597_v34  ;;  %8058 = vmatmul.mubr.bf16.vlgmr.msra.gmra.mrb[72].mxu0 %v7597_v34  ;;  %v18636_v34 = vld [vmem:[#allocation25 + $0x1a4] ss:$16 sps:$4 sm:$0xff]  }
 0xfdc   : > { %8387 = vmatpush1.bf16.msra.mxu1 %v18556_v32  ;;  %8428 = vmatpush1.bf16.msra.mxu0 %v18559_v7  ;;  %v18628_v32 = vld [vmem:[#allocation25 + $0x180] ss:$16 sps:$4 sm:$0xff]   ;;  %v18631_v7 = vld [vmem:[#allocation25 + $0x188] ss:$16 sps:$4 sm:$0xff]  }
 0xfdd   : > { %8418 = vmatprep.mubr.bf16.mxu1 %v7486_v38  ;;  %8459 = vmatprep.mubr.bf16.mxu0 %v7486_v38  ;;  %v18642_v38 = vld [vmem:[#allocation25 + $0x1c4] ss:$16 sps:$4 sm:$0xff]  }
 0xfde   : > { %8388 = vmatprep.subr.bf16.mxu1 %v18564_v36  ;;  %8429 = vmatprep.subr.bf16.mxu0 %v18567_v37  ;;  %v18634_v36 = vld [vmem:[#allocation25 + $0x1a0] ss:$16 sps:$4 sm:$0xff]   ;;  %v18637_v37 = vld [vmem:[#allocation25 + $0x1a8] ss:$16 sps:$4 sm:$0xff]  }
 0xfe0   : > { %8389 = vmatpush1.bf16.msra.mxu1 %v18562_v41  ;;  %8430 = vmatpush1.bf16.msra.mxu0 %v18565_v50  ;;  %v18645_v41 = vld [vmem:[#allocation25 + $0x1cc] ss:$16 sps:$4 sm:$0xff]   ;;  %v18640_v50 = vld [vmem:[#allocation25 + $0x1c0] ss:$16 sps:$4 sm:$0xff]  }
 0xfe1   : > { %8390 = vmatprep.subr.bf16.mxu1 %v18570_v28  ;;  %8431 = vmatprep.subr.bf16.mxu0 %v18573_v39  ;;  %v18643_v28 = vld [vmem:[#allocation25 + $0x1c8] ss:$16 sps:$4 sm:$0xff]   ;;  %v18648_v39 = vld [vmem:[#allocation25 + $0x1e4] ss:$16 sps:$4 sm:$0xff]  }
 0xfe4   : > { %8391 = vmatpush1.bf16.msra.mxu1 %v18568_v53  ;;  %8432 = vmatpush1.bf16.msra.mxu0 %v18571_v54  ;;  %v18651_v53 = vld [vmem:[#allocation25 + $0x1ec] ss:$16 sps:$4 sm:$0xff]   ;;  %v18646_v54 = vld [vmem:[#allocation25 + $0x1e0] ss:$16 sps:$4 sm:$0xff]  }
 0xfe5   : > { %8392 = vmatprep.subr.bf16.mxu1 %v18576_v33  ;;  %8433 = vmatprep.subr.bf16.mxu0 %v18579_v55  ;;  %v18649_v33 = vld [vmem:[#allocation25 + $0x1e8] ss:$16 sps:$4 sm:$0xff]   ;;  %v18654_v55 = vld [vmem:[#allocation25 + $0x40c] ss:$16 sps:$4 sm:$0xff]  }
 0xfe8   : > { %8393 = vmatpush1.bf16.msra.mxu1 %v18574_v56  ;;  %8434 = vmatpush1.bf16.msra.mxu0 %v18577_v49  ;;  %v18652_v56 = vld [vmem:[#allocation25 + $0x408] ss:$16 sps:$4 sm:$0xff]   ;;  %v7485_v49 = vpack.c.bf16 %v20992_v18, %v20992_v18  ;;  %v18663_v18 = vld [vmem:[#allocation25 + $0x46c] ss:$16 sps:$4 sm:$0xff]  }
 0xfe9   : > { %8394 = vmatprep.subr.bf16.mxu1 %v18582_v57  ;;  %8435 = vmatprep.subr.bf16.mxu0 %v18585_v58  ;;  %v18657_v57 = vld [vmem:[#allocation25 + $0x42c] ss:$16 sps:$4 sm:$0xff]   ;;  %v18655_v58 = vld [vmem:[#allocation25 + $0x428] ss:$16 sps:$4 sm:$0xff]  }
 0xfec   : > { %8395 = vmatpush1.bf16.msra.mxu1 %v18580_v60  ;;  %8436 = vmatpush1.bf16.msra.mxu0 %v18583_v61  ;;  %v18660_v60 = vld [vmem:[#allocation25 + $0x44c] ss:$16 sps:$4 sm:$0xff]  }
 0xfed   : > { %8396 = vmatprep.subr.bf16.mxu1 %v18588_v63  ;;  %8437 = vmatprep.subr.bf16.mxu0 %v18591_v31  ;;  %v8469_v61 = vld [vmem:[#allocation24 + $0x8] sm:$0xf]  ;;  %v18658_v63 = vld [vmem:[#allocation25 + $0x448] ss:$16 sps:$4 sm:$0xff]  }
 0xfee   : > { %v18666_v31 = vld [vmem:[#allocation25 + $0x48c] ss:$16 sps:$4 sm:$0xff]  }
 0xff0   : > { %8397 = vmatpush1.bf16.msra.mxu1 %v18586_v0  ;;  %8438 = vmatpush1.bf16.msra.mxu0 %v18589_v40  ;;  %v18664_v0 = vld [vmem:[#allocation25 + $0x488] ss:$16 sps:$4 sm:$0xff]  }
 0xff1   : > { %8398 = vmatprep.subr.bf16.mxu1 %v18594_v47  ;;  %8439 = vmatprep.subr.bf16.mxu0 %v18597_v62  ;;  %v18667_v40 = vld [vmem:[#allocation25 + $0x4a8] ss:$16 sps:$4 sm:$0xff]   ;;  %v18672_v47 = vld [vmem:[#allocation25 + $0x4cc] ss:$16 sps:$4 sm:$0xff]  }
 0xff2   : > { %v18670_v62 = vld [vmem:[#allocation25 + $0x4c8] ss:$16 sps:$4 sm:$0xff]  }
 0xff4   : > { %8399 = vmatpush1.bf16.msra.mxu1 %v18592_v1  ;;  %8440 = vmatpush1.bf16.msra.mxu0 %v18595_v14  ;;  %v18675_v1 = vld [vmem:[#allocation25 + $0x4ec] ss:$16 sps:$4 sm:$0xff]   ;;  %v18700_v14 = vld [vmem:[#allocation25 + $0x400] ss:$16 sps:$4 sm:$0xff]  }
 0xff5   : > { %8400 = vmatprep.subr.bf16.mxu1 %v18600_v2  ;;  %8441 = vmatprep.subr.bf16.mxu0 %v18603_v43  ;;  %v18702_v2 = vld [vmem:[#allocation25 + $0x404] ss:$16 sps:$4 sm:$0xff]  }
 0xff6   : > { %v18705_v43 = vld [vmem:[#allocation25 + $0x424] ss:$16 sps:$4 sm:$0xff]  }
 0xff8   : > { %8401 = vmatpush1.bf16.msra.mxu1 %v18598_v52  ;;  %8442 = vmatpush1.bf16.msra.mxu0 %v18601_v3  ;;  %v18673_v52 = vld [vmem:[#allocation25 + $0x4e8] ss:$16 sps:$4 sm:$0xff]   ;;  %v18703_v3 = vld [vmem:[#allocation25 + $0x420] ss:$16 sps:$4 sm:$0xff]  }
 0xff9   : > { %8402 = vmatprep.subr.bf16.mxu1 %v18606_v4  ;;  %8443 = vmatprep.subr.bf16.mxu0 %v18609_v48  ;;  %v18678_v4 = vld [vmem:[#allocation25 + $0x50c] ss:$16 sps:$4 sm:$0xff]   ;;  %v18708_v48 = vld [vmem:[#allocation25 + $0x444] ss:$16 sps:$4 sm:$0xff]  }
 0xffc   : > { %8403 = vmatpush1.bf16.msra.mxu1 %v18604_v5  ;;  %8444 = vmatpush1.bf16.msra.mxu0 %v18607_v6  ;;  %v18676_v5 = vld [vmem:[#allocation25 + $0x508] ss:$16 sps:$4 sm:$0xff]   ;;  %v18706_v6 = vld [vmem:[#allocation25 + $0x440] ss:$16 sps:$4 sm:$0xff]  }
 0xffd   : > { %8404 = vmatprep.subr.bf16.mxu1 %v18612_v59  ;;  %8445 = vmatprep.subr.bf16.mxu0 %v18615_v8  ;;  %v18681_v59 = vld [vmem:[#allocation25 + $0x52c] ss:$16 sps:$4 sm:$0xff]   ;;  %v18711_v8 = vld [vmem:[#allocation25 + $0x464] ss:$16 sps:$4 sm:$0xff]  }
0x1000   : > { %8405 = vmatpush1.bf16.msra.mxu1 %v18610_v9  ;;  %8446 = vmatpush1.bf16.msra.mxu0 %v18613_v11  ;;  %v18679_v9 = vld [vmem:[#allocation25 + $0x528] ss:$16 sps:$4 sm:$0xff]   ;;  %v18709_v11 = vld [vmem:[#allocation25 + $0x460] ss:$16 sps:$4 sm:$0xff]  }
0x1001   : > { %8406 = vmatprep.subr.bf16.mxu1 %v18618_v16  ;;  %8447 = vmatprep.subr.bf16.mxu0 %v18621_v46  ;;  %v18684_v16 = vld [vmem:[#allocation25 + $0x54c] ss:$16 sps:$4 sm:$0xff]   ;;  %v18714_v46 = vld [vmem:[#allocation25 + $0x484] ss:$16 sps:$4 sm:$0xff]  }
0x1004   : > { %8407 = vmatpush1.bf16.msra.mxu1 %v18616_v17  ;;  %8448 = vmatpush1.bf16.msra.mxu0 %v18619_v19  ;;  %v18682_v17 = vld [vmem:[#allocation25 + $0x548] ss:$16 sps:$4 sm:$0xff]   ;;  %v18712_v19 = vld [vmem:[#allocation25 + $0x480] ss:$16 sps:$4 sm:$0xff]  }
0x1005   : > { %8408 = vmatprep.subr.bf16.mxu1 %v18624_v20  ;;  %8449 = vmatprep.subr.bf16.mxu0 %v18627_v21  ;;  %v18687_v20 = vld [vmem:[#allocation25 + $0x56c] ss:$16 sps:$4 sm:$0xff]   ;;  %v18717_v21 = vld [vmem:[#allocation25 + $0x4a4] ss:$16 sps:$4 sm:$0xff]  }
0x1008   : > { %8409 = vmatpush1.bf16.msra.mxu1 %v18622_v22  ;;  %8450 = vmatpush1.bf16.msra.mxu0 %v18625_v24  ;;  %v18685_v22 = vld [vmem:[#allocation25 + $0x568] ss:$16 sps:$4 sm:$0xff]   ;;  %v18715_v24 = vld [vmem:[#allocation25 + $0x4a0] ss:$16 sps:$4 sm:$0xff]  }
0x1009   : > { %8410 = vmatprep.subr.bf16.mxu1 %v18630_v25  ;;  %8451 = vmatprep.subr.bf16.mxu0 %v18633_v30  ;;  %v18690_v25 = vld [vmem:[#allocation25 + $0x58c] ss:$16 sps:$4 sm:$0xff]   ;;  %v18720_v30 = vld [vmem:[#allocation25 + $0x4c4] ss:$16 sps:$4 sm:$0xff]  }
0x100c   : > { %8411 = vmatpush1.bf16.msra.mxu1 %v18628_v32  ;;  %8452 = vmatpush1.bf16.msra.mxu0 %v18631_v7  ;;  %v18688_v32 = vld [vmem:[#allocation25 + $0x588] ss:$16 sps:$4 sm:$0xff]   ;;  %v18718_v7 = vld [vmem:[#allocation25 + $0x4c0] ss:$16 sps:$4 sm:$0xff]  }
0x100d   : > { %8412 = vmatprep.subr.bf16.mxu1 %v18636_v34  ;;  %8453 = vmatprep.subr.bf16.mxu0 %v18639_v35  ;;  %v18693_v34 = vld [vmem:[#allocation25 + $0x5ac] ss:$16 sps:$4 sm:$0xff]   ;;  %v18723_v35 = vld [vmem:[#allocation25 + $0x4e4] ss:$16 sps:$4 sm:$0xff]  }
0x1010   : > { %8413 = vmatpush1.bf16.msra.mxu1 %v18634_v36  ;;  %8454 = vmatpush1.bf16.msra.mxu0 %v18637_v37  ;;  %v18691_v36 = vld [vmem:[#allocation25 + $0x5a8] ss:$16 sps:$4 sm:$0xff]   ;;  %v18721_v37 = vld [vmem:[#allocation25 + $0x4e0] ss:$16 sps:$4 sm:$0xff]  }
0x1011   : > { %8414 = vmatprep.subr.bf16.mxu1 %v18642_v38  ;;  %8455 = vmatprep.subr.bf16.mxu0 %v18645_v41  ;;  %v18696_v38 = vld [vmem:[#allocation25 + $0x5cc] ss:$16 sps:$4 sm:$0xff]   ;;  %v18726_v41 = vld [vmem:[#allocation25 + $0x504] ss:$16 sps:$4 sm:$0xff]  }
0x1014   : > { %8415 = vmatpush1.bf16.msra.mxu1 %v18640_v50  ;;  %8456 = vmatpush1.bf16.msra.mxu0 %v18643_v28  ;;  %v18694_v50 = vld [vmem:[#allocation25 + $0x5c8] ss:$16 sps:$4 sm:$0xff]   ;;  %v18724_v28 = vld [vmem:[#allocation25 + $0x500] ss:$16 sps:$4 sm:$0xff]  }
0x1015   : > { %8416 = vmatprep.subr.bf16.mxu1 %v18648_v39  ;;  %8457 = vmatprep.subr.bf16.mxu0 %v18651_v53  ;;  %v18699_v39 = vld [vmem:[#allocation25 + $0x5ec] ss:$16 sps:$4 sm:$0xff]   ;;  %v18729_v53 = vld [vmem:[#allocation25 + $0x524] ss:$16 sps:$4 sm:$0xff]  }
0x1018   : > { %8417 = vmatpush1.bf16.msra.mxu1 %v18646_v54  ;;  %8458 = vmatpush1.bf16.msra.mxu0 %v18649_v33  ;;  %v18697_v54 = vld [vmem:[#allocation25 + $0x5e8] ss:$16 sps:$4 sm:$0xff]   ;;  %v18727_v33 = vld [vmem:[#allocation25 + $0x520] ss:$16 sps:$4 sm:$0xff]  }
0x1019   : > { %16002 = vmatprep.subr.msk.bf16.mxu1 %vm2713_vm4, %v20489_v10  ;;  %8942 = vmatprep.subr.bf16.mxu0 %v18654_v55  ;;  %v18661_v10 = vld [vmem:[#allocation25 + $0x468] ss:$16 sps:$4 sm:$0xff]   ;;  %v18732_v55 = vld [vmem:[#allocation25 + $0x544] ss:$16 sps:$4 sm:$0xff]  }
0x101b   : > { %8419 = vmatmul.mubr.bf16.vlgmr.msra.gmra.mrb[92].mxu1 %v7485_v49  ;;  %8460 = vmatmul.mubr.bf16.vlgmr.msra.gmra.mrb[76].mxu0 %v7485_v49  ;;  %v18735_v49 = vld [vmem:[#allocation25 + $0x564] ss:$16 sps:$4 sm:$0xff]  }
0x101c   : > { %8474 = vmatpush1.bf16.msra.mxu1 %v20492_v12  ;;  %8943 = vmatpush1.bf16.msra.mxu0 %v18652_v56  ;;  %v18669_v12 = vld [vmem:[#allocation25 + $0x4ac] ss:$16 sps:$4 sm:$0xff]   ;;  %v18730_v56 = vld [vmem:[#allocation25 + $0x540] ss:$16 sps:$4 sm:$0xff]  }
0x101d   : > { %8944 = vmatprep.subr.bf16.mxu0 %v18657_v57  ;;  %8505 = vmatprep.mubr.bf16.mxu1 %v19844_v23  ;;  %v18733_v57 = vld [vmem:[#allocation25 + $0x560] ss:$16 sps:$4 sm:$0xff]  }
0x101e   : > { %8901 = vmatprep.subr.bf16.mxu1 %v18702_v2 }
0x1020   : > { %8945 = vmatpush1.bf16.msra.mxu0 %v18655_v58  ;;  %v18738_v58 = vld [vmem:[#allocation25 + $0x584] ss:$16 sps:$4 sm:$0xff]  }
0x1021   : > { %8946 = vmatprep.subr.bf16.mxu0 %v18660_v60  ;;  %v18736_v60 = vld [vmem:[#allocation25 + $0x580] ss:$16 sps:$4 sm:$0xff]  }
0x1023   : > { %16003 = vmatmul.mubr.msk.bf16.vlgmr.msra.gmra.mrb[96].mxu1 %vm2709_vm5, %v8469_v61  ;;  %v18741_v61 = vld [vmem:[#allocation25 + $0x5a4] ss:$16 sps:$4 sm:$0xff]  }
0x1024   : > { %8947 = vmatpush1.bf16.msra.mxu0 %v18658_v63  ;;  %8902 = vmatpush1.bf16.msra.mxu1 %v18700_v14  ;;  %v18739_v63 = vld [vmem:[#allocation25 + $0x5a0] ss:$16 sps:$4 sm:$0xff]  }
0x1025   : > { %8948 = vmatprep.subr.bf16.mxu0 %v18663_v18  ;;  %8903 = vmatprep.subr.bf16.mxu1 %v18705_v43  ;;  %v18742_v18 = vld [vmem:[#allocation25 + $0x5c0] ss:$16 sps:$4 sm:$0xff]  }
0x1028   : > { %8949 = vmatpush1.bf16.msra.mxu0 %v18661_v10  ;;  %8904 = vmatpush1.bf16.msra.mxu1 %v18703_v3  ;;  %v18744_v10 = vld [vmem:[#allocation25 + $0x5c4] ss:$16 sps:$4 sm:$0xff]  }
0x1029   : > { %8950 = vmatprep.subr.bf16.mxu0 %v18666_v31  ;;  %8905 = vmatprep.subr.bf16.mxu1 %v18708_v48  ;;  %v18747_v31 = vld [vmem:[#allocation25 + $0x5e4] ss:$16 sps:$4 sm:$0xff]  }
0x102c   : > { %8951 = vmatpush1.bf16.msra.mxu0 %v18664_v0  ;;  %8906 = vmatpush1.bf16.msra.mxu1 %v18706_v6  ;;  %v18745_v0 = vld [vmem:[#allocation25 + $0x5e0] ss:$16 sps:$4 sm:$0xff]  }
0x102d   : > { %8952 = vmatprep.subr.bf16.mxu0 %v18669_v12  ;;  %8907 = vmatprep.subr.bf16.mxu1 %v18711_v8  ;;  %v18752_v12 = vld [vmem:[%s21965_s28 + $0x4] ss:$8 sps:$4 sm:$0xff]  }
0x1030   : > { %8953 = vmatpush1.bf16.msra.mxu0 %v18667_v40  ;;  %8908 = vmatpush1.bf16.msra.mxu1 %v18709_v11 }
0x1031   : > { %8954 = vmatprep.subr.bf16.mxu0 %v18672_v47  ;;  %8909 = vmatprep.subr.bf16.mxu1 %v18714_v46 }
0x1034   : > { %8955 = vmatpush1.bf16.msra.mxu0 %v18670_v62  ;;  %8910 = vmatpush1.bf16.msra.mxu1 %v18712_v19 }
0x1035   : > { %8956 = vmatprep.subr.bf16.mxu0 %v18675_v1  ;;  %8911 = vmatprep.subr.bf16.mxu1 %v18717_v21 }
0x1038   : > { %8957 = vmatpush1.bf16.msra.mxu0 %v18673_v52  ;;  %8912 = vmatpush1.bf16.msra.mxu1 %v18715_v24 }
0x1039   : > { %8958 = vmatprep.subr.bf16.mxu0 %v18678_v4  ;;  %8913 = vmatprep.subr.bf16.mxu1 %v18720_v30  ;;  %v18750_v30 = vld [vmem:[%s21965_s28] ss:$8 sps:$4 sm:$0xff]  }
0x103c   : > { %8959 = vmatpush1.bf16.msra.mxu0 %v18676_v5  ;;  %8914 = vmatpush1.bf16.msra.mxu1 %v18718_v7  ;;  %v18753_v7 = vld [vmem:[%s21965_s28 + $0x10] ss:$8 sps:$4 sm:$0xff]  }
0x103d   : > { %8960 = vmatprep.subr.bf16.mxu0 %v18681_v59  ;;  %8915 = vmatprep.subr.bf16.mxu1 %v18723_v35  ;;  %v16138_v35 = vld [vmem:[%s21966_s15 + $0x400] sm:$0xff] }
0x1040   : > { %8961 = vmatpush1.bf16.msra.mxu0 %v18679_v9  ;;  %8916 = vmatpush1.bf16.msra.mxu1 %v18721_v37  ;;  %v18748_v37 = vld [vmem:[%s21967_s16] sm:$0xff]  }
0x1041   : > { %8962 = vmatprep.subr.bf16.mxu0 %v18684_v16  ;;  %8917 = vmatprep.subr.bf16.mxu1 %v18726_v41 }
0x1044   : > { %8963 = vmatpush1.bf16.msra.mxu0 %v18682_v17  ;;  %8918 = vmatpush1.bf16.msra.mxu1 %v18724_v28  ;;  %v18759_v28 = vld [vmem:[%s21965_s28 + $0x30] ss:$8 sps:$4 sm:$0xff]  }
0x1045   : > { %8964 = vmatprep.subr.bf16.mxu0 %v18687_v20  ;;  %8919 = vmatprep.subr.bf16.mxu1 %v18729_v53  ;;  %v16146_v53 = vld [vmem:[%s21966_s15 + $0x440] sm:$0xff] }
0x1048   : > { %8965 = vmatpush1.bf16.msra.mxu0 %v18685_v22  ;;  %8920 = vmatpush1.bf16.msra.mxu1 %v18727_v33  ;;  %v18749_v33 = vld [vmem:[%s21967_s16 + $0x8] sm:$0xff]  }
0x1049   : > { %8966 = vmatprep.subr.bf16.mxu0 %v18690_v25  ;;  %8921 = vmatprep.subr.bf16.mxu1 %v18732_v55 }
0x104c   : > { %8967 = vmatpush1.bf16.msra.mxu0 %v18688_v32  ;;  %8922 = vmatpush1.bf16.msra.mxu1 %v18730_v56  ;;  %v18755_v32 = vld [vmem:[%s21965_s28 + $0x14] ss:$8 sps:$4 sm:$0xff]   ;;  %v18762_v56 = vld [vmem:[%s21965_s28 + $0x40] ss:$8 sps:$4 sm:$0xff]  }
0x104d   : > { %8968 = vmatprep.subr.bf16.mxu0 %v18693_v34  ;;  %8923 = vmatprep.subr.bf16.mxu1 %v18735_v49  ;;  %v18758_v34 = vld [vmem:[%s21965_s28 + $0x24] ss:$8 sps:$4 sm:$0xff]  }
0x1050   : > { %8969 = vmatpush1.bf16.msra.mxu0 %v18691_v36  ;;  %8924 = vmatpush1.bf16.msra.mxu1 %v18733_v57  ;;  %v16142_v36 = vld [vmem:[%s21966_s15 + $0x420] sm:$0xff]  ;;  %v18767_v57 = vld [vmem:[%s21965_s28 + $0x54] ss:$8 sps:$4 sm:$0xff]  }
0x1051   : > { %8970 = vmatprep.subr.bf16.mxu0 %v18696_v38  ;;  %8925 = vmatprep.subr.bf16.mxu1 %v18738_v58  ;;  %v18756_v38 = vld [vmem:[%s21965_s28 + $0x20] ss:$8 sps:$4 sm:$0xff]   ;;  %v16267_v41 = vcombine.high %v16138_v35, %v16142_v36  ;;  %v16266_v55 = vcombine.low %v16138_v35, %v16142_v36  ;;  %v18785_v35 = vld [vmem:[%s21965_s28 + $0xb4] ss:$8 sps:$4 sm:$0xff]  }
0x1052   : > { %v16154_v58 = vld [vmem:[%s21966_s15 + $0x480] sm:$0xff] }
0x1053   : > { %v16202_v36 = vld [vmem:[%s21966_s15 + $0x600] sm:$0xff] }
0x1054   : > { %8971 = vmatpush1.bf16.msra.mxu0 %v18694_v50  ;;  %8926 = vmatpush1.bf16.msra.mxu1 %v18736_v60  ;;  %v18761_v50 = vld [vmem:[%s21965_s28 + $0x34] ss:$8 sps:$4 sm:$0xff]   ;;  %v16158_v60 = vld [vmem:[%s21966_s15 + $0x4a0] sm:$0xff] }
0x1055   : > { %8972 = vmatprep.subr.bf16.mxu0 %v18699_v39  ;;  %8927 = vmatprep.subr.bf16.mxu1 %v18741_v61  ;;  %v18764_v39 = vld [vmem:[%s21965_s28 + $0x44] ss:$8 sps:$4 sm:$0xff]  }
0x1058   : > { %8973 = vmatpush1.bf16.msra.mxu0 %v18697_v54  ;;  %8928 = vmatpush1.bf16.msra.mxu1 %v18739_v63  ;;  %v16150_v54 = vld [vmem:[%s21966_s15 + $0x460] sm:$0xff]  ;;  %v18765_v63 = vld [vmem:[%s21965_s28 + $0x50] ss:$8 sps:$4 sm:$0xff]  }
0x1059   : > { %9512 = vmatprep.subr.bf16.mxu0 %v20391_v45  ;;  %8929 = vmatprep.subr.bf16.mxu1 %v18744_v10  ;;  %v16275_v49 = vcombine.high %v16146_v53, %v16150_v54  ;;  %v16274_v61 = vcombine.low %v16146_v53, %v16150_v54  ;;  %v18770_v10 = vld [vmem:[%s21965_s28 + $0x64] ss:$8 sps:$4 sm:$0xff]  }
0x105a   : > { %v16214_v53 = vld [vmem:[%s21966_s15 + $0x660] sm:$0xff] }
0x105c   : > { %8930 = vmatpush1.bf16.msra.mxu1 %v18742_v18  ;;  %v16283_v18 = vcombine.high %v16154_v58, %v16158_v60 }
0x105d   : > { %8931 = vmatprep.subr.bf16.mxu1 %v18747_v31  ;;  %v16162_v31 = vld [vmem:[%s21966_s15 + $0x4c0] sm:$0xff] }
0x1060   : > { %8932 = vmatpush1.bf16.msra.mxu1 %v18745_v0  ;;  %v16166_v0 = vld [vmem:[%s21966_s15 + $0x4e0] sm:$0xff] }
0x1061   : > { %9417 = vmatprep.subr.bf16.mxu1 %v18752_v12  ;;  %v16282_v12 = vcombine.low %v16154_v58, %v16158_v60  ;;  %v18789_v60 = vld [vmem:[%s21965_s28 + $0xd0] ss:$8 sps:$4 sm:$0xff]  }
0x10ae   : > { %v8018_v40 = vpop.f32.mrb[88].mxu1  ;;  %v8059_v47 = vpop.f32.mrb[72].mxu0 }
0x10af   : > { %v8020_v62 = vpop.f32.mrb[89].mxu1  ;;  %v8061_v1 = vpop.f32.mrb[73].mxu0 }
0x10b0   : > { %v8022_v14 = vpop.f32.mrb[90].mxu1  ;;  %v8063_v2 = vpop.f32.mrb[74].mxu0 }
0x10b1   : > { %v8023_v43 = vpop.f32.mrb[91].mxu1  ;;  %v8064_v52 = vpop.f32.mrb[75].mxu0  ;;  %v16174_v14 = vld [vmem:[%s21966_s15 + $0x520] sm:$0xff]  ;;  %v16290_v2 = vcombine.low %v16162_v31, %v16166_v0 }
0x10b2   : > { %v18771_v43 = vld [vmem:[%s21965_s28 + $0x70] ss:$8 sps:$4 sm:$0xff]  }
0x10ee   : > { %v8420_v3 = vpop.f32.mrb[92].mxu1  ;;  %v8461_v4 = vpop.f32.mrb[76].mxu0 }
0x10ef   : > { %v21003_v48 = vadd.f32 %v8420_v3, %v8018_v40  ;;  %v21005_v5 = vadd.f32 %v8461_v4, %v8059_v47  ;;  %v8422_v6 = vpop.f32.mrb[93].mxu1  ;;  %v8463_v59 = vpop.f32.mrb[77].mxu0  ;;  %v18768_v40 = vld [vmem:[%s21965_s28 + $0x60] ss:$8 sps:$4 sm:$0xff]   ;;  %v16291_v47 = vcombine.high %v16162_v31, %v16166_v0  ;;  %v18776_v3 = vld [vmem:[%s21965_s28 + $0x84] ss:$8 sps:$4 sm:$0xff]  }
0x10f0   : > { %v21007_v8 = vadd.f32 %v8422_v6, %v8020_v62  ;;  %v21009_v9 = vadd.f32 %v8463_v59, %v8061_v1  ;;  %v8424_v11 = vpop.f32.mrb[94].mxu1  ;;  %v8465_v16 = vpop.f32.mrb[78].mxu0  ;;  %v18773_v62 = vld [vmem:[%s21965_s28 + $0x74] ss:$8 sps:$4 sm:$0xff]   ;;  %v16170_v1 = vld [vmem:[%s21966_s15 + $0x500] sm:$0xff] }
0x10f1   : > { %v8425_v46 = vpop.f32.mrb[95].mxu1  ;;  %v8466_v17 = vpop.f32.mrb[79].mxu0  ;;  %v16299_v52 = vcombine.high %v16170_v1, %v16174_v14  ;;  %v16178_v4 = vld [vmem:[%s21966_s15 + $0x540] sm:$0xff]  ;;  %v16298_v59 = vcombine.low %v16170_v1, %v16174_v14  ;;  %v18797_v1 = vld [vmem:[%s21965_s28 + $0xf4] ss:$8 sps:$4 sm:$0xff]  }
0x10f2   : > { %v16182_v6 = vld [vmem:[%s21966_s15 + $0x560] sm:$0xff]  ;;  %v18779_v46 = vld [vmem:[%s21965_s28 + $0x94] ss:$8 sps:$4 sm:$0xff]  }
0x10f3   : > { %v18774_v11 = vld [vmem:[%s21965_s28 + $0x80] ss:$8 sps:$4 sm:$0xff]   ;;  %v16307_v16 = vcombine.high %v16178_v4, %v16182_v6  ;;  %v18794_v31 = vld [vmem:[%s21965_s28 + $0xe4] ss:$8 sps:$4 sm:$0xff]  }
0x10f4   : > { %v16186_v17 = vld [vmem:[%s21966_s15 + $0x580] sm:$0xff] }
0x10f6   : > { %v8507_v19 = vpop.f32.mrb[96].mxu1 }
0x10f7   : > { %v8509_v20 = vpop.f32.mrb[97].mxu1  ;;  %v8514_v24 = vpack.c.bf16 %v8507_v19, %v8507_v19  ;;  %v16190_v19 = vld [vmem:[%s21966_s15 + $0x5a0] sm:$0xff] }
0x10f8   : > { %v8515_v21 = vpack.c.bf16 %v8509_v20, %v8509_v20  ;;  %v8511_v22 = vpop.f32.mrb[98].mxu1  ;;  %v16306_v20 = vcombine.low %v16178_v4, %v16182_v6  ;;  %v18800_v4 = vld [vmem:[%s21965_s28 + $0x104] ss:$8 sps:$4 sm:$0xff]  }
0x10f9   : > { %v8512_v25 = vpop.f32.mrb[99].mxu1  ;;  %v16315_v22 = vcombine.high %v16186_v17, %v16190_v19 }
0x10fa   : > { %8933 = vmatprep.mubr.bf16.mxu1 %v8515_v21  ;;  %8974 = vmatprep.mubr.bf16.mxu0 %v8515_v21  ;;  %v18777_v21 = vld [vmem:[%s21965_s28 + $0x90] ss:$8 sps:$4 sm:$0xff]   ;;  %v16194_v25 = vld [vmem:[%s21966_s15 + $0x5c0] sm:$0xff] }
0x10fb   : > { %8934 = vmatmul.mubr.bf16.vlgmr.msra.gmra.mrb[100].mxu1 %v8514_v24  ;;  %8975 = vmatmul.mubr.bf16.vlgmr.msra.gmra.mrb[80].mxu0 %v8514_v24  ;;  %v18782_v24 = vld [vmem:[%s21965_s28 + $0xa4] ss:$8 sps:$4 sm:$0xff]  }
0x10fc   : > { %9513 = vmatpush1.bf16.msra.mxu0 %v20389_v44  ;;  %9544 = vmatprep.mubr.bf16.mxu0 %v19844_v23 }
0x10fd   : > { %9696 = vmatprep.subr.bf16.mxu0 %v20391_v45  ;;  %9418 = vmatpush1.bf16.msra.mxu1 %v18750_v30  ;;  %v16198_v30 = vld [vmem:[%s21966_s15 + $0x5e0] sm:$0xff] }
0x10fe   : > { %9419 = vmatprep.subr.bf16.mxu1 %v18755_v32  ;;  %v16314_v32 = vcombine.low %v16186_v17, %v16190_v19  ;;  %v16258_v19 = vld [vmem:[%s21966_s15 + $0x7c0] sm:$0xff] }
0x1101   : > { %9420 = vmatpush1.bf16.msra.mxu1 %v18753_v7  ;;  %v18780_v7 = vld [vmem:[%s21965_s28 + $0xa0] ss:$8 sps:$4 sm:$0xff]  }
0x1102   : > { %9421 = vmatprep.subr.bf16.mxu1 %v18758_v34  ;;  %v16323_v34 = vcombine.high %v16194_v25, %v16198_v30 }
0x1103   : > { %16133 = vmatmul.mubr.msk.bf16.vlgmr.msra.gmra.mrb[84].mxu0 %vm1844_vm3, %v18748_v37  ;;  %v16206_v37 = vld [vmem:[%s21966_s15 + $0x620] sm:$0xff] }
0x1104   : > { %9697 = vmatpush1.bf16.msra.mxu0 %v20389_v44  ;;  %9728 = vmatprep.mubr.bf16.mxu0 %v19844_v23  ;;  %v16330_v54 = vcombine.low %v16202_v36, %v16206_v37 }
0x1105   : > { %9422 = vmatpush1.bf16.msra.mxu1 %v18756_v38  ;;  %10510 = vmatprep.subr.bf16.mxu0 %v16267_v41  ;;  %v16322_v38 = vcombine.low %v16194_v25, %v16198_v30  ;;  %v18783_v41 = vld [vmem:[%s21965_s28 + $0xb0] ss:$8 sps:$4 sm:$0xff]   ;;  %v21088_v25 = vld [vmem:[%s21966_s15 + $0x428] sm:$0xff] }
0x1106   : > { %9423 = vmatprep.subr.bf16.mxu1 %v18761_v50  ;;  %v16331_v50 = vcombine.high %v16202_v36, %v16206_v37 }
0x1109   : > { %9424 = vmatpush1.bf16.msra.mxu1 %v18759_v28  ;;  %v18788_v28 = vld [vmem:[%s21965_s28 + $0xc4] ss:$8 sps:$4 sm:$0xff]  }
0x110a   : > { %9425 = vmatprep.subr.bf16.mxu1 %v18764_v39  ;;  %v16210_v39 = vld [vmem:[%s21966_s15 + $0x640] sm:$0xff] }
0x110b   : > { %16137 = vmatmul.mubr.msk.bf16.vlgmr.msra.gmra.mrb[88].mxu0 %vm1844_vm3, %v18749_v33  ;;  %v18786_v33 = vld [vmem:[%s21965_s28 + $0xc0] ss:$8 sps:$4 sm:$0xff]   ;;  %v16338_v58 = vcombine.low %v16210_v39, %v16214_v53 }
0x110c   : > { %10511 = vmatpush1.bf16.msra.mxu0 %v16266_v55  ;;  %v16339_v55 = vcombine.high %v16210_v39, %v16214_v53 }
0x110d   : > { %10512 = vmatprep.subr.bf16.mxu0 %v16275_v49  ;;  %9426 = vmatpush1.bf16.msra.mxu1 %v18762_v56  ;;  %v18791_v56 = vld [vmem:[%s21965_s28 + $0xd4] ss:$8 sps:$4 sm:$0xff]   ;;  %v16218_v49 = vld [vmem:[%s21966_s15 + $0x680] sm:$0xff] }
0x110e   : > { %9427 = vmatprep.subr.bf16.mxu1 %v18767_v57  ;;  %v16222_v57 = vld [vmem:[%s21966_s15 + $0x6a0] sm:$0xff] }
0x1110   : > { %10513 = vmatpush1.bf16.msra.mxu0 %v16274_v61  ;;  %v16347_v61 = vcombine.high %v16218_v49, %v16222_v57 }
0x1111   : > { %10514 = vmatprep.subr.bf16.mxu0 %v16283_v18  ;;  %9428 = vmatpush1.bf16.msra.mxu1 %v18765_v63  ;;  %v16346_v63 = vcombine.low %v16218_v49, %v16222_v57  ;;  %v16226_v18 = vld [vmem:[%s21966_s15 + $0x6c0] sm:$0xff] }
0x1112   : > { %9429 = vmatprep.subr.bf16.mxu1 %v18770_v10  ;;  %v16230_v10 = vld [vmem:[%s21966_s15 + $0x6e0] sm:$0xff] }
0x1113   : > { %v16355_v0 = vcombine.high %v16226_v18, %v16230_v10 }
0x1114   : > { %10515 = vmatpush1.bf16.msra.mxu0 %v16282_v12  ;;  %v18792_v12 = vld [vmem:[%s21965_s28 + $0xe0] ss:$8 sps:$4 sm:$0xff]  }
0x1115   : > { %10516 = vmatprep.subr.bf16.mxu0 %v16291_v47  ;;  %9430 = vmatpush1.bf16.msra.mxu1 %v18768_v40  ;;  %v16354_v40 = vcombine.low %v16226_v18, %v16230_v10  ;;  %v16234_v47 = vld [vmem:[%s21966_s15 + $0x700] sm:$0xff] }
0x1116   : > { %9431 = vmatprep.subr.bf16.mxu1 %v18773_v62  ;;  %v16238_v62 = vld [vmem:[%s21966_s15 + $0x720] sm:$0xff] }
0x1117   : > { %v16363_v14 = vcombine.high %v16234_v47, %v16238_v62 }
0x1118   : > { %10517 = vmatpush1.bf16.msra.mxu0 %v16290_v2  ;;  %v18795_v2 = vld [vmem:[%s21965_s28 + $0xf0] ss:$8 sps:$4 sm:$0xff]  }
0x1119   : > { %10518 = vmatprep.subr.bf16.mxu0 %v16299_v52  ;;  %9432 = vmatpush1.bf16.msra.mxu1 %v18771_v43  ;;  %v16362_v43 = vcombine.low %v16234_v47, %v16238_v62  ;;  %v16242_v52 = vld [vmem:[%s21966_s15 + $0x740] sm:$0xff] }
0x111a   : > { %9433 = vmatprep.subr.bf16.mxu1 %v18776_v3  ;;  %v16246_v3 = vld [vmem:[%s21966_s15 + $0x760] sm:$0xff] }
0x111b   : > { %v16371_v6 = vcombine.high %v16242_v52, %v16246_v3 }
0x111c   : > { %10519 = vmatpush1.bf16.msra.mxu0 %v16298_v59  ;;  %v16370_v59 = vcombine.low %v16242_v52, %v16246_v3  ;;  %v18804_v3 = vld [vmem:[%s21965_s28 + $0x120] ss:$8 sps:$4 sm:$0xff]  }
0x111d   : > { %10520 = vmatprep.subr.bf16.mxu0 %v16307_v16  ;;  %9434 = vmatpush1.bf16.msra.mxu1 %v18774_v11  ;;  %v16250_v11 = vld [vmem:[%s21966_s15 + $0x780] sm:$0xff] }
0x111e   : > { %9435 = vmatprep.subr.bf16.mxu1 %v18779_v46  ;;  %v16254_v16 = vld [vmem:[%s21966_s15 + $0x7a0] sm:$0xff] }
0x111f   : > { %v16378_v46 = vcombine.low %v16250_v11, %v16254_v16  ;;  %v16379_v17 = vcombine.high %v16250_v11, %v16254_v16  ;;  %v16147_v11 = vld [vmem:[%s21966_s15 + $0x448] sm:$0xff] }
0x1120   : > { %10521 = vmatpush1.bf16.msra.mxu0 %v16306_v20  ;;  %v16262_v20 = vld [vmem:[%s21966_s15 + $0x7e0] sm:$0xff]  ;;  %v16151_v16 = vld [vmem:[%s21966_s15 + $0x468] sm:$0xff] }
0x1121   : > { %10522 = vmatprep.subr.bf16.mxu0 %v16315_v22  ;;  %9436 = vmatpush1.bf16.msra.mxu1 %v18777_v21  ;;  %v16387_v21 = vcombine.high %v16258_v19, %v16262_v20  ;;  %v16386_v22 = vcombine.low %v16258_v19, %v16262_v20  ;;  %v18807_v20 = vld [vmem:[%s21965_s28 + $0x130] ss:$8 sps:$4 sm:$0xff]  }
0x1122   : > { %9437 = vmatprep.subr.bf16.mxu1 %v18782_v24  ;;  %v21085_v24 = vld [vmem:[%s21966_s15 + $0x408] sm:$0xff] }
0x1123   : > { %v16268_v30 = vcombine.low %v21085_v24, %v21088_v25 }
0x1124   : > { %10523 = vmatpush1.bf16.msra.mxu0 %v16314_v32  ;;  %v16269_v32 = vcombine.high %v21085_v24, %v21088_v25  ;;  %v18818_v25 = vld [vmem:[%s21965_s28 + $0x164] ss:$8 sps:$4 sm:$0xff]  }
0x1125   : > { %10524 = vmatprep.subr.bf16.mxu0 %v16323_v34  ;;  %9438 = vmatpush1.bf16.msra.mxu1 %v18780_v7  ;;  %v8987_v7 = vld [vmem:[#allocation27] sm:$0xf] }
0x1126   : > { %9439 = vmatprep.subr.bf16.mxu1 %v18785_v35  ;;  %v8992_v34 = vrot.slane %v8987_v7, %v20382_v27  ;;  %v9000_v35 = vrot.slane %v8987_v7, %v20896_v13 }
0x1128   : > { %10525 = vmatpush1.bf16.msra.mxu0 %v16322_v38  ;;  %v8996_v38 = vrot.slane %v8987_v7, %v20385_v29 }
0x1129   : > { %10526 = vmatprep.subr.bf16.mxu0 %v16331_v50  ;;  %9440 = vmatpush1.bf16.msra.mxu1 %v18783_v41  ;;  %v9004_v41 = vrot.slane %v8987_v7, %v20901_v15  ;;  %v16159_v7 = vld [vmem:[%s21966_s15 + $0x4a8] sm:$0xff] }
0x112a   : > { %9441 = vmatprep.subr.bf16.mxu1 %v18788_v28 }
0x112c   : > { %10527 = vmatpush1.bf16.msra.mxu0 %v16330_v54 }
0x112d   : > { %10528 = vmatprep.subr.bf16.mxu0 %v16339_v55  ;;  %9442 = vmatpush1.bf16.msra.mxu1 %v18786_v33 }
0x112e   : > { %9443 = vmatprep.subr.bf16.mxu1 %v18791_v56 }
0x1130   : > { %10529 = vmatpush1.bf16.msra.mxu0 %v16338_v58 }
0x1131   : > { %10530 = vmatprep.subr.bf16.mxu0 %v16347_v61  ;;  %9444 = vmatpush1.bf16.msra.mxu1 %v18789_v60 }
0x1132   : > { %9445 = vmatprep.subr.bf16.mxu1 %v18794_v31  ;;  %v18798_v31 = vld [vmem:[%s21965_s28 + $0x100] ss:$8 sps:$4 sm:$0xff]  }
0x1134   : > { %10531 = vmatpush1.bf16.msra.mxu0 %v16346_v63 }
0x1135   : > { %10532 = vmatprep.subr.bf16.mxu0 %v16355_v0  ;;  %9446 = vmatpush1.bf16.msra.mxu1 %v18792_v12  ;;  %v18803_v12 = vld [vmem:[%s21965_s28 + $0x114] ss:$8 sps:$4 sm:$0xff]  }
0x1136   : > { %9447 = vmatprep.subr.bf16.mxu1 %v18797_v1 }
0x1138   : > { %10533 = vmatpush1.bf16.msra.mxu0 %v16354_v40 }
0x1139   : > { %10534 = vmatprep.subr.bf16.mxu0 %v16363_v14  ;;  %9448 = vmatpush1.bf16.msra.mxu1 %v18795_v2  ;;  %v18801_v14 = vld [vmem:[%s21965_s28 + $0x110] ss:$8 sps:$4 sm:$0xff]  }
0x113a   : > { %9458 = vmatprep.subr.bf16.mxu1 %v18800_v4 }
0x113c   : > { %10535 = vmatpush1.bf16.msra.mxu0 %v16362_v43  ;;  %v18806_v43 = vld [vmem:[%s21965_s28 + $0x124] ss:$8 sps:$4 sm:$0xff]  }
0x113d   : > { %10536 = vmatprep.subr.bf16.mxu0 %v16371_v6  ;;  %v18809_v6 = vld [vmem:[%s21965_s28 + $0x134] ss:$8 sps:$4 sm:$0xff]  }
0x1140   : > { %10537 = vmatpush1.bf16.msra.mxu0 %v16370_v59 }
0x1141   : > { %10538 = vmatprep.subr.bf16.mxu0 %v16379_v17 }
0x1144   : > { %10539 = vmatpush1.bf16.msra.mxu0 %v16378_v46 }
0x1145   : > { %10540 = vmatprep.subr.bf16.mxu0 %v16387_v21  ;;  %v18812_v21 = vld [vmem:[%s21965_s28 + $0x144] ss:$8 sps:$4 sm:$0xff]  }
0x1148   : > { %10541 = vmatpush1.bf16.msra.mxu0 %v16386_v22  ;;  %v16277_v22 = vcombine.high %v16147_v11, %v16151_v16 }
0x1149   : > { %10553 = vmatprep.subr.bf16.mxu0 %v16269_v32  ;;  %v16155_v32 = vld [vmem:[%s21966_s15 + $0x488] sm:$0xff] }
0x114a   : > { %v16284_v24 = vcombine.low %v16155_v32, %v16159_v7 }
0x11ce   : > { %v8935_v36 = vpop.f32.mrb[100].mxu1  ;;  %v8976_v37 = vpop.f32.mrb[80].mxu0 }
0x11cf   : > { %v8983_v50 = vadd.f32 %v8935_v36, %v21003_v48  ;;  %v8985_v28 = vadd.f32 %v8976_v37, %v21005_v5  ;;  %v8937_v39 = vpop.f32.mrb[101].mxu1  ;;  %v8978_v53 = vpop.f32.mrb[81].mxu0  ;;  %v18815_v36 = vld [vmem:[%s21965_s28 + $0x154] ss:$8 sps:$4 sm:$0xff]   ;;  %v16285_v37 = vcombine.high %v16155_v32, %v16159_v7  ;;  %v16223_v32 = vld [vmem:[%s21966_s15 + $0x6a8] sm:$0xff] }
0x11d0   : > { %v8984_v54 = vadd.f32 %v8937_v39, %v21007_v8  ;;  %v8986_v33 = vadd.f32 %v8978_v53, %v21009_v9  ;;  %v8939_v55 = vpop.f32.mrb[102].mxu1  ;;  %v8980_v56 = vpop.f32.mrb[82].mxu0  ;;  %v16175_v39 = vld [vmem:[%s21966_s15 + $0x528] sm:$0xff] }
0x11d1   : > { %v9009_v49 = vadd.f32 %v8992_v34, %v8983_v50  ;;  %v21102_v57 = vadd.f32 %v9000_v35, %v8985_v28  ;;  %v8940_v58 = vpop.f32.mrb[103].mxu1  ;;  %v8981_v60 = vpop.f32.mrb[83].mxu0  ;;  %v18810_v34 = vld [vmem:[%s21965_s28 + $0x140] ss:$8 sps:$4 sm:$0xff]   ;;  %v16276_v35 = vcombine.low %v16147_v11, %v16151_v16  ;;  %v18813_v50 = vld [vmem:[%s21965_s28 + $0x150] ss:$8 sps:$4 sm:$0xff]  }
0x11d2   : > { %v9010_v61 = vadd.f32 %v8996_v38, %v8984_v54  ;;  %v9012_v63 = vadd.f32 %v9004_v41, %v8986_v33  ;;  %v16163_v38 = vld [vmem:[%s21966_s15 + $0x4c8] sm:$0xff]  ;;  %v18821_v33 = vld [vmem:[%s21965_s28 + $0x174] ss:$8 sps:$4 sm:$0xff]   ;;  %v18819_v58 = vld [vmem:[%s21965_s28 + $0x170] ss:$8 sps:$4 sm:$0xff]  }
0x11d3   : > { %v9013_v48 = vmax.f32 %v9009_v49, 0.0  ;;  %v16167_v41 = vld [vmem:[%s21966_s15 + $0x4e8] sm:$0xff]  ;;  %v18831_v16 = vld [vmem:[%s21965_s28 + $0x1b0] ss:$8 sps:$4 sm:$0xff]  }
0x11d4   : > { %v9014_v18 = vmax.f32 %v9010_v61, 0.0  ;;  %v9016_v5 = vmax.f32 %v9012_v63, 0.0  ;;  %v16171_v28 = vld [vmem:[%s21966_s15 + $0x508] sm:$0xff]  ;;  %v16292_v54 = vcombine.low %v16163_v38, %v16167_v41 }
0x11d5   : > { %v9017_v0 = vpack.c.bf16 %v9013_v48, %v9013_v48  ;;  %v18816_v53 = vld [vmem:[%s21965_s28 + $0x160] ss:$8 sps:$4 sm:$0xff]   ;;  %v16301_v55 = vcombine.high %v16171_v28, %v16175_v39  ;;  %v16300_v60 = vcombine.low %v16171_v28, %v16175_v39  ;;  %v18824_v61 = vld [vmem:[%s21965_s28 + $0x184] ss:$8 sps:$4 sm:$0xff]  }
0x11d6   : > { %v9018_v10 = vpack.c.bf16 %v9014_v18, %v9014_v18  ;;  %v9546_v8 = vpop.f32.mrb[84].mxu0  ;;  %v9020_v40 = vpack.c.bf16 %v9016_v5, %v9016_v5  ;;  %v16179_v56 = vld [vmem:[%s21966_s15 + $0x548] sm:$0xff] }
0x11d7   : > { %v9548_v9 = vpop.f32.mrb[85].mxu0  ;;  %v16183_v49 = vld [vmem:[%s21966_s15 + $0x568] sm:$0xff] }
0x11d8   : > { %9449 = vmatprep.mubr.bf16.mxu1 %v9018_v10  ;;  %v9550_v47 = vpop.f32.mrb[86].mxu0  ;;  %v16309_v63 = vcombine.high %v16179_v56, %v16183_v49  ;;  %v16187_v48 = vld [vmem:[%s21966_s15 + $0x588] sm:$0xff]  ;;  %v16308_v10 = vcombine.low %v16179_v56, %v16183_v49  ;;  %v16140_v49 = vld [vmem:[%s21966_s15 + $0x410] sm:$0xff] }
0x11d9   : > { %9450 = vmatmul.mubr.bf16.vlgmr.msra.gmra.mrb[104].mxu1 %v9017_v0  ;;  %v21106_v62 = vpack.c.bf16 %v9550_v47, %v9546_v8  ;;  %v9552_v1 = vpop.f32.mrb[87].mxu0  ;;  %v16191_v18 = vld [vmem:[%s21966_s15 + $0x5a8] sm:$0xff] }
0x11da   : > { %9459 = vmatpush1.bf16.msra.mxu1 %v18798_v31  ;;  %9490 = vmatprep.mubr.bf16.mxu1 %v9020_v40  ;;  %v21109_v2 = vpack.c.bf16 %v9552_v1, %v9548_v9  ;;  %v18822_v5 = vld [vmem:[%s21965_s28 + $0x180] ss:$8 sps:$4 sm:$0xff]   ;;  %v18827_v31 = vld [vmem:[%s21965_s28 + $0x194] ss:$8 sps:$4 sm:$0xff]   ;;  %v16317_v8 = vcombine.high %v16187_v48, %v16191_v18  ;;  %v16316_v40 = vcombine.low %v16187_v48, %v16191_v18  ;;  %v18830_v47 = vld [vmem:[%s21965_s28 + $0x1a4] ss:$8 sps:$4 sm:$0xff]  }
0x11db   : > { %9460 = vmatprep.subr.bf16.mxu1 %v18803_v12  ;;  %v16195_v0 = vld [vmem:[%s21966_s15 + $0x5c8] sm:$0xff]  ;;  %v18825_v12 = vld [vmem:[%s21965_s28 + $0x190] ss:$8 sps:$4 sm:$0xff]  }
0x11dc   : > { %v16199_v9 = vld [vmem:[%s21966_s15 + $0x5e8] sm:$0xff] }
0x11dd   : > { %v16325_v1 = vcombine.high %v16195_v0, %v16199_v9  ;;  %v16215_v11 = vld [vmem:[%s21966_s15 + $0x668] sm:$0xff] }
0x11de   : > { %9461 = vmatpush1.bf16.msra.mxu1 %v18801_v14  ;;  %v9730_v52 = vpop.f32.mrb[88].mxu0  ;;  %v16203_v14 = vld [vmem:[%s21966_s15 + $0x608] sm:$0xff] }
0x11df   : > { %v9732_v4 = vpop.f32.mrb[89].mxu0  ;;  %9462 = vmatprep.subr.bf16.mxu1 %v18806_v43  ;;  %v16207_v43 = vld [vmem:[%s21966_s15 + $0x628] sm:$0xff] }
0x11e0   : > { %v9734_v59 = vpop.f32.mrb[90].mxu0  ;;  %v18834_v7 = vld [vmem:[%s21965_s28 + $0x1c0] ss:$8 sps:$4 sm:$0xff]  }
0x11e1   : > { %v21116_v46 = vpack.c.bf16 %v9734_v59, %v9730_v52  ;;  %v9736_v17 = vpop.f32.mrb[91].mxu0  ;;  %v18828_v52 = vld [vmem:[%s21965_s28 + $0x1a0] ss:$8 sps:$4 sm:$0xff]  }
0x11e2   : > { %9463 = vmatpush1.bf16.msra.mxu1 %v18804_v3  ;;  %v21118_v19 = vpack.c.bf16 %v9736_v17, %v9732_v4  ;;  %v16324_v3 = vcombine.low %v16195_v0, %v16199_v9  ;;  %v18833_v4 = vld [vmem:[%s21965_s28 + $0x1b4] ss:$8 sps:$4 sm:$0xff]   ;;  %v16211_v59 = vld [vmem:[%s21966_s15 + $0x648] sm:$0xff]  ;;  %v16332_v17 = vcombine.low %v16203_v14, %v16207_v43 }
0x11e3   : > { %9464 = vmatprep.subr.bf16.mxu1 %v18809_v6  ;;  %v16333_v6 = vcombine.high %v16203_v14, %v16207_v43  ;;  %v16239_v28 = vld [vmem:[%s21966_s15 + $0x728] sm:$0xff]  ;;  %v16156_v14 = vld [vmem:[%s21966_s15 + $0x490] sm:$0xff] }
0x11e4   : > { %10542 = vmatprep.mubr.bf16.mxu0 %v21118_v19  ;;  %v18840_v39 = vld [vmem:[%s21965_s28 + $0x1e0] ss:$8 sps:$4 sm:$0xff]   ;;  %v16160_v43 = vld [vmem:[%s21966_s15 + $0x4b0] sm:$0xff] }
0x11e5   : > { %10543 = vmatmul.mubr.bf16.vlgmr.msra.gmra.mrb[92].mxu0 %v21116_v46  ;;  %v16247_v56 = vld [vmem:[%s21966_s15 + $0x768] sm:$0xff] }
0x11e6   : > { %9465 = vmatpush1.bf16.msra.mxu1 %v18807_v20  ;;  %10554 = vmatpush1.bf16.msra.mxu0 %v16268_v30  ;;  %v16293_v30 = vcombine.high %v16163_v38, %v16167_v41  ;;  %v18836_v20 = vld [vmem:[%s21965_s28 + $0x1c4] ss:$8 sps:$4 sm:$0xff]   ;;  %v18837_v41 = vld [vmem:[%s21965_s28 + $0x1d0] ss:$8 sps:$4 sm:$0xff]  }
0x11e7   : > { %9466 = vmatprep.subr.bf16.mxu1 %v18812_v21  ;;  %10555 = vmatprep.subr.bf16.mxu0 %v16277_v22  ;;  %v16341_v21 = vcombine.high %v16211_v59, %v16215_v11  ;;  %v16219_v22 = vld [vmem:[%s21966_s15 + $0x688] sm:$0xff] }
0x11e8   : > { %10585 = vmatprep.mubr.bf16.mxu0 %v21118_v19  ;;  %v16231_v38 = vld [vmem:[%s21966_s15 + $0x6e8] sm:$0xff] }
0x11ea   : > { %9467 = vmatpush1.bf16.msra.mxu1 %v18810_v34  ;;  %10556 = vmatpush1.bf16.msra.mxu0 %v16276_v35  ;;  %v16340_v34 = vcombine.low %v16211_v59, %v16215_v11  ;;  %v18839_v35 = vld [vmem:[%s21965_s28 + $0x1d4] ss:$8 sps:$4 sm:$0xff]  }
0x11eb   : > { %9468 = vmatprep.subr.bf16.mxu1 %v18815_v36  ;;  %10557 = vmatprep.subr.bf16.mxu0 %v16285_v37  ;;  %v16349_v36 = vcombine.high %v16219_v22, %v16223_v32  ;;  %v16227_v37 = vld [vmem:[%s21966_s15 + $0x6c8] sm:$0xff]  ;;  %v16164_v59 = vld [vmem:[%s21966_s15 + $0x4d0] sm:$0xff] }
0x11ec   : > { %v16168_v11 = vld [vmem:[%s21966_s15 + $0x4f0] sm:$0xff] }
0x11ee   : > { %9469 = vmatpush1.bf16.msra.mxu1 %v18813_v50  ;;  %10558 = vmatpush1.bf16.msra.mxu0 %v16284_v24  ;;  %v16348_v50 = vcombine.low %v16219_v22, %v16223_v32  ;;  %v18842_v24 = vld [vmem:[%s21965_s28 + $0x1e4] ss:$8 sps:$4 sm:$0xff]   ;;  %v16295_v22 = vcombine.high %v16164_v59, %v16168_v11 }
0x11ef   : > { %9470 = vmatprep.subr.bf16.mxu1 %v18818_v25  ;;  %10559 = vmatprep.subr.bf16.mxu0 %v16293_v30  ;;  %v16357_v25 = vcombine.high %v16227_v37, %v16231_v38  ;;  %v16235_v30 = vld [vmem:[%s21966_s15 + $0x708] sm:$0xff] }
0x11f2   : > { %9471 = vmatpush1.bf16.msra.mxu1 %v18816_v53  ;;  %10560 = vmatpush1.bf16.msra.mxu0 %v16292_v54  ;;  %v16356_v53 = vcombine.low %v16227_v37, %v16231_v38  ;;  %v18845_v54 = vld [vmem:[%s21965_s28 + $0x1f4] ss:$8 sps:$4 sm:$0xff]   ;;  %v16294_v37 = vcombine.low %v16164_v59, %v16168_v11 }
0x11f3   : > { %9472 = vmatprep.subr.bf16.mxu1 %v18821_v33  ;;  %10561 = vmatprep.subr.bf16.mxu0 %v16301_v55  ;;  %v16365_v33 = vcombine.high %v16235_v30, %v16239_v28  ;;  %v16243_v55 = vld [vmem:[%s21966_s15 + $0x748] sm:$0xff]  ;;  %v16193_v59 = vld [vmem:[%s21966_s15 + $0x5b8] sm:$0xff] }
0x11f4   : > { %v16373_v48 = vcombine.high %v16243_v55, %v16247_v56  ;;  %v16372_v0 = vcombine.low %v16243_v55, %v16247_v56  ;;  %v16188_v55 = vld [vmem:[%s21966_s15 + $0x590] sm:$0xff] }
0x11f5   : > { %v16192_v56 = vld [vmem:[%s21966_s15 + $0x5b0] sm:$0xff] }
0x11f6   : > { %9473 = vmatpush1.bf16.msra.mxu1 %v18819_v58  ;;  %10562 = vmatpush1.bf16.msra.mxu0 %v16300_v60  ;;  %v16144_v58 = vld [vmem:[%s21966_s15 + $0x430] sm:$0xff] }
0x11f7   : > { %9474 = vmatprep.subr.bf16.mxu1 %v18824_v61  ;;  %10563 = vmatprep.subr.bf16.mxu0 %v16309_v63  ;;  %v18843_v60 = vld [vmem:[%s21965_s28 + $0x1f0] ss:$8 sps:$4 sm:$0xff]   ;;  %v16364_v61 = vcombine.low %v16235_v30, %v16239_v28  ;;  %v9015_v63 = vmax.f32 %v21102_v57, 0.0  ;;  %v16271_v18 = vcombine.high %v16140_v49, %v16144_v58  ;;  %v16270_v9 = vcombine.low %v16140_v49, %v16144_v58 }
0x11f8   : > { %v16157_v30 = vld [vmem:[%s21966_s15 + $0x498] sm:$0xff] }
0x11f9   : > { %v16161_v28 = vld [vmem:[%s21966_s15 + $0x4b8] sm:$0xff] }
0x11fa   : > { %9475 = vmatpush1.bf16.msra.mxu1 %v18822_v5  ;;  %10564 = vmatpush1.bf16.msra.mxu0 %v16308_v10  ;;  %v16251_v5 = vld [vmem:[%s21966_s15 + $0x788] sm:$0xff]  ;;  %v16165_v49 = vld [vmem:[%s21966_s15 + $0x4d8] sm:$0xff] }
0x11fb   : > { %9476 = vmatprep.subr.bf16.mxu1 %v18827_v31  ;;  %10565 = vmatprep.subr.bf16.mxu0 %v16317_v8  ;;  %v16255_v10 = vld [vmem:[%s21966_s15 + $0x7a8] sm:$0xff]  ;;  %v16148_v31 = vld [vmem:[%s21966_s15 + $0x450] sm:$0xff]  ;;  %v16169_v58 = vld [vmem:[%s21966_s15 + $0x4f8] sm:$0xff] }
0x11fc   : > { %v16152_v8 = vld [vmem:[%s21966_s15 + $0x470] sm:$0xff]  ;;  %v16381_v57 = vcombine.high %v16251_v5, %v16255_v10 }
0x11fe   : > { %9477 = vmatpush1.bf16.msra.mxu1 %v18825_v12  ;;  %10566 = vmatpush1.bf16.msra.mxu0 %v16316_v40  ;;  %v9019_v12 = vpack.c.bf16 %v9015_v63, %v9015_v63  ;;  %v16259_v40 = vld [vmem:[%s21966_s15 + $0x7c8] sm:$0xff]  ;;  %v16297_v63 = vcombine.high %v16165_v49, %v16169_v58 }
0x11ff   : > { %9478 = vmatprep.subr.bf16.mxu1 %v18830_v47  ;;  %10567 = vmatprep.subr.bf16.mxu0 %v16325_v1  ;;  %v16279_v47 = vcombine.high %v16148_v31, %v16152_v8  ;;  %v16263_v1 = vld [vmem:[%s21966_s15 + $0x7e8] sm:$0xff] }
0x1202   : > { %9479 = vmatpush1.bf16.msra.mxu1 %v18828_v52  ;;  %10568 = vmatpush1.bf16.msra.mxu0 %v16324_v3  ;;  %v16380_v52 = vcombine.low %v16251_v5, %v16255_v10  ;;  %v16278_v3 = vcombine.low %v16148_v31, %v16152_v8  ;;  %v16173_v5 = vld [vmem:[%s21966_s15 + $0x518] sm:$0xff]  ;;  %v16318_v31 = vcombine.low %v16188_v55, %v16192_v56 }
0x1203   : > { %9480 = vmatprep.subr.bf16.mxu1 %v18833_v4  ;;  %10569 = vmatprep.subr.bf16.mxu0 %v16333_v6  ;;  %v16389_v4 = vcombine.high %v16259_v40, %v16263_v1  ;;  %v16287_v6 = vcombine.high %v16156_v14, %v16160_v43  ;;  %v16177_v10 = vld [vmem:[%s21966_s15 + $0x538] sm:$0xff]  ;;  %v16296_v8 = vcombine.low %v16165_v49, %v16169_v58 }
0x1206   : > { %9481 = vmatpush1.bf16.msra.mxu1 %v18831_v16  ;;  %10570 = vmatpush1.bf16.msra.mxu0 %v16332_v17  ;;  %v16141_v16 = vld [vmem:[%s21966_s15 + $0x418] sm:$0xff] }
0x1207   : > { %9482 = vmatprep.subr.bf16.mxu1 %v18836_v20  ;;  %10571 = vmatprep.subr.bf16.mxu0 %v16341_v21  ;;  %v16145_v17 = vld [vmem:[%s21966_s15 + $0x438] sm:$0xff]  ;;  %v16388_v20 = vcombine.low %v16259_v40, %v16263_v1  ;;  %v16286_v21 = vcombine.low %v16156_v14, %v16160_v43  ;;  %v16304_v14 = vcombine.low %v16173_v5, %v16177_v10 }
0x1208   : > { %v16273_v32 = vcombine.high %v16141_v16, %v16145_v17  ;;  %v16272_v38 = vcombine.low %v16141_v16, %v16145_v17  ;;  %v16181_v40 = vld [vmem:[%s21966_s15 + $0x558] sm:$0xff] }
0x120a   : > { %9483 = vmatpush1.bf16.msra.mxu1 %v18834_v7  ;;  %10572 = vmatpush1.bf16.msra.mxu0 %v16340_v34  ;;  %v16172_v7 = vld [vmem:[%s21966_s15 + $0x510] sm:$0xff] }
0x120b   : > { %9484 = vmatprep.subr.bf16.mxu1 %v18839_v35  ;;  %10573 = vmatprep.subr.bf16.mxu0 %v16349_v36  ;;  %v16176_v34 = vld [vmem:[%s21966_s15 + $0x530] sm:$0xff]  ;;  %v16149_v35 = vld [vmem:[%s21966_s15 + $0x458] sm:$0xff] }
0x120c   : > { %v16153_v36 = vld [vmem:[%s21966_s15 + $0x478] sm:$0xff] }
0x120e   : > { %9485 = vmatpush1.bf16.msra.mxu1 %v18837_v41  ;;  %10574 = vmatpush1.bf16.msra.mxu0 %v16348_v50  ;;  %v16303_v41 = vcombine.high %v16172_v7, %v16176_v34  ;;  %v16180_v50 = vld [vmem:[%s21966_s15 + $0x550] sm:$0xff] }
0x120f   : > { %9486 = vmatprep.subr.bf16.mxu1 %v18842_v24  ;;  %10575 = vmatprep.subr.bf16.mxu0 %v16357_v25  ;;  %v16281_v24 = vcombine.high %v16149_v35, %v16153_v36  ;;  %v16184_v25 = vld [vmem:[%s21966_s15 + $0x570] sm:$0xff] }
0x1212   : > { %9487 = vmatpush1.bf16.msra.mxu1 %v18840_v39  ;;  %10576 = vmatpush1.bf16.msra.mxu0 %v16356_v53  ;;  %v16302_v39 = vcombine.low %v16172_v7, %v16176_v34  ;;  %v16280_v53 = vcombine.low %v16149_v35, %v16153_v36  ;;  %v16201_v7 = vld [vmem:[%s21966_s15 + $0x5f8] sm:$0xff] }
0x1213   : > { %9488 = vmatprep.subr.bf16.mxu1 %v18845_v54  ;;  %10577 = vmatprep.subr.bf16.mxu0 %v16365_v33  ;;  %v16311_v54 = vcombine.high %v16180_v50, %v16184_v25  ;;  %v16289_v33 = vcombine.high %v16157_v30, %v16161_v28 }
0x1216   : > { %9489 = vmatpush1.bf16.msra.mxu1 %v18843_v60  ;;  %10578 = vmatpush1.bf16.msra.mxu0 %v16364_v61  ;;  %v16310_v60 = vcombine.low %v16180_v50, %v16184_v25  ;;  %v16288_v61 = vcombine.low %v16157_v30, %v16161_v28  ;;  %v16205_v50 = vld [vmem:[%s21966_s15 + $0x618] sm:$0xff] }
0x1217   : > { %10579 = vmatprep.subr.bf16.mxu0 %v16373_v48  ;;  %10596 = vmatprep.subr.bf16.mxu1 %v16271_v18  ;;  %v16196_v48 = vld [vmem:[%s21966_s15 + $0x5d0] sm:$0xff] }
0x1218   : > { %v16200_v18 = vld [vmem:[%s21966_s15 + $0x5f0] sm:$0xff] }
0x1219   : > { %9491 = vmatmul.mubr.bf16.vlgmr.msra.gmra.mrb[104].mxu1 %v9019_v12  ;;  %v16204_v12 = vld [vmem:[%s21966_s15 + $0x610] sm:$0xff]  ;;  %v16326_v1 = vcombine.low %v16196_v48, %v16200_v18 }
0x121a   : > { %10580 = vmatpush1.bf16.msra.mxu0 %v16372_v0  ;;  %10597 = vmatpush1.bf16.msra.mxu1 %v16270_v9  ;;  %v16327_v0 = vcombine.high %v16196_v48, %v16200_v18  ;;  %v16305_v9 = vcombine.high %v16173_v5, %v16177_v10  ;;  %v16225_v48 = vld [vmem:[%s21966_s15 + $0x6b8] sm:$0xff] }
0x121b   : > { %10628 = vmatprep.mubr.bf16.mxu1 %v21118_v19  ;;  %10581 = vmatprep.subr.bf16.mxu0 %v16381_v57  ;;  %v16208_v57 = vld [vmem:[%s21966_s15 + $0x630] sm:$0xff] }
0x121c   : > { %10598 = vmatprep.subr.bf16.mxu1 %v16279_v47  ;;  %v16185_v47 = vld [vmem:[%s21966_s15 + $0x578] sm:$0xff]  ;;  %v16335_v43 = vcombine.high %v16204_v12, %v16208_v57  ;;  %v16334_v11 = vcombine.low %v16204_v12, %v16208_v57 }
0x121d   : > { %v16312_v16 = vcombine.low %v16181_v40, %v16185_v47  ;;  %v16233_v12 = vld [vmem:[%s21966_s15 + $0x6f8] sm:$0xff] }
0x121e   : > { %10582 = vmatpush1.bf16.msra.mxu0 %v16380_v52  ;;  %10599 = vmatpush1.bf16.msra.mxu1 %v16278_v3  ;;  %v16313_v52 = vcombine.high %v16181_v40, %v16185_v47  ;;  %v16212_v3 = vld [vmem:[%s21966_s15 + $0x650] sm:$0xff] }
0x121f   : > { %10583 = vmatprep.subr.bf16.mxu0 %v16389_v4  ;;  %10600 = vmatprep.subr.bf16.mxu1 %v16287_v6  ;;  %v16216_v4 = vld [vmem:[%s21966_s15 + $0x670] sm:$0xff]  ;;  %v16189_v6 = vld [vmem:[%s21966_s15 + $0x598] sm:$0xff] }
0x1220   : > { %v16343_v17 = vcombine.high %v16212_v3, %v16216_v4  ;;  %v16342_v34 = vcombine.low %v16212_v3, %v16216_v4  ;;  %v16320_v35 = vcombine.low %v16189_v6, %v16193_v59  ;;  %v16241_v3 = vld [vmem:[%s21966_s15 + $0x738] sm:$0xff] }
0x1222   : > { %10584 = vmatpush1.bf16.msra.mxu0 %v16388_v20  ;;  %10601 = vmatpush1.bf16.msra.mxu1 %v16286_v21  ;;  %v16321_v20 = vcombine.high %v16189_v6, %v16193_v59  ;;  %v16220_v21 = vld [vmem:[%s21966_s15 + $0x690] sm:$0xff] }
0x1223   : > { %10602 = vmatprep.subr.bf16.mxu1 %v16295_v22  ;;  %10639 = vmatprep.subr.bf16.mxu0 %v16273_v32  ;;  %v16224_v22 = vld [vmem:[%s21966_s15 + $0x6b0] sm:$0xff]  ;;  %v16197_v32 = vld [vmem:[%s21966_s15 + $0x5d8] sm:$0xff] }
0x1224   : > { %v16351_v36 = vcombine.high %v16220_v21, %v16224_v22  ;;  %v16350_v25 = vcombine.low %v16220_v21, %v16224_v22  ;;  %v16328_v30 = vcombine.low %v16197_v32, %v16201_v7  ;;  %v9563_v21 = vld [vmem:[%s21966_s15 + $0x30] sm:$0xff] }
0x1225   : > { %10586 = vmatmul.mubr.bf16.vlgmr.msra.gmra.mrb[96].mxu0 %v21116_v46 }
0x1226   : > { %10603 = vmatpush1.bf16.msra.mxu1 %v16294_v37  ;;  %10640 = vmatpush1.bf16.msra.mxu0 %v16272_v38  ;;  %v16329_v37 = vcombine.high %v16197_v32, %v16201_v7  ;;  %v16228_v38 = vld [vmem:[%s21966_s15 + $0x6d0] sm:$0xff] }
0x1227   : > { %10671 = vmatprep.mubr.bf16.mxu0 %v21118_v19  ;;  %10604 = vmatprep.subr.bf16.mxu1 %v16303_v41  ;;  %v16319_v19 = vcombine.high %v16188_v55, %v16192_v56  ;;  %v16232_v41 = vld [vmem:[%s21966_s15 + $0x6f0] sm:$0xff]  ;;  %v16217_v55 = vld [vmem:[%s21966_s15 + $0x678] sm:$0xff] }
0x1228   : > { %10641 = vmatprep.subr.bf16.mxu0 %v16281_v24  ;;  %v16209_v24 = vld [vmem:[%s21966_s15 + $0x638] sm:$0xff]  ;;  %v16359_v28 = vcombine.high %v16228_v38, %v16232_v41  ;;  %v16358_v56 = vcombine.low %v16228_v38, %v16232_v41  ;;  %v9571_v38 = vld [vmem:[%s21966_s15 + $0x70] sm:$0xff] }
0x1229   : > { %v16336_v49 = vcombine.low %v16205_v50, %v16209_v24 }
0x122a   : > { %10605 = vmatpush1.bf16.msra.mxu1 %v16302_v39  ;;  %10642 = vmatpush1.bf16.msra.mxu0 %v16280_v53  ;;  %v16337_v39 = vcombine.high %v16205_v50, %v16209_v24  ;;  %v16236_v53 = vld [vmem:[%s21966_s15 + $0x710] sm:$0xff] }
0x122b   : > { %10606 = vmatprep.subr.bf16.mxu1 %v16311_v54  ;;  %10643 = vmatprep.subr.bf16.mxu0 %v16289_v33  ;;  %v16240_v54 = vld [vmem:[%s21966_s15 + $0x730] sm:$0xff]  ;;  %v16213_v33 = vld [vmem:[%s21966_s15 + $0x658] sm:$0xff] }
0x122c   : > { %v16367_v58 = vcombine.high %v16236_v53, %v16240_v54  ;;  %v16366_v18 = vcombine.low %v16236_v53, %v16240_v54  ;;  %v16344_v5 = vcombine.low %v16213_v33, %v16217_v55  ;;  %v9579_v53 = vld [vmem:[%s21966_s15 + $0xb0] sm:$0xff] }
0x122e   : > { %10607 = vmatpush1.bf16.msra.mxu1 %v16310_v60  ;;  %10644 = vmatpush1.bf16.msra.mxu0 %v16288_v61  ;;  %v16345_v60 = vcombine.high %v16213_v33, %v16217_v55  ;;  %v16244_v61 = vld [vmem:[%s21966_s15 + $0x750] sm:$0xff] }
0x122f   : > { %10608 = vmatprep.subr.bf16.mxu1 %v16319_v19  ;;  %10645 = vmatprep.subr.bf16.mxu0 %v16297_v63  ;;  %v16248_v19 = vld [vmem:[%s21966_s15 + $0x770] sm:$0xff]  ;;  %v16221_v63 = vld [vmem:[%s21966_s15 + $0x698] sm:$0xff] }
0x1230   : > { %v16375_v10 = vcombine.high %v16244_v61, %v16248_v19  ;;  %v16374_v57 = vcombine.low %v16244_v61, %v16248_v19  ;;  %v16352_v40 = vcombine.low %v16221_v63, %v16225_v48  ;;  %v9587_v61 = vld [vmem:[%s21966_s15 + $0xf0] sm:$0xff] }
0x1232   : > { %10609 = vmatpush1.bf16.msra.mxu1 %v16318_v31  ;;  %10646 = vmatpush1.bf16.msra.mxu0 %v16296_v8  ;;  %v16353_v31 = vcombine.high %v16221_v63, %v16225_v48  ;;  %v16252_v8 = vld [vmem:[%s21966_s15 + $0x790] sm:$0xff] }
0x1233   : > { %10610 = vmatprep.subr.bf16.mxu1 %v16327_v0  ;;  %10647 = vmatprep.subr.bf16.mxu0 %v16305_v9  ;;  %v16256_v0 = vld [vmem:[%s21966_s15 + $0x7b0] sm:$0xff]  ;;  %v16229_v9 = vld [vmem:[%s21966_s15 + $0x6d8] sm:$0xff] }
0x1234   : > { %v16383_v47 = vcombine.high %v16252_v8, %v16256_v0  ;;  %v16382_v4 = vcombine.low %v16252_v8, %v16256_v0  ;;  %v16360_v6 = vcombine.low %v16229_v9, %v16233_v12  ;;  %v9595_v8 = vld [vmem:[%s21966_s15 + $0x130] sm:$0xff] }
0x1236   : > { %10611 = vmatpush1.bf16.msra.mxu1 %v16326_v1  ;;  %10648 = vmatpush1.bf16.msra.mxu0 %v16304_v14  ;;  %v16361_v1 = vcombine.high %v16229_v9, %v16233_v12  ;;  %v16260_v14 = vld [vmem:[%s21966_s15 + $0x7d0] sm:$0xff] }
0x1237   : > { %10612 = vmatprep.subr.bf16.mxu1 %v16335_v43  ;;  %10649 = vmatprep.subr.bf16.mxu0 %v16313_v52  ;;  %v16264_v43 = vld [vmem:[%s21966_s15 + $0x7f0] sm:$0xff]  ;;  %v16237_v52 = vld [vmem:[%s21966_s15 + $0x718] sm:$0xff] }
0x1238   : > { %v16391_v59 = vcombine.high %v16260_v14, %v16264_v43  ;;  %v16390_v22 = vcombine.low %v16260_v14, %v16264_v43  ;;  %v16368_v32 = vcombine.low %v16237_v52, %v16241_v3  ;;  %v9603_v14 = vld [vmem:[%s21966_s15 + $0x170] sm:$0xff] }
0x123a   : > { %10613 = vmatpush1.bf16.msra.mxu1 %v16334_v11  ;;  %10650 = vmatpush1.bf16.msra.mxu0 %v16312_v16  ;;  %v16369_v11 = vcombine.high %v16237_v52, %v16241_v3  ;;  %v16245_v16 = vld [vmem:[%s21966_s15 + $0x758] sm:$0xff] }
0x123b   : > { %10614 = vmatprep.subr.bf16.mxu1 %v16343_v17  ;;  %10651 = vmatprep.subr.bf16.mxu0 %v16321_v20  ;;  %v16249_v17 = vld [vmem:[%s21966_s15 + $0x778] sm:$0xff]  ;;  %v9559_v20 = vld [vmem:[%s21966_s15 + $0x10] sm:$0xff] }
0x123c   : > { %v16377_v7 = vcombine.high %v16245_v16, %v16249_v17  ;;  %v16376_v41 = vcombine.low %v16245_v16, %v16249_v17  ;;  %v16398_v50 = vcombine.low %v9559_v20, %v9563_v21 }
0x123e   : > { %10615 = vmatpush1.bf16.msra.mxu1 %v16342_v34  ;;  %10652 = vmatpush1.bf16.msra.mxu0 %v16320_v35  ;;  %v16399_v34 = vcombine.high %v9559_v20, %v9563_v21  ;;  %v16253_v35 = vld [vmem:[%s21966_s15 + $0x798] sm:$0xff] }
0x123f   : > { %10616 = vmatprep.subr.bf16.mxu1 %v16351_v36  ;;  %10653 = vmatprep.subr.bf16.mxu0 %v16329_v37  ;;  %v16257_v36 = vld [vmem:[%s21966_s15 + $0x7b8] sm:$0xff]  ;;  %v9567_v37 = vld [vmem:[%s21966_s15 + $0x50] sm:$0xff] }
0x1240   : > { %v16385_v24 = vcombine.high %v16253_v35, %v16257_v36  ;;  %v16384_v54 = vcombine.low %v16253_v35, %v16257_v36  ;;  %v16406_v33 = vcombine.low %v9567_v37, %v9571_v38 }
0x1242   : > { %10617 = vmatpush1.bf16.msra.mxu1 %v16350_v25  ;;  %10654 = vmatpush1.bf16.msra.mxu0 %v16328_v30  ;;  %v16261_v25 = vld [vmem:[%s21966_s15 + $0x7d8] sm:$0xff]  ;;  %v16407_v30 = vcombine.high %v9567_v37, %v9571_v38 }
0x1243   : > { %10618 = vmatprep.subr.bf16.mxu1 %v16359_v28  ;;  %10655 = vmatprep.subr.bf16.mxu0 %v16337_v39  ;;  %v16265_v28 = vld [vmem:[%s21966_s15 + $0x7f8] sm:$0xff]  ;;  %v9575_v39 = vld [vmem:[%s21966_s15 + $0x90] sm:$0xff] }
0x1244   : > { %v16393_v55 = vcombine.high %v16261_v25, %v16265_v28  ;;  %v16392_v19 = vcombine.low %v16261_v25, %v16265_v28  ;;  %v16414_v63 = vcombine.low %v9575_v39, %v9579_v53  ;;  %v9627_v25 = vld [vmem:[%s21966_s15 + $0x230] sm:$0xff] }
0x1246   : > { %10619 = vmatpush1.bf16.msra.mxu1 %v16358_v56  ;;  %10656 = vmatpush1.bf16.msra.mxu0 %v16336_v49  ;;  %v16415_v56 = vcombine.high %v9575_v39, %v9579_v53  ;;  %v9557_v49 = vld [vmem:[%s21966_s15] sm:$0xff] }
0x1247   : > { %10620 = vmatprep.subr.bf16.mxu1 %v16367_v58  ;;  %10657 = vmatprep.subr.bf16.mxu0 %v16345_v60  ;;  %v9561_v58 = vld [vmem:[%s21966_s15 + $0x20] sm:$0xff]  ;;  %v9583_v60 = vld [vmem:[%s21966_s15 + $0xd0] sm:$0xff] }
0x1248   : > { %v16395_v48 = vcombine.high %v9557_v49, %v9561_v58  ;;  %v16394_v0 = vcombine.low %v9557_v49, %v9561_v58  ;;  %v16422_v9 = vcombine.low %v9583_v60, %v9587_v61 }
0x124a   : > { %10621 = vmatpush1.bf16.msra.mxu1 %v16366_v18  ;;  %10658 = vmatpush1.bf16.msra.mxu0 %v16344_v5  ;;  %v16423_v18 = vcombine.high %v9583_v60, %v9587_v61  ;;  %v9565_v5 = vld [vmem:[%s21966_s15 + $0x40] sm:$0xff] }
0x124b   : > { %10622 = vmatprep.subr.bf16.mxu1 %v16375_v10  ;;  %10659 = vmatprep.subr.bf16.mxu0 %v16353_v31  ;;  %v9569_v10 = vld [vmem:[%s21966_s15 + $0x60] sm:$0xff]  ;;  %v9591_v31 = vld [vmem:[%s21966_s15 + $0x110] sm:$0xff] }
0x124c   : > { %v16403_v12 = vcombine.high %v9565_v5, %v9569_v10  ;;  %v16402_v43 = vcombine.low %v9565_v5, %v9569_v10  ;;  %v16430_v52 = vcombine.low %v9591_v31, %v9595_v8 }
0x124e   : > { %10623 = vmatpush1.bf16.msra.mxu1 %v16374_v57  ;;  %10660 = vmatpush1.bf16.msra.mxu0 %v16352_v40  ;;  %v16431_v57 = vcombine.high %v9591_v31, %v9595_v8  ;;  %v9573_v40 = vld [vmem:[%s21966_s15 + $0x80] sm:$0xff] }
0x124f   : > { %10624 = vmatprep.subr.bf16.mxu1 %v16383_v47  ;;  %10661 = vmatprep.subr.bf16.mxu0 %v16361_v1  ;;  %v9577_v47 = vld [vmem:[%s21966_s15 + $0xa0] sm:$0xff]  ;;  %v9599_v1 = vld [vmem:[%s21966_s15 + $0x150] sm:$0xff] }
0x1250   : > { %v16411_v3 = vcombine.high %v9573_v40, %v9577_v47  ;;  %v16410_v16 = vcombine.low %v9573_v40, %v9577_v47  ;;  %v16438_v17 = vcombine.low %v9599_v1, %v9603_v14 }
0x1252   : > { %10625 = vmatpush1.bf16.msra.mxu1 %v16382_v4  ;;  %10662 = vmatpush1.bf16.msra.mxu0 %v16360_v6  ;;  %v16439_v4 = vcombine.high %v9599_v1, %v9603_v14  ;;  %v9581_v6 = vld [vmem:[%s21966_s15 + $0xc0] sm:$0xff] }
0x1253   : > { %10626 = vmatprep.subr.bf16.mxu1 %v16391_v59  ;;  %10663 = vmatprep.subr.bf16.mxu0 %v16369_v11  ;;  %v9585_v59 = vld [vmem:[%s21966_s15 + $0xe0] sm:$0xff]  ;;  %v9607_v11 = vld [vmem:[%s21966_s15 + $0x190] sm:$0xff] }
0x1254   : > { %v16419_v20 = vcombine.high %v9581_v6, %v9585_v59  ;;  %v16418_v35 = vcombine.low %v9581_v6, %v9585_v59 }
0x1256   : > { %10627 = vmatpush1.bf16.msra.mxu1 %v16390_v22  ;;  %10664 = vmatpush1.bf16.msra.mxu0 %v16368_v32  ;;  %v9589_v22 = vld [vmem:[%s21966_s15 + $0x100] sm:$0xff] }
0x1257   : > { %10665 = vmatprep.subr.bf16.mxu0 %v16377_v7  ;;  %11408 = vmatprep.subr.bf16.mxu1 %v16399_v34  ;;  %v9593_v32 = vld [vmem:[%s21966_s15 + $0x120] sm:$0xff]  ;;  %v9615_v7 = vld [vmem:[%s21966_s15 + $0x1d0] sm:$0xff] }
0x1258   : > { %v9619_v34 = vld [vmem:[%s21966_s15 + $0x1f0] sm:$0xff]  ;;  %v16427_v37 = vcombine.high %v9589_v22, %v9593_v32 }
0x1259   : > { %10629 = vmatmul.mubr.bf16.vlgmr.msra.gmra.mrb[108].mxu1 %v21116_v46  ;;  %v16455_v38 = vcombine.high %v9615_v7, %v9619_v34  ;;  %v16454_v28 = vcombine.low %v9615_v7, %v9619_v34 }
0x125a   : > { %10666 = vmatpush1.bf16.msra.mxu0 %v16376_v41  ;;  %11409 = vmatpush1.bf16.msra.mxu1 %v16398_v50  ;;  %v9597_v41 = vld [vmem:[%s21966_s15 + $0x140] sm:$0xff] }
0x125b   : > { %11440 = vmatprep.mubr.bf16.mxu1 %v21109_v2  ;;  %10667 = vmatprep.subr.bf16.mxu0 %v16385_v24  ;;  %v9601_v50 = vld [vmem:[%s21966_s15 + $0x160] sm:$0xff]  ;;  %v9623_v24 = vld [vmem:[%s21966_s15 + $0x210] sm:$0xff] }
0x125c   : > { %11410 = vmatprep.subr.bf16.mxu1 %v16407_v30  ;;  %v16426_v30 = vcombine.low %v9589_v22, %v9593_v32  ;;  %v16435_v39 = vcombine.high %v9597_v41, %v9601_v50  ;;  %v16463_v53 = vcombine.high %v9623_v24, %v9627_v25  ;;  %v16434_v49 = vcombine.low %v9597_v41, %v9601_v50 }
0x125d   : > { %v16462_v58 = vcombine.low %v9623_v24, %v9627_v25 }
0x125e   : > { %10668 = vmatpush1.bf16.msra.mxu0 %v16384_v54  ;;  %11411 = vmatpush1.bf16.msra.mxu1 %v16406_v33  ;;  %v9605_v54 = vld [vmem:[%s21966_s15 + $0x180] sm:$0xff] }
0x125f   : > { %10669 = vmatprep.subr.bf16.mxu0 %v16393_v55  ;;  %11412 = vmatprep.subr.bf16.mxu1 %v16415_v56  ;;  %v9609_v33 = vld [vmem:[%s21966_s15 + $0x1a0] sm:$0xff]  ;;  %v9631_v55 = vld [vmem:[%s21966_s15 + $0x250] sm:$0xff] }
0x1260   : > { %v9635_v56 = vld [vmem:[%s21966_s15 + $0x270] sm:$0xff]  ;;  %v16443_v60 = vcombine.high %v9605_v54, %v9609_v33  ;;  %v16442_v5 = vcombine.low %v9605_v54, %v9609_v33 }
0x1261   : > { %v16471_v61 = vcombine.high %v9631_v55, %v9635_v56  ;;  %v16470_v10 = vcombine.low %v9631_v55, %v9635_v56 }
0x1262   : > { %10670 = vmatpush1.bf16.msra.mxu0 %v16392_v19  ;;  %11413 = vmatpush1.bf16.msra.mxu1 %v16414_v63  ;;  %v9613_v19 = vld [vmem:[%s21966_s15 + $0x1c0] sm:$0xff] }
0x1263   : > { %11322 = vmatprep.subr.bf16.mxu0 %v16395_v48  ;;  %11414 = vmatprep.subr.bf16.mxu1 %v16423_v18  ;;  %v9617_v63 = vld [vmem:[%s21966_s15 + $0x1e0] sm:$0xff]  ;;  %v9639_v48 = vld [vmem:[%s21966_s15 + $0x290] sm:$0xff] }
0x1264   : > { %v9643_v18 = vld [vmem:[%s21966_s15 + $0x2b0] sm:$0xff]  ;;  %v16451_v31 = vcombine.high %v9613_v19, %v9617_v63  ;;  %v16450_v40 = vcombine.low %v9613_v19, %v9617_v63  ;;  %v9669_v63 = vld [vmem:[%s21966_s15 + $0x380] sm:$0xff] }
0x1265   : > { %10672 = vmatmul.mubr.bf16.vlgmr.msra.gmra.mrb[100].mxu0 %v21116_v46  ;;  %v9611_v46 = vld [vmem:[%s21966_s15 + $0x1b0] sm:$0xff]  ;;  %v16479_v8 = vcombine.high %v9639_v48, %v9643_v18  ;;  %v16478_v47 = vcombine.low %v9639_v48, %v9643_v18  ;;  %v9673_v48 = vld [vmem:[%s21966_s15 + $0x3a0] sm:$0xff] }
0x1266   : > { %11323 = vmatpush1.bf16.msra.mxu0 %v16394_v0  ;;  %11354 = vmatprep.mubr.bf16.mxu0 %v21109_v2  ;;  %v16447_v21 = vcombine.high %v9607_v11, %v9611_v46  ;;  %v16446_v36 = vcombine.low %v9607_v11, %v9611_v46  ;;  %v9621_v0 = vld [vmem:[%s21966_s15 + $0x200] sm:$0xff] }
0x1267   : > { %11415 = vmatpush1.bf16.msra.mxu1 %v16422_v9  ;;  %11324 = vmatprep.subr.bf16.mxu0 %v16403_v12  ;;  %v9625_v9 = vld [vmem:[%s21966_s15 + $0x220] sm:$0xff]  ;;  %v9647_v12 = vld [vmem:[%s21966_s15 + $0x2d0] sm:$0xff] }
0x1268   : > { %11416 = vmatprep.subr.bf16.mxu1 %v16431_v57  ;;  %v9651_v57 = vld [vmem:[%s21966_s15 + $0x2f0] sm:$0xff]  ;;  %v16459_v1 = vcombine.high %v9621_v0, %v9625_v9  ;;  %v16458_v6 = vcombine.low %v9621_v0, %v9625_v9  ;;  %v9558_v9 = vld [vmem:[%s21966_s15 + $0x8] sm:$0xff] }
0x1269   : > { %v16487_v14 = vcombine.high %v9647_v12, %v9651_v57  ;;  %v16486_v59 = vcombine.low %v9647_v12, %v9651_v57  ;;  %v9562_v12 = vld [vmem:[%s21966_s15 + $0x28] sm:$0xff]  ;;  %v18846_v57 = vld [vmem:[%s21967_s16 + $0x10] sm:$0xff]  }
0x126a   : > { %11325 = vmatpush1.bf16.msra.mxu0 %v16402_v43  ;;  %v9629_v43 = vld [vmem:[%s21966_s15 + $0x240] sm:$0xff] }
0x126b   : > { %11417 = vmatpush1.bf16.msra.mxu1 %v16430_v52  ;;  %11326 = vmatprep.subr.bf16.mxu0 %v16411_v3  ;;  %v9633_v52 = vld [vmem:[%s21966_s15 + $0x260] sm:$0xff]  ;;  %v9655_v3 = vld [vmem:[%s21966_s15 + $0x310] sm:$0xff] }
0x126c   : > { %11418 = vmatprep.subr.bf16.mxu1 %v16439_v4  ;;  %v9659_v4 = vld [vmem:[%s21966_s15 + $0x330] sm:$0xff]  ;;  %v16467_v11 = vcombine.high %v9629_v43, %v9633_v52  ;;  %v16466_v22 = vcombine.low %v9629_v43, %v9633_v52  ;;  %v9578_v43 = vld [vmem:[%s21966_s15 + $0xa8] sm:$0xff] }
0x126d   : > { %v16495_v46 = vcombine.high %v9655_v3, %v9659_v4  ;;  %v16494_v32 = vcombine.low %v9655_v3, %v9659_v4  ;;  %v16528_v3 = vld [vmem:[%s21966_s15 + $0x810] sm:$0xff] }
0x126e   : > { %11327 = vmatpush1.bf16.msra.mxu0 %v16410_v16  ;;  %v9637_v16 = vld [vmem:[%s21966_s15 + $0x280] sm:$0xff]  ;;  %v16532_v4 = vld [vmem:[%s21966_s15 + $0x830] sm:$0xff] }
0x126f   : > { %11419 = vmatpush1.bf16.msra.mxu1 %v16438_v17  ;;  %11328 = vmatprep.subr.bf16.mxu0 %v16419_v20  ;;  %v9641_v17 = vld [vmem:[%s21966_s15 + $0x2a0] sm:$0xff]  ;;  %v9663_v20 = vld [vmem:[%s21966_s15 + $0x350] sm:$0xff] }
0x1270   : > { %11420 = vmatprep.subr.bf16.mxu1 %v16447_v21  ;;  %v9667_v21 = vld [vmem:[%s21966_s15 + $0x370] sm:$0xff]  ;;  %v16475_v7 = vcombine.high %v9637_v16, %v9641_v17  ;;  %v16474_v41 = vcombine.low %v9637_v16, %v9641_v17  ;;  %v9586_v16 = vld [vmem:[%s21966_s15 + $0xe8] sm:$0xff] }
0x1271   : > { %v16503_v34 = vcombine.high %v9663_v20, %v9667_v21  ;;  %v16502_v50 = vcombine.low %v9663_v20, %v9667_v21  ;;  %v16536_v20 = vld [vmem:[%s21966_s15 + $0x850] sm:$0xff] }
0x1272   : > { %11329 = vmatpush1.bf16.msra.mxu0 %v16418_v35  ;;  %v9645_v35 = vld [vmem:[%s21966_s15 + $0x2c0] sm:$0xff]  ;;  %v16540_v21 = vld [vmem:[%s21966_s15 + $0x870] sm:$0xff] }
0x1273   : > { %11421 = vmatpush1.bf16.msra.mxu1 %v16446_v36  ;;  %11330 = vmatprep.subr.bf16.mxu0 %v16427_v37  ;;  %v9649_v36 = vld [vmem:[%s21966_s15 + $0x2e0] sm:$0xff]  ;;  %v9671_v37 = vld [vmem:[%s21966_s15 + $0x390] sm:$0xff] }
0x1274   : > { %11422 = vmatprep.subr.bf16.mxu1 %v16455_v38  ;;  %v9675_v38 = vld [vmem:[%s21966_s15 + $0x3b0] sm:$0xff]  ;;  %v16483_v24 = vcombine.high %v9645_v35, %v9649_v36  ;;  %v16482_v54 = vcombine.low %v9645_v35, %v9649_v36  ;;  %v9594_v35 = vld [vmem:[%s21966_s15 + $0x128] sm:$0xff] }
0x1275   : > { %v16511_v25 = vcombine.high %v9671_v37, %v9675_v38  ;;  %v16510_v33 = vcombine.low %v9671_v37, %v9675_v38  ;;  %v16544_v37 = vld [vmem:[%s21966_s15 + $0x890] sm:$0xff] }
0x1276   : > { %11331 = vmatpush1.bf16.msra.mxu0 %v16426_v30  ;;  %v9653_v30 = vld [vmem:[%s21966_s15 + $0x300] sm:$0xff]  ;;  %v16548_v38 = vld [vmem:[%s21966_s15 + $0x8b0] sm:$0xff] }
0x1277   : > { %11423 = vmatpush1.bf16.msra.mxu1 %v16454_v28  ;;  %11332 = vmatprep.subr.bf16.mxu0 %v16435_v39  ;;  %v9657_v28 = vld [vmem:[%s21966_s15 + $0x320] sm:$0xff]  ;;  %v9679_v39 = vld [vmem:[%s21966_s15 + $0x3d0] sm:$0xff] }
0x1278   : > { %11424 = vmatprep.subr.bf16.mxu1 %v16463_v53  ;;  %v9683_v53 = vld [vmem:[%s21966_s15 + $0x3f0] sm:$0xff]  ;;  %v16491_v55 = vcombine.high %v9653_v30, %v9657_v28 }
0x1279   : > { %v16519_v56 = vcombine.high %v9679_v39, %v9683_v53 }
0x127a   : > { %11333 = vmatpush1.bf16.msra.mxu0 %v16434_v49  ;;  %v9661_v49 = vld [vmem:[%s21966_s15 + $0x340] sm:$0xff] }
0x127b   : > { %11425 = vmatpush1.bf16.msra.mxu1 %v16462_v58  ;;  %11334 = vmatprep.subr.bf16.mxu0 %v16443_v60  ;;  %v9665_v58 = vld [vmem:[%s21966_s15 + $0x360] sm:$0xff]  ;;  %v16490_v60 = vcombine.low %v9653_v30, %v9657_v28  ;;  %v9602_v30 = vld [vmem:[%s21966_s15 + $0x168] sm:$0xff] }
0x127c   : > { %11426 = vmatprep.subr.bf16.mxu1 %v16471_v61  ;;  %v16518_v61 = vcombine.low %v9679_v39, %v9683_v53  ;;  %v16499_v19 = vcombine.high %v9661_v49, %v9665_v58  ;;  %v16498_v18 = vcombine.low %v9661_v49, %v9665_v58  ;;  %v16552_v39 = vld [vmem:[%s21966_s15 + $0x8d0] sm:$0xff]  ;;  %v9610_v49 = vld [vmem:[%s21966_s15 + $0x1a8] sm:$0xff] }
0x127d   : > { %v16556_v53 = vld [vmem:[%s21966_s15 + $0x8f0] sm:$0xff] }
0x127e   : > { %11335 = vmatpush1.bf16.msra.mxu0 %v16442_v5  ;;  %v16507_v5 = vcombine.high %v9669_v63, %v9673_v48 }
0x127f   : > { %11427 = vmatpush1.bf16.msra.mxu1 %v16470_v10  ;;  %11336 = vmatprep.subr.bf16.mxu0 %v16451_v31  ;;  %v9677_v10 = vld [vmem:[%s21966_s15 + $0x3c0] sm:$0xff] }
0x1280   : > { %11428 = vmatprep.subr.bf16.mxu1 %v16479_v8  ;;  %v9681_v31 = vld [vmem:[%s21966_s15 + $0x3e0] sm:$0xff]  ;;  %v16506_v8 = vcombine.low %v9669_v63, %v9673_v48 }
0x1281   : > { %v16515_v0 = vcombine.high %v9677_v10, %v9681_v31 }
0x1282   : > { %11337 = vmatpush1.bf16.msra.mxu0 %v16450_v40  ;;  %v16397_v40 = vcombine.high %v9558_v9, %v9562_v12 }
0x1283   : > { %11429 = vmatpush1.bf16.msra.mxu1 %v16478_v47  ;;  %11338 = vmatprep.subr.bf16.mxu0 %v16459_v1  ;;  %v9566_v47 = vld [vmem:[%s21966_s15 + $0x48] sm:$0xff] }
0x1284   : > { %11430 = vmatprep.subr.bf16.mxu1 %v16487_v14  ;;  %v9570_v1 = vld [vmem:[%s21966_s15 + $0x68] sm:$0xff] }
0x1285   : > { %v9574_v14 = vld [vmem:[%s21966_s15 + $0x88] sm:$0xff]  ;;  %v16404_v52 = vcombine.low %v9566_v47, %v9570_v1 }
0x1286   : > { %11339 = vmatpush1.bf16.msra.mxu0 %v16458_v6  ;;  %v16413_v6 = vcombine.high %v9574_v14, %v9578_v43  ;;  %v16412_v17 = vcombine.low %v9574_v14, %v9578_v43  ;;  %v9630_v43 = vld [vmem:[%s21966_s15 + $0x248] sm:$0xff] }
0x1287   : > { %11431 = vmatpush1.bf16.msra.mxu1 %v16486_v59  ;;  %11340 = vmatprep.subr.bf16.mxu0 %v16467_v11  ;;  %v16658_v59 = vcombine.low %v16528_v3, %v16532_v4  ;;  %v16659_v11 = vcombine.high %v16528_v3, %v16532_v4  ;;  %v16584_v4 = vld [vmem:[%s21966_s15 + $0x9d0] sm:$0xff] }
0x1288   : > { %11432 = vmatprep.subr.bf16.mxu1 %v16495_v46  ;;  %v9582_v46 = vld [vmem:[%s21966_s15 + $0xc8] sm:$0xff] }
0x1289   : > { %v16420_v36 = vcombine.low %v9582_v46, %v9586_v16 }
0x128a   : > { %11341 = vmatpush1.bf16.msra.mxu0 %v16466_v22  ;;  %v16421_v22 = vcombine.high %v9582_v46, %v9586_v16  ;;  %v9638_v16 = vld [vmem:[%s21966_s15 + $0x288] sm:$0xff] }
0x128b   : > { %11433 = vmatpush1.bf16.msra.mxu1 %v16494_v32  ;;  %11342 = vmatprep.subr.bf16.mxu0 %v16475_v7  ;;  %v16666_v32 = vcombine.low %v16536_v20, %v16540_v21  ;;  %v16667_v7 = vcombine.high %v16536_v20, %v16540_v21  ;;  %v16592_v21 = vld [vmem:[%s21966_s15 + $0xa10] sm:$0xff] }
0x128c   : > { %11434 = vmatprep.subr.bf16.mxu1 %v16503_v34  ;;  %v9590_v34 = vld [vmem:[%s21966_s15 + $0x108] sm:$0xff] }
0x128d   : > { %v16428_v28 = vcombine.low %v9590_v34, %v9594_v35 }
0x128e   : > { %11343 = vmatpush1.bf16.msra.mxu0 %v16474_v41  ;;  %v16429_v41 = vcombine.high %v9590_v34, %v9594_v35  ;;  %v9646_v35 = vld [vmem:[%s21966_s15 + $0x2c8] sm:$0xff] }
0x128f   : > { %11435 = vmatpush1.bf16.msra.mxu1 %v16502_v50  ;;  %11344 = vmatprep.subr.bf16.mxu0 %v16483_v24  ;;  %v16674_v50 = vcombine.low %v16544_v37, %v16548_v38  ;;  %v16675_v24 = vcombine.high %v16544_v37, %v16548_v38  ;;  %v16600_v38 = vld [vmem:[%s21966_s15 + $0xa50] sm:$0xff] }
0x1290   : > { %11436 = vmatprep.subr.bf16.mxu1 %v16511_v25  ;;  %v9598_v25 = vld [vmem:[%s21966_s15 + $0x148] sm:$0xff] }
0x1291   : > { %v16436_v58 = vcombine.low %v9598_v25, %v9602_v30 }
0x1292   : > { %11345 = vmatpush1.bf16.msra.mxu0 %v16482_v54  ;;  %v16437_v54 = vcombine.high %v9598_v25, %v9602_v30  ;;  %v9654_v30 = vld [vmem:[%s21966_s15 + $0x308] sm:$0xff] }
0x1293   : > { %11437 = vmatpush1.bf16.msra.mxu1 %v16510_v33  ;;  %11346 = vmatprep.subr.bf16.mxu0 %v16491_v55  ;;  %v16682_v33 = vcombine.low %v16552_v39, %v16556_v53  ;;  %v16683_v55 = vcombine.high %v16552_v39, %v16556_v53  ;;  %v16608_v53 = vld [vmem:[%s21966_s15 + $0xa90] sm:$0xff] }
0x1294   : > { %11438 = vmatprep.subr.bf16.mxu1 %v16519_v56  ;;  %v9606_v56 = vld [vmem:[%s21966_s15 + $0x188] sm:$0xff] }
0x1296   : > { %11347 = vmatpush1.bf16.msra.mxu0 %v16490_v60  ;;  %v16560_v60 = vld [vmem:[%s21966_s15 + $0x910] sm:$0xff] }
0x1297   : > { %11439 = vmatpush1.bf16.msra.mxu1 %v16518_v61  ;;  %11348 = vmatprep.subr.bf16.mxu0 %v16499_v19  ;;  %v16564_v61 = vld [vmem:[%s21966_s15 + $0x930] sm:$0xff]  ;;  %v16445_v19 = vcombine.high %v9606_v56, %v9610_v49 }
0x1298   : > { %11505 = vmatprep.subr.bf16.mxu1 %v20391_v45  ;;  %v16514_v45 = vcombine.low %v9677_v10, %v9681_v31  ;;  %v16690_v63 = vcombine.low %v16560_v60, %v16564_v61  ;;  %v16691_v48 = vcombine.high %v16560_v60, %v16564_v61  ;;  %v16444_v10 = vcombine.low %v9606_v56, %v9610_v49  ;;  %v16568_v31 = vld [vmem:[%s21966_s15 + $0x950] sm:$0xff]  ;;  %v9662_v49 = vld [vmem:[%s21966_s15 + $0x348] sm:$0xff] }
0x1299   : > { %v16616_v61 = vld [vmem:[%s21966_s15 + $0xad0] sm:$0xff] }
0x129a   : > { %11441 = vmatmul.mubr.bf16.vlgmr.msra.gmra.mrb[108].mxu1 %v21106_v62  ;;  %11349 = vmatpush1.bf16.msra.mxu0 %v16498_v18  ;;  %v9614_v18 = vld [vmem:[%s21966_s15 + $0x1c8] sm:$0xff] }
0x129b   : > { %11506 = vmatpush1.bf16.msra.mxu1 %v20389_v44  ;;  %11350 = vmatprep.subr.bf16.mxu0 %v16507_v5  ;;  %v16396_v44 = vcombine.low %v9558_v9, %v9562_v12  ;;  %v9618_v5 = vld [vmem:[%s21966_s15 + $0x1e8] sm:$0xff] }
0x129c   : > { %11537 = vmatprep.mubr.bf16.mxu1 %v19844_v23  ;;  %v16405_v23 = vcombine.high %v9566_v47, %v9570_v1  ;;  %12405 = vmatprep.subr.bf16.mxu1 %v16659_v11  ;;  %v16576_v47 = vld [vmem:[%s21966_s15 + $0x990] sm:$0xff] }
0x129d   : > { %v16580_v1 = vld [vmem:[%s21966_s15 + $0x9b0] sm:$0xff] }
0x129e   : > { %11351 = vmatpush1.bf16.msra.mxu0 %v16506_v8  ;;  %v16572_v8 = vld [vmem:[%s21966_s15 + $0x970] sm:$0xff]  ;;  %v16707_v14 = vcombine.high %v16576_v47, %v16580_v1 }
0x129f   : > { %11352 = vmatprep.subr.bf16.mxu0 %v16515_v0  ;;  %v16453_v0 = vcombine.high %v9614_v18, %v9618_v5  ;;  %v16698_v9 = vcombine.low %v16568_v31, %v16572_v8  ;;  %v16699_v12 = vcombine.high %v16568_v31, %v16572_v8  ;;  %v16624_v8 = vld [vmem:[%s21966_s15 + $0xb10] sm:$0xff] }
0x12a2   : > { %16525 = vmatmul.mubr.msk.bf16.vlgmr.msra.gmra.mrb[112].mxu1 %vm1844_vm3, %v18846_v57  ;;  %11353 = vmatpush1.bf16.msra.mxu0 %v16514_v45  ;;  %v9622_v45 = vld [vmem:[%s21966_s15 + $0x208] sm:$0xff] }
0x12a3   : > { %11365 = vmatprep.subr.bf16.mxu0 %v16397_v40  ;;  %12406 = vmatpush1.bf16.msra.mxu1 %v16658_v59  ;;  %v9626_v57 = vld [vmem:[%s21966_s15 + $0x228] sm:$0xff]  ;;  %v16452_v40 = vcombine.low %v9614_v18, %v9618_v5 }
0x12a4   : > { %12407 = vmatprep.subr.bf16.mxu1 %v16667_v7  ;;  %v16460_v3 = vcombine.low %v9622_v45, %v9626_v57  ;;  %v9670_v5 = vld [vmem:[%s21966_s15 + $0x388] sm:$0xff] }
0x12a5   : > { %11355 = vmatmul.mubr.bf16.vlgmr.msra.gmra.mrb[92].mxu0 %v21106_v62 }
0x12a6   : > { %11366 = vmatpush1.bf16.msra.mxu0 %v16396_v44  ;;  %11397 = vmatprep.mubr.bf16.mxu0 %v21109_v2  ;;  %v16461_v44 = vcombine.high %v9622_v45, %v9626_v57  ;;  %v9678_v57 = vld [vmem:[%s21966_s15 + $0x3c8] sm:$0xff] }
0x12a7   : > { %11367 = vmatprep.subr.bf16.mxu0 %v16405_v23  ;;  %12408 = vmatpush1.bf16.msra.mxu1 %v16666_v32  ;;  %v16706_v23 = vcombine.low %v16576_v47, %v16580_v1  ;;  %v16632_v1 = vld [vmem:[%s21966_s15 + $0xb50] sm:$0xff] }
0x12a8   : > { %12409 = vmatprep.subr.bf16.mxu1 %v16675_v24 }
0x12aa   : > { %11368 = vmatpush1.bf16.msra.mxu0 %v16404_v52  ;;  %v9634_v52 = vld [vmem:[%s21966_s15 + $0x268] sm:$0xff] }
0x12ab   : > { %11369 = vmatprep.subr.bf16.mxu0 %v16413_v6  ;;  %12410 = vmatpush1.bf16.msra.mxu1 %v16674_v50  ;;  %v16588_v6 = vld [vmem:[%s21966_s15 + $0x9f0] sm:$0xff]  ;;  %v16469_v59 = vcombine.high %v9630_v43, %v9634_v52  ;;  %v16468_v20 = vcombine.low %v9630_v43, %v9634_v52  ;;  %v9560_v52 = vld [vmem:[%s21966_s15 + $0x18] sm:$0xff] }
0x12ac   : > { %12411 = vmatprep.subr.bf16.mxu1 %v16683_v55  ;;  %v16714_v11 = vcombine.low %v16584_v4, %v16588_v6  ;;  %v16715_v46 = vcombine.high %v16584_v4, %v16588_v6  ;;  %v16640_v6 = vld [vmem:[%s21966_s15 + $0xb90] sm:$0xff] }
0x12ae   : > { %11370 = vmatpush1.bf16.msra.mxu0 %v16412_v17  ;;  %v9642_v17 = vld [vmem:[%s21966_s15 + $0x2a8] sm:$0xff] }
0x12af   : > { %11371 = vmatprep.subr.bf16.mxu0 %v16421_v22  ;;  %12412 = vmatpush1.bf16.msra.mxu1 %v16682_v33  ;;  %v16596_v22 = vld [vmem:[%s21966_s15 + $0xa30] sm:$0xff]  ;;  %v16477_v32 = vcombine.high %v9638_v16, %v9642_v17  ;;  %v16476_v37 = vcombine.low %v9638_v16, %v9642_v17  ;;  %v9568_v17 = vld [vmem:[%s21966_s15 + $0x58] sm:$0xff] }
0x12b0   : > { %12413 = vmatprep.subr.bf16.mxu1 %v16691_v48  ;;  %v16722_v7 = vcombine.low %v16592_v21, %v16596_v22  ;;  %v16723_v34 = vcombine.high %v16592_v21, %v16596_v22 }
0x12b2   : > { %11372 = vmatpush1.bf16.msra.mxu0 %v16420_v36  ;;  %v9650_v36 = vld [vmem:[%s21966_s15 + $0x2e8] sm:$0xff] }
0x12b3   : > { %11373 = vmatprep.subr.bf16.mxu0 %v16429_v41  ;;  %12414 = vmatpush1.bf16.msra.mxu1 %v16690_v63  ;;  %v16604_v41 = vld [vmem:[%s21966_s15 + $0xa70] sm:$0xff]  ;;  %v16485_v50 = vcombine.high %v9646_v35, %v9650_v36  ;;  %v16484_v39 = vcombine.low %v9646_v35, %v9650_v36 }
0x12b4   : > { %12415 = vmatprep.subr.bf16.mxu1 %v16699_v12  ;;  %v16730_v24 = vcombine.low %v16600_v38, %v16604_v41  ;;  %v16731_v25 = vcombine.high %v16600_v38, %v16604_v41  ;;  %v9085_v35 = vld [vmem:[#allocation28] sm:$0x3]  ;;  %v9588_v38 = vld [vmem:[%s21966_s15 + $0xf8] sm:$0xff] }
0x12b5   : > { %v9090_v41 = vrot.slane %v9085_v35, %v20382_v27 }
0x12b6   : > { %11374 = vmatpush1.bf16.msra.mxu0 %v16428_v28  ;;  %v9658_v28 = vld [vmem:[%s21966_s15 + $0x328] sm:$0xff] }
0x12b7   : > { %11375 = vmatprep.subr.bf16.mxu0 %v16437_v54  ;;  %12416 = vmatpush1.bf16.msra.mxu1 %v16698_v9  ;;  %v16612_v54 = vld [vmem:[%s21966_s15 + $0xab0] sm:$0xff]  ;;  %v16493_v33 = vcombine.high %v9654_v30, %v9658_v28  ;;  %v16492_v60 = vcombine.low %v9654_v30, %v9658_v28  ;;  %v9592_v30 = vld [vmem:[%s21966_s15 + $0x118] sm:$0xff] }
0x12b8   : > { %12417 = vmatprep.subr.bf16.mxu1 %v16707_v14  ;;  %v16738_v55 = vcombine.low %v16608_v53, %v16612_v54  ;;  %v16739_v56 = vcombine.high %v16608_v53, %v16612_v54  ;;  %v9596_v28 = vld [vmem:[%s21966_s15 + $0x138] sm:$0xff] }
0x12ba   : > { %11376 = vmatpush1.bf16.msra.mxu0 %v16436_v58  ;;  %v9666_v58 = vld [vmem:[%s21966_s15 + $0x368] sm:$0xff] }
0x12bb   : > { %11377 = vmatprep.subr.bf16.mxu0 %v16445_v19  ;;  %12418 = vmatpush1.bf16.msra.mxu1 %v16706_v23  ;;  %v16620_v19 = vld [vmem:[%s21966_s15 + $0xaf0] sm:$0xff]  ;;  %v16501_v63 = vcombine.high %v9662_v49, %v9666_v58  ;;  %v16500_v31 = vcombine.low %v9662_v49, %v9666_v58  ;;  %v16433_v49 = vcombine.high %v9592_v30, %v9596_v28  ;;  %v9600_v58 = vld [vmem:[%s21966_s15 + $0x158] sm:$0xff] }
0x12bc   : > { %12419 = vmatprep.subr.bf16.mxu1 %v16715_v46  ;;  %v16746_v48 = vcombine.low %v16616_v61, %v16620_v19  ;;  %v16747_v18 = vcombine.high %v16616_v61, %v16620_v19  ;;  %v16432_v61 = vcombine.low %v9592_v30, %v9596_v28  ;;  %v16526_v28 = vld [vmem:[%s21966_s15 + $0x800] sm:$0xff] }
0x12be   : > { %11378 = vmatpush1.bf16.msra.mxu0 %v16444_v10  ;;  %v9674_v10 = vld [vmem:[%s21966_s15 + $0x3a8] sm:$0xff] }
0x12bf   : > { %11379 = vmatprep.subr.bf16.mxu0 %v16453_v0  ;;  %12420 = vmatpush1.bf16.msra.mxu1 %v16714_v11  ;;  %v16628_v0 = vld [vmem:[%s21966_s15 + $0xb30] sm:$0xff]  ;;  %v16509_v9 = vcombine.high %v9670_v5, %v9674_v10  ;;  %v16508_v47 = vcombine.low %v9670_v5, %v9674_v10 }
0x12c0   : > { %12421 = vmatprep.subr.bf16.mxu1 %v16723_v34  ;;  %v16754_v12 = vcombine.low %v16624_v8, %v16628_v0  ;;  %v16755_v45 = vcombine.high %v16624_v8, %v16628_v0  ;;  %v16652_v5 = vld [vmem:[%s21966_s15 + $0xbf0] sm:$0xff] }
0x12c2   : > { %11380 = vmatpush1.bf16.msra.mxu0 %v16452_v40  ;;  %v9682_v40 = vld [vmem:[%s21966_s15 + $0x3e8] sm:$0xff] }
0x12c3   : > { %11381 = vmatprep.subr.bf16.mxu0 %v16461_v44  ;;  %12422 = vmatpush1.bf16.msra.mxu1 %v16722_v7  ;;  %v16636_v44 = vld [vmem:[%s21966_s15 + $0xb70] sm:$0xff]  ;;  %v16517_v23 = vcombine.high %v9678_v57, %v9682_v40  ;;  %v16516_v4 = vcombine.low %v9678_v57, %v9682_v40  ;;  %v9580_v7 = vld [vmem:[%s21966_s15 + $0xb8] sm:$0xff] }
0x12c4   : > { %12423 = vmatprep.subr.bf16.mxu1 %v16731_v25  ;;  %v16762_v14 = vcombine.low %v16632_v1, %v16636_v44  ;;  %v16763_v43 = vcombine.high %v16632_v1, %v16636_v44  ;;  %v9624_v40 = vld [vmem:[%s21966_s15 + $0x218] sm:$0xff] }
0x12c6   : > { %11382 = vmatpush1.bf16.msra.mxu0 %v16460_v3  ;;  %v9564_v3 = vld [vmem:[%s21966_s15 + $0x38] sm:$0xff] }
0x12c7   : > { %11383 = vmatprep.subr.bf16.mxu0 %v16469_v59  ;;  %12424 = vmatpush1.bf16.msra.mxu1 %v16730_v24  ;;  %v16644_v59 = vld [vmem:[%s21966_s15 + $0xbb0] sm:$0xff]  ;;  %v16401_v11 = vcombine.high %v9560_v52, %v9564_v3  ;;  %v16400_v21 = vcombine.low %v9560_v52, %v9564_v3  ;;  %v9640_v3 = vld [vmem:[%s21966_s15 + $0x298] sm:$0xff] }
0x12c8   : > { %12425 = vmatprep.subr.bf16.mxu1 %v16739_v56  ;;  %v16770_v46 = vcombine.low %v16640_v6, %v16644_v59  ;;  %v16771_v16 = vcombine.high %v16640_v6, %v16644_v59 }
0x12ca   : > { %11384 = vmatpush1.bf16.msra.mxu0 %v16468_v20  ;;  %v9572_v20 = vld [vmem:[%s21966_s15 + $0x78] sm:$0xff] }
0x12cb   : > { %11385 = vmatprep.subr.bf16.mxu0 %v16477_v32  ;;  %12426 = vmatpush1.bf16.msra.mxu1 %v16738_v55  ;;  %v16409_v22 = vcombine.high %v9568_v17, %v9572_v20  ;;  %v9576_v32 = vld [vmem:[%s21966_s15 + $0x98] sm:$0xff]  ;;  %v16408_v34 = vcombine.low %v9568_v17, %v9572_v20 }
0x12cc   : > { %12427 = vmatprep.subr.bf16.mxu1 %v16747_v18  ;;  %v16417_v36 = vcombine.high %v9576_v32, %v9580_v7  ;;  %v16416_v24 = vcombine.low %v9576_v32, %v9580_v7  ;;  %v16648_v18 = vld [vmem:[%s21966_s15 + $0xbd0] sm:$0xff]  ;;  %v9656_v20 = vld [vmem:[%s21966_s15 + $0x318] sm:$0xff] }
0x12cd   : > { %v16778_v0 = vcombine.low %v16648_v18, %v16652_v5  ;;  %v9664_v7 = vld [vmem:[%s21966_s15 + $0x358] sm:$0xff] }
0x12ce   : > { %11386 = vmatpush1.bf16.msra.mxu0 %v16476_v37  ;;  %v9584_v37 = vld [vmem:[%s21966_s15 + $0xd8] sm:$0xff] }
0x12cf   : > { %11387 = vmatprep.subr.bf16.mxu0 %v16485_v50  ;;  %12428 = vmatpush1.bf16.msra.mxu1 %v16746_v48  ;;  %v9094_v50 = vrot.slane %v9085_v35, %v20385_v29  ;;  %v16425_v25 = vcombine.high %v9584_v37, %v9588_v38  ;;  %v16424_v55 = vcombine.low %v9584_v37, %v9588_v38  ;;  %v9612_v48 = vld [vmem:[%s21966_s15 + $0x1b8] sm:$0xff] }
0x12d0   : > { %12429 = vmatprep.subr.bf16.mxu1 %v16755_v45  ;;  %v9672_v37 = vld [vmem:[%s21966_s15 + $0x398] sm:$0xff] }
0x12d1   : > { %v9676_v38 = vld [vmem:[%s21966_s15 + $0x3b8] sm:$0xff] }
0x12d2   : > { %11388 = vmatpush1.bf16.msra.mxu0 %v16484_v39 }
0x12d3   : > { %11389 = vmatprep.subr.bf16.mxu0 %v16493_v33  ;;  %12430 = vmatpush1.bf16.msra.mxu1 %v16754_v12  ;;  %v9620_v12 = vld [vmem:[%s21966_s15 + $0x1f8] sm:$0xff] }
0x12d4   : > { %12431 = vmatprep.subr.bf16.mxu1 %v16763_v43 }
0x12d6   : > { %11390 = vmatpush1.bf16.msra.mxu0 %v16492_v60  ;;  %v9604_v60 = vld [vmem:[%s21966_s15 + $0x178] sm:$0xff] }
0x12d7   : > { %11391 = vmatprep.subr.bf16.mxu0 %v16501_v63  ;;  %12432 = vmatpush1.bf16.msra.mxu1 %v16762_v14  ;;  %v16441_v19 = vcombine.high %v9600_v58, %v9604_v60  ;;  %v9608_v63 = vld [vmem:[%s21966_s15 + $0x198] sm:$0xff]  ;;  %v16440_v10 = vcombine.low %v9600_v58, %v9604_v60  ;;  %v16542_v58 = vld [vmem:[%s21966_s15 + $0x880] sm:$0xff] }
0x12d8   : > { %12433 = vmatprep.subr.bf16.mxu1 %v16771_v16  ;;  %v16449_v8 = vcombine.high %v9608_v63, %v9612_v48  ;;  %v16448_v45 = vcombine.low %v9608_v63, %v9612_v48  ;;  %v9636_v14 = vld [vmem:[%s21966_s15 + $0x278] sm:$0xff]  ;;  %v16546_v60 = vld [vmem:[%s21966_s15 + $0x8a0] sm:$0xff] }
0x12d9   : > { %v16550_v63 = vld [vmem:[%s21966_s15 + $0x8c0] sm:$0xff] }
0x12da   : > { %11392 = vmatpush1.bf16.msra.mxu0 %v16500_v31  ;;  %v16779_v31 = vcombine.high %v16648_v18, %v16652_v5  ;;  %v16554_v48 = vld [vmem:[%s21966_s15 + $0x8e0] sm:$0xff]  ;;  %v16670_v18 = vcombine.low %v16542_v58, %v16546_v60 }
0x12db   : > { %11393 = vmatprep.subr.bf16.mxu0 %v16509_v9  ;;  %12434 = vmatpush1.bf16.msra.mxu1 %v16770_v46  ;;  %v9616_v9 = vld [vmem:[%s21966_s15 + $0x1d8] sm:$0xff]  ;;  %v16679_v5 = vcombine.high %v16550_v63, %v16554_v48 }
0x12dc   : > { %12435 = vmatprep.subr.bf16.mxu1 %v16779_v31  ;;  %v16457_v57 = vcombine.high %v9616_v9, %v9620_v12  ;;  %v16456_v1 = vcombine.low %v9616_v9, %v9620_v12  ;;  %v9652_v46 = vld [vmem:[%s21966_s15 + $0x2f8] sm:$0xff]  ;;  %v16562_v31 = vld [vmem:[%s21966_s15 + $0x920] sm:$0xff] }
0x12dd   : > { %v16570_v9 = vld [vmem:[%s21966_s15 + $0x960] sm:$0xff] }
0x12de   : > { %11394 = vmatpush1.bf16.msra.mxu0 %v16508_v47  ;;  %v9628_v47 = vld [vmem:[%s21966_s15 + $0x238] sm:$0xff] }
0x12df   : > { %11395 = vmatprep.subr.bf16.mxu0 %v16517_v23  ;;  %12436 = vmatpush1.bf16.msra.mxu1 %v16778_v0  ;;  %v16465_v44 = vcombine.high %v9624_v40, %v9628_v47  ;;  %v9632_v23 = vld [vmem:[%s21966_s15 + $0x258] sm:$0xff]  ;;  %v16464_v43 = vcombine.low %v9624_v40, %v9628_v47  ;;  %v16566_v0 = vld [vmem:[%s21966_s15 + $0x940] sm:$0xff] }
0x12e0   : > { %v16473_v52 = vcombine.high %v9632_v23, %v9636_v14  ;;  %v16472_v6 = vcombine.low %v9632_v23, %v9636_v14  ;;  %v16578_v40 = vld [vmem:[%s21966_s15 + $0x9a0] sm:$0xff]  ;;  %v16694_v47 = vcombine.low %v16566_v0, %v16570_v9 }
0x12e1   : > { %v16586_v23 = vld [vmem:[%s21966_s15 + $0x9e0] sm:$0xff] }
0x12e2   : > { %11396 = vmatpush1.bf16.msra.mxu0 %v16516_v4  ;;  %v9644_v4 = vld [vmem:[%s21966_s15 + $0x2b8] sm:$0xff] }
0x12e3   : > { %11451 = vmatprep.subr.bf16.mxu0 %v16401_v11  ;;  %v16481_v59 = vcombine.high %v9640_v3, %v9644_v4  ;;  %v9648_v11 = vld [vmem:[%s21966_s15 + $0x2d8] sm:$0xff]  ;;  %v16480_v16 = vcombine.low %v9640_v3, %v9644_v4  ;;  %v16594_v3 = vld [vmem:[%s21966_s15 + $0xa20] sm:$0xff] }
0x12e4   : > { %v16489_v17 = vcombine.high %v9648_v11, %v9652_v46 }
0x12e5   : > { %11398 = vmatmul.mubr.bf16.vlgmr.msra.gmra.mrb[96].mxu0 %v21106_v62 }
0x12e6   : > { %11452 = vmatpush1.bf16.msra.mxu0 %v16400_v21  ;;  %11483 = vmatprep.mubr.bf16.mxu0 %v21109_v2  ;;  %v9660_v21 = vld [vmem:[%s21966_s15 + $0x338] sm:$0xff] }
0x12e7   : > { %11453 = vmatprep.subr.bf16.mxu0 %v16409_v22  ;;  %v16488_v22 = vcombine.low %v9648_v11, %v9652_v46  ;;  %v16497_v32 = vcombine.high %v9656_v20, %v9660_v21  ;;  %v16496_v35 = vcombine.low %v9656_v20, %v9660_v21  ;;  %v16602_v11 = vld [vmem:[%s21966_s15 + $0xa60] sm:$0xff] }
0x12e8   : > { %v16610_v20 = vld [vmem:[%s21966_s15 + $0xaa0] sm:$0xff] }
0x12ea   : > { %11454 = vmatpush1.bf16.msra.mxu0 %v16408_v34  ;;  %v9668_v34 = vld [vmem:[%s21966_s15 + $0x378] sm:$0xff] }
0x12eb   : > { %11455 = vmatprep.subr.bf16.mxu0 %v16417_v36  ;;  %v16505_v36 = vcombine.high %v9664_v7, %v9668_v34 }
0x12ec   : > { %v9492_v2 = vpop.f32.mrb[104].mxu1 }
0x12ed   : > { %v17164_v39 = vadd.f32 %v9492_v2, %v9090_v41  ;;  %v9494_v53 = vpop.f32.mrb[105].mxu1  ;;  %v16504_v41 = vcombine.low %v9664_v7, %v9668_v34  ;;  %v16512_v2 = vcombine.low %v9672_v37, %v9676_v38  ;;  %v16618_v7 = vld [vmem:[%s21966_s15 + $0xae0] sm:$0xff] }
0x12ee   : > { %v17165_v54 = vadd.f32 %v9494_v53, %v9094_v50  ;;  %v9496_v33 = vpop.f32.mrb[106].mxu1  ;;  %11456 = vmatpush1.bf16.msra.mxu0 %v16416_v24  ;;  %v16513_v50 = vcombine.high %v9672_v37, %v9676_v38  ;;  %v9680_v24 = vld [vmem:[%s21966_s15 + $0x3d8] sm:$0xff]  ;;  %v16626_v37 = vld [vmem:[%s21966_s15 + $0xb20] sm:$0xff] }
0x12ef   : > { %9499 = vst [vmem:[%s1288_s22] sm:$0xff] %v17164_v39  ;;  %v9497_v56 = vpop.f32.mrb[107].mxu1  ;;  %11457 = vmatprep.subr.bf16.mxu0 %v16425_v25  ;;  %v9684_v25 = vld [vmem:[%s21966_s15 + $0x3f8] sm:$0xff]  ;;  %v16530_v39 = vld [vmem:[%s21966_s15 + $0x820] sm:$0xff] }
0x12f0   : > { %9501 = vst.msk [vmem:[%s1288_s22 + $0x8] sm:$0xff] %vm9500_vm10, %v17165_v54  ;;  %v16521_v30 = vcombine.high %v9680_v24, %v9684_v25  ;;  %v16520_v53 = vcombine.low %v9680_v24, %v9684_v25  ;;  %v16655_v54 = vcombine.high %v16526_v28, %v16530_v39  ;;  %v16534_v33 = vld [vmem:[%s21966_s15 + $0x840] sm:$0xff]  ;;  %v16654_v56 = vcombine.low %v16526_v28, %v16530_v39  ;;  %s21832_s22 = scalar_lea.vmem %s20018_s27, %s17042_s1 }
0x12f1   : > { %v16634_v24 = vld [vmem:[%s21966_s15 + $0xb60] sm:$0xff] }
0x12f2   : > { %11458 = vmatpush1.bf16.msra.mxu0 %v16424_v55  ;;  %v16538_v55 = vld [vmem:[%s21966_s15 + $0x860] sm:$0xff] }
0x12f3   : > { %11459 = vmatprep.subr.bf16.mxu0 %v16433_v49  ;;  %v16663_v49 = vcombine.high %v16534_v33, %v16538_v55  ;;  %v16642_v28 = vld [vmem:[%s21966_s15 + $0xba0] sm:$0xff] }
0x12f6   : > { %11460 = vmatpush1.bf16.msra.mxu0 %v16432_v61  ;;  %v16662_v61 = vcombine.low %v16534_v33, %v16538_v55  ;;  %v16650_v33 = vld [vmem:[%s21966_s15 + $0xbe0] sm:$0xff] }
0x12f7   : > { %11461 = vmatprep.subr.bf16.mxu0 %v16441_v19  ;;  %v16671_v19 = vcombine.high %v16542_v58, %v16546_v60  ;;  %v16531_v58 = vld [vmem:[%s21966_s15 + $0x828] sm:$0xff] }
0x12fa   : > { %11462 = vmatpush1.bf16.msra.mxu0 %v16440_v10  ;;  %v16558_v10 = vld [vmem:[%s21966_s15 + $0x900] sm:$0xff] }
0x12fb   : > { %11463 = vmatprep.subr.bf16.mxu0 %v16449_v8  ;;  %v16678_v8 = vcombine.low %v16550_v63, %v16554_v48  ;;  %v16686_v12 = vcombine.low %v16558_v10, %v16562_v31 }
0x12fe   : > { %11464 = vmatpush1.bf16.msra.mxu0 %v16448_v45  ;;  %v16695_v45 = vcombine.high %v16566_v0, %v16570_v9  ;;  %v16543_v9 = vld [vmem:[%s21966_s15 + $0x888] sm:$0xff] }
0x12ff   : > { %11465 = vmatprep.subr.bf16.mxu0 %v16457_v57  ;;  %v16574_v57 = vld [vmem:[%s21966_s15 + $0x980] sm:$0xff] }
0x1300   : > { %v16702_v14 = vcombine.low %v16574_v57, %v16578_v40 }
0x1302   : > { %11466 = vmatpush1.bf16.msra.mxu0 %v16456_v1  ;;  %v16703_v1 = vcombine.high %v16574_v57, %v16578_v40  ;;  %v18849_v57 = vld [vmem:[%s21968_s4 + $0x4] ss:$16 sps:$4 sm:$0xff]  }
0x1303   : > { %11467 = vmatprep.subr.bf16.mxu0 %v16465_v44  ;;  %v16582_v44 = vld [vmem:[%s21966_s15 + $0x9c0] sm:$0xff]  ;;  %14147 = vmatprep.subr.bf16.mxu1 %v18849_v57 }
0x1304   : > { %v16710_v4 = vcombine.low %v16582_v44, %v16586_v23  ;;  %v18879_v57 = vld [vmem:[%s21968_s4 + $0x144] ss:$16 sps:$4 sm:$0xff]  }
0x1306   : > { %11468 = vmatpush1.bf16.msra.mxu0 %v16464_v43  ;;  %v16711_v43 = vcombine.high %v16582_v44, %v16586_v23  ;;  %v16551_v44 = vld [vmem:[%s21966_s15 + $0x8c8] sm:$0xff] }
0x1307   : > { %11469 = vmatprep.subr.bf16.mxu0 %v16473_v52  ;;  %v16590_v52 = vld [vmem:[%s21966_s15 + $0xa00] sm:$0xff]  ;;  %v16555_v23 = vld [vmem:[%s21966_s15 + $0x8e8] sm:$0xff] }
0x1308   : > { %v16718_v46 = vcombine.low %v16590_v52, %v16594_v3 }
0x130a   : > { %11470 = vmatpush1.bf16.msra.mxu0 %v16472_v6  ;;  %v16719_v6 = vcombine.high %v16590_v52, %v16594_v3  ;;  %v16681_v3 = vcombine.high %v16551_v44, %v16555_v23 }
0x130b   : > { %11471 = vmatprep.subr.bf16.mxu0 %v16481_v59  ;;  %v16598_v59 = vld [vmem:[%s21966_s15 + $0xa40] sm:$0xff] }
0x130c   : > { %v16726_v21 = vcombine.low %v16598_v59, %v16602_v11 }
0x130e   : > { %11472 = vmatpush1.bf16.msra.mxu0 %v16480_v16  ;;  %v16727_v16 = vcombine.high %v16598_v59, %v16602_v11  ;;  %v18853_v59 = vld [vmem:[%s21968_s4 + $0x40] ss:$16 sps:$4 sm:$0xff]   ;;  %v18858_v11 = vld [vmem:[%s21968_s4 + $0x64] ss:$16 sps:$4 sm:$0xff]  }
0x130f   : > { %11473 = vmatprep.subr.bf16.mxu0 %v16489_v17  ;;  %v16606_v17 = vld [vmem:[%s21966_s15 + $0xa80] sm:$0xff] }
0x1310   : > { %v16734_v34 = vcombine.low %v16606_v17, %v16610_v20 }
0x1312   : > { %11474 = vmatpush1.bf16.msra.mxu0 %v16488_v22  ;;  %v16735_v22 = vcombine.high %v16606_v17, %v16610_v20  ;;  %v16567_v17 = vld [vmem:[%s21966_s15 + $0x948] sm:$0xff] }
0x1313   : > { %11475 = vmatprep.subr.bf16.mxu0 %v16497_v32  ;;  %v16614_v32 = vld [vmem:[%s21966_s15 + $0xac0] sm:$0xff]  ;;  %v16571_v20 = vld [vmem:[%s21966_s15 + $0x968] sm:$0xff] }
0x1314   : > { %v16742_v38 = vcombine.low %v16614_v32, %v16618_v7 }
0x1316   : > { %11476 = vmatpush1.bf16.msra.mxu0 %v16496_v35  ;;  %v16743_v35 = vcombine.high %v16614_v32, %v16618_v7  ;;  %v16697_v7 = vcombine.high %v16567_v17, %v16571_v20 }
0x1317   : > { %11477 = vmatprep.subr.bf16.mxu0 %v16505_v36  ;;  %v16622_v36 = vld [vmem:[%s21966_s15 + $0xb00] sm:$0xff] }
0x1318   : > { %v16750_v25 = vcombine.low %v16622_v36, %v16626_v37 }
0x131a   : > { %11478 = vmatpush1.bf16.msra.mxu0 %v16504_v41  ;;  %v16751_v41 = vcombine.high %v16622_v36, %v16626_v37  ;;  %v18859_v36 = vld [vmem:[%s21968_s4 + $0x80] ss:$16 sps:$4 sm:$0xff]   ;;  %v18864_v37 = vld [vmem:[%s21968_s4 + $0xa4] ss:$16 sps:$4 sm:$0xff]  }
0x131b   : > { %11479 = vmatprep.subr.bf16.mxu0 %v16513_v50  ;;  %v16630_v50 = vld [vmem:[%s21966_s15 + $0xb40] sm:$0xff] }
0x131c   : > { %v16758_v39 = vcombine.low %v16630_v50, %v16634_v24 }
0x131e   : > { %11480 = vmatpush1.bf16.msra.mxu0 %v16512_v2  ;;  %v16759_v2 = vcombine.high %v16630_v50, %v16634_v24  ;;  %v16583_v50 = vld [vmem:[%s21966_s15 + $0x9c8] sm:$0xff] }
0x131f   : > { %11481 = vmatprep.subr.bf16.mxu0 %v16521_v30  ;;  %v16638_v30 = vld [vmem:[%s21966_s15 + $0xb80] sm:$0xff]  ;;  %v16587_v24 = vld [vmem:[%s21966_s15 + $0x9e8] sm:$0xff] }
0x1320   : > { %v16766_v55 = vcombine.low %v16638_v30, %v16642_v28 }
0x1322   : > { %11482 = vmatpush1.bf16.msra.mxu0 %v16520_v53  ;;  %v16767_v53 = vcombine.high %v16638_v30, %v16642_v28  ;;  %v16713_v28 = vcombine.high %v16583_v50, %v16587_v24 }
0x1323   : > { %12319 = vmatprep.subr.bf16.mxu0 %v16655_v54  ;;  %v16646_v54 = vld [vmem:[%s21966_s15 + $0xbc0] sm:$0xff] }
0x1324   : > { %v16774_v60 = vcombine.low %v16646_v54, %v16650_v33 }
0x1325   : > { %11484 = vmatmul.mubr.bf16.vlgmr.msra.gmra.mrb[100].mxu0 %v21106_v62  ;;  %v16687_v62 = vcombine.high %v16558_v10, %v16562_v31 }
0x1326   : > { %12320 = vmatpush1.bf16.msra.mxu0 %v16654_v56  ;;  %v16775_v56 = vcombine.high %v16646_v54, %v16650_v33  ;;  %v18865_v54 = vld [vmem:[%s21968_s4 + $0xc0] ss:$16 sps:$4 sm:$0xff]   ;;  %v18870_v33 = vld [vmem:[%s21968_s4 + $0xe4] ss:$16 sps:$4 sm:$0xff]  }
0x1327   : > { %12321 = vmatprep.subr.bf16.mxu0 %v16663_v49  ;;  %v16527_v49 = vld [vmem:[%s21966_s15 + $0x808] sm:$0xff] }
0x132a   : > { %12322 = vmatpush1.bf16.msra.mxu0 %v16662_v61  ;;  %v16657_v61 = vcombine.high %v16527_v49, %v16531_v58 }
0x132b   : > { %12323 = vmatprep.subr.bf16.mxu0 %v16671_v19 }
0x132e   : > { %12324 = vmatpush1.bf16.msra.mxu0 %v16670_v18  ;;  %v16535_v18 = vld [vmem:[%s21966_s15 + $0x848] sm:$0xff] }
0x132f   : > { %12325 = vmatprep.subr.bf16.mxu0 %v16679_v5  ;;  %v16539_v5 = vld [vmem:[%s21966_s15 + $0x868] sm:$0xff] }
0x1330   : > { %v16665_v0 = vcombine.high %v16535_v18, %v16539_v5  ;;  %v16664_v40 = vcombine.low %v16535_v18, %v16539_v5  ;;  %v16611_v18 = vld [vmem:[%s21966_s15 + $0xaa8] sm:$0xff]  ;;  %v18871_v5 = vld [vmem:[%s21968_s4 + $0x100] ss:$16 sps:$4 sm:$0xff]  }
0x1332   : > { %12326 = vmatpush1.bf16.msra.mxu0 %v16678_v8 }
0x1333   : > { %12327 = vmatprep.subr.bf16.mxu0 %v16687_v62  ;;  %v16656_v62 = vcombine.low %v16527_v49, %v16531_v58  ;;  %v16599_v49 = vld [vmem:[%s21966_s15 + $0xa48] sm:$0xff] }
0x1334   : > { %v16603_v58 = vld [vmem:[%s21966_s15 + $0xa68] sm:$0xff] }
0x1336   : > { %12328 = vmatpush1.bf16.msra.mxu0 %v16686_v12  ;;  %v16547_v12 = vld [vmem:[%s21966_s15 + $0x8a8] sm:$0xff] }
0x1337   : > { %12329 = vmatprep.subr.bf16.mxu0 %v16695_v45  ;;  %v18847_v45 = vld [vmem:[%s21968_s4] ss:$16 sps:$4 sm:$0xff]   ;;  %v16672_v52 = vcombine.low %v16543_v9, %v16547_v12 }
0x133a   : > { %12330 = vmatpush1.bf16.msra.mxu0 %v16694_v47  ;;  %v18852_v47 = vld [vmem:[%s21968_s4 + $0x24] ss:$16 sps:$4 sm:$0xff]  }
0x133b   : > { %12331 = vmatprep.subr.bf16.mxu0 %v16703_v1  ;;  %v16673_v1 = vcombine.high %v16543_v9, %v16547_v12  ;;  %v16615_v9 = vld [vmem:[%s21966_s15 + $0xac8] sm:$0xff] }
0x133c   : > { %v16619_v12 = vld [vmem:[%s21966_s15 + $0xae8] sm:$0xff] }
0x133e   : > { %12332 = vmatpush1.bf16.msra.mxu0 %v16702_v14  ;;  %v18850_v14 = vld [vmem:[%s21968_s4 + $0x20] ss:$16 sps:$4 sm:$0xff]  }
0x133f   : > { %12333 = vmatprep.subr.bf16.mxu0 %v16711_v43  ;;  %v18855_v43 = vld [vmem:[%s21968_s4 + $0x44] ss:$16 sps:$4 sm:$0xff]  }
0x1342   : > { %12334 = vmatpush1.bf16.msra.mxu0 %v16710_v4  ;;  %v16559_v4 = vld [vmem:[%s21966_s15 + $0x908] sm:$0xff] }
0x1343   : > { %12335 = vmatprep.subr.bf16.mxu0 %v16719_v6  ;;  %v16563_v6 = vld [vmem:[%s21966_s15 + $0x928] sm:$0xff] }
0x1344   : > { %v16688_v32 = vcombine.low %v16559_v4, %v16563_v6 }
0x1346   : > { %12336 = vmatpush1.bf16.msra.mxu0 %v16718_v46  ;;  %v16680_v46 = vcombine.low %v16551_v44, %v16555_v23  ;;  %v16627_v44 = vld [vmem:[%s21966_s15 + $0xb28] sm:$0xff]  ;;  %v18877_v23 = vld [vmem:[%s21968_s4 + $0x140] ss:$16 sps:$4 sm:$0xff]  }
0x1347   : > { %12337 = vmatprep.subr.bf16.mxu0 %v16727_v16  ;;  %v16689_v16 = vcombine.high %v16559_v4, %v16563_v6  ;;  %v16635_v4 = vld [vmem:[%s21966_s15 + $0xb68] sm:$0xff]  ;;  %v18880_v6 = vld [vmem:[%s21968_s4 + $0x160] ss:$16 sps:$4 sm:$0xff]  }
0x134a   : > { %12338 = vmatpush1.bf16.msra.mxu0 %v16726_v21  ;;  %v18856_v21 = vld [vmem:[%s21968_s4 + $0x60] ss:$16 sps:$4 sm:$0xff]  }
0x134b   : > { %12339 = vmatprep.subr.bf16.mxu0 %v16735_v22  ;;  %v18861_v22 = vld [vmem:[%s21968_s4 + $0x84] ss:$16 sps:$4 sm:$0xff]  }
0x134e   : > { %12340 = vmatpush1.bf16.msra.mxu0 %v16734_v34  ;;  %v16575_v34 = vld [vmem:[%s21966_s15 + $0x988] sm:$0xff] }
0x134f   : > { %12341 = vmatprep.subr.bf16.mxu0 %v16743_v35  ;;  %v16579_v35 = vld [vmem:[%s21966_s15 + $0x9a8] sm:$0xff] }
0x1350   : > { %v16704_v30 = vcombine.low %v16575_v34, %v16579_v35 }
0x1352   : > { %12342 = vmatpush1.bf16.msra.mxu0 %v16742_v38  ;;  %v16696_v38 = vcombine.low %v16567_v17, %v16571_v20  ;;  %v16643_v17 = vld [vmem:[%s21966_s15 + $0xba8] sm:$0xff]  ;;  %v18883_v20 = vld [vmem:[%s21968_s4 + $0x180] ss:$16 sps:$4 sm:$0xff]  }
0x1353   : > { %12343 = vmatprep.subr.bf16.mxu0 %v16751_v41  ;;  %v16705_v41 = vcombine.high %v16575_v34, %v16579_v35  ;;  %v16651_v34 = vld [vmem:[%s21966_s15 + $0xbe8] sm:$0xff]  ;;  %v18886_v35 = vld [vmem:[%s21968_s4 + $0x1a0] ss:$16 sps:$4 sm:$0xff]  }
0x1356   : > { %12344 = vmatpush1.bf16.msra.mxu0 %v16750_v25  ;;  %v18862_v25 = vld [vmem:[%s21968_s4 + $0xa0] ss:$16 sps:$4 sm:$0xff]  }
0x1357   : > { %12345 = vmatprep.subr.bf16.mxu0 %v16759_v2  ;;  %v18867_v2 = vld [vmem:[%s21968_s4 + $0xc4] ss:$16 sps:$4 sm:$0xff]  }
0x135a   : > { %12346 = vmatpush1.bf16.msra.mxu0 %v16758_v39  ;;  %v16591_v39 = vld [vmem:[%s21966_s15 + $0xa08] sm:$0xff] }
0x135b   : > { %12347 = vmatprep.subr.bf16.mxu0 %v16767_v53  ;;  %v16595_v53 = vld [vmem:[%s21966_s15 + $0xa28] sm:$0xff] }
0x135e   : > { %12348 = vmatpush1.bf16.msra.mxu0 %v16766_v55  ;;  %v16712_v55 = vcombine.low %v16583_v50, %v16587_v24 }
0x135f   : > { %12349 = vmatprep.subr.bf16.mxu0 %v16775_v56  ;;  %v16721_v56 = vcombine.high %v16591_v39, %v16595_v53 }
0x1362   : > { %12350 = vmatpush1.bf16.msra.mxu0 %v16774_v60  ;;  %v18868_v60 = vld [vmem:[%s21968_s4 + $0xe0] ss:$16 sps:$4 sm:$0xff]  }
0x1363   : > { %12362 = vmatprep.subr.bf16.mxu0 %v16657_v61  ;;  %v18873_v61 = vld [vmem:[%s21968_s4 + $0x104] ss:$16 sps:$4 sm:$0xff]  }
0x1375   : > { %v11539_v19 = vpop.f32.mrb[112].mxu1 }
0x1376   : > { %v11541_v63 = vpop.f32.mrb[113].mxu1 }
0x1377   : > { %v11543_v48 = vpop.f32.mrb[114].mxu1 }
0x1378   : > { %v21462_v10 = vpack.c.bf16 %v11543_v48, %v11539_v19  ;;  %v11545_v31 = vpop.f32.mrb[115].mxu1  ;;  %v16720_v19 = vcombine.low %v16591_v39, %v16595_v53  ;;  %v16607_v48 = vld [vmem:[%s21966_s15 + $0xa88] sm:$0xff]  ;;  %v16545_v39 = vld [vmem:[%s21966_s15 + $0x898] sm:$0xff] }
0x1379   : > { %v21464_v8 = vpack.c.bf16 %v11545_v31, %v11541_v63  ;;  %v16729_v63 = vcombine.high %v16599_v49, %v16603_v58  ;;  %v18876_v31 = vld [vmem:[%s21968_s4 + $0x124] ss:$16 sps:$4 sm:$0xff]   ;;  %v16549_v53 = vld [vmem:[%s21966_s15 + $0x8b8] sm:$0xff] }
0x137b   : > { %12351 = vmatprep.mubr.bf16.mxu0 %v21464_v8  ;;  %12437 = vmatprep.mubr.bf16.mxu1 %v21464_v8 }
0x137c   : > { %12352 = vmatmul.mubr.bf16.vlgmr.msra.gmra.mrb[92].mxu0 %v21462_v10  ;;  %12438 = vmatmul.mubr.bf16.vlgmr.msra.gmra.mrb[108].mxu1 %v21462_v10 }
0x137d   : > { %12363 = vmatpush1.bf16.msra.mxu0 %v16656_v62  ;;  %12394 = vmatprep.mubr.bf16.mxu0 %v21464_v8  ;;  %v16728_v62 = vcombine.low %v16599_v49, %v16603_v58  ;;  %v16676_v49 = vcombine.low %v16545_v39, %v16549_v53 }
0x137e   : > { %12364 = vmatprep.subr.bf16.mxu0 %v16665_v0  ;;  %14148 = vmatpush1.bf16.msra.mxu1 %v18847_v45  ;;  %v16737_v0 = vcombine.high %v16607_v48, %v16611_v18  ;;  %v18874_v45 = vld [vmem:[%s21968_s4 + $0x120] ss:$16 sps:$4 sm:$0xff]  }
0x137f   : > { %14149 = vmatprep.subr.bf16.mxu1 %v18852_v47  ;;  %v16745_v47 = vcombine.high %v16615_v9, %v16619_v12 }
0x1381   : > { %12365 = vmatpush1.bf16.msra.mxu0 %v16664_v40  ;;  %v16736_v40 = vcombine.low %v16607_v48, %v16611_v18  ;;  %v16573_v48 = vld [vmem:[%s21966_s15 + $0x978] sm:$0xff] }
0x1382   : > { %12366 = vmatprep.subr.bf16.mxu0 %v16673_v1  ;;  %14150 = vmatpush1.bf16.msra.mxu1 %v18850_v14  ;;  %v16623_v1 = vld [vmem:[%s21966_s15 + $0xb08] sm:$0xff]  ;;  %v18882_v14 = vld [vmem:[%s21968_s4 + $0x164] ss:$16 sps:$4 sm:$0xff]  }
0x1383   : > { %14151 = vmatprep.subr.bf16.mxu1 %v18855_v43  ;;  %v16744_v43 = vcombine.low %v16615_v9, %v16619_v12  ;;  %v16585_v12 = vld [vmem:[%s21966_s15 + $0x9d8] sm:$0xff] }
0x1385   : > { %12367 = vmatpush1.bf16.msra.mxu0 %v16672_v52  ;;  %v16753_v52 = vcombine.high %v16623_v1, %v16627_v44 }
0x1386   : > { %12368 = vmatprep.subr.bf16.mxu0 %v16681_v3  ;;  %14152 = vmatpush1.bf16.msra.mxu1 %v18853_v59  ;;  %v16631_v3 = vld [vmem:[%s21966_s15 + $0xb48] sm:$0xff]  ;;  %v18885_v59 = vld [vmem:[%s21968_s4 + $0x184] ss:$16 sps:$4 sm:$0xff]  }
0x1387   : > { %14153 = vmatprep.subr.bf16.mxu1 %v18858_v11  ;;  %v16752_v11 = vcombine.low %v16623_v1, %v16627_v44  ;;  %v16593_v44 = vld [vmem:[%s21966_s15 + $0xa18] sm:$0xff] }
0x1389   : > { %12369 = vmatpush1.bf16.msra.mxu0 %v16680_v46  ;;  %v16761_v46 = vcombine.high %v16631_v3, %v16635_v4 }
0x138a   : > { %12370 = vmatprep.subr.bf16.mxu0 %v16689_v16  ;;  %14154 = vmatpush1.bf16.msra.mxu1 %v18856_v21  ;;  %v16639_v16 = vld [vmem:[%s21966_s15 + $0xb88] sm:$0xff]  ;;  %v18888_v21 = vld [vmem:[%s21968_s4 + $0x1a4] ss:$16 sps:$4 sm:$0xff]  }
0x138b   : > { %14155 = vmatprep.subr.bf16.mxu1 %v18861_v22  ;;  %v16760_v22 = vcombine.low %v16631_v3, %v16635_v4  ;;  %v16601_v4 = vld [vmem:[%s21966_s15 + $0xa58] sm:$0xff] }
0x138d   : > { %12371 = vmatpush1.bf16.msra.mxu0 %v16688_v32  ;;  %v16769_v32 = vcombine.high %v16639_v16, %v16643_v17 }
0x138e   : > { %12372 = vmatprep.subr.bf16.mxu0 %v16697_v7  ;;  %14156 = vmatpush1.bf16.msra.mxu1 %v18859_v36  ;;  %v16647_v7 = vld [vmem:[%s21966_s15 + $0xbc8] sm:$0xff]  ;;  %v16768_v36 = vcombine.low %v16639_v16, %v16643_v17  ;;  %v16609_v16 = vld [vmem:[%s21966_s15 + $0xa98] sm:$0xff] }
0x138f   : > { %14157 = vmatprep.subr.bf16.mxu1 %v18864_v37  ;;  %v16777_v37 = vcombine.high %v16647_v7, %v16651_v34  ;;  %v16776_v50 = vcombine.low %v16647_v7, %v16651_v34  ;;  %v16613_v17 = vld [vmem:[%s21966_s15 + $0xab8] sm:$0xff] }
0x1390   : > { %v16740_v7 = vcombine.low %v16609_v16, %v16613_v17 }
0x1391   : > { %12373 = vmatpush1.bf16.msra.mxu0 %v16696_v38  ;;  %v16529_v38 = vld [vmem:[%s21966_s15 + $0x818] sm:$0xff] }
0x1392   : > { %12374 = vmatprep.subr.bf16.mxu0 %v16705_v41  ;;  %14158 = vmatpush1.bf16.msra.mxu1 %v18862_v25  ;;  %v16533_v41 = vld [vmem:[%s21966_s15 + $0x838] sm:$0xff] }
0x1393   : > { %14159 = vmatprep.subr.bf16.mxu1 %v18867_v2  ;;  %v16661_v24 = vcombine.high %v16529_v38, %v16533_v41  ;;  %v16537_v25 = vld [vmem:[%s21966_s15 + $0x858] sm:$0xff] }
0x1394   : > { %v16541_v2 = vld [vmem:[%s21966_s15 + $0x878] sm:$0xff] }
0x1395   : > { %12375 = vmatpush1.bf16.msra.mxu0 %v16704_v30  ;;  %v16660_v30 = vcombine.low %v16529_v38, %v16533_v41  ;;  %v16633_v41 = vld [vmem:[%s21966_s15 + $0xb58] sm:$0xff] }
0x1396   : > { %12376 = vmatprep.subr.bf16.mxu0 %v16713_v28  ;;  %14160 = vmatpush1.bf16.msra.mxu1 %v18865_v54  ;;  %v16669_v28 = vcombine.high %v16537_v25, %v16541_v2  ;;  %v16668_v54 = vcombine.low %v16537_v25, %v16541_v2  ;;  %v16641_v2 = vld [vmem:[%s21966_s15 + $0xb98] sm:$0xff] }
0x1397   : > { %14161 = vmatprep.subr.bf16.mxu1 %v18870_v33  ;;  %v16677_v33 = vcombine.high %v16545_v39, %v16549_v53  ;;  %v16649_v53 = vld [vmem:[%s21966_s15 + $0xbd8] sm:$0xff] }
0x1399   : > { %12377 = vmatpush1.bf16.msra.mxu0 %v16712_v55  ;;  %v16553_v55 = vld [vmem:[%s21966_s15 + $0x8d8] sm:$0xff] }
0x139a   : > { %12378 = vmatprep.subr.bf16.mxu0 %v16721_v56  ;;  %14162 = vmatpush1.bf16.msra.mxu1 %v18868_v60  ;;  %v16557_v56 = vld [vmem:[%s21966_s15 + $0x8f8] sm:$0xff] }
0x139b   : > { %14163 = vmatprep.subr.bf16.mxu1 %v18873_v61  ;;  %v16685_v58 = vcombine.high %v16553_v55, %v16557_v56  ;;  %v16561_v60 = vld [vmem:[%s21966_s15 + $0x918] sm:$0xff] }
0x139c   : > { %v16565_v61 = vld [vmem:[%s21966_s15 + $0x938] sm:$0xff] }
0x139d   : > { %12379 = vmatpush1.bf16.msra.mxu0 %v16720_v19  ;;  %v16684_v19 = vcombine.low %v16553_v55, %v16557_v56  ;;  %v16692_v18 = vcombine.low %v16561_v60, %v16565_v61 }
0x139e   : > { %12380 = vmatprep.subr.bf16.mxu0 %v16729_v63  ;;  %14164 = vmatpush1.bf16.msra.mxu1 %v18871_v5  ;;  %v16569_v63 = vld [vmem:[%s21966_s15 + $0x958] sm:$0xff] }
0x139f   : > { %14165 = vmatprep.subr.bf16.mxu1 %v18876_v31  ;;  %v16701_v5 = vcombine.high %v16569_v63, %v16573_v48  ;;  %v16577_v31 = vld [vmem:[%s21966_s15 + $0x998] sm:$0xff] }
0x13a1   : > { %12381 = vmatpush1.bf16.msra.mxu0 %v16728_v62  ;;  %v16581_v62 = vld [vmem:[%s21966_s15 + $0x9b8] sm:$0xff] }
0x13a2   : > { %12382 = vmatprep.subr.bf16.mxu0 %v16737_v0  ;;  %14166 = vmatpush1.bf16.msra.mxu1 %v18874_v45  ;;  %v16700_v0 = vcombine.low %v16569_v63, %v16573_v48  ;;  %v16709_v9 = vcombine.high %v16577_v31, %v16581_v62  ;;  %v16589_v45 = vld [vmem:[%s21966_s15 + $0x9f8] sm:$0xff] }
0x13a3   : > { %14167 = vmatprep.subr.bf16.mxu1 %v18879_v57  ;;  %v18891_v57 = vld [vmem:[%s21968_s4 + $0x1c4] ss:$16 sps:$4 sm:$0xff]   ;;  %v16717_v1 = vcombine.high %v16585_v12, %v16589_v45 }
0x13a5   : > { %12383 = vmatpush1.bf16.msra.mxu0 %v16736_v40  ;;  %v16708_v40 = vcombine.low %v16577_v31, %v16581_v62 }
0x13a6   : > { %12384 = vmatprep.subr.bf16.mxu0 %v16745_v47  ;;  %14168 = vmatpush1.bf16.msra.mxu1 %v18877_v23  ;;  %v18889_v47 = vld [vmem:[%s21968_s4 + $0x1c0] ss:$16 sps:$4 sm:$0xff]   ;;  %v16597_v23 = vld [vmem:[%s21966_s15 + $0xa38] sm:$0xff] }
0x13a7   : > { %14169 = vmatprep.subr.bf16.mxu1 %v18882_v14  ;;  %v18894_v14 = vld [vmem:[%s21968_s4 + $0x1e4] ss:$16 sps:$4 sm:$0xff]   ;;  %v16725_v3 = vcombine.high %v16593_v44, %v16597_v23 }
0x13a9   : > { %12385 = vmatpush1.bf16.msra.mxu0 %v16744_v43  ;;  %v16716_v43 = vcombine.low %v16585_v12, %v16589_v45 }
0x13aa   : > { %12386 = vmatprep.subr.bf16.mxu0 %v16753_v52  ;;  %14170 = vmatpush1.bf16.msra.mxu1 %v18880_v6  ;;  %v18892_v52 = vld [vmem:[%s21968_s4 + $0x1e0] ss:$16 sps:$4 sm:$0xff]   ;;  %v16605_v6 = vld [vmem:[%s21966_s15 + $0xa78] sm:$0xff] }
0x13ab   : > { %14171 = vmatprep.subr.bf16.mxu1 %v18885_v59  ;;  %v18897_v59 = vld [vmem:[%s21968_s4 + $0x204] ss:$16 sps:$4 sm:$0xff]  }
0x13ad   : > { %12387 = vmatpush1.bf16.msra.mxu0 %v16752_v11  ;;  %v16724_v11 = vcombine.low %v16593_v44, %v16597_v23 }
0x13ae   : > { %12388 = vmatprep.subr.bf16.mxu0 %v16761_v46  ;;  %14172 = vmatpush1.bf16.msra.mxu1 %v18883_v20  ;;  %v16733_v46 = vcombine.high %v16601_v4, %v16605_v6  ;;  %v16732_v20 = vcombine.low %v16601_v4, %v16605_v6 }
0x13af   : > { %14173 = vmatprep.subr.bf16.mxu1 %v18888_v21  ;;  %v16741_v21 = vcombine.high %v16609_v16, %v16613_v17  ;;  %v18900_v16 = vld [vmem:[%s21968_s4 + $0x224] ss:$16 sps:$4 sm:$0xff]   ;;  %v18898_v17 = vld [vmem:[%s21968_s4 + $0x220] ss:$16 sps:$4 sm:$0xff]  }
0x13b1   : > { %12389 = vmatpush1.bf16.msra.mxu0 %v16760_v22  ;;  %v16617_v22 = vld [vmem:[%s21966_s15 + $0xad8] sm:$0xff] }
0x13b2   : > { %12390 = vmatprep.subr.bf16.mxu0 %v16769_v32  ;;  %14174 = vmatpush1.bf16.msra.mxu1 %v18886_v35  ;;  %v16621_v32 = vld [vmem:[%s21966_s15 + $0xaf8] sm:$0xff] }
0x13b3   : > { %14175 = vmatprep.subr.bf16.mxu1 %v18891_v57  ;;  %v16749_v34 = vcombine.high %v16617_v22, %v16621_v32  ;;  %v16625_v35 = vld [vmem:[%s21966_s15 + $0xb18] sm:$0xff] }
0x13b5   : > { %12391 = vmatpush1.bf16.msra.mxu0 %v16768_v36  ;;  %v16629_v36 = vld [vmem:[%s21966_s15 + $0xb38] sm:$0xff] }
0x13b6   : > { %12392 = vmatprep.subr.bf16.mxu0 %v16777_v37  ;;  %14176 = vmatpush1.bf16.msra.mxu1 %v18889_v47  ;;  %v16748_v37 = vcombine.low %v16617_v22, %v16621_v32  ;;  %v16757_v38 = vcombine.high %v16625_v35, %v16629_v36  ;;  %v18906_v22 = vld [vmem:[%s21968_s4 + $0x264] ss:$16 sps:$4 sm:$0xff]   ;;  %v18904_v32 = vld [vmem:[%s21968_s4 + $0x260] ss:$16 sps:$4 sm:$0xff]  }
0x13b7   : > { %14177 = vmatprep.subr.bf16.mxu1 %v18894_v14 }
0x13b9   : > { %12393 = vmatpush1.bf16.msra.mxu0 %v16776_v50  ;;  %v16637_v50 = vld [vmem:[%s21966_s15 + $0xb78] sm:$0xff] }
0x13ba   : > { %12448 = vmatprep.subr.bf16.mxu0 %v16661_v24  ;;  %14178 = vmatpush1.bf16.msra.mxu1 %v18892_v52  ;;  %v16756_v24 = vcombine.low %v16625_v35, %v16629_v36  ;;  %v16765_v25 = vcombine.high %v16633_v41, %v16637_v50  ;;  %v18912_v35 = vld [vmem:[%s21968_s4 + $0x2a4] ss:$16 sps:$4 sm:$0xff]   ;;  %v18910_v36 = vld [vmem:[%s21968_s4 + $0x2a0] ss:$16 sps:$4 sm:$0xff]  }
0x13bb   : > { %14190 = vmatprep.subr.bf16.mxu1 %v18897_v59 }
0x13bc   : > { %12395 = vmatmul.mubr.bf16.vlgmr.msra.gmra.mrb[96].mxu0 %v21462_v10 }
0x13bd   : > { %12449 = vmatpush1.bf16.msra.mxu0 %v16660_v30  ;;  %12480 = vmatprep.mubr.bf16.mxu0 %v21464_v8  ;;  %v16693_v8 = vcombine.high %v16561_v60, %v16565_v61  ;;  %v16645_v30 = vld [vmem:[%s21966_s15 + $0xbb8] sm:$0xff] }
0x13be   : > { %12450 = vmatprep.subr.bf16.mxu0 %v16669_v28  ;;  %v16764_v28 = vcombine.low %v16633_v41, %v16637_v50  ;;  %v16773_v39 = vcombine.high %v16641_v2, %v16645_v30  ;;  %v18918_v41 = vld [vmem:[%s21968_s4 + $0x2e4] ss:$16 sps:$4 sm:$0xff]   ;;  %v18916_v50 = vld [vmem:[%s21968_s4 + $0x2e0] ss:$16 sps:$4 sm:$0xff]  }
0x13c1   : > { %12451 = vmatpush1.bf16.msra.mxu0 %v16668_v54  ;;  %v16653_v54 = vld [vmem:[%s21966_s15 + $0xbf8] sm:$0xff] }
0x13c2   : > { %12452 = vmatprep.subr.bf16.mxu0 %v16677_v33  ;;  %v16772_v33 = vcombine.low %v16641_v2, %v16645_v30  ;;  %v16781_v55 = vcombine.high %v16649_v53, %v16653_v54  ;;  %v16780_v56 = vcombine.low %v16649_v53, %v16653_v54  ;;  %v18924_v2 = vld [vmem:[%s21968_s4 + $0x324] ss:$16 sps:$4 sm:$0xff]   ;;  %v18922_v30 = vld [vmem:[%s21968_s4 + $0x320] ss:$16 sps:$4 sm:$0xff]  }
0x13c3   : > { %v18930_v53 = vld [vmem:[%s21968_s4 + $0x364] ss:$16 sps:$4 sm:$0xff]   ;;  %v18928_v54 = vld [vmem:[%s21968_s4 + $0x360] ss:$16 sps:$4 sm:$0xff]  }
0x13c5   : > { %12453 = vmatpush1.bf16.msra.mxu0 %v16676_v49  ;;  %v21568_v49 = vld [vmem:[%s21969_s3] sm:$0xff] }
0x13c6   : > { %12454 = vmatprep.subr.bf16.mxu0 %v16685_v58  ;;  %v12512_v58 = vrot.slane %v21568_v49, %v20382_v27  ;;  %v12528_v60 = vrot.slane %v21568_v49, %v5856_v42  ;;  %v12516_v61 = vrot.slane %v21568_v49, %v20385_v29 }
0x13c9   : > { %12455 = vmatpush1.bf16.msra.mxu0 %v16684_v19  ;;  %v12532_v19 = vrot.slane %v21568_v49, %v5860_v51 }
0x13ca   : > { %12456 = vmatprep.subr.bf16.mxu0 %v16693_v8 }
0x13cd   : > { %12457 = vmatpush1.bf16.msra.mxu0 %v16692_v18 }
0x13ce   : > { %12458 = vmatprep.subr.bf16.mxu0 %v16701_v5 }
0x13d1   : > { %12459 = vmatpush1.bf16.msra.mxu0 %v16700_v0 }
0x13d2   : > { %12460 = vmatprep.subr.bf16.mxu0 %v16709_v9 }
0x13d5   : > { %12461 = vmatpush1.bf16.msra.mxu0 %v16708_v40 }
0x13d6   : > { %12462 = vmatprep.subr.bf16.mxu0 %v16717_v1 }
0x13d9   : > { %12463 = vmatpush1.bf16.msra.mxu0 %v16716_v43 }
0x13da   : > { %12464 = vmatprep.subr.bf16.mxu0 %v16725_v3 }
0x13dd   : > { %12465 = vmatpush1.bf16.msra.mxu0 %v16724_v11 }
0x13de   : > { %12466 = vmatprep.subr.bf16.mxu0 %v16733_v46  ;;  %v18895_v46 = vld [vmem:[%s21968_s4 + $0x200] ss:$16 sps:$4 sm:$0xff]  }
0x13e1   : > { %12467 = vmatpush1.bf16.msra.mxu0 %v16732_v20  ;;  %v18903_v20 = vld [vmem:[%s21968_s4 + $0x244] ss:$16 sps:$4 sm:$0xff]  }
0x13e2   : > { %12468 = vmatprep.subr.bf16.mxu0 %v16741_v21  ;;  %v18901_v21 = vld [vmem:[%s21968_s4 + $0x240] ss:$16 sps:$4 sm:$0xff]  }
0x13e5   : > { %12469 = vmatpush1.bf16.msra.mxu0 %v16740_v7  ;;  %v18909_v7 = vld [vmem:[%s21968_s4 + $0x284] ss:$16 sps:$4 sm:$0xff]  }
0x13e6   : > { %12470 = vmatprep.subr.bf16.mxu0 %v16749_v34  ;;  %v18907_v34 = vld [vmem:[%s21968_s4 + $0x280] ss:$16 sps:$4 sm:$0xff]  }
0x13e9   : > { %12471 = vmatpush1.bf16.msra.mxu0 %v16748_v37  ;;  %v18915_v37 = vld [vmem:[%s21968_s4 + $0x2c4] ss:$16 sps:$4 sm:$0xff]  }
0x13ea   : > { %12472 = vmatprep.subr.bf16.mxu0 %v16757_v38  ;;  %v18913_v38 = vld [vmem:[%s21968_s4 + $0x2c0] ss:$16 sps:$4 sm:$0xff]  }
0x13ed   : > { %12473 = vmatpush1.bf16.msra.mxu0 %v16756_v24  ;;  %v18921_v24 = vld [vmem:[%s21968_s4 + $0x304] ss:$16 sps:$4 sm:$0xff]  }
0x13ee   : > { %12474 = vmatprep.subr.bf16.mxu0 %v16765_v25  ;;  %v18919_v25 = vld [vmem:[%s21968_s4 + $0x300] ss:$16 sps:$4 sm:$0xff]  }
0x13f1   : > { %12475 = vmatpush1.bf16.msra.mxu0 %v16764_v28  ;;  %v18927_v28 = vld [vmem:[%s21968_s4 + $0x344] ss:$16 sps:$4 sm:$0xff]  }
0x13f2   : > { %12476 = vmatprep.subr.bf16.mxu0 %v16773_v39  ;;  %v18925_v39 = vld [vmem:[%s21968_s4 + $0x340] ss:$16 sps:$4 sm:$0xff]  }
0x13f5   : > { %12477 = vmatpush1.bf16.msra.mxu0 %v16772_v33  ;;  %v18933_v33 = vld [vmem:[%s21968_s4 + $0x384] ss:$16 sps:$4 sm:$0xff]  }
0x13f6   : > { %12478 = vmatprep.subr.bf16.mxu0 %v16781_v55  ;;  %v18931_v55 = vld [vmem:[%s21968_s4 + $0x380] ss:$16 sps:$4 sm:$0xff]  }
0x13f9   : > { %12479 = vmatpush1.bf16.msra.mxu0 %v16780_v56  ;;  %v18936_v56 = vld [vmem:[%s21968_s4 + $0x3a4] ss:$16 sps:$4 sm:$0xff]  }
0x13fc   : > { %12481 = vmatmul.mubr.bf16.vlgmr.msra.gmra.mrb[100].mxu0 %v21462_v10 }
0x144f   : > { %v12353_v8 = vpop.f32.mrb[92].mxu0  ;;  %v12439_v63 = vpop.f32.mrb[108].mxu1 }
0x1450   : > { %v12549_v48 = vadd.f32 %v12512_v58, %v12353_v8  ;;  %v12553_v10 = vadd.f32 %v12528_v60, %v12439_v63  ;;  %v12355_v18 = vpop.f32.mrb[93].mxu0  ;;  %v12441_v5 = vpop.f32.mrb[109].mxu1  ;;  %v18937_v63 = vld [vmem:[%s21968_s4 + $0x3c0] ss:$16 sps:$4 sm:$0xff]  }
0x1451   : > { %v12550_v31 = vadd.f32 %v12516_v61, %v12355_v18  ;;  %v12554_v62 = vadd.f32 %v12532_v19, %v12441_v5  ;;  %v12357_v0 = vpop.f32.mrb[94].mxu0  ;;  %v12443_v9 = vpop.f32.mrb[110].mxu1  ;;  %v18942_v18 = vld [vmem:[%s21968_s4 + $0x3e4] ss:$16 sps:$4 sm:$0xff]  }
0x1452   : > { %v12557_v12 = vadd.f32 %v12512_v58, %v12357_v0  ;;  %v12561_v45 = vadd.f32 %v12528_v60, %v12443_v9  ;;  %v12359_v42 = vpop.f32.mrb[95].mxu0  ;;  %v12445_v57 = vpop.f32.mrb[111].mxu1  ;;  %v12565_v1 = vmax.f32 %v12549_v48, 0.0  ;;  %v12569_v51 = vmax.f32 %v12553_v10, 0.0  ;;  %v18934_v58 = vld [vmem:[%s21968_s4 + $0x3a0] ss:$16 sps:$4 sm:$0xff]  }
0x1453   : > { %v12558_v40 = vadd.f32 %v12516_v61, %v12359_v42  ;;  %v12562_v47 = vadd.f32 %v12532_v19, %v12445_v57  ;;  %v12566_v14 = vmax.f32 %v12550_v31, 0.0  ;;  %v12570_v43 = vmax.f32 %v12554_v62, 0.0  ;;  %v18939_v61 = vld [vmem:[%s21968_s4 + $0x3c4] ss:$16 sps:$4 sm:$0xff]  }
0x1454   : > { %v12573_v44 = vmax.f32 %v12557_v12, 0.0  ;;  %v12577_v23 = vmax.f32 %v12561_v45, 0.0  ;;  %v12520_v60 = vrot.slane %v21568_v49, %v20896_v13  ;;  %v12524_v19 = vrot.slane %v21568_v49, %v20901_v15  ;;  %v18940_v12 = vld [vmem:[%s21968_s4 + $0x3e0] ss:$16 sps:$4 sm:$0xff]   ;;  %v18945_v57 = vld [vmem:[%s21968_s4 + $0x404] ss:$16 sps:$4 sm:$0xff]  }
0x1455   : > { %v12574_v52 = vmax.f32 %v12558_v40, 0.0  ;;  %v12578_v3 = vmax.f32 %v12562_v47, 0.0 }
0x1456   : > { %v21580_v4 = vpack.c.bf16 %v12573_v44, %v12565_v1  ;;  %v21582_v6 = vpack.c.bf16 %v12577_v23, %v12569_v51  ;;  %v18943_v44 = vld [vmem:[%s21968_s4 + $0x400] ss:$16 sps:$4 sm:$0xff]   ;;  %v18948_v23 = vld [vmem:[%s21968_s4 + $0x424] ss:$16 sps:$4 sm:$0xff]  }
0x1457   : > { %v21584_v59 = vpack.c.bf16 %v12574_v52, %v12566_v14  ;;  %v21586_v11 = vpack.c.bf16 %v12578_v3, %v12570_v43  ;;  %v18946_v14 = vld [vmem:[%s21968_s4 + $0x420] ss:$16 sps:$4 sm:$0xff]   ;;  %v18951_v43 = vld [vmem:[%s21968_s4 + $0x444] ss:$16 sps:$4 sm:$0xff]  }
0x1458   : > { %v18949_v52 = vld [vmem:[%s21968_s4 + $0x440] ss:$16 sps:$4 sm:$0xff]   ;;  %v18954_v3 = vld [vmem:[%s21968_s4 + $0x464] ss:$16 sps:$4 sm:$0xff]  }
0x1459   : > { %14179 = vmatprep.mubr.bf16.mxu1 %v21584_v59 }
0x145a   : > { %14180 = vmatmul.mubr.bf16.vlgmr.msra.gmra.mrb[116].mxu1 %v21580_v4 }
0x145b   : > { %14191 = vmatpush1.bf16.msra.mxu1 %v18895_v46  ;;  %v18952_v46 = vld [vmem:[%s21968_s4 + $0x460] ss:$16 sps:$4 sm:$0xff]  }
0x145c   : > { %14192 = vmatprep.subr.bf16.mxu1 %v18900_v16  ;;  %v18957_v16 = vld [vmem:[%s21968_s4 + $0x484] ss:$16 sps:$4 sm:$0xff]  }
0x145f   : > { %14193 = vmatpush1.bf16.msra.mxu1 %v18898_v17  ;;  %v18955_v17 = vld [vmem:[%s21968_s4 + $0x480] ss:$16 sps:$4 sm:$0xff]  }
0x1460   : > { %14194 = vmatprep.subr.bf16.mxu1 %v18903_v20  ;;  %v18960_v20 = vld [vmem:[%s21968_s4 + $0x4a4] ss:$16 sps:$4 sm:$0xff]  }
0x1463   : > { %14195 = vmatpush1.bf16.msra.mxu1 %v18901_v21  ;;  %v18958_v21 = vld [vmem:[%s21968_s4 + $0x4a0] ss:$16 sps:$4 sm:$0xff]  }
0x1464   : > { %14196 = vmatprep.subr.bf16.mxu1 %v18906_v22  ;;  %v18963_v22 = vld [vmem:[%s21968_s4 + $0x4c4] ss:$16 sps:$4 sm:$0xff]  }
0x1467   : > { %14197 = vmatpush1.bf16.msra.mxu1 %v18904_v32  ;;  %v18961_v32 = vld [vmem:[%s21968_s4 + $0x4c0] ss:$16 sps:$4 sm:$0xff]  }
0x1468   : > { %14198 = vmatprep.subr.bf16.mxu1 %v18909_v7  ;;  %v18966_v7 = vld [vmem:[%s21968_s4 + $0x4e4] ss:$16 sps:$4 sm:$0xff]  }
0x146b   : > { %14199 = vmatpush1.bf16.msra.mxu1 %v18907_v34  ;;  %v18964_v34 = vld [vmem:[%s21968_s4 + $0x4e0] ss:$16 sps:$4 sm:$0xff]  }
0x146c   : > { %14200 = vmatprep.subr.bf16.mxu1 %v18912_v35  ;;  %v18969_v35 = vld [vmem:[%s21968_s4 + $0x504] ss:$16 sps:$4 sm:$0xff]  }
0x146f   : > { %14201 = vmatpush1.bf16.msra.mxu1 %v18910_v36  ;;  %v18967_v36 = vld [vmem:[%s21968_s4 + $0x500] ss:$16 sps:$4 sm:$0xff]  }
0x1470   : > { %14202 = vmatprep.subr.bf16.mxu1 %v18915_v37  ;;  %v18972_v37 = vld [vmem:[%s21968_s4 + $0x524] ss:$16 sps:$4 sm:$0xff]  }
0x1473   : > { %14203 = vmatpush1.bf16.msra.mxu1 %v18913_v38  ;;  %v18970_v38 = vld [vmem:[%s21968_s4 + $0x520] ss:$16 sps:$4 sm:$0xff]  }
0x1474   : > { %14204 = vmatprep.subr.bf16.mxu1 %v18918_v41  ;;  %v18975_v41 = vld [vmem:[%s21968_s4 + $0x544] ss:$16 sps:$4 sm:$0xff]  }
0x1477   : > { %14205 = vmatpush1.bf16.msra.mxu1 %v18916_v50  ;;  %v18973_v50 = vld [vmem:[%s21968_s4 + $0x540] ss:$16 sps:$4 sm:$0xff]  }
0x1478   : > { %14206 = vmatprep.subr.bf16.mxu1 %v18921_v24  ;;  %v18978_v24 = vld [vmem:[%s21968_s4 + $0x564] ss:$16 sps:$4 sm:$0xff]  }
0x147b   : > { %14207 = vmatpush1.bf16.msra.mxu1 %v18919_v25  ;;  %v18976_v25 = vld [vmem:[%s21968_s4 + $0x560] ss:$16 sps:$4 sm:$0xff]  }
0x147c   : > { %14208 = vmatprep.subr.bf16.mxu1 %v18924_v2  ;;  %v18981_v2 = vld [vmem:[%s21968_s4 + $0x584] ss:$16 sps:$4 sm:$0xff]  }
0x147f   : > { %14209 = vmatpush1.bf16.msra.mxu1 %v18922_v30  ;;  %v18979_v30 = vld [vmem:[%s21968_s4 + $0x580] ss:$16 sps:$4 sm:$0xff]  }
0x1480   : > { %14210 = vmatprep.subr.bf16.mxu1 %v18927_v28  ;;  %v18984_v28 = vld [vmem:[%s21968_s4 + $0x5a4] ss:$16 sps:$4 sm:$0xff]  }
0x1483   : > { %14211 = vmatpush1.bf16.msra.mxu1 %v18925_v39  ;;  %v12535_v39 = vsub.s32 6, %v20379_v26 }
0x1484   : > { %14212 = vmatprep.subr.bf16.mxu1 %v18930_v53  ;;  %v12539_v53 = vsub.s32 7, %v20379_v26 }
0x1487   : > { %14213 = vmatpush1.bf16.msra.mxu1 %v18928_v54  ;;  %v18982_v54 = vld [vmem:[%s21968_s4 + $0x5a0] ss:$16 sps:$4 sm:$0xff]  }
0x1488   : > { %14214 = vmatprep.subr.bf16.mxu1 %v18933_v33  ;;  %v12536_v33 = vrot.slane %v21568_v49, %v12535_v39  ;;  %v19036_v39 = vld [vmem:[%s21968_s4 + $0x7e0] ss:$16 sps:$4 sm:$0xff]  }
0x148b   : > { %14215 = vmatpush1.bf16.msra.mxu1 %v18931_v55  ;;  %v18987_v55 = vld [vmem:[%s21968_s4 + $0x5c4] ss:$16 sps:$4 sm:$0xff]  }
0x148c   : > { %14216 = vmatprep.subr.bf16.mxu1 %v18936_v56  ;;  %v12540_v56 = vrot.slane %v21568_v49, %v12539_v53  ;;  %v19041_v53 = vld [vmem:[%s21968_s4 + $0xc] ss:$16 sps:$4 sm:$0xff]  }
0x148f   : > { %v12396_v8 = vpop.f32.mrb[96].mxu0  ;;  %14217 = vmatpush1.bf16.msra.mxu1 %v18934_v58 }
0x1490   : > { %v12551_v48 = vadd.f32 %v12520_v60, %v12396_v8  ;;  %v12398_v10 = vpop.f32.mrb[97].mxu0  ;;  %14218 = vmatprep.subr.bf16.mxu1 %v18939_v61  ;;  %v18990_v8 = vld [vmem:[%s21968_s4 + $0x5e4] ss:$16 sps:$4 sm:$0xff]  }
0x1491   : > { %v12552_v5 = vadd.f32 %v12524_v19, %v12398_v10  ;;  %v12400_v31 = vpop.f32.mrb[98].mxu0 }
0x1492   : > { %v12559_v62 = vadd.f32 %v12520_v60, %v12400_v31  ;;  %v12402_v0 = vpop.f32.mrb[99].mxu0  ;;  %v12567_v45 = vmax.f32 %v12551_v48, 0.0  ;;  %v18985_v60 = vld [vmem:[%s21968_s4 + $0x5c0] ss:$16 sps:$4 sm:$0xff]  }
0x1493   : > { %v12560_v9 = vadd.f32 %v12524_v19, %v12402_v0  ;;  %14219 = vmatpush1.bf16.msra.mxu1 %v18937_v63  ;;  %v12568_v40 = vmax.f32 %v12552_v5, 0.0  ;;  %v18988_v5 = vld [vmem:[%s21968_s4 + $0x5e0] ss:$16 sps:$4 sm:$0xff]  }
0x1494   : > { %v12575_v42 = vmax.f32 %v12559_v62, 0.0  ;;  %14220 = vmatprep.subr.bf16.mxu1 %v18942_v18  ;;  %v18993_v62 = vld [vmem:[%s21968_s4 + $0x604] ss:$16 sps:$4 sm:$0xff]  }
0x1495   : > { %v12576_v47 = vmax.f32 %v12560_v9, 0.0 }
0x1496   : > { %v21626_v1 = vpack.c.bf16 %v12575_v42, %v12567_v45  ;;  %v18991_v42 = vld [vmem:[%s21968_s4 + $0x600] ss:$16 sps:$4 sm:$0xff]  }
0x1497   : > { %v21628_v51 = vpack.c.bf16 %v12576_v47, %v12568_v40  ;;  %14221 = vmatpush1.bf16.msra.mxu1 %v18940_v12  ;;  %v18994_v40 = vld [vmem:[%s21968_s4 + $0x620] ss:$16 sps:$4 sm:$0xff]   ;;  %v18999_v47 = vld [vmem:[%s21968_s4 + $0x644] ss:$16 sps:$4 sm:$0xff]  }
0x1498   : > { %14233 = vmatprep.subr.bf16.mxu1 %v18945_v57  ;;  %v18996_v57 = vld [vmem:[%s21968_s4 + $0x624] ss:$16 sps:$4 sm:$0xff]  }
0x1499   : > { %14222 = vmatprep.mubr.bf16.mxu1 %v21628_v51 }
0x149a   : > { %14223 = vmatmul.mubr.bf16.vlgmr.msra.gmra.mrb[116].mxu1 %v21626_v1 }
0x149b   : > { %14234 = vmatpush1.bf16.msra.mxu1 %v18943_v44  ;;  %14265 = vmatprep.mubr.bf16.mxu1 %v21586_v11  ;;  %v18997_v44 = vld [vmem:[%s21968_s4 + $0x640] ss:$16 sps:$4 sm:$0xff]  }
0x149c   : > { %14235 = vmatprep.subr.bf16.mxu1 %v18948_v23  ;;  %v19002_v23 = vld [vmem:[%s21968_s4 + $0x664] ss:$16 sps:$4 sm:$0xff]  }
0x149f   : > { %14236 = vmatpush1.bf16.msra.mxu1 %v18946_v14  ;;  %v19000_v14 = vld [vmem:[%s21968_s4 + $0x660] ss:$16 sps:$4 sm:$0xff]  }
0x14a0   : > { %14237 = vmatprep.subr.bf16.mxu1 %v18951_v43  ;;  %v19005_v43 = vld [vmem:[%s21968_s4 + $0x684] ss:$16 sps:$4 sm:$0xff]  }
0x14a3   : > { %14238 = vmatpush1.bf16.msra.mxu1 %v18949_v52  ;;  %v19003_v52 = vld [vmem:[%s21968_s4 + $0x680] ss:$16 sps:$4 sm:$0xff]  }
0x14a4   : > { %14239 = vmatprep.subr.bf16.mxu1 %v18954_v3  ;;  %v19008_v3 = vld [vmem:[%s21968_s4 + $0x6a4] ss:$16 sps:$4 sm:$0xff]  }
0x14a7   : > { %14240 = vmatpush1.bf16.msra.mxu1 %v18952_v46  ;;  %v19006_v46 = vld [vmem:[%s21968_s4 + $0x6a0] ss:$16 sps:$4 sm:$0xff]  }
0x14a8   : > { %14241 = vmatprep.subr.bf16.mxu1 %v18957_v16  ;;  %v19011_v16 = vld [vmem:[%s21968_s4 + $0x6c4] ss:$16 sps:$4 sm:$0xff]  }
0x14ab   : > { %14242 = vmatpush1.bf16.msra.mxu1 %v18955_v17  ;;  %v19009_v17 = vld [vmem:[%s21968_s4 + $0x6c0] ss:$16 sps:$4 sm:$0xff]  }
0x14ac   : > { %14243 = vmatprep.subr.bf16.mxu1 %v18960_v20  ;;  %v19014_v20 = vld [vmem:[%s21968_s4 + $0x6e4] ss:$16 sps:$4 sm:$0xff]  }
0x14af   : > { %14244 = vmatpush1.bf16.msra.mxu1 %v18958_v21  ;;  %v19012_v21 = vld [vmem:[%s21968_s4 + $0x6e0] ss:$16 sps:$4 sm:$0xff]  }
0x14b0   : > { %14245 = vmatprep.subr.bf16.mxu1 %v18963_v22  ;;  %v19017_v22 = vld [vmem:[%s21968_s4 + $0x704] ss:$16 sps:$4 sm:$0xff]  }
0x14b3   : > { %14246 = vmatpush1.bf16.msra.mxu1 %v18961_v32  ;;  %v19015_v32 = vld [vmem:[%s21968_s4 + $0x700] ss:$16 sps:$4 sm:$0xff]  }
0x14b4   : > { %14247 = vmatprep.subr.bf16.mxu1 %v18966_v7  ;;  %v19020_v7 = vld [vmem:[%s21968_s4 + $0x724] ss:$16 sps:$4 sm:$0xff]  }
0x14b7   : > { %14248 = vmatpush1.bf16.msra.mxu1 %v18964_v34  ;;  %v19018_v34 = vld [vmem:[%s21968_s4 + $0x720] ss:$16 sps:$4 sm:$0xff]  }
0x14b8   : > { %14249 = vmatprep.subr.bf16.mxu1 %v18969_v35  ;;  %v19023_v35 = vld [vmem:[%s21968_s4 + $0x744] ss:$16 sps:$4 sm:$0xff]  }
0x14bb   : > { %14250 = vmatpush1.bf16.msra.mxu1 %v18967_v36  ;;  %v19021_v36 = vld [vmem:[%s21968_s4 + $0x740] ss:$16 sps:$4 sm:$0xff]  }
0x14bc   : > { %14251 = vmatprep.subr.bf16.mxu1 %v18972_v37  ;;  %v19026_v37 = vld [vmem:[%s21968_s4 + $0x764] ss:$16 sps:$4 sm:$0xff]  }
0x14bf   : > { %14252 = vmatpush1.bf16.msra.mxu1 %v18970_v38  ;;  %v19024_v38 = vld [vmem:[%s21968_s4 + $0x760] ss:$16 sps:$4 sm:$0xff]  }
0x14c0   : > { %14253 = vmatprep.subr.bf16.mxu1 %v18975_v41  ;;  %v19029_v41 = vld [vmem:[%s21968_s4 + $0x784] ss:$16 sps:$4 sm:$0xff]  }
0x14c3   : > { %14254 = vmatpush1.bf16.msra.mxu1 %v18973_v50  ;;  %v19027_v50 = vld [vmem:[%s21968_s4 + $0x780] ss:$16 sps:$4 sm:$0xff]  }
0x14c4   : > { %14255 = vmatprep.subr.bf16.mxu1 %v18978_v24  ;;  %v19032_v24 = vld [vmem:[%s21968_s4 + $0x7a4] ss:$16 sps:$4 sm:$0xff]  }
0x14c7   : > { %14256 = vmatpush1.bf16.msra.mxu1 %v18976_v25  ;;  %v19030_v25 = vld [vmem:[%s21968_s4 + $0x7a0] ss:$16 sps:$4 sm:$0xff]  }
0x14c8   : > { %14257 = vmatprep.subr.bf16.mxu1 %v18981_v2  ;;  %v19035_v2 = vld [vmem:[%s21968_s4 + $0x7c4] ss:$16 sps:$4 sm:$0xff]  }
0x14cb   : > { %14258 = vmatpush1.bf16.msra.mxu1 %v18979_v30  ;;  %v19033_v30 = vld [vmem:[%s21968_s4 + $0x7c0] ss:$16 sps:$4 sm:$0xff]  }
0x14cc   : > { %14259 = vmatprep.subr.bf16.mxu1 %v18984_v28  ;;  %v19038_v28 = vld [vmem:[%s21968_s4 + $0x7e4] ss:$16 sps:$4 sm:$0xff]  }
0x14cf   : > { %v12482_v58 = vpop.f32.mrb[100].mxu0  ;;  %14260 = vmatpush1.bf16.msra.mxu1 %v18982_v54  ;;  %v19039_v54 = vld [vmem:[%s21968_s4 + $0x8] ss:$16 sps:$4 sm:$0xff]  }
0x14d0   : > { %v12555_v61 = vadd.f32 %v12536_v33, %v12482_v58  ;;  %v12484_v19 = vpop.f32.mrb[101].mxu0  ;;  %14261 = vmatprep.subr.bf16.mxu1 %v18987_v55  ;;  %v19042_v55 = vld [vmem:[%s21968_s4 + $0x28] ss:$16 sps:$4 sm:$0xff]  }
0x14d1   : > { %v12556_v63 = vadd.f32 %v12540_v56, %v12484_v19  ;;  %v12486_v26 = vpop.f32.mrb[102].mxu0  ;;  %v19045_v58 = vld [vmem:[%s21968_s4 + $0x48] ss:$16 sps:$4 sm:$0xff]   ;;  %v19053_v19 = vld [vmem:[%s21968_s4 + $0x8c] ss:$16 sps:$4 sm:$0xff]  }
0x14d2   : > { %v12563_v48 = vadd.f32 %v12536_v33, %v12486_v26  ;;  %v12488_v10 = vpop.f32.mrb[103].mxu0  ;;  %v12571_v31 = vmax.f32 %v12555_v61, 0.0  ;;  %v19044_v33 = vld [vmem:[%s21968_s4 + $0x2c] ss:$16 sps:$4 sm:$0xff]   ;;  %v19048_v61 = vld [vmem:[%s21968_s4 + $0x68] ss:$16 sps:$4 sm:$0xff]  }
0x14d3   : > { %v12564_v18 = vadd.f32 %v12540_v56, %v12488_v10  ;;  %14262 = vmatpush1.bf16.msra.mxu1 %v18985_v60  ;;  %v12572_v0 = vmax.f32 %v12556_v63, 0.0  ;;  %v19047_v56 = vld [vmem:[%s21968_s4 + $0x4c] ss:$16 sps:$4 sm:$0xff]   ;;  %v19054_v63 = vld [vmem:[%s21968_s4 + $0xa8] ss:$16 sps:$4 sm:$0xff]  }
0x14d4   : > { %v12579_v49 = vmax.f32 %v12563_v48, 0.0  ;;  %14263 = vmatprep.subr.bf16.mxu1 %v18990_v8  ;;  %v19050_v60 = vld [vmem:[%s21968_s4 + $0x6c] ss:$16 sps:$4 sm:$0xff]   ;;  %v19051_v8 = vld [vmem:[%s21968_s4 + $0x88] ss:$16 sps:$4 sm:$0xff]  }
0x14d5   : > { %v12580_v9 = vmax.f32 %v12564_v18, 0.0  ;;  %v19059_v26 = vld [vmem:[%s21968_s4 + $0xcc] ss:$16 sps:$4 sm:$0xff]   ;;  %v19057_v48 = vld [vmem:[%s21968_s4 + $0xc8] ss:$16 sps:$4 sm:$0xff]  }
0x14d6   : > { %v21669_v12 = vpack.c.bf16 %v12579_v49, %v12571_v31  ;;  %v19062_v10 = vld [vmem:[%s21968_s4 + $0xec] ss:$16 sps:$4 sm:$0xff]   ;;  %v19060_v18 = vld [vmem:[%s21968_s4 + $0xe8] ss:$16 sps:$4 sm:$0xff]  }
0x14d7   : > { %v21671_v45 = vpack.c.bf16 %v12580_v9, %v12572_v0  ;;  %14264 = vmatpush1.bf16.msra.mxu1 %v18988_v5  ;;  %v19065_v5 = vld [vmem:[%s21968_s4 + $0x10c] ss:$16 sps:$4 sm:$0xff]   ;;  %v19063_v31 = vld [vmem:[%s21968_s4 + $0x108] ss:$16 sps:$4 sm:$0xff]  }
0x14d8   : > { %14276 = vmatprep.subr.bf16.mxu1 %v18993_v62  ;;  %v19068_v49 = vld [vmem:[%s21968_s4 + $0x12c] ss:$16 sps:$4 sm:$0xff]   ;;  %v19066_v62 = vld [vmem:[%s21968_s4 + $0x128] ss:$16 sps:$4 sm:$0xff]  }
0x14d9   : > { %v19071_v0 = vld [vmem:[%s21968_s4 + $0x14c] ss:$16 sps:$4 sm:$0xff]   ;;  %v19069_v9 = vld [vmem:[%s21968_s4 + $0x148] ss:$16 sps:$4 sm:$0xff]  }
0x14da   : > { %14266 = vmatmul.mubr.bf16.vlgmr.msra.gmra.mrb[116].mxu1 %v21582_v6 }
0x14db   : > { %14277 = vmatpush1.bf16.msra.mxu1 %v18991_v42  ;;  %14308 = vmatprep.mubr.bf16.mxu1 %v21671_v45  ;;  %v19074_v42 = vld [vmem:[%s21968_s4 + $0x16c] ss:$16 sps:$4 sm:$0xff]  }
0x14dc   : > { %14278 = vmatprep.subr.bf16.mxu1 %v18996_v57  ;;  %v19072_v57 = vld [vmem:[%s21968_s4 + $0x168] ss:$16 sps:$4 sm:$0xff]  }
0x14df   : > { %14279 = vmatpush1.bf16.msra.mxu1 %v18994_v40  ;;  %v19077_v40 = vld [vmem:[%s21968_s4 + $0x18c] ss:$16 sps:$4 sm:$0xff]  }
0x14e0   : > { %14280 = vmatprep.subr.bf16.mxu1 %v18999_v47  ;;  %v19075_v47 = vld [vmem:[%s21968_s4 + $0x188] ss:$16 sps:$4 sm:$0xff]  }
0x14e3   : > { %14281 = vmatpush1.bf16.msra.mxu1 %v18997_v44  ;;  %v19080_v44 = vld [vmem:[%s21968_s4 + $0x1ac] ss:$16 sps:$4 sm:$0xff]  }
0x14e4   : > { %14282 = vmatprep.subr.bf16.mxu1 %v19002_v23  ;;  %v19078_v23 = vld [vmem:[%s21968_s4 + $0x1a8] ss:$16 sps:$4 sm:$0xff]  }
0x14e7   : > { %14283 = vmatpush1.bf16.msra.mxu1 %v19000_v14  ;;  %v19083_v14 = vld [vmem:[%s21968_s4 + $0x1cc] ss:$16 sps:$4 sm:$0xff]  }
0x14e8   : > { %14284 = vmatprep.subr.bf16.mxu1 %v19005_v43  ;;  %v19081_v43 = vld [vmem:[%s21968_s4 + $0x1c8] ss:$16 sps:$4 sm:$0xff]  }
0x14eb   : > { %14285 = vmatpush1.bf16.msra.mxu1 %v19003_v52  ;;  %v19086_v52 = vld [vmem:[%s21968_s4 + $0x1ec] ss:$16 sps:$4 sm:$0xff]  }
0x14ec   : > { %14286 = vmatprep.subr.bf16.mxu1 %v19008_v3  ;;  %v19084_v3 = vld [vmem:[%s21968_s4 + $0x1e8] ss:$16 sps:$4 sm:$0xff]  }
0x14ef   : > { %14287 = vmatpush1.bf16.msra.mxu1 %v19006_v46  ;;  %v19089_v46 = vld [vmem:[%s21968_s4 + $0x20c] ss:$16 sps:$4 sm:$0xff]  }
0x14f0   : > { %14288 = vmatprep.subr.bf16.mxu1 %v19011_v16  ;;  %v19087_v16 = vld [vmem:[%s21968_s4 + $0x208] ss:$16 sps:$4 sm:$0xff]  }
0x14f3   : > { %14289 = vmatpush1.bf16.msra.mxu1 %v19009_v17  ;;  %v19092_v17 = vld [vmem:[%s21968_s4 + $0x22c] ss:$16 sps:$4 sm:$0xff]  }
0x14f4   : > { %14290 = vmatprep.subr.bf16.mxu1 %v19014_v20  ;;  %v19090_v20 = vld [vmem:[%s21968_s4 + $0x228] ss:$16 sps:$4 sm:$0xff]  }
0x14f7   : > { %14291 = vmatpush1.bf16.msra.mxu1 %v19012_v21  ;;  %v19095_v21 = vld [vmem:[%s21968_s4 + $0x24c] ss:$16 sps:$4 sm:$0xff]  }
0x14f8   : > { %14292 = vmatprep.subr.bf16.mxu1 %v19017_v22  ;;  %v19093_v22 = vld [vmem:[%s21968_s4 + $0x248] ss:$16 sps:$4 sm:$0xff]  }
0x14fb   : > { %14293 = vmatpush1.bf16.msra.mxu1 %v19015_v32  ;;  %v19098_v32 = vld [vmem:[%s21968_s4 + $0x26c] ss:$16 sps:$4 sm:$0xff]  }
0x14fc   : > { %14294 = vmatprep.subr.bf16.mxu1 %v19020_v7  ;;  %v19096_v7 = vld [vmem:[%s21968_s4 + $0x268] ss:$16 sps:$4 sm:$0xff]  }
0x14ff   : > { %14295 = vmatpush1.bf16.msra.mxu1 %v19018_v34  ;;  %v19099_v34 = vld [vmem:[%s21968_s4 + $0x288] ss:$16 sps:$4 sm:$0xff]  }
0x1500   : > { %14296 = vmatprep.subr.bf16.mxu1 %v19023_v35  ;;  %v19102_v35 = vld [vmem:[%s21968_s4 + $0x2a8] ss:$16 sps:$4 sm:$0xff]  }
0x1503   : > { %14297 = vmatpush1.bf16.msra.mxu1 %v19021_v36  ;;  %v19107_v36 = vld [vmem:[%s21968_s4 + $0x2cc] ss:$16 sps:$4 sm:$0xff]  }
0x1504   : > { %14298 = vmatprep.subr.bf16.mxu1 %v19026_v37  ;;  %v19105_v37 = vld [vmem:[%s21968_s4 + $0x2c8] ss:$16 sps:$4 sm:$0xff]  }
0x1507   : > { %14299 = vmatpush1.bf16.msra.mxu1 %v19024_v38  ;;  %v19110_v38 = vld [vmem:[%s21968_s4 + $0x2ec] ss:$16 sps:$4 sm:$0xff]  }
0x1508   : > { %14300 = vmatprep.subr.bf16.mxu1 %v19029_v41  ;;  %v19108_v41 = vld [vmem:[%s21968_s4 + $0x2e8] ss:$16 sps:$4 sm:$0xff]  }
0x150b   : > { %14301 = vmatpush1.bf16.msra.mxu1 %v19027_v50  ;;  %v19113_v50 = vld [vmem:[%s21968_s4 + $0x30c] ss:$16 sps:$4 sm:$0xff]  }
0x150c   : > { %14302 = vmatprep.subr.bf16.mxu1 %v19032_v24  ;;  %v19111_v24 = vld [vmem:[%s21968_s4 + $0x308] ss:$16 sps:$4 sm:$0xff]  }
0x150f   : > { %14303 = vmatpush1.bf16.msra.mxu1 %v19030_v25  ;;  %v19116_v25 = vld [vmem:[%s21968_s4 + $0x32c] ss:$16 sps:$4 sm:$0xff]  }
0x1510   : > { %14304 = vmatprep.subr.bf16.mxu1 %v19035_v2  ;;  %v19114_v2 = vld [vmem:[%s21968_s4 + $0x328] ss:$16 sps:$4 sm:$0xff]  }
0x1513   : > { %14305 = vmatpush1.bf16.msra.mxu1 %v19033_v30  ;;  %v19119_v30 = vld [vmem:[%s21968_s4 + $0x34c] ss:$16 sps:$4 sm:$0xff]  }
0x1514   : > { %14306 = vmatprep.subr.bf16.mxu1 %v19038_v28  ;;  %v19117_v28 = vld [vmem:[%s21968_s4 + $0x348] ss:$16 sps:$4 sm:$0xff]  }
0x1517   : > { %14307 = vmatpush1.bf16.msra.mxu1 %v19036_v39  ;;  %v19122_v39 = vld [vmem:[%s21968_s4 + $0x36c] ss:$16 sps:$4 sm:$0xff]  }
0x1518   : > { %14319 = vmatprep.subr.bf16.mxu1 %v19041_v53  ;;  %v19120_v53 = vld [vmem:[%s21968_s4 + $0x368] ss:$16 sps:$4 sm:$0xff]  }
0x151a   : > { %14309 = vmatmul.mubr.bf16.vlgmr.msra.gmra.mrb[116].mxu1 %v21669_v12 }
0x151b   : > { %14320 = vmatpush1.bf16.msra.mxu1 %v19039_v54  ;;  %14351 = vmatprep.mubr.bf16.mxu1 %v21584_v59  ;;  %v19056_v59 = vld [vmem:[%s21968_s4 + $0xac] ss:$16 sps:$4 sm:$0xff]  }
0x151c   : > { %14321 = vmatprep.subr.bf16.mxu1 %v19044_v33  ;;  %v19125_v54 = vld [vmem:[%s21968_s4 + $0x38c] ss:$16 sps:$4 sm:$0xff]   ;;  %v19123_v33 = vld [vmem:[%s21968_s4 + $0x388] ss:$16 sps:$4 sm:$0xff]  }
0x151f   : > { %14322 = vmatpush1.bf16.msra.mxu1 %v19042_v55  ;;  %v19128_v55 = vld [vmem:[%s21968_s4 + $0x3ac] ss:$16 sps:$4 sm:$0xff]  }
0x1520   : > { %14323 = vmatprep.subr.bf16.mxu1 %v19047_v56  ;;  %v19126_v56 = vld [vmem:[%s21968_s4 + $0x3a8] ss:$16 sps:$4 sm:$0xff]  }
0x1523   : > { %14324 = vmatpush1.bf16.msra.mxu1 %v19045_v58  ;;  %v19131_v58 = vld [vmem:[%s21968_s4 + $0x3cc] ss:$16 sps:$4 sm:$0xff]  }
0x1524   : > { %14325 = vmatprep.subr.bf16.mxu1 %v19050_v60  ;;  %v19129_v60 = vld [vmem:[%s21968_s4 + $0x3c8] ss:$16 sps:$4 sm:$0xff]  }
0x1527   : > { %14326 = vmatpush1.bf16.msra.mxu1 %v19048_v61  ;;  %v19134_v61 = vld [vmem:[%s21968_s4 + $0x3ec] ss:$16 sps:$4 sm:$0xff]  }
0x1528   : > { %14327 = vmatprep.subr.bf16.mxu1 %v19053_v19  ;;  %v19132_v19 = vld [vmem:[%s21968_s4 + $0x3e8] ss:$16 sps:$4 sm:$0xff]  }
0x152b   : > { %14328 = vmatpush1.bf16.msra.mxu1 %v19051_v8  ;;  %v19137_v8 = vld [vmem:[%s21968_s4 + $0x40c] ss:$16 sps:$4 sm:$0xff]  }
0x152c   : > { %14329 = vmatprep.subr.bf16.mxu1 %v19056_v59  ;;  %v19135_v59 = vld [vmem:[%s21968_s4 + $0x408] ss:$16 sps:$4 sm:$0xff]  }
0x152f   : > { %14330 = vmatpush1.bf16.msra.mxu1 %v19054_v63  ;;  %v19140_v63 = vld [vmem:[%s21968_s4 + $0x42c] ss:$16 sps:$4 sm:$0xff]  }
0x1530   : > { %14331 = vmatprep.subr.bf16.mxu1 %v19059_v26  ;;  %v19138_v26 = vld [vmem:[%s21968_s4 + $0x428] ss:$16 sps:$4 sm:$0xff]  }
0x1533   : > { %14332 = vmatpush1.bf16.msra.mxu1 %v19057_v48  ;;  %v19143_v48 = vld [vmem:[%s21968_s4 + $0x44c] ss:$16 sps:$4 sm:$0xff]  }
0x1534   : > { %14333 = vmatprep.subr.bf16.mxu1 %v19062_v10  ;;  %v19141_v10 = vld [vmem:[%s21968_s4 + $0x448] ss:$16 sps:$4 sm:$0xff]  }
0x1537   : > { %14334 = vmatpush1.bf16.msra.mxu1 %v19060_v18  ;;  %v19146_v18 = vld [vmem:[%s21968_s4 + $0x46c] ss:$16 sps:$4 sm:$0xff]  }
0x1538   : > { %14335 = vmatprep.subr.bf16.mxu1 %v19065_v5  ;;  %v19144_v5 = vld [vmem:[%s21968_s4 + $0x468] ss:$16 sps:$4 sm:$0xff]  }
0x153b   : > { %14336 = vmatpush1.bf16.msra.mxu1 %v19063_v31  ;;  %v19147_v31 = vld [vmem:[%s21968_s4 + $0x488] ss:$16 sps:$4 sm:$0xff]  }
0x153c   : > { %14337 = vmatprep.subr.bf16.mxu1 %v19068_v49  ;;  %v19150_v49 = vld [vmem:[%s21968_s4 + $0x4a8] ss:$16 sps:$4 sm:$0xff]  }
0x153f   : > { %14338 = vmatpush1.bf16.msra.mxu1 %v19066_v62  ;;  %v19155_v62 = vld [vmem:[%s21968_s4 + $0x4cc] ss:$16 sps:$4 sm:$0xff]  }
0x1540   : > { %14339 = vmatprep.subr.bf16.mxu1 %v19071_v0  ;;  %v19153_v0 = vld [vmem:[%s21968_s4 + $0x4c8] ss:$16 sps:$4 sm:$0xff]  }
0x1543   : > { %14340 = vmatpush1.bf16.msra.mxu1 %v19069_v9  ;;  %v19158_v9 = vld [vmem:[%s21968_s4 + $0x4ec] ss:$16 sps:$4 sm:$0xff]  }
0x1544   : > { %14341 = vmatprep.subr.bf16.mxu1 %v19074_v42  ;;  %v19156_v42 = vld [vmem:[%s21968_s4 + $0x4e8] ss:$16 sps:$4 sm:$0xff]  }
0x1547   : > { %14342 = vmatpush1.bf16.msra.mxu1 %v19072_v57  ;;  %v19161_v57 = vld [vmem:[%s21968_s4 + $0x50c] ss:$16 sps:$4 sm:$0xff]  }
0x1548   : > { %14343 = vmatprep.subr.bf16.mxu1 %v19077_v40  ;;  %v19159_v40 = vld [vmem:[%s21968_s4 + $0x508] ss:$16 sps:$4 sm:$0xff]  }
0x154b   : > { %14344 = vmatpush1.bf16.msra.mxu1 %v19075_v47  ;;  %v19164_v47 = vld [vmem:[%s21968_s4 + $0x52c] ss:$16 sps:$4 sm:$0xff]  }
0x154c   : > { %14345 = vmatprep.subr.bf16.mxu1 %v19080_v44  ;;  %v19162_v44 = vld [vmem:[%s21968_s4 + $0x528] ss:$16 sps:$4 sm:$0xff]  }
0x154f   : > { %14346 = vmatpush1.bf16.msra.mxu1 %v19078_v23  ;;  %v19167_v23 = vld [vmem:[%s21968_s4 + $0x54c] ss:$16 sps:$4 sm:$0xff]  }
0x1550   : > { %14347 = vmatprep.subr.bf16.mxu1 %v19083_v14  ;;  %v19165_v14 = vld [vmem:[%s21968_s4 + $0x548] ss:$16 sps:$4 sm:$0xff]  }
0x1553   : > { %14348 = vmatpush1.bf16.msra.mxu1 %v19081_v43  ;;  %v19170_v43 = vld [vmem:[%s21968_s4 + $0x56c] ss:$16 sps:$4 sm:$0xff]  }
0x1554   : > { %14349 = vmatprep.subr.bf16.mxu1 %v19086_v52  ;;  %v19168_v52 = vld [vmem:[%s21968_s4 + $0x568] ss:$16 sps:$4 sm:$0xff]  }
0x1557   : > { %14350 = vmatpush1.bf16.msra.mxu1 %v19084_v3  ;;  %v19173_v3 = vld [vmem:[%s21968_s4 + $0x58c] ss:$16 sps:$4 sm:$0xff]  }
0x1558   : > { %14362 = vmatprep.subr.bf16.mxu1 %v19089_v46  ;;  %v19171_v46 = vld [vmem:[%s21968_s4 + $0x588] ss:$16 sps:$4 sm:$0xff]  }
0x155a   : > { %14352 = vmatmul.mubr.bf16.vlgmr.msra.gmra.mrb[120].mxu1 %v21580_v4  ;;  %v19101_v4 = vld [vmem:[%s21968_s4 + $0x28c] ss:$16 sps:$4 sm:$0xff]  }
0x155b   : > { %14363 = vmatpush1.bf16.msra.mxu1 %v19087_v16  ;;  %14394 = vmatprep.mubr.bf16.mxu1 %v21628_v51  ;;  %v19104_v51 = vld [vmem:[%s21968_s4 + $0x2ac] ss:$16 sps:$4 sm:$0xff]  }
0x155c   : > { %14364 = vmatprep.subr.bf16.mxu1 %v19092_v17  ;;  %v19176_v16 = vld [vmem:[%s21968_s4 + $0x5ac] ss:$16 sps:$4 sm:$0xff]   ;;  %v19174_v17 = vld [vmem:[%s21968_s4 + $0x5a8] ss:$16 sps:$4 sm:$0xff]  }
0x155f   : > { %14365 = vmatpush1.bf16.msra.mxu1 %v19090_v20  ;;  %v19179_v20 = vld [vmem:[%s21968_s4 + $0x5cc] ss:$16 sps:$4 sm:$0xff]  }
0x1560   : > { %14366 = vmatprep.subr.bf16.mxu1 %v19095_v21  ;;  %v19177_v21 = vld [vmem:[%s21968_s4 + $0x5c8] ss:$16 sps:$4 sm:$0xff]  }
0x1563   : > { %14367 = vmatpush1.bf16.msra.mxu1 %v19093_v22  ;;  %v19182_v22 = vld [vmem:[%s21968_s4 + $0x5ec] ss:$16 sps:$4 sm:$0xff]  }
0x1564   : > { %14368 = vmatprep.subr.bf16.mxu1 %v19098_v32  ;;  %v19180_v32 = vld [vmem:[%s21968_s4 + $0x5e8] ss:$16 sps:$4 sm:$0xff]  }
0x1567   : > { %14369 = vmatpush1.bf16.msra.mxu1 %v19096_v7  ;;  %v19185_v7 = vld [vmem:[%s21968_s4 + $0x60c] ss:$16 sps:$4 sm:$0xff]  }
0x1568   : > { %14370 = vmatprep.subr.bf16.mxu1 %v19101_v4  ;;  %v19183_v4 = vld [vmem:[%s21968_s4 + $0x608] ss:$16 sps:$4 sm:$0xff]  }
0x156b   : > { %14371 = vmatpush1.bf16.msra.mxu1 %v19099_v34  ;;  %v19188_v34 = vld [vmem:[%s21968_s4 + $0x62c] ss:$16 sps:$4 sm:$0xff]  }
0x156c   : > { %14372 = vmatprep.subr.bf16.mxu1 %v19104_v51  ;;  %v19186_v51 = vld [vmem:[%s21968_s4 + $0x628] ss:$16 sps:$4 sm:$0xff]  }
0x156f   : > { %14373 = vmatpush1.bf16.msra.mxu1 %v19102_v35  ;;  %v19191_v35 = vld [vmem:[%s21968_s4 + $0x64c] ss:$16 sps:$4 sm:$0xff]  }
0x1570   : > { %14374 = vmatprep.subr.bf16.mxu1 %v19107_v36  ;;  %v19189_v36 = vld [vmem:[%s21968_s4 + $0x648] ss:$16 sps:$4 sm:$0xff]  }
0x1573   : > { %14375 = vmatpush1.bf16.msra.mxu1 %v19105_v37  ;;  %v19194_v37 = vld [vmem:[%s21968_s4 + $0x66c] ss:$16 sps:$4 sm:$0xff]  }
0x1574   : > { %14376 = vmatprep.subr.bf16.mxu1 %v19110_v38  ;;  %v19192_v38 = vld [vmem:[%s21968_s4 + $0x668] ss:$16 sps:$4 sm:$0xff]  }
0x1577   : > { %14377 = vmatpush1.bf16.msra.mxu1 %v19108_v41  ;;  %v19195_v41 = vld [vmem:[%s21968_s4 + $0x688] ss:$16 sps:$4 sm:$0xff]  }
0x1578   : > { %14378 = vmatprep.subr.bf16.mxu1 %v19113_v50  ;;  %v21821_v50 = vld [vmem:[%s21970_s26] sm:$0xf] }
0x157b   : > { %14379 = vmatpush1.bf16.msra.mxu1 %v19111_v24  ;;  %v12850_v24 = vrot.slane %v21821_v50, %v20382_v27 }
0x157c   : > { %14380 = vmatprep.subr.bf16.mxu1 %v19116_v25  ;;  %v12854_v25 = vrot.slane %v21821_v50, %v20385_v29  ;;  %v19201_v29 = vld [vmem:[%s21968_s4 + $0x6c8] ss:$16 sps:$4 sm:$0xff]  }
0x157f   : > { %14381 = vmatpush1.bf16.msra.mxu1 %v19114_v2  ;;  %v19198_v2 = vld [vmem:[%s21968_s4 + $0x6a8] ss:$16 sps:$4 sm:$0xff]  }
0x1580   : > { %14382 = vmatprep.subr.bf16.mxu1 %v19119_v30  ;;  %v19203_v30 = vld [vmem:[%s21968_s4 + $0x6cc] ss:$16 sps:$4 sm:$0xff]  }
0x1583   : > { %14383 = vmatpush1.bf16.msra.mxu1 %v19117_v28 }
0x1584   : > { %14384 = vmatprep.subr.bf16.mxu1 %v19122_v39 }
0x1587   : > { %14385 = vmatpush1.bf16.msra.mxu1 %v19120_v53 }
0x1588   : > { %14386 = vmatprep.subr.bf16.mxu1 %v19125_v54 }
0x158b   : > { %14387 = vmatpush1.bf16.msra.mxu1 %v19123_v33 }
0x158c   : > { %14388 = vmatprep.subr.bf16.mxu1 %v19128_v55 }
0x158f   : > { %14389 = vmatpush1.bf16.msra.mxu1 %v19126_v56  ;;  %v19206_v56 = vld [vmem:[%s21968_s4 + $0x6ec] ss:$16 sps:$4 sm:$0xff]  }
0x1590   : > { %14390 = vmatprep.subr.bf16.mxu1 %v19131_v58 }
0x1593   : > { %14391 = vmatpush1.bf16.msra.mxu1 %v19129_v60  ;;  %v19204_v60 = vld [vmem:[%s21968_s4 + $0x6e8] ss:$16 sps:$4 sm:$0xff]  }
0x1594   : > { %14392 = vmatprep.subr.bf16.mxu1 %v19134_v61  ;;  %v19209_v61 = vld [vmem:[%s21968_s4 + $0x70c] ss:$16 sps:$4 sm:$0xff]  }
0x1597   : > { %14393 = vmatpush1.bf16.msra.mxu1 %v19132_v19  ;;  %v19207_v19 = vld [vmem:[%s21968_s4 + $0x708] ss:$16 sps:$4 sm:$0xff]  }
0x1598   : > { %14405 = vmatprep.subr.bf16.mxu1 %v19137_v8  ;;  %v19212_v8 = vld [vmem:[%s21968_s4 + $0x72c] ss:$16 sps:$4 sm:$0xff]  }
0x159a   : > { %14395 = vmatmul.mubr.bf16.vlgmr.msra.gmra.mrb[120].mxu1 %v21626_v1  ;;  %v19149_v1 = vld [vmem:[%s21968_s4 + $0x48c] ss:$16 sps:$4 sm:$0xff]  }
0x159b   : > { %14406 = vmatpush1.bf16.msra.mxu1 %v19135_v59  ;;  %14437 = vmatprep.mubr.bf16.mxu1 %v21586_v11  ;;  %v19152_v11 = vld [vmem:[%s21968_s4 + $0x4ac] ss:$16 sps:$4 sm:$0xff]   ;;  %v19210_v59 = vld [vmem:[%s21968_s4 + $0x728] ss:$16 sps:$4 sm:$0xff]  }
0x159c   : > { %14407 = vmatprep.subr.bf16.mxu1 %v19140_v63  ;;  %v19215_v63 = vld [vmem:[%s21968_s4 + $0x74c] ss:$16 sps:$4 sm:$0xff]  }
0x159f   : > { %14408 = vmatpush1.bf16.msra.mxu1 %v19138_v26  ;;  %v19213_v26 = vld [vmem:[%s21968_s4 + $0x748] ss:$16 sps:$4 sm:$0xff]  }
0x15a0   : > { %14409 = vmatprep.subr.bf16.mxu1 %v19143_v48  ;;  %v19218_v48 = vld [vmem:[%s21968_s4 + $0x76c] ss:$16 sps:$4 sm:$0xff]  }
0x15a3   : > { %14410 = vmatpush1.bf16.msra.mxu1 %v19141_v10  ;;  %v19216_v10 = vld [vmem:[%s21968_s4 + $0x768] ss:$16 sps:$4 sm:$0xff]  }
0x15a4   : > { %14411 = vmatprep.subr.bf16.mxu1 %v19146_v18  ;;  %v19221_v18 = vld [vmem:[%s21968_s4 + $0x78c] ss:$16 sps:$4 sm:$0xff]  }
0x15a7   : > { %14412 = vmatpush1.bf16.msra.mxu1 %v19144_v5  ;;  %v19219_v5 = vld [vmem:[%s21968_s4 + $0x788] ss:$16 sps:$4 sm:$0xff]  }
0x15a8   : > { %14413 = vmatprep.subr.bf16.mxu1 %v19149_v1  ;;  %v19224_v1 = vld [vmem:[%s21968_s4 + $0x7ac] ss:$16 sps:$4 sm:$0xff]  }
0x15ab   : > { %14414 = vmatpush1.bf16.msra.mxu1 %v19147_v31  ;;  %v19222_v31 = vld [vmem:[%s21968_s4 + $0x7a8] ss:$16 sps:$4 sm:$0xff]  }
0x15ac   : > { %14415 = vmatprep.subr.bf16.mxu1 %v19152_v11  ;;  %v19227_v11 = vld [vmem:[%s21968_s4 + $0x7cc] ss:$16 sps:$4 sm:$0xff]  }
0x15af   : > { %14416 = vmatpush1.bf16.msra.mxu1 %v19150_v49  ;;  %v19225_v49 = vld [vmem:[%s21968_s4 + $0x7c8] ss:$16 sps:$4 sm:$0xff]  }
0x15b0   : > { %14417 = vmatprep.subr.bf16.mxu1 %v19155_v62  ;;  %v19230_v62 = vld [vmem:[%s21968_s4 + $0x7ec] ss:$16 sps:$4 sm:$0xff]  }
0x15b3   : > { %14418 = vmatpush1.bf16.msra.mxu1 %v19153_v0  ;;  %v19228_v0 = vld [vmem:[%s21968_s4 + $0x7e8] ss:$16 sps:$4 sm:$0xff]  }
0x15b4   : > { %14419 = vmatprep.subr.bf16.mxu1 %v19158_v9  ;;  %v12858_v9 = vrot.slane %v21821_v50, %v20896_v13 }
0x15b7   : > { %14420 = vmatpush1.bf16.msra.mxu1 %v19156_v42  ;;  %v12862_v42 = vrot.slane %v21821_v50, %v20901_v15 }
0x15b8   : > { %14421 = vmatprep.subr.bf16.mxu1 %v19161_v57 }
0x15bb   : > { %14422 = vmatpush1.bf16.msra.mxu1 %v19159_v40 }
0x15bc   : > { %14423 = vmatprep.subr.bf16.mxu1 %v19164_v47 }
0x15bf   : > { %14424 = vmatpush1.bf16.msra.mxu1 %v19162_v44 }
0x15c0   : > { %14425 = vmatprep.subr.bf16.mxu1 %v19167_v23 }
0x15c3   : > { %14426 = vmatpush1.bf16.msra.mxu1 %v19165_v14 }
0x15c4   : > { %14427 = vmatprep.subr.bf16.mxu1 %v19170_v43 }
0x15c7   : > { %14428 = vmatpush1.bf16.msra.mxu1 %v19168_v52 }
0x15c8   : > { %14429 = vmatprep.subr.bf16.mxu1 %v19173_v3 }
0x15cb   : > { %14430 = vmatpush1.bf16.msra.mxu1 %v19171_v46 }
0x15cc   : > { %14431 = vmatprep.subr.bf16.mxu1 %v19176_v16 }
0x15cf   : > { %14432 = vmatpush1.bf16.msra.mxu1 %v19174_v17 }
0x15d0   : > { %14433 = vmatprep.subr.bf16.mxu1 %v19179_v20 }
0x15d3   : > { %14434 = vmatpush1.bf16.msra.mxu1 %v19177_v21 }
0x15d4   : > { %14435 = vmatprep.subr.bf16.mxu1 %v19182_v22 }
0x15d7   : > { %14436 = vmatpush1.bf16.msra.mxu1 %v19180_v32 }
0x15d8   : > { %14448 = vmatprep.subr.bf16.mxu1 %v19185_v7 }
0x15da   : > { %14438 = vmatmul.mubr.bf16.vlgmr.msra.gmra.mrb[120].mxu1 %v21582_v6  ;;  %v19197_v6 = vld [vmem:[%s21968_s4 + $0x68c] ss:$16 sps:$4 sm:$0xff]  }
0x15db   : > { %14449 = vmatpush1.bf16.msra.mxu1 %v19183_v4  ;;  %14480 = vmatprep.mubr.bf16.mxu1 %v21671_v45  ;;  %v19200_v45 = vld [vmem:[%s21968_s4 + $0x6ac] ss:$16 sps:$4 sm:$0xff]  }
0x15dc   : > { %14450 = vmatprep.subr.bf16.mxu1 %v19188_v34 }
0x15df   : > { %14451 = vmatpush1.bf16.msra.mxu1 %v19186_v51 }
0x15e0   : > { %14452 = vmatprep.subr.bf16.mxu1 %v19191_v35 }
0x15e3   : > { %14453 = vmatpush1.bf16.msra.mxu1 %v19189_v36 }
0x15e4   : > { %14454 = vmatprep.subr.bf16.mxu1 %v19194_v37 }
0x15e7   : > { %14455 = vmatpush1.bf16.msra.mxu1 %v19192_v38 }
0x15e8   : > { %14456 = vmatprep.subr.bf16.mxu1 %v19197_v6 }
0x15eb   : > { %14457 = vmatpush1.bf16.msra.mxu1 %v19195_v41 }
0x15ec   : > { %14458 = vmatprep.subr.bf16.mxu1 %v19200_v45 }
0x15ed   : > { %v14310_v28 = vpop.f32.mrb[116].mxu1 }
0x15ee   : > { %v17166_v39 = vadd.f32 %v14310_v28, %v12850_v24  ;;  %v14312_v53 = vpop.f32.mrb[117].mxu1 }
0x15ef   : > { %v17167_v54 = vadd.f32 %v14312_v53, %v12854_v25  ;;  %v14314_v27 = vpop.f32.mrb[118].mxu1  ;;  %14459 = vmatpush1.bf16.msra.mxu1 %v19198_v2 }
0x15f0   : > { %14491 = vst [vmem:[%s21832_s22] sm:$0xff] %v17166_v39  ;;  %v17168_v33 = vadd.f32 %v14314_v27, %v12850_v24  ;;  %v14316_v55 = vpop.f32.mrb[119].mxu1  ;;  %14460 = vmatprep.subr.bf16.mxu1 %v19203_v30 }
0x15f1   : > { %14492 = vst [vmem:[%s21832_s22 + $0x8] sm:$0xff] %v17167_v54  ;;  %v17169_v58 = vadd.f32 %v14316_v55, %v12854_v25 }
0x15f2   : > { %14496 = vst [vmem:[%s21832_s22 + $0x20] sm:$0xff] %v17168_v33 }
0x15f3   : > { %14497 = vst [vmem:[%s21832_s22 + $0x28] sm:$0xff] %v17169_v58  ;;  %14461 = vmatpush1.bf16.msra.mxu1 %v19201_v29 }
0x15f4   : > { %14462 = vmatprep.subr.bf16.mxu1 %v19206_v56 }
0x15f7   : > { %14463 = vmatpush1.bf16.msra.mxu1 %v19204_v60 }
0x15f8   : > { %14464 = vmatprep.subr.bf16.mxu1 %v19209_v61 }
0x15fb   : > { %14465 = vmatpush1.bf16.msra.mxu1 %v19207_v19 }
0x15fc   : > { %14466 = vmatprep.subr.bf16.mxu1 %v19212_v8 }
0x15ff   : > { %14467 = vmatpush1.bf16.msra.mxu1 %v19210_v59 }
0x1600   : > { %14468 = vmatprep.subr.bf16.mxu1 %v19215_v63 }
0x1603   : > { %14469 = vmatpush1.bf16.msra.mxu1 %v19213_v26 }
0x1604   : > { %14470 = vmatprep.subr.bf16.mxu1 %v19218_v48 }
0x1607   : > { %14471 = vmatpush1.bf16.msra.mxu1 %v19216_v10 }
0x1608   : > { %14472 = vmatprep.subr.bf16.mxu1 %v19221_v18 }
0x160b   : > { %14473 = vmatpush1.bf16.msra.mxu1 %v19219_v5 }
0x160c   : > { %14474 = vmatprep.subr.bf16.mxu1 %v19224_v1 }
0x160f   : > { %14475 = vmatpush1.bf16.msra.mxu1 %v19222_v31 }
0x1610   : > { %14476 = vmatprep.subr.bf16.mxu1 %v19227_v11 }
0x1613   : > { %14477 = vmatpush1.bf16.msra.mxu1 %v19225_v49 }
0x1614   : > { %14478 = vmatprep.subr.bf16.mxu1 %v19230_v62 }
0x1617   : > { %14479 = vmatpush1.bf16.msra.mxu1 %v19228_v0 }
0x161a   : > { %14481 = vmatmul.mubr.bf16.vlgmr.msra.gmra.mrb[120].mxu1 %v21669_v12 }
0x16ed   : > { %v14482_v57 = vpop.f32.mrb[120].mxu1 }
0x16ee   : > { %v17170_v40 = vadd.f32 %v14482_v57, %v12858_v9  ;;  %v14484_v47 = vpop.f32.mrb[121].mxu1 }
0x16ef   : > { %v17171_v44 = vadd.f32 %v14484_v47, %v12862_v42  ;;  %v14486_v23 = vpop.f32.mrb[122].mxu1 }
0x16f0   : > { %14493 = vst [vmem:[%s21832_s22 + $0x10] sm:$0xff] %v17170_v40  ;;  %v17172_v14 = vadd.f32 %v14486_v23, %v12858_v9  ;;  %v14488_v43 = vpop.f32.mrb[123].mxu1 }
0x16f1   : > { %14495 = vst.msk [vmem:[%s21832_s22 + $0x18] sm:$0xff] %vm14494_vm11, %v17171_v44  ;;  %v17173_v52 = vadd.f32 %v14488_v43, %v12862_v42 }
0x16f2   : > { %14498 = vst [vmem:[%s21832_s22 + $0x30] sm:$0xff] %v17172_v14 }
0x16f3   : > { %14499 = vst.msk [vmem:[%s21832_s22 + $0x38] sm:$0xff] %vm14494_vm11, %v17173_v52 }
0x16f4 PF: > { %s88_s7 = sadd.s32 1, %s19781_s7  }
0x16f5   : > { %p85_p11 = scmp.ge.s32.totalorder %s88_s7, 4  }
0x16f7   :  { %87 = sbr.rel (!%p85_p11) target bundleno = 66 (0x42), region = 340 }
0x16fe   :  { %14565 = vsyncpa [#allocation3], 1 }
0x16ff   :  { %14567 = vsyncpa [#allocation3 + $0x1], 1 }
0x1700   :  { %14568 = vsyncpa [#allocation5], 1 }
0x1701   :  { %14569 = vsyncpa [#allocation8], 1 }
0x1702   :  { %14570 = vsyncpa [#allocation11], 1 }
0x1703   :  { %14571 = vsyncpa [#allocation14], 1 }
0x1704   :  { %14572 = vsyncpa [#allocation17], 1 }
0x1705   :  { %14573 = vsyncpa [#allocation20], 1 }
0x1706   :  { %14574 = vsyncpa [#allocation23], 1 }
0x1707   :  { %14575 = vsyncpa [#allocation26], 1 }
0x1708   :  { %14576 = vsyncpa [#allocation29], 1 }

</bundles_post_ra>
